<compile_context>
chip_gen: v5e
topology: v5e:2x2
jax: 0.10.0
libtpu: 0.0.40
codegen_flags: <defaults>
</compile_context>

<pallas_src>
import functools

import numpy as np

import jax
import jax.numpy as jnp
from jax.experimental import pallas as pl
from jax.experimental.pallas import tpu as pltpu


# Fixed LeNet geometry from the spec: 12 channels, 5x5 kernels, 28x28 input
# (hidden = 12*7*7 = 588), strides 2/2/1, padding 2.
_C = 12             # conv channels
_K = 5              # kernel size
_TAPS = _K * _K     # 25
_S1 = 200           # conv1 output spatial 14*14 = 196, padded to a multiple of 8
_S2 = 56            # conv2/3 output spatial 7*7 = 49, padded to a multiple of 8
_NCLS = 10
_NCLS_PAD = 128     # lane-dense output width


def _sigmoid(x):
    # Exact rewrite of 1/(1+exp(-x)); a single EUP tanh + cheap VPU ops.
    return 0.5 * (jnp.tanh(0.5 * x) + 1.0)


# ----------------------------------------------------------------------------
# The fused kernel: conv1 -> conv2 -> conv3 -> flatten -> FC, all in VMEM.
# Activation layout everywhere: (spatial_padded, batch*12) f32.
# ----------------------------------------------------------------------------
def _lenet_kernel(patches1_ref, g2_ref, g3_ref,
                  w1_ref, b1_ref, w2_ref, b2_ref, w3_ref, b3_ref,
                  wcat_ref, bfc_ref, out_ref, *, batch):
    f32 = jnp.float32
    bc = batch * _C

    # ---- conv1 + sigmoid: (200, B*25*cin) @ block-diag (B*25*cin, B*12) -----------
    a1 = _sigmoid(
        jnp.dot(patches1_ref[...], w1_ref[...], preferred_element_type=f32)
        + b1_ref[...])                                                  # (200, B*12)

    def conv_block(a_in, g_ref, w_ref, b_ref):
        # Spatial gather (shift + stride im2col) as one MXU matmul with a constant
        # 0/1 matrix; rows of `st` are grouped by tap p (56 output pixels per tap).
        st = jnp.dot(g_ref[...], a_in, preferred_element_type=f32)      # (1400, B*12)
        w = w_ref[...]                                                  # (25*B*12, B*12)
        acc = jnp.zeros((_S2, bc), f32)
        for p in range(_TAPS):                                          # tap-sum channel mix
            acc = acc + jnp.dot(st[p * _S2:(p + 1) * _S2, :],
                                w[p * bc:(p + 1) * bc, :],
                                preferred_element_type=f32)
        return _sigmoid(acc + b_ref[...])                               # (56, B*12)

    a2 = conv_block(a1, g2_ref, w2_ref, b2_ref)   # conv2 (stride 2)
    a3 = conv_block(a2, g3_ref, w3_ref, b3_ref)   # conv3 (stride 1)

    # ---- flatten (PyTorch NCHW order is baked into the pre-reordered FC weight) + FC
    wcat = wcat_ref[...]          # (84, 8*128)
    bfc = bfc_ref[...]            # (1, 128)
    rows = []
    for n in range(batch):
        a3n = a3[:, n * _C:(n + 1) * _C]                                # (56, 12)
        # Fold the 7 column-groups of spatial rows into lanes: x8[r, c*12+ci] = a3n[c*8+r, ci]
        x8 = jnp.concatenate([a3n[c * 8:(c + 1) * 8, :] for c in range(7)], axis=1)  # (8, 84)
        y = jnp.dot(x8, wcat, preferred_element_type=f32)               # (8, 1024)
        logits = bfc
        for r in range(8):                                              # 128-aligned slices
            logits = logits + y[r:r + 1, r * _NCLS_PAD:(r + 1) * _NCLS_PAD]
        rows.append(logits)
    out_ref[...] = jnp.concatenate(rows, axis=0).astype(out_ref.dtype)  # (B, 128) lane-dense


# ----------------------------------------------------------------------------
# One-time setup: constant spatial gather matrices + weight repacking.
# ----------------------------------------------------------------------------
def _gather_matrix(h_in, w_in, s_in_pad, h_out, w_out, s_out_pad, k, stride, pad):
    """Constant 0/1 matrix (k*k*s_out_pad, s_in_pad).  Row p*s_out_pad + (ho*w_out+wo)
    selects input pixel (ho*stride+ki-pad, wo*stride+kj-pad), or is all-zero for
    padding / alignment rows.  Weight- and input-independent."""
    g = np.zeros((k * k * s_out_pad, s_in_pad), dtype=np.float32)
    for ki in range(k):
        for kj in range(k):
            p = ki * k + kj
            for ho in range(h_out):
                for wo in range(w_out):
                    h = ho * stride + ki - pad
                    w = wo * stride + kj - pad
                    if 0 <= h < h_in and 0 <= w < w_in:
                        g[p * s_out_pad + ho * w_out + wo, h * w_in + w] = 1.0
    return g


def prepare_params(params, batch):
    """One-time repack of torch-layout params into kernel-friendly matrices
    (called once, outside the per-forward hot path)."""
    eye_b = jnp.eye(batch, dtype=jnp.float32)

    def conv_blockdiag(w):
        # torch (co, ci, 5, 5) -> (25*batch*ci, batch*co); per-tap block-diag over samples.
        co, ci, kh, kw = w.shape
        wt = jnp.transpose(w, (2, 3, 1, 0)).reshape(kh * kw, ci, co)    # [p, ci, co]
        blk = jnp.einsum('nm,pic->pnimc', eye_b, wt)                    # [p, n, ci, m, co]
        return blk.reshape(kh * kw * batch * ci, batch * co)

    def tile_bias(b):
        return jnp.tile(b.reshape(1, -1), (1, batch))                   # lanes (n, co)

    wfc = params["wfc"]                                 # (10, 588), torch (out, in)
    ncls = wfc.shape[0]
    # V[s, ci, k] = wfc[k, ci*49 + s] for s < 49; zero-padded to s < 56 and k < 128.
    V = jnp.zeros((_S2, _C, _NCLS_PAD), jnp.float32)
    V = V.at[:49, :, :ncls].set(jnp.transpose(wfc.reshape(ncls, _C, 49), (2, 1, 0)))
    # Wcat[c*12+ci, r*128+k] = V[c*8+r, ci, k]  (matches the kernel's x8 fold)
    wcat = jnp.transpose(V.reshape(7, 8, _C, _NCLS_PAD),
                         (0, 2, 1, 3)).reshape(7 * _C, 8 * _NCLS_PAD)

    return {
        "w1": conv_blockdiag(params["w1"]), "b1": tile_bias(params["b1"]),
        "w2": conv_blockdiag(params["w2"]), "b2": tile_bias(params["b2"]),
        "w3": conv_blockdiag(params["w3"]), "b3": tile_bias(params["b3"]),
        "wcat": wcat,
        "bfc": jnp.pad(params["bfc"].reshape(1, ncls), ((0, 0), (0, _NCLS_PAD - ncls))),
        "g2": jnp.asarray(_gather_matrix(14, 14, _S1, 7, 7, _S2, _K, 2, 2)),
        "g3": jnp.asarray(_gather_matrix(7, 7, _S2, 7, 7, _S2, _K, 1, 2)),
    }


def _conv1_patches(x_nchw):
    """im2col for the first conv, applied to the raw network input only (tiny).
    Output layout: (200, 25*B*Cin) with lane index (tap, sample, in-channel)."""
    b, cin = x_nchw.shape[0], x_nchw.shape[1]
    xp = jnp.pad(x_nchw.astype(jnp.float32), ((0, 0), (0, 0), (2, 2), (2, 2)))  # (B,C,32,32)
    cols = [xp[:, :, ki:ki + 27:2, kj:kj + 27:2]
            for ki in range(_K) for kj in range(_K)]                   # each (B, Cin, 14, 14)
    p = jnp.stack(cols, axis=0).reshape(_TAPS, b, cin, 196)            # [p, n, ci, s]
    p = jnp.transpose(p, (3, 0, 1, 2)).reshape(196, _TAPS * b * cin)   # [s, (p, n, ci)]
    return jnp.pad(p, ((0, _S1 - 196), (0, 0)))                        # spatial 196 -> 200


# ----------------------------------------------------------------------------
# Forward pass.
# ----------------------------------------------------------------------------
@jax.jit
def lenet_forward(prepared, x_nchw):
    b = x_nchw.shape[0]
    patches1 = _conv1_patches(x_nchw)

    flops = 2 * b * _C * (_S1 * _TAPS                  # conv1
                          + _TAPS * _S2 * _S1          # gather for conv2
                          + _TAPS * _S2 * _S2          # gather for conv3
                          + 2 * _TAPS * _S2 * _C       # conv2/conv3 channel mix
                          ) + 2 * b * 8 * 84 * 8 * _NCLS_PAD          # fc
    bytes_accessed = 4 * (patches1.size + prepared["g2"].size + prepared["g3"].size
                          + prepared["wcat"].size + 3 * _TAPS * b * _C * b * _C
                          + b * _NCLS_PAD)

    out = pl.pallas_call(
        functools.partial(_lenet_kernel, batch=b),
        out_shape=jax.ShapeDtypeStruct((b, _NCLS_PAD), jnp.float32),
        in_specs=[pl.BlockSpec(memory_space=pltpu.MemorySpace.VMEM)] * 11,
        out_specs=pl.BlockSpec(memory_space=pltpu.MemorySpace.VMEM),
        compiler_params=pltpu.CompilerParams(vmem_limit_bytes=32 * 1024 * 1024),
        cost_estimate=pl.CostEstimate(
            flops=flops,
            transcendentals=b * _C * (_S1 + 2 * _S2),
            bytes_accessed=bytes_accessed),
    )(patches1, prepared["g2"], prepared["g3"],
      prepared["w1"], prepared["b1"], prepared["w2"], prepared["b2"],
      prepared["w3"], prepared["b3"], prepared["wcat"], prepared["bfc"])
    return out[:, :_NCLS]


# ----------------------------------------------------------------------------
# Params (torch layout) + pure-JAX reference for validation.
# ----------------------------------------------------------------------------
def init_params(key, channel=1, num_classes=_NCLS):
    ks = jax.random.split(key, 8)
    s = 0.1
    return {
        "w1": s * jax.random.normal(ks[0], (_C, channel, _K, _K), jnp.float32),
        "b1": s * jax.random.normal(ks[1], (_C,), jnp.float32),
        "w2": s * jax.random.normal(ks[2], (_C, _C, _K, _K), jnp.float32),
        "b2": s * jax.random.normal(ks[3], (_C,), jnp.float32),
        "w3": s * jax.random.normal(ks[4], (_C, _C, _K, _K), jnp.float32),
        "b3": s * jax.random.normal(ks[5], (_C,), jnp.float32),
        "wfc": s * jax.random.normal(ks[6], (num_classes, _C * 49), jnp.float32),
        "bfc": s * jax.random.normal(ks[7], (num_classes,), jnp.float32),
    }


def _reference_forward(params, x):
    hp = jax.lax.Precision.HIGHEST

    def conv(h, w, b, stride):
        y = jax.lax.conv_general_dilated(
            h, w, window_strides=(stride, stride), padding=((2, 2), (2, 2)),
            dimension_numbers=("NCHW", "OIHW", "NCHW"), precision=hp)
        return jax.nn.sigmoid(y + b.reshape(1, -1, 1, 1))

    h = conv(x, params["w1"], params["b1"], 2)
    h = conv(h, params["w2"], params["b2"], 2)
    h = conv(h, params["w3"], params["b3"], 1)
    flat = h.reshape(x.shape[0], -1)
    return jnp.dot(flat, params["wfc"].T, precision=hp) + params["bfc"]


if __name__ == "__main__":
    key = jax.random.PRNGKey(0)
    pkey, xkey = jax.random.split(key)
    params = init_params(pkey)
    # Input consistent with hidden=588: channel=1, 28x28 (MNIST-like), batch=2.
    x = jax.random.normal(xkey, (2, 1, 28, 28), jnp.float32)

    prepared = prepare_params(params, batch=x.shape[0])   # one-time repack, off the hot path
    out = jax.block_until_ready(lenet_forward(prepared, x))
    assert out.shape == (2, _NCLS), out.shape
    assert out.dtype == jnp.float32

    ref = jax.block_until_ready(_reference_forward(params, x))
    np.testing.assert_allclose(np.asarray(out), np.asarray(ref), rtol=1e-2, atol=1e-2)
    print("KERNEL_OK")
</pallas_src>

<mosaic_0001>
module attributes {stable_mosaic.version = 11 : i64} {
  func.func @_lenet_kernel(%arg0: memref<200x50xf32, #tpu.memory_space<vmem>>, %arg1: memref<1400x200xf32, #tpu.memory_space<vmem>>, %arg2: memref<1400x56xf32, #tpu.memory_space<vmem>>, %arg3: memref<50x24xf32, #tpu.memory_space<vmem>>, %arg4: memref<1x24xf32, #tpu.memory_space<vmem>>, %arg5: memref<600x24xf32, #tpu.memory_space<vmem>>, %arg6: memref<1x24xf32, #tpu.memory_space<vmem>>, %arg7: memref<600x24xf32, #tpu.memory_space<vmem>>, %arg8: memref<1x24xf32, #tpu.memory_space<vmem>>, %arg9: memref<84x1024xf32, #tpu.memory_space<vmem>>, %arg10: memref<1x128xf32, #tpu.memory_space<vmem>>, %arg11: memref<2x128xf32, #tpu.memory_space<vmem>>) attributes {dimension_semantics = [], scalar_prefetch = 0 : i64, scratch_operands = 0 : i64, tpu.core_type = #tpu.core_type<tc>} {
    %c0 = arith.constant 0 : index
    %c0_0 = arith.constant 0 : index
    %0 = vector.load %arg0[%c0, %c0_0] : memref<200x50xf32, #tpu.memory_space<vmem>>, vector<200x50xf32>
    %c0_1 = arith.constant 0 : index
    %c0_2 = arith.constant 0 : index
    %1 = vector.load %arg3[%c0_1, %c0_2] : memref<50x24xf32, #tpu.memory_space<vmem>>, vector<50x24xf32>
    %cst = arith.constant dense<0.000000e+00> : vector<200x24xf32>
    %2 = tpu.matmul %0, %1, %cst {dimension_numbers = #tpu.dot_dimension_numbers<[1], [0], [0], [1], [0, 0, 1, 1], [], []>} : vector<200x50xf32>, vector<50x24xf32>, vector<200x24xf32> -> vector<200x24xf32>
    %c0_3 = arith.constant 0 : index
    %c0_4 = arith.constant 0 : index
    %3 = vector.load %arg4[%c0_3, %c0_4] : memref<1x24xf32, #tpu.memory_space<vmem>>, vector<1x24xf32>
    %4 = vector.broadcast %3 : vector<1x24xf32> to vector<200x24xf32>
    %5 = arith.addf %2, %4 : vector<200x24xf32>
    %cst_5 = arith.constant 5.000000e-01 : f32
    %6 = vector.broadcast %cst_5 : f32 to vector<200x24xf32>
    %7 = arith.mulf %6, %5 : vector<200x24xf32>
    %8 = math.tanh %7 : vector<200x24xf32>
    %cst_6 = arith.constant 1.000000e+00 : f32
    %9 = vector.broadcast %cst_6 : f32 to vector<200x24xf32>
    %10 = arith.addf %8, %9 : vector<200x24xf32>
    %cst_7 = arith.constant 5.000000e-01 : f32
    %11 = vector.broadcast %cst_7 : f32 to vector<200x24xf32>
    %12 = arith.mulf %11, %10 : vector<200x24xf32>
    %c0_8 = arith.constant 0 : index
    %c0_9 = arith.constant 0 : index
    %13 = vector.load %arg1[%c0_8, %c0_9] : memref<1400x200xf32, #tpu.memory_space<vmem>>, vector<1400x200xf32>
    %cst_10 = arith.constant dense<0.000000e+00> : vector<1400x24xf32>
    %14 = tpu.matmul %13, %12, %cst_10 {dimension_numbers = #tpu.dot_dimension_numbers<[1], [0], [0], [1], [0, 0, 1, 1], [], []>} : vector<1400x200xf32>, vector<200x24xf32>, vector<1400x24xf32> -> vector<1400x24xf32>
    %c0_11 = arith.constant 0 : index
    %c0_12 = arith.constant 0 : index
    %15 = vector.load %arg5[%c0_11, %c0_12] : memref<600x24xf32, #tpu.memory_space<vmem>>, vector<600x24xf32>
    %cst_13 = arith.constant 0.000000e+00 : f32
    %16 = vector.broadcast %cst_13 : f32 to vector<56x24xf32>
    %17 = vector.extract_strided_slice %14 {offsets = [0, 0], sizes = [56, 24], strides = [1, 1]} : vector<1400x24xf32> to vector<56x24xf32>
    %18 = vector.extract_strided_slice %15 {offsets = [0, 0], sizes = [24, 24], strides = [1, 1]} : vector<600x24xf32> to vector<24x24xf32>
    %cst_14 = arith.constant dense<0.000000e+00> : vector<56x24xf32>
    %19 = tpu.matmul %17, %18, %cst_14 {dimension_numbers = #tpu.dot_dimension_numbers<[1], [0], [0], [1], [0, 0, 1, 1], [], []>} : vector<56x24xf32>, vector<24x24xf32>, vector<56x24xf32> -> vector<56x24xf32>
    %20 = arith.addf %16, %19 : vector<56x24xf32>
    %21 = vector.extract_strided_slice %14 {offsets = [56, 0], sizes = [56, 24], strides = [1, 1]} : vector<1400x24xf32> to vector<56x24xf32>
    %22 = vector.extract_strided_slice %15 {offsets = [24, 0], sizes = [24, 24], strides = [1, 1]} : vector<600x24xf32> to vector<24x24xf32>
    %cst_15 = arith.constant dense<0.000000e+00> : vector<56x24xf32>
    %23 = tpu.matmul %21, %22, %cst_15 {dimension_numbers = #tpu.dot_dimension_numbers<[1], [0], [0], [1], [0, 0, 1, 1], [], []>} : vector<56x24xf32>, vector<24x24xf32>, vector<56x24xf32> -> vector<56x24xf32>
    %24 = arith.addf %20, %23 : vector<56x24xf32>
    %25 = vector.extract_strided_slice %14 {offsets = [112, 0], sizes = [56, 24], strides = [1, 1]} : vector<1400x24xf32> to vector<56x24xf32>
    %26 = vector.extract_strided_slice %15 {offsets = [48, 0], sizes = [24, 24], strides = [1, 1]} : vector<600x24xf32> to vector<24x24xf32>
    %cst_16 = arith.constant dense<0.000000e+00> : vector<56x24xf32>
    %27 = tpu.matmul %25, %26, %cst_16 {dimension_numbers = #tpu.dot_dimension_numbers<[1], [0], [0], [1], [0, 0, 1, 1], [], []>} : vector<56x24xf32>, vector<24x24xf32>, vector<56x24xf32> -> vector<56x24xf32>
    %28 = arith.addf %24, %27 : vector<56x24xf32>
    %29 = vector.extract_strided_slice %14 {offsets = [168, 0], sizes = [56, 24], strides = [1, 1]} : vector<1400x24xf32> to vector<56x24xf32>
    %30 = vector.extract_strided_slice %15 {offsets = [72, 0], sizes = [24, 24], strides = [1, 1]} : vector<600x24xf32> to vector<24x24xf32>
    %cst_17 = arith.constant dense<0.000000e+00> : vector<56x24xf32>
    %31 = tpu.matmul %29, %30, %cst_17 {dimension_numbers = #tpu.dot_dimension_numbers<[1], [0], [0], [1], [0, 0, 1, 1], [], []>} : vector<56x24xf32>, vector<24x24xf32>, vector<56x24xf32> -> vector<56x24xf32>
    %32 = arith.addf %28, %31 : vector<56x24xf32>
    %33 = vector.extract_strided_slice %14 {offsets = [224, 0], sizes = [56, 24], strides = [1, 1]} : vector<1400x24xf32> to vector<56x24xf32>
    %34 = vector.extract_strided_slice %15 {offsets = [96, 0], sizes = [24, 24], strides = [1, 1]} : vector<600x24xf32> to vector<24x24xf32>
    %cst_18 = arith.constant dense<0.000000e+00> : vector<56x24xf32>
    %35 = tpu.matmul %33, %34, %cst_18 {dimension_numbers = #tpu.dot_dimension_numbers<[1], [0], [0], [1], [0, 0, 1, 1], [], []>} : vector<56x24xf32>, vector<24x24xf32>, vector<56x24xf32> -> vector<56x24xf32>
    %36 = arith.addf %32, %35 : vector<56x24xf32>
    %37 = vector.extract_strided_slice %14 {offsets = [280, 0], sizes = [56, 24], strides = [1, 1]} : vector<1400x24xf32> to vector<56x24xf32>
    %38 = vector.extract_strided_slice %15 {offsets = [120, 0], sizes = [24, 24], strides = [1, 1]} : vector<600x24xf32> to vector<24x24xf32>
    %cst_19 = arith.constant dense<0.000000e+00> : vector<56x24xf32>
    %39 = tpu.matmul %37, %38, %cst_19 {dimension_numbers = #tpu.dot_dimension_numbers<[1], [0], [0], [1], [0, 0, 1, 1], [], []>} : vector<56x24xf32>, vector<24x24xf32>, vector<56x24xf32> -> vector<56x24xf32>
    %40 = arith.addf %36, %39 : vector<56x24xf32>
    %41 = vector.extract_strided_slice %14 {offsets = [336, 0], sizes = [56, 24], strides = [1, 1]} : vector<1400x24xf32> to vector<56x24xf32>
    %42 = vector.extract_strided_slice %15 {offsets = [144, 0], sizes = [24, 24], strides = [1, 1]} : vector<600x24xf32> to vector<24x24xf32>
    %cst_20 = arith.constant dense<0.000000e+00> : vector<56x24xf32>
    %43 = tpu.matmul %41, %42, %cst_20 {dimension_numbers = #tpu.dot_dimension_numbers<[1], [0], [0], [1], [0, 0, 1, 1], [], []>} : vector<56x24xf32>, vector<24x24xf32>, vector<56x24xf32> -> vector<56x24xf32>
    %44 = arith.addf %40, %43 : vector<56x24xf32>
    %45 = vector.extract_strided_slice %14 {offsets = [392, 0], sizes = [56, 24], strides = [1, 1]} : vector<1400x24xf32> to vector<56x24xf32>
    %46 = vector.extract_strided_slice %15 {offsets = [168, 0], sizes = [24, 24], strides = [1, 1]} : vector<600x24xf32> to vector<24x24xf32>
    %cst_21 = arith.constant dense<0.000000e+00> : vector<56x24xf32>
    %47 = tpu.matmul %45, %46, %cst_21 {dimension_numbers = #tpu.dot_dimension_numbers<[1], [0], [0], [1], [0, 0, 1, 1], [], []>} : vector<56x24xf32>, vector<24x24xf32>, vector<56x24xf32> -> vector<56x24xf32>
    %48 = arith.addf %44, %47 : vector<56x24xf32>
    %49 = vector.extract_strided_slice %14 {offsets = [448, 0], sizes = [56, 24], strides = [1, 1]} : vector<1400x24xf32> to vector<56x24xf32>
    %50 = vector.extract_strided_slice %15 {offsets = [192, 0], sizes = [24, 24], strides = [1, 1]} : vector<600x24xf32> to vector<24x24xf32>
    %cst_22 = arith.constant dense<0.000000e+00> : vector<56x24xf32>
    %51 = tpu.matmul %49, %50, %cst_22 {dimension_numbers = #tpu.dot_dimension_numbers<[1], [0], [0], [1], [0, 0, 1, 1], [], []>} : vector<56x24xf32>, vector<24x24xf32>, vector<56x24xf32> -> vector<56x24xf32>
    %52 = arith.addf %48, %51 : vector<56x24xf32>
    %53 = vector.extract_strided_slice %14 {offsets = [504, 0], sizes = [56, 24], strides = [1, 1]} : vector<1400x24xf32> to vector<56x24xf32>
    %54 = vector.extract_strided_slice %15 {offsets = [216, 0], sizes = [24, 24], strides = [1, 1]} : vector<600x24xf32> to vector<24x24xf32>
    %cst_23 = arith.constant dense<0.000000e+00> : vector<56x24xf32>
    %55 = tpu.matmul %53, %54, %cst_23 {dimension_numbers = #tpu.dot_dimension_numbers<[1], [0], [0], [1], [0, 0, 1, 1], [], []>} : vector<56x24xf32>, vector<24x24xf32>, vector<56x24xf32> -> vector<56x24xf32>
    %56 = arith.addf %52, %55 : vector<56x24xf32>
    %57 = vector.extract_strided_slice %14 {offsets = [560, 0], sizes = [56, 24], strides = [1, 1]} : vector<1400x24xf32> to vector<56x24xf32>
    %58 = vector.extract_strided_slice %15 {offsets = [240, 0], sizes = [24, 24], strides = [1, 1]} : vector<600x24xf32> to vector<24x24xf32>
    %cst_24 = arith.constant dense<0.000000e+00> : vector<56x24xf32>
    %59 = tpu.matmul %57, %58, %cst_24 {dimension_numbers = #tpu.dot_dimension_numbers<[1], [0], [0], [1], [0, 0, 1, 1], [], []>} : vector<56x24xf32>, vector<24x24xf32>, vector<56x24xf32> -> vector<56x24xf32>
    %60 = arith.addf %56, %59 : vector<56x24xf32>
    %61 = vector.extract_strided_slice %14 {offsets = [616, 0], sizes = [56, 24], strides = [1, 1]} : vector<1400x24xf32> to vector<56x24xf32>
    %62 = vector.extract_strided_slice %15 {offsets = [264, 0], sizes = [24, 24], strides = [1, 1]} : vector<600x24xf32> to vector<24x24xf32>
    %cst_25 = arith.constant dense<0.000000e+00> : vector<56x24xf32>
    %63 = tpu.matmul %61, %62, %cst_25 {dimension_numbers = #tpu.dot_dimension_numbers<[1], [0], [0], [1], [0, 0, 1, 1], [], []>} : vector<56x24xf32>, vector<24x24xf32>, vector<56x24xf32> -> vector<56x24xf32>
    %64 = arith.addf %60, %63 : vector<56x24xf32>
    %65 = vector.extract_strided_slice %14 {offsets = [672, 0], sizes = [56, 24], strides = [1, 1]} : vector<1400x24xf32> to vector<56x24xf32>
    %66 = vector.extract_strided_slice %15 {offsets = [288, 0], sizes = [24, 24], strides = [1, 1]} : vector<600x24xf32> to vector<24x24xf32>
    %cst_26 = arith.constant dense<0.000000e+00> : vector<56x24xf32>
    %67 = tpu.matmul %65, %66, %cst_26 {dimension_numbers = #tpu.dot_dimension_numbers<[1], [0], [0], [1], [0, 0, 1, 1], [], []>} : vector<56x24xf32>, vector<24x24xf32>, vector<56x24xf32> -> vector<56x24xf32>
    %68 = arith.addf %64, %67 : vector<56x24xf32>
    %69 = vector.extract_strided_slice %14 {offsets = [728, 0], sizes = [56, 24], strides = [1, 1]} : vector<1400x24xf32> to vector<56x24xf32>
    %70 = vector.extract_strided_slice %15 {offsets = [312, 0], sizes = [24, 24], strides = [1, 1]} : vector<600x24xf32> to vector<24x24xf32>
    %cst_27 = arith.constant dense<0.000000e+00> : vector<56x24xf32>
    %71 = tpu.matmul %69, %70, %cst_27 {dimension_numbers = #tpu.dot_dimension_numbers<[1], [0], [0], [1], [0, 0, 1, 1], [], []>} : vector<56x24xf32>, vector<24x24xf32>, vector<56x24xf32> -> vector<56x24xf32>
    %72 = arith.addf %68, %71 : vector<56x24xf32>
    %73 = vector.extract_strided_slice %14 {offsets = [784, 0], sizes = [56, 24], strides = [1, 1]} : vector<1400x24xf32> to vector<56x24xf32>
    %74 = vector.extract_strided_slice %15 {offsets = [336, 0], sizes = [24, 24], strides = [1, 1]} : vector<600x24xf32> to vector<24x24xf32>
    %cst_28 = arith.constant dense<0.000000e+00> : vector<56x24xf32>
    %75 = tpu.matmul %73, %74, %cst_28 {dimension_numbers = #tpu.dot_dimension_numbers<[1], [0], [0], [1], [0, 0, 1, 1], [], []>} : vector<56x24xf32>, vector<24x24xf32>, vector<56x24xf32> -> vector<56x24xf32>
    %76 = arith.addf %72, %75 : vector<56x24xf32>
    %77 = vector.extract_strided_slice %14 {offsets = [840, 0], sizes = [56, 24], strides = [1, 1]} : vector<1400x24xf32> to vector<56x24xf32>
    %78 = vector.extract_strided_slice %15 {offsets = [360, 0], sizes = [24, 24], strides = [1, 1]} : vector<600x24xf32> to vector<24x24xf32>
    %cst_29 = arith.constant dense<0.000000e+00> : vector<56x24xf32>
    %79 = tpu.matmul %77, %78, %cst_29 {dimension_numbers = #tpu.dot_dimension_numbers<[1], [0], [0], [1], [0, 0, 1, 1], [], []>} : vector<56x24xf32>, vector<24x24xf32>, vector<56x24xf32> -> vector<56x24xf32>
    %80 = arith.addf %76, %79 : vector<56x24xf32>
    %81 = vector.extract_strided_slice %14 {offsets = [896, 0], sizes = [56, 24], strides = [1, 1]} : vector<1400x24xf32> to vector<56x24xf32>
    %82 = vector.extract_strided_slice %15 {offsets = [384, 0], sizes = [24, 24], strides = [1, 1]} : vector<600x24xf32> to vector<24x24xf32>
    %cst_30 = arith.constant dense<0.000000e+00> : vector<56x24xf32>
    %83 = tpu.matmul %81, %82, %cst_30 {dimension_numbers = #tpu.dot_dimension_numbers<[1], [0], [0], [1], [0, 0, 1, 1], [], []>} : vector<56x24xf32>, vector<24x24xf32>, vector<56x24xf32> -> vector<56x24xf32>
    %84 = arith.addf %80, %83 : vector<56x24xf32>
    %85 = vector.extract_strided_slice %14 {offsets = [952, 0], sizes = [56, 24], strides = [1, 1]} : vector<1400x24xf32> to vector<56x24xf32>
    %86 = vector.extract_strided_slice %15 {offsets = [408, 0], sizes = [24, 24], strides = [1, 1]} : vector<600x24xf32> to vector<24x24xf32>
    %cst_31 = arith.constant dense<0.000000e+00> : vector<56x24xf32>
    %87 = tpu.matmul %85, %86, %cst_31 {dimension_numbers = #tpu.dot_dimension_numbers<[1], [0], [0], [1], [0, 0, 1, 1], [], []>} : vector<56x24xf32>, vector<24x24xf32>, vector<56x24xf32> -> vector<56x24xf32>
    %88 = arith.addf %84, %87 : vector<56x24xf32>
    %89 = vector.extract_strided_slice %14 {offsets = [1008, 0], sizes = [56, 24], strides = [1, 1]} : vector<1400x24xf32> to vector<56x24xf32>
    %90 = vector.extract_strided_slice %15 {offsets = [432, 0], sizes = [24, 24], strides = [1, 1]} : vector<600x24xf32> to vector<24x24xf32>
    %cst_32 = arith.constant dense<0.000000e+00> : vector<56x24xf32>
    %91 = tpu.matmul %89, %90, %cst_32 {dimension_numbers = #tpu.dot_dimension_numbers<[1], [0], [0], [1], [0, 0, 1, 1], [], []>} : vector<56x24xf32>, vector<24x24xf32>, vector<56x24xf32> -> vector<56x24xf32>
    %92 = arith.addf %88, %91 : vector<56x24xf32>
    %93 = vector.extract_strided_slice %14 {offsets = [1064, 0], sizes = [56, 24], strides = [1, 1]} : vector<1400x24xf32> to vector<56x24xf32>
    %94 = vector.extract_strided_slice %15 {offsets = [456, 0], sizes = [24, 24], strides = [1, 1]} : vector<600x24xf32> to vector<24x24xf32>
    %cst_33 = arith.constant dense<0.000000e+00> : vector<56x24xf32>
    %95 = tpu.matmul %93, %94, %cst_33 {dimension_numbers = #tpu.dot_dimension_numbers<[1], [0], [0], [1], [0, 0, 1, 1], [], []>} : vector<56x24xf32>, vector<24x24xf32>, vector<56x24xf32> -> vector<56x24xf32>
    %96 = arith.addf %92, %95 : vector<56x24xf32>
    %97 = vector.extract_strided_slice %14 {offsets = [1120, 0], sizes = [56, 24], strides = [1, 1]} : vector<1400x24xf32> to vector<56x24xf32>
    %98 = vector.extract_strided_slice %15 {offsets = [480, 0], sizes = [24, 24], strides = [1, 1]} : vector<600x24xf32> to vector<24x24xf32>
    %cst_34 = arith.constant dense<0.000000e+00> : vector<56x24xf32>
    %99 = tpu.matmul %97, %98, %cst_34 {dimension_numbers = #tpu.dot_dimension_numbers<[1], [0], [0], [1], [0, 0, 1, 1], [], []>} : vector<56x24xf32>, vector<24x24xf32>, vector<56x24xf32> -> vector<56x24xf32>
    %100 = arith.addf %96, %99 : vector<56x24xf32>
    %101 = vector.extract_strided_slice %14 {offsets = [1176, 0], sizes = [56, 24], strides = [1, 1]} : vector<1400x24xf32> to vector<56x24xf32>
    %102 = vector.extract_strided_slice %15 {offsets = [504, 0], sizes = [24, 24], strides = [1, 1]} : vector<600x24xf32> to vector<24x24xf32>
    %cst_35 = arith.constant dense<0.000000e+00> : vector<56x24xf32>
    %103 = tpu.matmul %101, %102, %cst_35 {dimension_numbers = #tpu.dot_dimension_numbers<[1], [0], [0], [1], [0, 0, 1, 1], [], []>} : vector<56x24xf32>, vector<24x24xf32>, vector<56x24xf32> -> vector<56x24xf32>
    %104 = arith.addf %100, %103 : vector<56x24xf32>
    %105 = vector.extract_strided_slice %14 {offsets = [1232, 0], sizes = [56, 24], strides = [1, 1]} : vector<1400x24xf32> to vector<56x24xf32>
    %106 = vector.extract_strided_slice %15 {offsets = [528, 0], sizes = [24, 24], strides = [1, 1]} : vector<600x24xf32> to vector<24x24xf32>
    %cst_36 = arith.constant dense<0.000000e+00> : vector<56x24xf32>
    %107 = tpu.matmul %105, %106, %cst_36 {dimension_numbers = #tpu.dot_dimension_numbers<[1], [0], [0], [1], [0, 0, 1, 1], [], []>} : vector<56x24xf32>, vector<24x24xf32>, vector<56x24xf32> -> vector<56x24xf32>
    %108 = arith.addf %104, %107 : vector<56x24xf32>
    %109 = vector.extract_strided_slice %14 {offsets = [1288, 0], sizes = [56, 24], strides = [1, 1]} : vector<1400x24xf32> to vector<56x24xf32>
    %110 = vector.extract_strided_slice %15 {offsets = [552, 0], sizes = [24, 24], strides = [1, 1]} : vector<600x24xf32> to vector<24x24xf32>
    %cst_37 = arith.constant dense<0.000000e+00> : vector<56x24xf32>
    %111 = tpu.matmul %109, %110, %cst_37 {dimension_numbers = #tpu.dot_dimension_numbers<[1], [0], [0], [1], [0, 0, 1, 1], [], []>} : vector<56x24xf32>, vector<24x24xf32>, vector<56x24xf32> -> vector<56x24xf32>
    %112 = arith.addf %108, %111 : vector<56x24xf32>
    %113 = vector.extract_strided_slice %14 {offsets = [1344, 0], sizes = [56, 24], strides = [1, 1]} : vector<1400x24xf32> to vector<56x24xf32>
    %114 = vector.extract_strided_slice %15 {offsets = [576, 0], sizes = [24, 24], strides = [1, 1]} : vector<600x24xf32> to vector<24x24xf32>
    %cst_38 = arith.constant dense<0.000000e+00> : vector<56x24xf32>
    %115 = tpu.matmul %113, %114, %cst_38 {dimension_numbers = #tpu.dot_dimension_numbers<[1], [0], [0], [1], [0, 0, 1, 1], [], []>} : vector<56x24xf32>, vector<24x24xf32>, vector<56x24xf32> -> vector<56x24xf32>
    %116 = arith.addf %112, %115 : vector<56x24xf32>
    %c0_39 = arith.constant 0 : index
    %c0_40 = arith.constant 0 : index
    %117 = vector.load %arg6[%c0_39, %c0_40] : memref<1x24xf32, #tpu.memory_space<vmem>>, vector<1x24xf32>
    %118 = vector.broadcast %117 : vector<1x24xf32> to vector<56x24xf32>
    %119 = arith.addf %116, %118 : vector<56x24xf32>
    %cst_41 = arith.constant 5.000000e-01 : f32
    %120 = vector.broadcast %cst_41 : f32 to vector<56x24xf32>
    %121 = arith.mulf %120, %119 : vector<56x24xf32>
    %122 = math.tanh %121 : vector<56x24xf32>
    %cst_42 = arith.constant 1.000000e+00 : f32
    %123 = vector.broadcast %cst_42 : f32 to vector<56x24xf32>
    %124 = arith.addf %122, %123 : vector<56x24xf32>
    %cst_43 = arith.constant 5.000000e-01 : f32
    %125 = vector.broadcast %cst_43 : f32 to vector<56x24xf32>
    %126 = arith.mulf %125, %124 : vector<56x24xf32>
    %c0_44 = arith.constant 0 : index
    %c0_45 = arith.constant 0 : index
    %127 = vector.load %arg2[%c0_44, %c0_45] : memref<1400x56xf32, #tpu.memory_space<vmem>>, vector<1400x56xf32>
    %cst_46 = arith.constant dense<0.000000e+00> : vector<1400x24xf32>
    %128 = tpu.matmul %127, %126, %cst_46 {dimension_numbers = #tpu.dot_dimension_numbers<[1], [0], [0], [1], [0, 0, 1, 1], [], []>} : vector<1400x56xf32>, vector<56x24xf32>, vector<1400x24xf32> -> vector<1400x24xf32>
    %c0_47 = arith.constant 0 : index
    %c0_48 = arith.constant 0 : index
    %129 = vector.load %arg7[%c0_47, %c0_48] : memref<600x24xf32, #tpu.memory_space<vmem>>, vector<600x24xf32>
    %cst_49 = arith.constant 0.000000e+00 : f32
    %130 = vector.broadcast %cst_49 : f32 to vector<56x24xf32>
    %131 = vector.extract_strided_slice %128 {offsets = [0, 0], sizes = [56, 24], strides = [1, 1]} : vector<1400x24xf32> to vector<56x24xf32>
    %132 = vector.extract_strided_slice %129 {offsets = [0, 0], sizes = [24, 24], strides = [1, 1]} : vector<600x24xf32> to vector<24x24xf32>
    %cst_50 = arith.constant dense<0.000000e+00> : vector<56x24xf32>
    %133 = tpu.matmul %131, %132, %cst_50 {dimension_numbers = #tpu.dot_dimension_numbers<[1], [0], [0], [1], [0, 0, 1, 1], [], []>} : vector<56x24xf32>, vector<24x24xf32>, vector<56x24xf32> -> vector<56x24xf32>
    %134 = arith.addf %130, %133 : vector<56x24xf32>
    %135 = vector.extract_strided_slice %128 {offsets = [56, 0], sizes = [56, 24], strides = [1, 1]} : vector<1400x24xf32> to vector<56x24xf32>
    %136 = vector.extract_strided_slice %129 {offsets = [24, 0], sizes = [24, 24], strides = [1, 1]} : vector<600x24xf32> to vector<24x24xf32>
    %cst_51 = arith.constant dense<0.000000e+00> : vector<56x24xf32>
    %137 = tpu.matmul %135, %136, %cst_51 {dimension_numbers = #tpu.dot_dimension_numbers<[1], [0], [0], [1], [0, 0, 1, 1], [], []>} : vector<56x24xf32>, vector<24x24xf32>, vector<56x24xf32> -> vector<56x24xf32>
    %138 = arith.addf %134, %137 : vector<56x24xf32>
    %139 = vector.extract_strided_slice %128 {offsets = [112, 0], sizes = [56, 24], strides = [1, 1]} : vector<1400x24xf32> to vector<56x24xf32>
    %140 = vector.extract_strided_slice %129 {offsets = [48, 0], sizes = [24, 24], strides = [1, 1]} : vector<600x24xf32> to vector<24x24xf32>
    %cst_52 = arith.constant dense<0.000000e+00> : vector<56x24xf32>
    %141 = tpu.matmul %139, %140, %cst_52 {dimension_numbers = #tpu.dot_dimension_numbers<[1], [0], [0], [1], [0, 0, 1, 1], [], []>} : vector<56x24xf32>, vector<24x24xf32>, vector<56x24xf32> -> vector<56x24xf32>
    %142 = arith.addf %138, %141 : vector<56x24xf32>
    %143 = vector.extract_strided_slice %128 {offsets = [168, 0], sizes = [56, 24], strides = [1, 1]} : vector<1400x24xf32> to vector<56x24xf32>
    %144 = vector.extract_strided_slice %129 {offsets = [72, 0], sizes = [24, 24], strides = [1, 1]} : vector<600x24xf32> to vector<24x24xf32>
    %cst_53 = arith.constant dense<0.000000e+00> : vector<56x24xf32>
    %145 = tpu.matmul %143, %144, %cst_53 {dimension_numbers = #tpu.dot_dimension_numbers<[1], [0], [0], [1], [0, 0, 1, 1], [], []>} : vector<56x24xf32>, vector<24x24xf32>, vector<56x24xf32> -> vector<56x24xf32>
    %146 = arith.addf %142, %145 : vector<56x24xf32>
    %147 = vector.extract_strided_slice %128 {offsets = [224, 0], sizes = [56, 24], strides = [1, 1]} : vector<1400x24xf32> to vector<56x24xf32>
    %148 = vector.extract_strided_slice %129 {offsets = [96, 0], sizes = [24, 24], strides = [1, 1]} : vector<600x24xf32> to vector<24x24xf32>
    %cst_54 = arith.constant dense<0.000000e+00> : vector<56x24xf32>
    %149 = tpu.matmul %147, %148, %cst_54 {dimension_numbers = #tpu.dot_dimension_numbers<[1], [0], [0], [1], [0, 0, 1, 1], [], []>} : vector<56x24xf32>, vector<24x24xf32>, vector<56x24xf32> -> vector<56x24xf32>
    %150 = arith.addf %146, %149 : vector<56x24xf32>
    %151 = vector.extract_strided_slice %128 {offsets = [280, 0], sizes = [56, 24], strides = [1, 1]} : vector<1400x24xf32> to vector<56x24xf32>
    %152 = vector.extract_strided_slice %129 {offsets = [120, 0], sizes = [24, 24], strides = [1, 1]} : vector<600x24xf32> to vector<24x24xf32>
    %cst_55 = arith.constant dense<0.000000e+00> : vector<56x24xf32>
    %153 = tpu.matmul %151, %152, %cst_55 {dimension_numbers = #tpu.dot_dimension_numbers<[1], [0], [0], [1], [0, 0, 1, 1], [], []>} : vector<56x24xf32>, vector<24x24xf32>, vector<56x24xf32> -> vector<56x24xf32>
    %154 = arith.addf %150, %153 : vector<56x24xf32>
    %155 = vector.extract_strided_slice %128 {offsets = [336, 0], sizes = [56, 24], strides = [1, 1]} : vector<1400x24xf32> to vector<56x24xf32>
    %156 = vector.extract_strided_slice %129 {offsets = [144, 0], sizes = [24, 24], strides = [1, 1]} : vector<600x24xf32> to vector<24x24xf32>
    %cst_56 = arith.constant dense<0.000000e+00> : vector<56x24xf32>
    %157 = tpu.matmul %155, %156, %cst_56 {dimension_numbers = #tpu.dot_dimension_numbers<[1], [0], [0], [1], [0, 0, 1, 1], [], []>} : vector<56x24xf32>, vector<24x24xf32>, vector<56x24xf32> -> vector<56x24xf32>
    %158 = arith.addf %154, %157 : vector<56x24xf32>
    %159 = vector.extract_strided_slice %128 {offsets = [392, 0], sizes = [56, 24], strides = [1, 1]} : vector<1400x24xf32> to vector<56x24xf32>
    %160 = vector.extract_strided_slice %129 {offsets = [168, 0], sizes = [24, 24], strides = [1, 1]} : vector<600x24xf32> to vector<24x24xf32>
    %cst_57 = arith.constant dense<0.000000e+00> : vector<56x24xf32>
    %161 = tpu.matmul %159, %160, %cst_57 {dimension_numbers = #tpu.dot_dimension_numbers<[1], [0], [0], [1], [0, 0, 1, 1], [], []>} : vector<56x24xf32>, vector<24x24xf32>, vector<56x24xf32> -> vector<56x24xf32>
    %162 = arith.addf %158, %161 : vector<56x24xf32>
    %163 = vector.extract_strided_slice %128 {offsets = [448, 0], sizes = [56, 24], strides = [1, 1]} : vector<1400x24xf32> to vector<56x24xf32>
    %164 = vector.extract_strided_slice %129 {offsets = [192, 0], sizes = [24, 24], strides = [1, 1]} : vector<600x24xf32> to vector<24x24xf32>
    %cst_58 = arith.constant dense<0.000000e+00> : vector<56x24xf32>
    %165 = tpu.matmul %163, %164, %cst_58 {dimension_numbers = #tpu.dot_dimension_numbers<[1], [0], [0], [1], [0, 0, 1, 1], [], []>} : vector<56x24xf32>, vector<24x24xf32>, vector<56x24xf32> -> vector<56x24xf32>
    %166 = arith.addf %162, %165 : vector<56x24xf32>
    %167 = vector.extract_strided_slice %128 {offsets = [504, 0], sizes = [56, 24], strides = [1, 1]} : vector<1400x24xf32> to vector<56x24xf32>
    %168 = vector.extract_strided_slice %129 {offsets = [216, 0], sizes = [24, 24], strides = [1, 1]} : vector<600x24xf32> to vector<24x24xf32>
    %cst_59 = arith.constant dense<0.000000e+00> : vector<56x24xf32>
    %169 = tpu.matmul %167, %168, %cst_59 {dimension_numbers = #tpu.dot_dimension_numbers<[1], [0], [0], [1], [0, 0, 1, 1], [], []>} : vector<56x24xf32>, vector<24x24xf32>, vector<56x24xf32> -> vector<56x24xf32>
    %170 = arith.addf %166, %169 : vector<56x24xf32>
    %171 = vector.extract_strided_slice %128 {offsets = [560, 0], sizes = [56, 24], strides = [1, 1]} : vector<1400x24xf32> to vector<56x24xf32>
    %172 = vector.extract_strided_slice %129 {offsets = [240, 0], sizes = [24, 24], strides = [1, 1]} : vector<600x24xf32> to vector<24x24xf32>
    %cst_60 = arith.constant dense<0.000000e+00> : vector<56x24xf32>
    %173 = tpu.matmul %171, %172, %cst_60 {dimension_numbers = #tpu.dot_dimension_numbers<[1], [0], [0], [1], [0, 0, 1, 1], [], []>} : vector<56x24xf32>, vector<24x24xf32>, vector<56x24xf32> -> vector<56x24xf32>
    %174 = arith.addf %170, %173 : vector<56x24xf32>
    %175 = vector.extract_strided_slice %128 {offsets = [616, 0], sizes = [56, 24], strides = [1, 1]} : vector<1400x24xf32> to vector<56x24xf32>
    %176 = vector.extract_strided_slice %129 {offsets = [264, 0], sizes = [24, 24], strides = [1, 1]} : vector<600x24xf32> to vector<24x24xf32>
    %cst_61 = arith.constant dense<0.000000e+00> : vector<56x24xf32>
    %177 = tpu.matmul %175, %176, %cst_61 {dimension_numbers = #tpu.dot_dimension_numbers<[1], [0], [0], [1], [0, 0, 1, 1], [], []>} : vector<56x24xf32>, vector<24x24xf32>, vector<56x24xf32> -> vector<56x24xf32>
    %178 = arith.addf %174, %177 : vector<56x24xf32>
    %179 = vector.extract_strided_slice %128 {offsets = [672, 0], sizes = [56, 24], strides = [1, 1]} : vector<1400x24xf32> to vector<56x24xf32>
    %180 = vector.extract_strided_slice %129 {offsets = [288, 0], sizes = [24, 24], strides = [1, 1]} : vector<600x24xf32> to vector<24x24xf32>
    %cst_62 = arith.constant dense<0.000000e+00> : vector<56x24xf32>
    %181 = tpu.matmul %179, %180, %cst_62 {dimension_numbers = #tpu.dot_dimension_numbers<[1], [0], [0], [1], [0, 0, 1, 1], [], []>} : vector<56x24xf32>, vector<24x24xf32>, vector<56x24xf32> -> vector<56x24xf32>
    %182 = arith.addf %178, %181 : vector<56x24xf32>
    %183 = vector.extract_strided_slice %128 {offsets = [728, 0], sizes = [56, 24], strides = [1, 1]} : vector<1400x24xf32> to vector<56x24xf32>
    %184 = vector.extract_strided_slice %129 {offsets = [312, 0], sizes = [24, 24], strides = [1, 1]} : vector<600x24xf32> to vector<24x24xf32>
    %cst_63 = arith.constant dense<0.000000e+00> : vector<56x24xf32>
    %185 = tpu.matmul %183, %184, %cst_63 {dimension_numbers = #tpu.dot_dimension_numbers<[1], [0], [0], [1], [0, 0, 1, 1], [], []>} : vector<56x24xf32>, vector<24x24xf32>, vector<56x24xf32> -> vector<56x24xf32>
    %186 = arith.addf %182, %185 : vector<56x24xf32>
    %187 = vector.extract_strided_slice %128 {offsets = [784, 0], sizes = [56, 24], strides = [1, 1]} : vector<1400x24xf32> to vector<56x24xf32>
    %188 = vector.extract_strided_slice %129 {offsets = [336, 0], sizes = [24, 24], strides = [1, 1]} : vector<600x24xf32> to vector<24x24xf32>
    %cst_64 = arith.constant dense<0.000000e+00> : vector<56x24xf32>
    %189 = tpu.matmul %187, %188, %cst_64 {dimension_numbers = #tpu.dot_dimension_numbers<[1], [0], [0], [1], [0, 0, 1, 1], [], []>} : vector<56x24xf32>, vector<24x24xf32>, vector<56x24xf32> -> vector<56x24xf32>
    %190 = arith.addf %186, %189 : vector<56x24xf32>
    %191 = vector.extract_strided_slice %128 {offsets = [840, 0], sizes = [56, 24], strides = [1, 1]} : vector<1400x24xf32> to vector<56x24xf32>
    %192 = vector.extract_strided_slice %129 {offsets = [360, 0], sizes = [24, 24], strides = [1, 1]} : vector<600x24xf32> to vector<24x24xf32>
    %cst_65 = arith.constant dense<0.000000e+00> : vector<56x24xf32>
    %193 = tpu.matmul %191, %192, %cst_65 {dimension_numbers = #tpu.dot_dimension_numbers<[1], [0], [0], [1], [0, 0, 1, 1], [], []>} : vector<56x24xf32>, vector<24x24xf32>, vector<56x24xf32> -> vector<56x24xf32>
    %194 = arith.addf %190, %193 : vector<56x24xf32>
    %195 = vector.extract_strided_slice %128 {offsets = [896, 0], sizes = [56, 24], strides = [1, 1]} : vector<1400x24xf32> to vector<56x24xf32>
    %196 = vector.extract_strided_slice %129 {offsets = [384, 0], sizes = [24, 24], strides = [1, 1]} : vector<600x24xf32> to vector<24x24xf32>
    %cst_66 = arith.constant dense<0.000000e+00> : vector<56x24xf32>
    %197 = tpu.matmul %195, %196, %cst_66 {dimension_numbers = #tpu.dot_dimension_numbers<[1], [0], [0], [1], [0, 0, 1, 1], [], []>} : vector<56x24xf32>, vector<24x24xf32>, vector<56x24xf32> -> vector<56x24xf32>
    %198 = arith.addf %194, %197 : vector<56x24xf32>
    %199 = vector.extract_strided_slice %128 {offsets = [952, 0], sizes = [56, 24], strides = [1, 1]} : vector<1400x24xf32> to vector<56x24xf32>
    %200 = vector.extract_strided_slice %129 {offsets = [408, 0], sizes = [24, 24], strides = [1, 1]} : vector<600x24xf32> to vector<24x24xf32>
    %cst_67 = arith.constant dense<0.000000e+00> : vector<56x24xf32>
    %201 = tpu.matmul %199, %200, %cst_67 {dimension_numbers = #tpu.dot_dimension_numbers<[1], [0], [0], [1], [0, 0, 1, 1], [], []>} : vector<56x24xf32>, vector<24x24xf32>, vector<56x24xf32> -> vector<56x24xf32>
    %202 = arith.addf %198, %201 : vector<56x24xf32>
    %203 = vector.extract_strided_slice %128 {offsets = [1008, 0], sizes = [56, 24], strides = [1, 1]} : vector<1400x24xf32> to vector<56x24xf32>
    %204 = vector.extract_strided_slice %129 {offsets = [432, 0], sizes = [24, 24], strides = [1, 1]} : vector<600x24xf32> to vector<24x24xf32>
    %cst_68 = arith.constant dense<0.000000e+00> : vector<56x24xf32>
    %205 = tpu.matmul %203, %204, %cst_68 {dimension_numbers = #tpu.dot_dimension_numbers<[1], [0], [0], [1], [0, 0, 1, 1], [], []>} : vector<56x24xf32>, vector<24x24xf32>, vector<56x24xf32> -> vector<56x24xf32>
    %206 = arith.addf %202, %205 : vector<56x24xf32>
    %207 = vector.extract_strided_slice %128 {offsets = [1064, 0], sizes = [56, 24], strides = [1, 1]} : vector<1400x24xf32> to vector<56x24xf32>
    %208 = vector.extract_strided_slice %129 {offsets = [456, 0], sizes = [24, 24], strides = [1, 1]} : vector<600x24xf32> to vector<24x24xf32>
    %cst_69 = arith.constant dense<0.000000e+00> : vector<56x24xf32>
    %209 = tpu.matmul %207, %208, %cst_69 {dimension_numbers = #tpu.dot_dimension_numbers<[1], [0], [0], [1], [0, 0, 1, 1], [], []>} : vector<56x24xf32>, vector<24x24xf32>, vector<56x24xf32> -> vector<56x24xf32>
    %210 = arith.addf %206, %209 : vector<56x24xf32>
    %211 = vector.extract_strided_slice %128 {offsets = [1120, 0], sizes = [56, 24], strides = [1, 1]} : vector<1400x24xf32> to vector<56x24xf32>
    %212 = vector.extract_strided_slice %129 {offsets = [480, 0], sizes = [24, 24], strides = [1, 1]} : vector<600x24xf32> to vector<24x24xf32>
    %cst_70 = arith.constant dense<0.000000e+00> : vector<56x24xf32>
    %213 = tpu.matmul %211, %212, %cst_70 {dimension_numbers = #tpu.dot_dimension_numbers<[1], [0], [0], [1], [0, 0, 1, 1], [], []>} : vector<56x24xf32>, vector<24x24xf32>, vector<56x24xf32> -> vector<56x24xf32>
    %214 = arith.addf %210, %213 : vector<56x24xf32>
    %215 = vector.extract_strided_slice %128 {offsets = [1176, 0], sizes = [56, 24], strides = [1, 1]} : vector<1400x24xf32> to vector<56x24xf32>
    %216 = vector.extract_strided_slice %129 {offsets = [504, 0], sizes = [24, 24], strides = [1, 1]} : vector<600x24xf32> to vector<24x24xf32>
    %cst_71 = arith.constant dense<0.000000e+00> : vector<56x24xf32>
    %217 = tpu.matmul %215, %216, %cst_71 {dimension_numbers = #tpu.dot_dimension_numbers<[1], [0], [0], [1], [0, 0, 1, 1], [], []>} : vector<56x24xf32>, vector<24x24xf32>, vector<56x24xf32> -> vector<56x24xf32>
    %218 = arith.addf %214, %217 : vector<56x24xf32>
    %219 = vector.extract_strided_slice %128 {offsets = [1232, 0], sizes = [56, 24], strides = [1, 1]} : vector<1400x24xf32> to vector<56x24xf32>
    %220 = vector.extract_strided_slice %129 {offsets = [528, 0], sizes = [24, 24], strides = [1, 1]} : vector<600x24xf32> to vector<24x24xf32>
    %cst_72 = arith.constant dense<0.000000e+00> : vector<56x24xf32>
    %221 = tpu.matmul %219, %220, %cst_72 {dimension_numbers = #tpu.dot_dimension_numbers<[1], [0], [0], [1], [0, 0, 1, 1], [], []>} : vector<56x24xf32>, vector<24x24xf32>, vector<56x24xf32> -> vector<56x24xf32>
    %222 = arith.addf %218, %221 : vector<56x24xf32>
    %223 = vector.extract_strided_slice %128 {offsets = [1288, 0], sizes = [56, 24], strides = [1, 1]} : vector<1400x24xf32> to vector<56x24xf32>
    %224 = vector.extract_strided_slice %129 {offsets = [552, 0], sizes = [24, 24], strides = [1, 1]} : vector<600x24xf32> to vector<24x24xf32>
    %cst_73 = arith.constant dense<0.000000e+00> : vector<56x24xf32>
    %225 = tpu.matmul %223, %224, %cst_73 {dimension_numbers = #tpu.dot_dimension_numbers<[1], [0], [0], [1], [0, 0, 1, 1], [], []>} : vector<56x24xf32>, vector<24x24xf32>, vector<56x24xf32> -> vector<56x24xf32>
    %226 = arith.addf %222, %225 : vector<56x24xf32>
    %227 = vector.extract_strided_slice %128 {offsets = [1344, 0], sizes = [56, 24], strides = [1, 1]} : vector<1400x24xf32> to vector<56x24xf32>
    %228 = vector.extract_strided_slice %129 {offsets = [576, 0], sizes = [24, 24], strides = [1, 1]} : vector<600x24xf32> to vector<24x24xf32>
    %cst_74 = arith.constant dense<0.000000e+00> : vector<56x24xf32>
    %229 = tpu.matmul %227, %228, %cst_74 {dimension_numbers = #tpu.dot_dimension_numbers<[1], [0], [0], [1], [0, 0, 1, 1], [], []>} : vector<56x24xf32>, vector<24x24xf32>, vector<56x24xf32> -> vector<56x24xf32>
    %230 = arith.addf %226, %229 : vector<56x24xf32>
    %c0_75 = arith.constant 0 : index
    %c0_76 = arith.constant 0 : index
    %231 = vector.load %arg8[%c0_75, %c0_76] : memref<1x24xf32, #tpu.memory_space<vmem>>, vector<1x24xf32>
    %232 = vector.broadcast %231 : vector<1x24xf32> to vector<56x24xf32>
    %233 = arith.addf %230, %232 : vector<56x24xf32>
    %cst_77 = arith.constant 5.000000e-01 : f32
    %234 = vector.broadcast %cst_77 : f32 to vector<56x24xf32>
    %235 = arith.mulf %234, %233 : vector<56x24xf32>
    %236 = math.tanh %235 : vector<56x24xf32>
    %cst_78 = arith.constant 1.000000e+00 : f32
    %237 = vector.broadcast %cst_78 : f32 to vector<56x24xf32>
    %238 = arith.addf %236, %237 : vector<56x24xf32>
    %cst_79 = arith.constant 5.000000e-01 : f32
    %239 = vector.broadcast %cst_79 : f32 to vector<56x24xf32>
    %240 = arith.mulf %239, %238 : vector<56x24xf32>
    %c0_80 = arith.constant 0 : index
    %c0_81 = arith.constant 0 : index
    %241 = vector.load %arg9[%c0_80, %c0_81] : memref<84x1024xf32, #tpu.memory_space<vmem>>, vector<84x1024xf32>
    %c0_82 = arith.constant 0 : index
    %c0_83 = arith.constant 0 : index
    %242 = vector.load %arg10[%c0_82, %c0_83] : memref<1x128xf32, #tpu.memory_space<vmem>>, vector<1x128xf32>
    %243 = vector.extract_strided_slice %240 {offsets = [0, 0], sizes = [56, 12], strides = [1, 1]} : vector<56x24xf32> to vector<56x12xf32>
    %244 = vector.extract_strided_slice %243 {offsets = [0, 0], sizes = [8, 12], strides = [1, 1]} : vector<56x12xf32> to vector<8x12xf32>
    %245 = vector.extract_strided_slice %243 {offsets = [8, 0], sizes = [8, 12], strides = [1, 1]} : vector<56x12xf32> to vector<8x12xf32>
    %246 = vector.extract_strided_slice %243 {offsets = [16, 0], sizes = [8, 12], strides = [1, 1]} : vector<56x12xf32> to vector<8x12xf32>
    %247 = vector.extract_strided_slice %243 {offsets = [24, 0], sizes = [8, 12], strides = [1, 1]} : vector<56x12xf32> to vector<8x12xf32>
    %248 = vector.extract_strided_slice %243 {offsets = [32, 0], sizes = [8, 12], strides = [1, 1]} : vector<56x12xf32> to vector<8x12xf32>
    %249 = vector.extract_strided_slice %243 {offsets = [40, 0], sizes = [8, 12], strides = [1, 1]} : vector<56x12xf32> to vector<8x12xf32>
    %250 = vector.extract_strided_slice %243 {offsets = [48, 0], sizes = [8, 12], strides = [1, 1]} : vector<56x12xf32> to vector<8x12xf32>
    %251 = tpu.concatenate %244, %245, %246, %247, %248, %249, %250 in 1 : vector<8x12xf32>, vector<8x12xf32>, vector<8x12xf32>, vector<8x12xf32>, vector<8x12xf32>, vector<8x12xf32>, vector<8x12xf32> -> vector<8x84xf32>
    %cst_84 = arith.constant dense<0.000000e+00> : vector<8x1024xf32>
    %252 = tpu.matmul %251, %241, %cst_84 {dimension_numbers = #tpu.dot_dimension_numbers<[1], [0], [0], [1], [0, 0, 1, 1], [], []>} : vector<8x84xf32>, vector<84x1024xf32>, vector<8x1024xf32> -> vector<8x1024xf32>
    %253 = vector.extract_strided_slice %252 {offsets = [0, 0], sizes = [1, 128], strides = [1, 1]} : vector<8x1024xf32> to vector<1x128xf32>
    %254 = arith.addf %242, %253 : vector<1x128xf32>
    %255 = vector.extract_strided_slice %252 {offsets = [1, 128], sizes = [1, 128], strides = [1, 1]} : vector<8x1024xf32> to vector<1x128xf32>
    %256 = arith.addf %254, %255 : vector<1x128xf32>
    %257 = vector.extract_strided_slice %252 {offsets = [2, 256], sizes = [1, 128], strides = [1, 1]} : vector<8x1024xf32> to vector<1x128xf32>
    %258 = arith.addf %256, %257 : vector<1x128xf32>
    %259 = vector.extract_strided_slice %252 {offsets = [3, 384], sizes = [1, 128], strides = [1, 1]} : vector<8x1024xf32> to vector<1x128xf32>
    %260 = arith.addf %258, %259 : vector<1x128xf32>
    %261 = vector.extract_strided_slice %252 {offsets = [4, 512], sizes = [1, 128], strides = [1, 1]} : vector<8x1024xf32> to vector<1x128xf32>
    %262 = arith.addf %260, %261 : vector<1x128xf32>
    %263 = vector.extract_strided_slice %252 {offsets = [5, 640], sizes = [1, 128], strides = [1, 1]} : vector<8x1024xf32> to vector<1x128xf32>
    %264 = arith.addf %262, %263 : vector<1x128xf32>
    %265 = vector.extract_strided_slice %252 {offsets = [6, 768], sizes = [1, 128], strides = [1, 1]} : vector<8x1024xf32> to vector<1x128xf32>
    %266 = arith.addf %264, %265 : vector<1x128xf32>
    %267 = vector.extract_strided_slice %252 {offsets = [7, 896], sizes = [1, 128], strides = [1, 1]} : vector<8x1024xf32> to vector<1x128xf32>
    %268 = arith.addf %266, %267 : vector<1x128xf32>
    %269 = vector.extract_strided_slice %240 {offsets = [0, 12], sizes = [56, 12], strides = [1, 1]} : vector<56x24xf32> to vector<56x12xf32>
    %270 = vector.extract_strided_slice %269 {offsets = [0, 0], sizes = [8, 12], strides = [1, 1]} : vector<56x12xf32> to vector<8x12xf32>
    %271 = vector.extract_strided_slice %269 {offsets = [8, 0], sizes = [8, 12], strides = [1, 1]} : vector<56x12xf32> to vector<8x12xf32>
    %272 = vector.extract_strided_slice %269 {offsets = [16, 0], sizes = [8, 12], strides = [1, 1]} : vector<56x12xf32> to vector<8x12xf32>
    %273 = vector.extract_strided_slice %269 {offsets = [24, 0], sizes = [8, 12], strides = [1, 1]} : vector<56x12xf32> to vector<8x12xf32>
    %274 = vector.extract_strided_slice %269 {offsets = [32, 0], sizes = [8, 12], strides = [1, 1]} : vector<56x12xf32> to vector<8x12xf32>
    %275 = vector.extract_strided_slice %269 {offsets = [40, 0], sizes = [8, 12], strides = [1, 1]} : vector<56x12xf32> to vector<8x12xf32>
    %276 = vector.extract_strided_slice %269 {offsets = [48, 0], sizes = [8, 12], strides = [1, 1]} : vector<56x12xf32> to vector<8x12xf32>
    %277 = tpu.concatenate %270, %271, %272, %273, %274, %275, %276 in 1 : vector<8x12xf32>, vector<8x12xf32>, vector<8x12xf32>, vector<8x12xf32>, vector<8x12xf32>, vector<8x12xf32>, vector<8x12xf32> -> vector<8x84xf32>
    %cst_85 = arith.constant dense<0.000000e+00> : vector<8x1024xf32>
    %278 = tpu.matmul %277, %241, %cst_85 {dimension_numbers = #tpu.dot_dimension_numbers<[1], [0], [0], [1], [0, 0, 1, 1], [], []>} : vector<8x84xf32>, vector<84x1024xf32>, vector<8x1024xf32> -> vector<8x1024xf32>
    %279 = vector.extract_strided_slice %278 {offsets = [0, 0], sizes = [1, 128], strides = [1, 1]} : vector<8x1024xf32> to vector<1x128xf32>
    %280 = arith.addf %242, %279 : vector<1x128xf32>
    %281 = vector.extract_strided_slice %278 {offsets = [1, 128], sizes = [1, 128], strides = [1, 1]} : vector<8x1024xf32> to vector<1x128xf32>
    %282 = arith.addf %280, %281 : vector<1x128xf32>
    %283 = vector.extract_strided_slice %278 {offsets = [2, 256], sizes = [1, 128], strides = [1, 1]} : vector<8x1024xf32> to vector<1x128xf32>
    %284 = arith.addf %282, %283 : vector<1x128xf32>
    %285 = vector.extract_strided_slice %278 {offsets = [3, 384], sizes = [1, 128], strides = [1, 1]} : vector<8x1024xf32> to vector<1x128xf32>
    %286 = arith.addf %284, %285 : vector<1x128xf32>
    %287 = vector.extract_strided_slice %278 {offsets = [4, 512], sizes = [1, 128], strides = [1, 1]} : vector<8x1024xf32> to vector<1x128xf32>
    %288 = arith.addf %286, %287 : vector<1x128xf32>
    %289 = vector.extract_strided_slice %278 {offsets = [5, 640], sizes = [1, 128], strides = [1, 1]} : vector<8x1024xf32> to vector<1x128xf32>
    %290 = arith.addf %288, %289 : vector<1x128xf32>
    %291 = vector.extract_strided_slice %278 {offsets = [6, 768], sizes = [1, 128], strides = [1, 1]} : vector<8x1024xf32> to vector<1x128xf32>
    %292 = arith.addf %290, %291 : vector<1x128xf32>
    %293 = vector.extract_strided_slice %278 {offsets = [7, 896], sizes = [1, 128], strides = [1, 1]} : vector<8x1024xf32> to vector<1x128xf32>
    %294 = arith.addf %292, %293 : vector<1x128xf32>
    %295 = tpu.concatenate %268, %294 in 0 : vector<1x128xf32>, vector<1x128xf32> -> vector<2x128xf32>
    %c0_86 = arith.constant 0 : index
    %c0_87 = arith.constant 0 : index
    %296 = vector.load %arg11[%c0_86, %c0_87] : memref<2x128xf32, #tpu.memory_space<vmem>>, vector<2x128xf32>
    tpu.vector_store %arg11[%c0_86, %c0_87], %295 {strides = array<i32>} : memref<2x128xf32, #tpu.memory_space<vmem>>, vector<2x128xf32>,
    return
  }
}

</mosaic_0001>

<bundles_post_ra>
// kernel: lenet_forward.1
= control target key start
LH: loop header
LB: loop body
LE: loop exit
PB: predicated region body
PF: predicated region fallthrough
CT: control target
= control target key end

     0   :  { %vm151_vm0 = vcmask 1041408   ;;  %s13527_s0 = inlined_call_operand.vmem [shape: f32[200,50], index: 0, kind: input, shape index: {}]   ;;  %s13528_s1 = inlined_call_operand.vmem [shape: f32[1400,200], index: 1, kind: input, shape index: {}]   ;;  %s13529_s2 = inlined_call_operand.vmem [shape: f32[1400,56], index: 2, kind: input, shape index: {}]   ;;  %s13530_s3 = inlined_call_operand.vmem [shape: f32[50,24], index: 3, kind: input, shape index: {}]   ;;  %s13531_s4 = inlined_call_operand.vmem [shape: f32[1,24], index: 4, kind: input, shape index: {}]   ;;  %s13532_s5 = inlined_call_operand.vmem [shape: f32[600,24], index: 5, kind: input, shape index: {}]   ;;  %s13533_s6 = inlined_call_operand.vmem [shape: f32[1,24], index: 6, kind: input, shape index: {}]   ;;  %s13534_s7 = inlined_call_operand.vmem [shape: f32[600,24], index: 7, kind: input, shape index: {}]   ;;  %s13535_s8 = inlined_call_operand.vmem [shape: f32[1,24], index: 8, kind: input, shape index: {}]   ;;  %s13536_s9 = inlined_call_operand.vmem [shape: f32[84,1024], index: 9, kind: input, shape index: {}]   ;;  %s13537_s10 = inlined_call_operand.vmem [shape: f32[1,128], index: 10, kind: input, shape index: {}]   ;;  %s13538_s11 = inlined_call_operand.hbm [shape: f32[2,128], index: 11, kind: output, shape index: {}]  }
   0x1   :  { %v70_v0 = vld [vmem:[%s13530_s3 + $0x30] sm:$0x3]  ;;  %v69_v1 = vld [vmem:[%s13530_s3 + $0x28] sm:$0xff]  ;;  %v68_v2 = vld [vmem:[%s13530_s3 + $0x20] sm:$0xff] }
   0x2   :  { %8417 = vmatpush.msk.msra.mxu1 %vm151_vm0, %v70_v0  ;;  %8418 = vmatpush.msk.msra.mxu2 %vm151_vm0, %v70_v0  ;;  %v67_v3 = vld [vmem:[%s13530_s3 + $0x18] sm:$0xff]  ;;  %v66_v4 = vld [vmem:[%s13530_s3 + $0x10] sm:$0xff] }
   0x3   :  { %7659 = vmatpush.msk.msra.mxu0 %vm151_vm0, %v70_v0 }
   0x4   :  { %8419 = vmatpush.msra.mxu1 %v69_v1  ;;  %8420 = vmatpush.msra.mxu2 %v69_v1 }
   0x5   :  { %165 = vmatpush.msra.mxu0 %v69_v1 }
   0x6   :  { %8421 = vmatpush.msra.mxu1 %v68_v2  ;;  %8422 = vmatpush.msra.mxu2 %v68_v2 }
   0x7   :  { %166 = vmatpush.msra.mxu0 %v68_v2 }
   0x8   :  { %16 = vsyncpa [#allocation3], 0  ;;  %8423 = vmatpush.msra.mxu1 %v67_v3  ;;  %8424 = vmatpush.msra.mxu2 %v67_v3  ;;  %v65_v5 = vld [vmem:[%s13530_s3 + $0x8] sm:$0xff]  ;;  %v64_v6 = vld [vmem:[%s13530_s3] sm:$0xff]  ;;  %vm75_vm1 = vcmask 408576   ;;  %vm697_vm2 = vcmask 588800  }
   0x9   :  { %167 = vmatpush.msra.mxu0 %v67_v3  ;;  %v42_v7 = vld [vmem:[%s13527_s0 + $0x18] sm:$0xff]  ;;  %v51_v8 = vld [vmem:[%s13527_s0 + $0x60] sm:$0xff]  ;;  %v52_v10 = vld [vmem:[%s13527_s0 + $0x68] sm:$0xff]  ;;  %vm2382_vm3 = vcmask 195584   ;;  %vm4233_vm4 = vcmask 457728   ;;  %s8561_s16 = smov 36  }
   0xa   :  { %8425 = vmatpush.msra.mxu1 %v66_v4  ;;  %8426 = vmatpush.msra.mxu2 %v66_v4  ;;  %v43_v9 = vld [vmem:[%s13527_s0 + $0x20] sm:$0xff]  ;;  %v44_v11 = vld [vmem:[%s13527_s0 + $0x28] sm:$0xff]  ;;  %v53_v12 = vld [vmem:[%s13527_s0 + $0x70] sm:$0xff]  ;;  %s8563_s17 = smov 48   ;;  %vm7178_vm5 = vcmask 1043456   ;;  %s8564_s21 = smov 60  }
   0xb   :  { %168 = vmatpush.msra.mxu0 %v66_v4  ;;  %v45_v13 = vld [vmem:[%s13527_s0 + $0x30] sm:$0xff]  ;;  %v54_v14 = vld [vmem:[%s13527_s0 + $0x78] sm:$0xff]  ;;  %v55_v16 = vld [vmem:[%s13527_s0 + $0x80] sm:$0xff]  ;;  %vm7164_vm6 = vcmask 97280   ;;  %vm7167_vm7 = vcmask 293888   ;;  %vm7169_vm8 = vcmask 392192  }
   0xc   :  { %8427 = vmatpush.msra.mxu1 %v65_v5  ;;  %8428 = vmatpush.msra.mxu2 %v65_v5  ;;  %v46_v15 = vld [vmem:[%s13527_s0 + $0x38] sm:$0xff]  ;;  %v39_v17 = vld [vmem:[%s13527_s0] sm:$0xff]  ;;  %v56_v19 = vld [vmem:[%s13527_s0 + $0x88] sm:$0xff]  ;;  %vm7171_vm9 = vcmask 490496   ;;  %vm7174_vm10 = vcmask 687104   ;;  %vm7640_vm11 = vcmask 1040384  }
   0xd   :  { %169 = vmatpush.msra.mxu0 %v65_v5  ;;  %v47_v18 = vld [vmem:[%s13527_s0 + $0x40] sm:$0xff]  ;;  %v40_v20 = vld [vmem:[%s13527_s0 + $0x8] sm:$0xff]  ;;  %v57_v22 = vld [vmem:[%s13527_s0 + $0x90] sm:$0xff] }
   0xe   :  { %8429 = vmatpush.msra.mxu1 %v64_v6  ;;  %8430 = vmatpush.msra.mxu2 %v64_v6  ;;  %v48_v21 = vld [vmem:[%s13527_s0 + $0x48] sm:$0xff]  ;;  %v41_v23 = vld [vmem:[%s13527_s0 + $0x10] sm:$0xff]  ;;  %v58_v25 = vld [vmem:[%s13527_s0 + $0x98] sm:$0xff] }
   0xf   :  { %7663 = vmatmul.msk.f32.vlgmr.msra.gmra.mxu1 %vm75_vm1, %v42_v7  ;;  %7672 = vmatmul.msk.f32.vlgmr.msra.gmra.mxu2 %vm75_vm1, %v51_v8  ;;  %v49_v24 = vld [vmem:[%s13527_s0 + $0x50] sm:$0xff]  ;;  %v50_v26 = vld [vmem:[%s13527_s0 + $0x58] sm:$0xff]  ;;  %v59_v27 = vld [vmem:[%s13527_s0 + $0xa0] sm:$0xff] }
  0x10   :  { %170 = vmatpush.msra.mxu0 %v64_v6  ;;  %v60_v28 = vld [vmem:[%s13527_s0 + $0xa8] sm:$0xff]  ;;  %v61_v29 = vld [vmem:[%s13527_s0 + $0xb0] sm:$0xff]  ;;  %v62_v30 = vld [vmem:[%s13527_s0 + $0xb8] sm:$0xff] }
  0x11   :  { %7660 = vmatmul.msk.f32.vlgmr.msra.gmra.mxu0 %vm75_vm1, %v39_v17  ;;  %v63_v31 = vld [vmem:[%s13527_s0 + $0xc0] sm:$0xff] }
  0x12   :  { %v8755_v38 = vld [vmem:[%s13531_s4] ss:$0 sm:$0xff] }
  0x17   :  { %7664 = vmatmul.msk.f32.gmra.mxu1 %vm75_vm1, %v43_v9  ;;  %7673 = vmatmul.msk.f32.gmra.mxu2 %vm75_vm1, %v52_v10 }
  0x19   :  { %7661 = vmatmul.msk.f32.gmra.mxu0 %vm75_vm1, %v40_v20 }
  0x1f   :  { %7665 = vmatmul.msk.f32.gmra.mxu1 %vm75_vm1, %v44_v11  ;;  %7674 = vmatmul.msk.f32.gmra.mxu2 %vm75_vm1, %v53_v12 }
  0x21   :  { %7662 = vmatmul.msk.f32.gmra.mxu0 %vm75_vm1, %v41_v23 }
  0x27   :  { %7666 = vmatmul.msk.f32.gmra.mxu1 %vm75_vm1, %v45_v13  ;;  %7675 = vmatmul.msk.f32.gmra.mxu2 %vm75_vm1, %v54_v14 }
  0x2f   :  { %7667 = vmatmul.msk.f32.gmra.mxu1 %vm75_vm1, %v46_v15  ;;  %7676 = vmatmul.msk.f32.gmra.mxu2 %vm75_vm1, %v55_v16 }
  0x37   :  { %7668 = vmatmul.msk.f32.gmra.mxu1 %vm75_vm1, %v47_v18  ;;  %7677 = vmatmul.msk.f32.gmra.mxu2 %vm75_vm1, %v56_v19 }
  0x3f   :  { %7669 = vmatmul.msk.f32.gmra.mxu1 %vm75_vm1, %v48_v21  ;;  %7678 = vmatmul.msk.f32.gmra.mxu2 %vm75_vm1, %v57_v22 }
  0x47   :  { %7670 = vmatmul.msk.f32.gmra.mxu1 %vm75_vm1, %v49_v24  ;;  %7679 = vmatmul.msk.f32.gmra.mxu2 %vm75_vm1, %v58_v25 }
  0x4f   :  { %7671 = vmatmul.msk.f32.gmra.mxu1 %vm75_vm1, %v50_v26  ;;  %7680 = vmatmul.msk.f32.gmra.mxu2 %vm75_vm1, %v59_v27 }
  0x57   :  { %7681 = vmatmul.msk.f32.gmra.mxu2 %vm75_vm1, %v60_v28 }
  0x5f   :  { %7682 = vmatmul.msk.f32.gmra.mxu2 %vm75_vm1, %v61_v29 }
  0x67   :  { %7683 = vmatmul.msk.f32.gmra.mxu2 %vm75_vm1, %v62_v30 }
  0x6f   :  { %7684 = vmatmul.msk.f32.gmra.mxu2 %vm75_vm1, %v63_v31 }
  0x8c   :  { %v8748_v32 = vpop.f32.mrf.mxu1 }
  0x8d   :  { %v182_v25 = vadd.f32 %v8755_v38, %v8748_v32 }
  0x8e   :  { %v172_v2 = vpop.f32.mrf.mxu0 }
  0x92   :  { %v208_v33 = vpop.f32.mrf.mxu2 }
  0x93   :  { %v209_v42 = vadd.f32 %v8755_v38, %v208_v33 }
  0x94   :  { %v8750_v34 = vpop.f32.mrf.mxu1 }
  0x95   :  { %v259_v48 = vmul.f32 0.5, %v209_v42  ;;  %v185_v23 = vadd.f32 %v8755_v38, %v8750_v34  ;;  %v173_v34 = vadd.f32 %v8755_v38, %v172_v2 }
  0x96   :  { %v175_v8 = vpop.f32.mrf.mxu0 }
  0x97   :  { %v251_v33 = vmul.f32 0.5, %v185_v23 }
  0x9a   :  { %v211_v35 = vpop.f32.mrf.mxu2 }
  0x9b   :  { %v212_v41 = vadd.f32 %v8755_v38, %v211_v35  ;;  %v176_v35 = vadd.f32 %v8755_v38, %v175_v8 }
  0x9c   :  { %v187_v36 = vpop.f32.mrf.mxu1 }
  0x9d   :  { %v260_v44 = vmul.f32 0.5, %v212_v41  ;;  %v188_v18 = vadd.f32 %v8755_v38, %v187_v36  ;;  %v250_v36 = vmul.f32 0.5, %v182_v25 }
  0x9e   :  { %v178_v21 = vpop.f32.mrf.mxu0 }
  0x9f   :  { %v252_v27 = vmul.f32 0.5, %v188_v18  ;;  %v179_v28 = vadd.f32 %v8755_v38, %v178_v21 }
  0xa2   :  { %v214_v37 = vpop.f32.mrf.mxu2 }
  0xa3   :  { %v215_v40 = vadd.f32 %v8755_v38, %v214_v37 }
  0xa4   :  { %v190_v39 = vpop.f32.mrf.mxu1 }
  0xa5   :  { %v261_v43 = vmul.f32 0.5, %v215_v40  ;;  %v191_v16 = vadd.f32 %v8755_v38, %v190_v39  ;;  %v249_v40 = vmul.f32 0.5, %v179_v28 }
  0xa7   :  { %8455 = vtanh.f32 %v261_v43  ;;  %v253_v24 = vmul.f32 0.5, %v191_v16  ;;  %v347_v16 = vld [vmem:[%s13528_s1] sm:$0xff] }
  0xa8   :  { %8457 = vtanh.f32 %v260_v44 }
  0xaa   :  { %v217_v45 = vpop.f32.mrf.mxu2 }
  0xab   :  { %v218_v46 = vadd.f32 %v8755_v38, %v217_v45  ;;  %v248_v45 = vmul.f32 0.5, %v176_v35 }
  0xac   :  { %v193_v47 = vpop.f32.mrf.mxu1 }
  0xad   :  { %v262_v49 = vmul.f32 0.5, %v218_v46  ;;  %v8456_v51 = vpop.eup %8455  ;;  %v194_v14 = vadd.f32 %v8755_v38, %v193_v47 }
  0xae   :  { %v8458_v52 = vpop.eup %8457  ;;  %v311_v56 = vadd.f32 1.0, %v8456_v51 }
  0xaf   :  { %8459 = vtanh.f32 %v262_v49  ;;  %v310_v59 = vadd.f32 1.0, %v8458_v52  ;;  %v254_v19 = vmul.f32 0.5, %v194_v14 }
  0xb0   :  { %8461 = vtanh.f32 %v259_v48  ;;  %v336_v61 = vmul.f32 0.5, %v311_v56  ;;  %v247_v48 = vmul.f32 0.5, %v173_v34 }
  0xb1   :  { %v335_v0 = vmul.f32 0.5, %v310_v59 }
  0xb2   :  { %v8761_v50 = vpop.f32.mrf.mxu2 }
  0xb4   :  { %v196_v53 = vpop.f32.mrf.mxu1 }
  0xb5   :  { %v8460_v54 = vpop.eup %8459  ;;  %v197_v7 = vadd.f32 %v8755_v38, %v196_v53 }
  0xb6   :  { %v312_v55 = vadd.f32 1.0, %v8460_v54  ;;  %v8462_v57 = vpop.eup %8461 }
  0xb7   :  { %v309_v62 = vadd.f32 1.0, %v8462_v57  ;;  %v255_v12 = vmul.f32 0.5, %v197_v7 }
  0xb8   :  { %v337_v58 = vmul.f32 0.5, %v312_v55 }
  0xb9   :  { %v334_v1 = vmul.f32 0.5, %v309_v62 }
  0xba   :  { %v8763_v60 = vpop.f32.mrf.mxu2  ;;  %1223 = vmatpush.msrb.mxu1 %v337_v58 }
  0xbc   :  { %v199_v63 = vpop.f32.mrf.mxu1  ;;  %1224 = vmatpush.msrb.mxu1 %v336_v61 }
  0xbd   :  { %v200_v6 = vadd.f32 %v8755_v38, %v199_v63 }
  0xbe   :  { %1225 = vmatpush.msrb.mxu1 %v335_v0 }
  0xbf   :  { %v256_v11 = vmul.f32 0.5, %v200_v6 }
  0xc0   :  { %1226 = vmatpush.msrb.mxu1 %v334_v1 }
  0xc2   :  { %v8765_v3 = vpop.f32.mrf.mxu2 }
  0xc4   :  { %v202_v4 = vpop.f32.mrf.mxu1 }
  0xc5   :  { %v203_v5 = vadd.f32 %v8755_v38, %v202_v4 }
  0xc7   :  { %v257_v9 = vmul.f32 0.5, %v203_v5 }
  0xc9   :  { %8463 = vtanh.f32 %v257_v9 }
  0xca   :  { %v8770_v10 = vpop.f32.mrf.mxu2  ;;  %8465 = vtanh.f32 %v256_v11 }
  0xcb   :  { %8467 = vtanh.f32 %v255_v12 }
  0xcc   :  { %v205_v13 = vpop.f32.mrf.mxu1 }
  0xcd   :  { %v206_v15 = vadd.f32 %v8755_v38, %v205_v13 }
  0xcf   :  { %v258_v17 = vmul.f32 0.5, %v206_v15  ;;  %v8464_v22 = vpop.eup %8463 }
  0xd0   :  { %v8466_v26 = vpop.eup %8465  ;;  %v307_v30 = vadd.f32 1.0, %v8464_v22 }
  0xd1   :  { %8469 = vtanh.f32 %v258_v17  ;;  %v8468_v29 = vpop.eup %8467  ;;  %v306_v39 = vadd.f32 1.0, %v8466_v26 }
  0xd2   :  { %v8776_v20 = vpop.f32.mrf.mxu2  ;;  %8471 = vtanh.f32 %v254_v19  ;;  %v332_v42 = vmul.f32 0.5, %v307_v30  ;;  %v305_v43 = vadd.f32 1.0, %v8468_v29  ;;  %v349_v29 = vld [vmem:[%s13528_s1 + $0x10] sm:$0xff] }
  0xd3   :  { %8473 = vtanh.f32 %v253_v24  ;;  %v331_v46 = vmul.f32 0.5, %v306_v39  ;;  %v233_v22 = vadd.f32 %v8755_v38, %v8776_v20  ;;  %v230_v24 = vadd.f32 %v8755_v38, %v8770_v10 }
  0xd4   :  { %8475 = vtanh.f32 %v252_v27  ;;  %v330_v49 = vmul.f32 0.5, %v305_v43  ;;  %v227_v27 = vadd.f32 %v8755_v38, %v8765_v3  ;;  %v224_v20 = vadd.f32 %v8755_v38, %v8763_v60  ;;  %v351_v60 = vld [vmem:[%s13528_s1 + $0x20] sm:$0xff] }
  0xd5   :  { %8477 = vtanh.f32 %v251_v33  ;;  %v267_v28 = vmul.f32 0.5, %v233_v22  ;;  %v266_v30 = vmul.f32 0.5, %v230_v24  ;;  %v221_v10 = vadd.f32 %v8755_v38, %v8761_v50  ;;  %v368_v22 = vld [vmem:[%s13528_s1 + $0xa8] sm:$0xff]  ;;  %v370_v24 = vld [vmem:[%s13528_s1 + $0xb8] sm:$0xff] }
  0xd6   :  { %8479 = vtanh.f32 %v250_v36  ;;  %v265_v33 = vmul.f32 0.5, %v227_v27  ;;  %v264_v36 = vmul.f32 0.5, %v224_v20  ;;  %v372_v27 = vld [vmem:[%s13528_s1 + $0xc8] sm:$0xff]  ;;  %v374_v20 = vld [vmem:[%s13528_s1 + $0xd8] sm:$0xff] }
  0xd7   :  { %v8470_v31 = vpop.eup %8469  ;;  %8481 = vtanh.f32 %v249_v40  ;;  %v263_v40 = vmul.f32 0.5, %v221_v10  ;;  %v376_v10 = vld [vmem:[%s13528_s1 + $0xe8] sm:$0xff] }
  0xd8   :  { %v308_v37 = vadd.f32 1.0, %v8470_v31  ;;  %v8472_v44 = vpop.eup %8471  ;;  %8483 = vtanh.f32 %v248_v45 }
  0xd9   :  { %v8474_v47 = vpop.eup %8473  ;;  %v304_v51 = vadd.f32 1.0, %v8472_v44  ;;  %8485 = vtanh.f32 %v247_v48 }
  0xda   :  { %v235_v32 = vpop.f32.mrf.mxu2  ;;  %v333_v41 = vmul.f32 0.5, %v308_v37  ;;  %v8476_v52 = vpop.eup %8475  ;;  %v303_v53 = vadd.f32 1.0, %v8474_v47 }
  0xdb   :  { %v8478_v54 = vpop.eup %8477  ;;  %v329_v57 = vmul.f32 0.5, %v304_v51  ;;  %v302_v58 = vadd.f32 1.0, %v8476_v52  ;;  %v236_v17 = vadd.f32 %v8755_v38, %v235_v32  ;;  %v353_v52 = vld [vmem:[%s13528_s1 + $0x30] sm:$0xff] }
  0xdc   :  { %1227 = vmatpush.msrb.mxu1 %v333_v41  ;;  %v8480_v55 = vpop.eup %8479  ;;  %v328_v61 = vmul.f32 0.5, %v303_v53  ;;  %v301_v62 = vadd.f32 1.0, %v8478_v54 }
  0xdd   :  { %v8482_v59 = vpop.eup %8481  ;;  %v327_v0 = vmul.f32 0.5, %v302_v58  ;;  %v300_v1 = vadd.f32 1.0, %v8480_v55  ;;  %v268_v25 = vmul.f32 0.5, %v236_v17  ;;  %v364_v17 = vld [vmem:[%s13528_s1 + $0x88] sm:$0xff] }
  0xde   :  { %1228 = vmatpush.msrb.mxu1 %v332_v42  ;;  %v8484_v63 = vpop.eup %8483  ;;  %v299_v2 = vadd.f32 1.0, %v8482_v59  ;;  %v326_v5 = vmul.f32 0.5, %v301_v62  ;;  %v355_v62 = vld [vmem:[%s13528_s1 + $0x40] sm:$0xff] }
  0xdf   :  { %v8486_v4 = vpop.eup %8485  ;;  %v298_v6 = vadd.f32 1.0, %v8484_v63  ;;  %v325_v8 = vmul.f32 0.5, %v300_v1  ;;  %v348_v63 = vld [vmem:[%s13528_s1 + $0x8] sm:$0xff]  ;;  %v350_v1 = vld [vmem:[%s13528_s1 + $0x18] sm:$0xff] }
  0xe0   :  { %1229 = vmatpush.msrb.mxu1 %v331_v46  ;;  %v324_v9 = vmul.f32 0.5, %v299_v2  ;;  %v297_v11 = vadd.f32 1.0, %v8486_v4  ;;  %v359_v2 = vld [vmem:[%s13528_s1 + $0x60] sm:$0xff]  ;;  %v352_v4 = vld [vmem:[%s13528_s1 + $0x28] sm:$0xff] }
  0xe1   :  { %v323_v12 = vmul.f32 0.5, %v298_v6  ;;  %v354_v6 = vld [vmem:[%s13528_s1 + $0x38] sm:$0xff] }
  0xe2   :  { %v238_v56 = vpop.f32.mrf.mxu2  ;;  %1230 = vmatpush.msrb.mxu1 %v330_v49  ;;  %v322_v15 = vmul.f32 0.5, %v297_v11  ;;  %v358_v11 = vld [vmem:[%s13528_s1 + $0x58] sm:$0xff] }
  0xe3   :  { %v239_v14 = vadd.f32 %v8755_v38, %v238_v56 }
  0xe4   :  { %1231 = vmatpush.msrb.mxu1 %v329_v57 }
  0xe5   :  { %v269_v19 = vmul.f32 0.5, %v239_v14  ;;  %v369_v14 = vld [vmem:[%s13528_s1 + $0xb0] sm:$0xff] }
  0xe6   :  { %1232 = vmatpush.msrb.mxu1 %v328_v61 }
  0xe8   :  { %1233 = vmatpush.msrb.mxu1 %v327_v0  ;;  %v357_v0 = vld [vmem:[%s13528_s1 + $0x50] sm:$0xff] }
  0xea   :  { %v241_v7 = vpop.f32.mrf.mxu2  ;;  %1234 = vmatpush.msrb.mxu1 %v326_v5  ;;  %v361_v5 = vld [vmem:[%s13528_s1 + $0x70] sm:$0xff] }
  0xeb   :  { %v242_v13 = vadd.f32 %v8755_v38, %v241_v7  ;;  %v363_v7 = vld [vmem:[%s13528_s1 + $0x80] sm:$0xff] }
  0xec   :  { %1235 = vmatpush.msrb.mxu1 %v325_v8  ;;  %v356_v8 = vld [vmem:[%s13528_s1 + $0x48] sm:$0xff] }
  0xed   :  { %v270_v18 = vmul.f32 0.5, %v242_v13  ;;  %v360_v13 = vld [vmem:[%s13528_s1 + $0x68] sm:$0xff] }
  0xee   :  { %1236 = vmatpush.msrb.mxu1 %v324_v9  ;;  %v365_v9 = vld [vmem:[%s13528_s1 + $0x90] sm:$0xff] }
  0xef   :  { %8487 = vtanh.f32 %v270_v18  ;;  %v373_v18 = vld [vmem:[%s13528_s1 + $0xd0] sm:$0xff] }
  0xf0   :  { %1237 = vmatpush.msrb.mxu1 %v323_v12  ;;  %8489 = vtanh.f32 %v269_v19  ;;  %v367_v12 = vld [vmem:[%s13528_s1 + $0xa0] sm:$0xff]  ;;  %v366_v19 = vld [vmem:[%s13528_s1 + $0x98] sm:$0xff] }
  0xf2   :  { %v244_v21 = vpop.f32.mrf.mxu2  ;;  %1238 = vmatpush.msrb.mxu1 %v322_v15  ;;  %v362_v15 = vld [vmem:[%s13528_s1 + $0x78] sm:$0xff] }
  0xf3   :  { %v245_v23 = vadd.f32 %v8755_v38, %v244_v21  ;;  %1239 = vmatmul.f32.vlgmr.msrb.gmra.mxu1 %v347_v16  ;;  %v371_v16 = vld [vmem:[%s13528_s1 + $0xc0] sm:$0xff] }
  0xf4   :  { %v375_v21 = vld [vmem:[%s13528_s1 + $0xe0] sm:$0xff] }
  0xf5   :  { %v271_v26 = vmul.f32 0.5, %v245_v23  ;;  %v8488_v31 = vpop.eup %8487  ;;  %v377_v23 = vld [vmem:[%s13528_s1 + $0xf0] sm:$0xff] }
  0xf6   :  { %v8490_v35 = vpop.eup %8489  ;;  %v320_v39 = vadd.f32 1.0, %v8488_v31  ;;  %v383_v31 = vld [vmem:[%s13528_s1 + $0x120] sm:$0xff] }
  0xf7   :  { %8491 = vtanh.f32 %v271_v26  ;;  %v319_v41 = vadd.f32 1.0, %v8490_v35  ;;  %v379_v26 = vld [vmem:[%s13528_s1 + $0x100] sm:$0xff]  ;;  %v385_v35 = vld [vmem:[%s13528_s1 + $0x130] sm:$0xff] }
  0xf8   :  { %8493 = vtanh.f32 %v268_v25  ;;  %v345_v38 = vmul.f32 0.5, %v320_v39  ;;  %v380_v39 = vld [vmem:[%s13528_s1 + $0x108] sm:$0xff] }
  0xf9   :  { %8495 = vtanh.f32 %v267_v28  ;;  %v344_v44 = vmul.f32 0.5, %v319_v41  ;;  %v382_v41 = vld [vmem:[%s13528_s1 + $0x118] sm:$0xff] }
  0xfa   :  { %8497 = vtanh.f32 %v266_v30 }
  0xfb   :  { %1242 = vmatmul.f32.gmra.mxu1 %v349_v29  ;;  %8499 = vtanh.f32 %v265_v33  ;;  %v381_v29 = vld [vmem:[%s13528_s1 + $0x110] sm:$0xff] }
  0xfc   :  { %8501 = vtanh.f32 %v264_v36 }
  0xfd   :  { %v8492_v3 = vpop.eup %8491  ;;  %8503 = vtanh.f32 %v263_v40 }
  0xfe   :  { %v321_v37 = vadd.f32 1.0, %v8492_v3  ;;  %v8494_v34 = vpop.eup %8493  ;;  %v378_v3 = vld [vmem:[%s13528_s1 + $0xf8] sm:$0xff] }
  0xff   :  { %v8496_v42 = vpop.eup %8495  ;;  %v318_v50 = vadd.f32 1.0, %v8494_v34 }
 0x100   :  { %v346_v32 = vmul.f32 0.5, %v321_v37  ;;  %v8498_v43 = vpop.eup %8497  ;;  %v317_v45 = vadd.f32 1.0, %v8496_v42  ;;  %v387_v37 = vld [vmem:[%s13528_s1 + $0x140] sm:$0xff]  ;;  %v2312_v42 = vld [vmem:[%s13532_s5 + $0x28] sm:$0xff] }
 0x101   :  { %v8500_v46 = vpop.eup %8499  ;;  %v343_v47 = vmul.f32 0.5, %v318_v50  ;;  %v316_v48 = vadd.f32 1.0, %v8498_v43  ;;  %2417 = vmatpush.msra.mxu1 %v2312_v42  ;;  %8431 = vmatpush.msra.mxu3 %v2312_v42 }
 0x102   :  { %1772 = vmatpush.msrb.mxu2 %v346_v32  ;;  %v8502_v49 = vpop.eup %8501  ;;  %v342_v51 = vmul.f32 0.5, %v317_v45  ;;  %v315_v53 = vadd.f32 1.0, %v8500_v46  ;;  %v384_v45 = vld [vmem:[%s13528_s1 + $0x128] sm:$0xff] }
 0x103   :  { %1245 = vmatmul.f32.gmra.mxu1 %v351_v60  ;;  %v8504_v54 = vpop.eup %8503  ;;  %v341_v55 = vmul.f32 0.5, %v316_v48  ;;  %v314_v56 = vadd.f32 1.0, %v8502_v49  ;;  %v389_v60 = vld [vmem:[%s13528_s1 + $0x150] sm:$0xff] }
 0x104   :  { %1773 = vmatpush.msrb.mxu2 %v345_v38  ;;  %v340_v57 = vmul.f32 0.5, %v315_v53  ;;  %v313_v58 = vadd.f32 1.0, %v8504_v54  ;;  %v393_v49 = vld [vmem:[%s13528_s1 + $0x170] sm:$0xff] }
 0x105   :  { %v339_v59 = vmul.f32 0.5, %v314_v56  ;;  %v388_v56 = vld [vmem:[%s13528_s1 + $0x148] sm:$0xff] }
 0x106   :  { %1774 = vmatpush.msrb.mxu2 %v344_v44  ;;  %v338_v61 = vmul.f32 0.5, %v313_v58  ;;  %v391_v44 = vld [vmem:[%s13528_s1 + $0x160] sm:$0xff] }
 0x108   :  { %1775 = vmatpush.msrb.mxu2 %v343_v47 }
 0x10a   :  { %1776 = vmatpush.msrb.mxu2 %v342_v51  ;;  %v386_v51 = vld [vmem:[%s13528_s1 + $0x138] sm:$0xff] }
 0x10b   :  { %1248 = vmatmul.f32.gmra.mxu1 %v353_v52 }
 0x10c   :  { %1777 = vmatpush.msrb.mxu2 %v341_v55  ;;  %v395_v55 = vld [vmem:[%s13528_s1 + $0x180] sm:$0xff] }
 0x10e   :  { %1778 = vmatpush.msrb.mxu2 %v340_v57  ;;  %v2311_v57 = vld [vmem:[%s13532_s5 + $0x20] sm:$0xff] }
 0x10f   :  { %8432 = vmatpush.msra.mxu3 %v2311_v57  ;;  %2418 = vmatpush.msra.mxu1 %v2311_v57 }
 0x110   :  { %1779 = vmatpush.msrb.mxu2 %v339_v59 }
 0x112   :  { %1780 = vmatpush.msrb.mxu2 %v338_v61  ;;  %v2310_v61 = vld [vmem:[%s13532_s5 + $0x18] sm:$0xff] }
 0x113   :  { %1251 = vmatmul.f32.gmra.mxu1 %v355_v62  ;;  %7685 = vmatmul.msk.f32.vlgmr.msrb.gmra.mxu2 %vm697_vm2, %v348_v63  ;;  %v397_v63 = vld [vmem:[%s13528_s1 + $0x190] sm:$0xff] }
 0x114   :  { %8433 = vmatpush.msra.mxu3 %v2310_v61  ;;  %2419 = vmatpush.msra.mxu1 %v2310_v61  ;;  %v412_v61 = vld [vmem:[%s13528_s1 + $0x208] sm:$0xff] }
 0x11b   :  { %1254 = vmatmul.f32.gmra.mxu1 %v357_v0  ;;  %7686 = vmatmul.msk.f32.gmra.mxu2 %vm697_vm2, %v350_v1  ;;  %v390_v0 = vld [vmem:[%s13528_s1 + $0x158] sm:$0xff] }
 0x123   :  { %1257 = vmatmul.f32.gmra.mxu1 %v359_v2  ;;  %7687 = vmatmul.msk.f32.gmra.mxu2 %vm697_vm2, %v352_v4 }
 0x12b   :  { %1260 = vmatmul.f32.gmra.mxu1 %v361_v5  ;;  %7688 = vmatmul.msk.f32.gmra.mxu2 %vm697_vm2, %v354_v6  ;;  %v399_v5 = vld [vmem:[%s13528_s1 + $0x1a0] sm:$0xff]  ;;  %v392_v6 = vld [vmem:[%s13528_s1 + $0x168] sm:$0xff] }
 0x133   :  { %1263 = vmatmul.f32.gmra.mxu1 %v363_v7  ;;  %7689 = vmatmul.msk.f32.gmra.mxu2 %vm697_vm2, %v356_v8 }
 0x13b   :  { %1266 = vmatmul.f32.gmra.mxu1 %v365_v9  ;;  %7690 = vmatmul.msk.f32.gmra.mxu2 %vm697_vm2, %v358_v11  ;;  %v401_v11 = vld [vmem:[%s13528_s1 + $0x1b0] sm:$0xff] }
 0x143   :  { %1269 = vmatmul.f32.gmra.mxu1 %v367_v12  ;;  %7691 = vmatmul.msk.f32.gmra.mxu2 %vm697_vm2, %v360_v13  ;;  %v394_v12 = vld [vmem:[%s13528_s1 + $0x178] sm:$0xff] }
 0x14b   :  { %1272 = vmatmul.f32.gmra.mxu1 %v369_v14  ;;  %7692 = vmatmul.msk.f32.gmra.mxu2 %vm697_vm2, %v362_v15 }
 0x153   :  { %1275 = vmatmul.f32.gmra.mxu1 %v371_v16  ;;  %7693 = vmatmul.msk.f32.gmra.mxu2 %vm697_vm2, %v364_v17  ;;  %v403_v16 = vld [vmem:[%s13528_s1 + $0x1c0] sm:$0xff]  ;;  %v396_v17 = vld [vmem:[%s13528_s1 + $0x188] sm:$0xff] }
 0x15b   :  { %1278 = vmatmul.f32.gmra.mxu1 %v373_v18  ;;  %7694 = vmatmul.msk.f32.gmra.mxu2 %vm697_vm2, %v366_v19 }
 0x163   :  { %1281 = vmatmul.f32.gmra.mxu1 %v375_v21  ;;  %7695 = vmatmul.msk.f32.gmra.mxu2 %vm697_vm2, %v368_v22  ;;  %v405_v22 = vld [vmem:[%s13528_s1 + $0x1d0] sm:$0xff] }
 0x16b   :  { %1284 = vmatmul.f32.gmra.mxu1 %v377_v23  ;;  %7696 = vmatmul.msk.f32.gmra.mxu2 %vm697_vm2, %v370_v24  ;;  %v398_v23 = vld [vmem:[%s13528_s1 + $0x198] sm:$0xff] }
 0x170   :  { %v1240_v25 = vpop.f32.mrf.mxu1 }
 0x173   :  { %1287 = vmatmul.f32.gmra.mxu1 %v379_v26  ;;  %7697 = vmatmul.msk.f32.gmra.mxu2 %vm697_vm2, %v372_v27  ;;  %v407_v27 = vld [vmem:[%s13528_s1 + $0x1e0] sm:$0xff] }
 0x178   :  { %v1243_v28 = vpop.f32.mrf.mxu1 }
 0x17b   :  { %1290 = vmatmul.f32.gmra.mxu1 %v381_v29  ;;  %7698 = vmatmul.msk.f32.gmra.mxu2 %vm697_vm2, %v374_v20  ;;  %v2309_v29 = vld [vmem:[%s13532_s5 + $0x10] sm:$0xff]  ;;  %v2308_v20 = vld [vmem:[%s13532_s5 + $0x8] sm:$0xff] }
 0x17c   :  { %2476 = vmatpush.msrb.mxu3 %v2309_v29  ;;  %v426_v29 = vld [vmem:[%s13528_s1 + $0x278] sm:$0xff] }
 0x17e   :  { %2477 = vmatpush.msrb.mxu3 %v2308_v20 }
 0x180   :  { %v1246_v30 = vpop.f32.mrf.mxu1 }
 0x183   :  { %1293 = vmatmul.f32.gmra.mxu1 %v383_v31  ;;  %7699 = vmatmul.msk.f32.gmra.mxu2 %vm697_vm2, %v376_v10  ;;  %v2307_v10 = vld [vmem:[%s13532_s5] sm:$0xff] }
 0x184   :  { %2478 = vmatpush.msrb.mxu3 %v2307_v10  ;;  %v435_v10 = vld [vmem:[%s13528_s1 + $0x2c0] sm:$0xff] }
 0x188   :  { %v1249_v33 = vpop.f32.mrf.mxu1 }
 0x18b   :  { %1296 = vmatmul.f32.gmra.mxu1 %v385_v35  ;;  %7700 = vmatmul.msk.f32.gmra.mxu2 %vm697_vm2, %v378_v3  ;;  %v409_v35 = vld [vmem:[%s13528_s1 + $0x1f0] sm:$0xff]  ;;  %v402_v3 = vld [vmem:[%s13528_s1 + $0x1b8] sm:$0xff] }
 0x190   :  { %v1252_v36 = vpop.f32.mrf.mxu1 }
 0x193   :  { %1299 = vmatmul.f32.gmra.mxu1 %v387_v37  ;;  %7701 = vmatmul.msk.f32.gmra.mxu2 %vm697_vm2, %v380_v39 }
 0x196   :  { %v1782_v34 = vpop.f32.mrf.mxu2 }
 0x197   :  { %v8930_v40 = vadd.f32 %v1782_v34, %v1240_v25  ;;  %v411_v34 = vld [vmem:[%s13528_s1 + $0x200] sm:$0xff] }
 0x198   :  { %v1255_v32 = vpop.f32.mrf.mxu1 }
 0x19b   :  { %1302 = vmatmul.f32.gmra.mxu1 %v389_v60  ;;  %7702 = vmatmul.msk.f32.gmra.mxu2 %vm697_vm2, %v382_v41 }
 0x19e   :  { %v1785_v38 = vpop.f32.mrf.mxu2 }
 0x19f   :  { %v8942_v50 = vadd.f32 %v1785_v38, %v1243_v28  ;;  %v400_v28 = vld [vmem:[%s13528_s1 + $0x1a8] sm:$0xff]  ;;  %v413_v38 = vld [vmem:[%s13528_s1 + $0x210] sm:$0xff] }
 0x1a0   :  { %v1258_v43 = vpop.f32.mrf.mxu1 }
 0x1a3   :  { %1305 = vmatmul.f32.gmra.mxu1 %v391_v44  ;;  %7703 = vmatmul.msk.f32.gmra.mxu2 %vm697_vm2, %v384_v45 }
 0x1a6   :  { %v1788_v46 = vpop.f32.mrf.mxu2 }
 0x1a7   :  { %v8951_v47 = vadd.f32 %v1788_v46, %v1246_v30 }
 0x1a8   :  { %v1261_v48 = vpop.f32.mrf.mxu1 }
 0x1ab   :  { %1308 = vmatmul.f32.gmra.mxu1 %v393_v49  ;;  %7704 = vmatmul.msk.f32.gmra.mxu2 %vm697_vm2, %v386_v51  ;;  %v408_v49 = vld [vmem:[%s13528_s1 + $0x1e8] sm:$0xff] }
 0x1ae   :  { %v1791_v52 = vpop.f32.mrf.mxu2 }
 0x1af   :  { %v8960_v53 = vadd.f32 %v1791_v52, %v1249_v33 }
 0x1b0   :  { %v1264_v54 = vpop.f32.mrf.mxu1 }
 0x1b3   :  { %1311 = vmatmul.f32.gmra.mxu1 %v395_v55  ;;  %7705 = vmatmul.msk.f32.gmra.mxu2 %vm697_vm2, %v388_v56  ;;  %v410_v55 = vld [vmem:[%s13528_s1 + $0x1f8] sm:$0xff] }
 0x1b6   :  { %v1794_v58 = vpop.f32.mrf.mxu2 }
 0x1b7   :  { %v8972_v59 = vadd.f32 %v1794_v58, %v1252_v36  ;;  %v419_v58 = vld [vmem:[%s13528_s1 + $0x240] sm:$0xff] }
 0x1b8   :  { %v1267_v62 = vpop.f32.mrf.mxu1 }
 0x1bb   :  { %1314 = vmatmul.f32.gmra.mxu1 %v397_v63  ;;  %7706 = vmatmul.msk.f32.gmra.mxu2 %vm697_vm2, %v390_v0  ;;  %v421_v63 = vld [vmem:[%s13528_s1 + $0x250] sm:$0xff]  ;;  %v414_v0 = vld [vmem:[%s13528_s1 + $0x218] sm:$0xff] }
 0x1be   :  { %v1797_v1 = vpop.f32.mrf.mxu2 }
 0x1bf   :  { %v8984_v2 = vadd.f32 %v1797_v1, %v1255_v32  ;;  %v404_v32 = vld [vmem:[%s13528_s1 + $0x1c8] sm:$0xff]  ;;  %v2314_v1 = vld [vmem:[%s13532_s5 + $0x38] sm:$0xff] }
 0x1c0   :  { %v1270_v4 = vpop.f32.mrf.mxu1 }
 0x1c3   :  { %1317 = vmatmul.f32.gmra.mxu1 %v399_v5  ;;  %7707 = vmatmul.msk.f32.gmra.mxu2 %vm697_vm2, %v392_v6  ;;  %v2313_v5 = vld [vmem:[%s13532_s5 + $0x30] sm:$0xff]  ;;  %v423_v6 = vld [vmem:[%s13528_s1 + $0x260] sm:$0xff] }
 0x1c6   :  { %v1800_v7 = vpop.f32.mrf.mxu2 }
 0x1c7   :  { %v8993_v8 = vadd.f32 %v1800_v7, %v1258_v43  ;;  %v406_v43 = vld [vmem:[%s13528_s1 + $0x1d8] sm:$0xff]  ;;  %v416_v7 = vld [vmem:[%s13528_s1 + $0x228] sm:$0xff] }
 0x1c8   :  { %v1273_v9 = vpop.f32.mrf.mxu1 }
 0x1cb   :  { %1320 = vmatmul.f32.gmra.mxu1 %v401_v11  ;;  %7708 = vmatmul.msk.f32.gmra.mxu2 %vm697_vm2, %v394_v12  ;;  %v425_v12 = vld [vmem:[%s13528_s1 + $0x270] sm:$0xff] }
 0x1ce   :  { %v1803_v13 = vpop.f32.mrf.mxu2 }
 0x1cf   :  { %v9002_v14 = vadd.f32 %v1803_v13, %v1261_v48  ;;  %v415_v48 = vld [vmem:[%s13528_s1 + $0x220] sm:$0xff]  ;;  %v418_v13 = vld [vmem:[%s13528_s1 + $0x238] sm:$0xff] }
 0x1d0   :  { %v1276_v15 = vpop.f32.mrf.mxu1 }
 0x1d3   :  { %1323 = vmatmul.f32.gmra.mxu1 %v403_v16  ;;  %7709 = vmatmul.msk.f32.gmra.mxu2 %vm697_vm2, %v396_v17  ;;  %v427_v16 = vld [vmem:[%s13528_s1 + $0x280] sm:$0xff]  ;;  %v420_v17 = vld [vmem:[%s13528_s1 + $0x248] sm:$0xff] }
 0x1d6   :  { %v1806_v18 = vpop.f32.mrf.mxu2 }
 0x1d7   :  { %v1807_v19 = vadd.f32 %v1806_v18, %v1264_v54  ;;  %v417_v54 = vld [vmem:[%s13528_s1 + $0x230] sm:$0xff] }
 0x1d8   :  { %v1279_v21 = vpop.f32.mrf.mxu1 }
 0x1d9   :  { %7861 = vmatmul.msk.f32.vlgmr.msra.gmra.mxu3 %vm2382_vm3, %v1807_v19  ;;  %v429_v19 = vld [vmem:[%s13528_s1 + $0x290] sm:$0xff] }
 0x1db   :  { %1326 = vmatmul.f32.gmra.mxu1 %v405_v22  ;;  %7710 = vmatmul.msk.f32.gmra.mxu2 %vm697_vm2, %v398_v23 }
 0x1de   :  { %v1809_v24 = vpop.f32.mrf.mxu2 }
 0x1df   :  { %v1810_v25 = vadd.f32 %v1809_v24, %v1267_v62  ;;  %v431_v24 = vld [vmem:[%s13528_s1 + $0x2a0] sm:$0xff] }
 0x1e0   :  { %v9019_v26 = vpop.f32.mrf.mxu1 }
 0x1e1   :  { %7862 = vmatmul.msk.f32.gmra.mxu3 %vm2382_vm3, %v1810_v25  ;;  %v424_v25 = vld [vmem:[%s13528_s1 + $0x268] sm:$0xff] }
 0x1e3   :  { %1329 = vmatmul.f32.gmra.mxu1 %v407_v27  ;;  %7711 = vmatmul.msk.f32.gmra.mxu2 %vm697_vm2, %v400_v28  ;;  %v433_v28 = vld [vmem:[%s13528_s1 + $0x2b0] sm:$0xff] }
 0x1e6   :  { %v1812_v30 = vpop.f32.mrf.mxu2 }
 0x1e7   :  { %v1813_v31 = vadd.f32 %v1812_v30, %v1270_v4 }
 0x1e8   :  { %v9038_v33 = vpop.f32.mrf.mxu1 }
 0x1e9   :  { %7863 = vmatmul.msk.f32.gmra.mxu3 %vm2382_vm3, %v1813_v31 }
 0x1eb   :  { %1332 = vmatmul.f32.gmra.mxu1 %v409_v35  ;;  %7712 = vmatmul.msk.f32.gmra.mxu2 %vm697_vm2, %v402_v3  ;;  %v2318_v35 = vld [vmem:[%s13532_s5 + $0x58] sm:$0xff]  ;;  %v2321_v3 = vld [vmem:[%s13532_s5 + $0x70] sm:$0xff] }
 0x1ec   :  { %2667 = vmatpush.msrb.mxu0 %v2321_v3  ;;  %8434 = vmatpush.msrb.mxu1 %v2321_v3 }
 0x1ee   :  { %v1815_v36 = vpop.f32.mrf.mxu2 }
 0x1ef   :  { %v1816_v37 = vadd.f32 %v1815_v36, %v1273_v9  ;;  %v2317_v36 = vld [vmem:[%s13532_s5 + $0x50] sm:$0xff] }
 0x1f0   :  { %v9048_v39 = vpop.f32.mrf.mxu1 }
 0x1f1   :  { %7864 = vmatmul.msk.f32.gmra.mxu3 %vm2382_vm3, %v1816_v37  ;;  %v2320_v37 = vld [vmem:[%s13532_s5 + $0x68] sm:$0xff] }
 0x1f2   :  { %2668 = vmatpush.msrb.mxu0 %v2320_v37  ;;  %8435 = vmatpush.msrb.mxu1 %v2320_v37 }
 0x1f3   :  { %1335 = vmatmul.f32.gmra.mxu1 %v411_v34  ;;  %7713 = vmatmul.msk.f32.gmra.mxu2 %vm697_vm2, %v404_v32  ;;  %v2316_v32 = vld [vmem:[%s13532_s5 + $0x48] sm:$0xff] }
 0x1f6   :  { %v1818_v60 = vpop.f32.mrf.mxu2 }
 0x1f7   :  { %v1819_v41 = vadd.f32 %v1818_v60, %v1276_v15  ;;  %v2319_v60 = vld [vmem:[%s13532_s5 + $0x60] sm:$0xff] }
 0x1f8   :  { %v9058_v42 = vpop.f32.mrf.mxu1  ;;  %2669 = vmatpush.msrb.mxu0 %v2319_v60  ;;  %8436 = vmatpush.msrb.mxu1 %v2319_v60  ;;  %v446_v60 = vld [vmem:[%s13528_s1 + $0x318] sm:$0xff] }
 0x1f9   :  { %7865 = vmatmul.msk.f32.gmra.mxu3 %vm2382_vm3, %v1819_v41 }
 0x1fb   :  { %1338 = vmatmul.f32.gmra.mxu1 %v413_v38  ;;  %7714 = vmatmul.msk.f32.gmra.mxu2 %vm697_vm2, %v406_v43  ;;  %v437_v38 = vld [vmem:[%s13528_s1 + $0x2d0] sm:$0xff]  ;;  %v430_v43 = vld [vmem:[%s13528_s1 + $0x298] sm:$0xff] }
 0x1fe   :  { %v1821_v44 = vpop.f32.mrf.mxu2 }
 0x1ff   :  { %v1822_v45 = vadd.f32 %v1821_v44, %v1279_v21  ;;  %v422_v21 = vld [vmem:[%s13528_s1 + $0x258] sm:$0xff] }
 0x200   :  { %v9068_v46 = vpop.f32.mrf.mxu1 }
 0x201   :  { %7866 = vmatmul.msk.f32.gmra.mxu3 %vm2382_vm3, %v1822_v45 }
 0x203   :  { %1341 = vmatmul.f32.gmra.mxu1 %v415_v48  ;;  %7715 = vmatmul.msk.f32.gmra.mxu2 %vm697_vm2, %v408_v49  ;;  %v439_v49 = vld [vmem:[%s13528_s1 + $0x2e0] sm:$0xff] }
 0x206   :  { %v1824_v51 = vpop.f32.mrf.mxu2 }
 0x207   :  { %v1825_v22 = vadd.f32 %v1824_v51, %v9019_v26  ;;  %v432_v51 = vld [vmem:[%s13528_s1 + $0x2a8] sm:$0xff] }
 0x208   :  { %v9078_v52 = vpop.f32.mrf.mxu1 }
 0x209   :  { %7867 = vmatmul.msk.f32.vlgmr.msrb.gmra.mxu3 %vm2382_vm3, %v8930_v40 }
 0x20b   :  { %1344 = vmatmul.f32.gmra.mxu1 %v417_v54  ;;  %7716 = vmatmul.msk.f32.gmra.mxu2 %vm697_vm2, %v410_v55 }
 0x20e   :  { %v1827_v56 = vpop.f32.mrf.mxu2 }
 0x20f   :  { %v1828_v27 = vadd.f32 %v1827_v56, %v9038_v33  ;;  %v428_v33 = vld [vmem:[%s13528_s1 + $0x288] sm:$0xff] }
 0x210   :  { %v9089_v57 = vpop.f32.mrf.mxu1 }
 0x211   :  { %7868 = vmatmul.msk.f32.gmra.mxu3 %vm2382_vm3, %v8942_v50  ;;  %v2315_v50 = vld [vmem:[%s13532_s5 + $0x40] sm:$0xff] }
 0x212   :  { %2535 = vmatpush.msra.mxu3 %v2315_v50  ;;  %v443_v50 = vld [vmem:[%s13528_s1 + $0x300] sm:$0xff] }
 0x213   :  { %1347 = vmatmul.f32.gmra.mxu1 %v419_v58  ;;  %7717 = vmatmul.msk.f32.gmra.mxu2 %vm697_vm2, %v412_v61  ;;  %v441_v58 = vld [vmem:[%s13528_s1 + $0x2f0] sm:$0xff]  ;;  %v434_v61 = vld [vmem:[%s13528_s1 + $0x2b8] sm:$0xff] }
 0x214   :  { %2536 = vmatpush.msra.mxu3 %v2314_v1  ;;  %v436_v1 = vld [vmem:[%s13528_s1 + $0x2c8] sm:$0xff] }
 0x216   :  { %v1830_v40 = vpop.f32.mrf.mxu2  ;;  %2537 = vmatpush.msra.mxu3 %v2313_v5 }
 0x217   :  { %v1831_v30 = vadd.f32 %v1830_v40, %v9048_v39 }
 0x218   :  { %v9100_v62 = vpop.f32.mrf.mxu1  ;;  %2601 = vmatpush.msrb.mxu3 %v2318_v35  ;;  %v444_v35 = vld [vmem:[%s13528_s1 + $0x308] sm:$0xff] }
 0x219   :  { %7869 = vmatmul.msk.f32.gmra.mxu3 %vm2382_vm3, %v8951_v47 }
 0x21a   :  { %2602 = vmatpush.msrb.mxu3 %v2317_v36 }
 0x21b   :  { %1350 = vmatmul.f32.gmra.mxu1 %v421_v63  ;;  %7718 = vmatmul.msk.f32.gmra.mxu2 %vm697_vm2, %v414_v0 }
 0x21c   :  { %2603 = vmatpush.msrb.mxu3 %v2316_v32  ;;  %v453_v32 = vld [vmem:[%s13528_s1 + $0x350] sm:$0xff] }
 0x21e   :  { %v9117_v4 = vpop.f32.mrf.mxu2 }
 0x21f   :  { %v1834_v34 = vadd.f32 %v9117_v4, %v9058_v42 }
 0x220   :  { %v9122_v47 = vpop.f32.mrf.mxu1 }
 0x221   :  { %7870 = vmatmul.msk.f32.gmra.mxu3 %vm2382_vm3, %v8960_v53 }
 0x223   :  { %1353 = vmatmul.f32.gmra.mxu1 %v423_v6  ;;  %7719 = vmatmul.msk.f32.gmra.mxu2 %vm697_vm2, %v416_v7 }
 0x226   :  { %v9133_v9 = vpop.f32.mrf.mxu2 }
 0x227   :  { %v1837_v45 = vadd.f32 %v9133_v9, %v9068_v46  ;;  %v445_v9 = vld [vmem:[%s13528_s1 + $0x310] sm:$0xff] }
 0x228   :  { %v9135_v11 = vpop.f32.mrf.mxu1 }
 0x229   :  { %7871 = vmatmul.msk.f32.gmra.mxu3 %vm2382_vm3, %v8972_v59 }
 0x22b   :  { %1356 = vmatmul.f32.gmra.mxu1 %v425_v12  ;;  %7720 = vmatmul.msk.f32.gmra.mxu2 %vm697_vm2, %v418_v13  ;;  %v438_v12 = vld [vmem:[%s13528_s1 + $0x2d8] sm:$0xff] }
 0x22e   :  { %v9146_v53 = vpop.f32.mrf.mxu2 }
 0x22f   :  { %v1840_v46 = vadd.f32 %v9146_v53, %v9078_v52 }
 0x230   :  { %v9148_v15 = vpop.f32.mrf.mxu1 }
 0x231   :  { %7872 = vmatmul.msk.f32.gmra.mxu3 %vm2382_vm3, %v8984_v2 }
 0x233   :  { %1359 = vmatmul.f32.gmra.mxu1 %v427_v16  ;;  %7721 = vmatmul.msk.f32.gmra.mxu2 %vm697_vm2, %v420_v17 }
 0x236   :  { %v9159_v59 = vpop.f32.mrf.mxu2 }
 0x237   :  { %v1843_v52 = vadd.f32 %v9159_v59, %v9089_v57  ;;  %v447_v59 = vld [vmem:[%s13528_s1 + $0x320] sm:$0xff] }
 0x238   :  { %v9161_v18 = vpop.f32.mrf.mxu1 }
 0x239   :  { %7873 = vmatmul.msk.f32.gmra.mxu3 %vm2382_vm3, %v8993_v8 }
 0x23b   :  { %1362 = vmatmul.f32.gmra.mxu1 %v429_v19  ;;  %7722 = vmatmul.msk.f32.gmra.mxu2 %vm697_vm2, %v422_v21  ;;  %v440_v19 = vld [vmem:[%s13528_s1 + $0x2e8] sm:$0xff] }
 0x23e   :  { %v9172_v2 = vpop.f32.mrf.mxu2 }
 0x23f   :  { %v1846_v57 = vadd.f32 %v9172_v2, %v9100_v62 }
 0x240   :  { %v9175_v23 = vpop.f32.mrf.mxu1 }
 0x241   :  { %7874 = vmatmul.msk.f32.vlgmr.msra.gmra.mxu3 %vm2382_vm3, %v1825_v22 }
 0x243   :  { %1365 = vmatmul.f32.gmra.mxu1 %v431_v24  ;;  %7723 = vmatmul.msk.f32.gmra.mxu2 %vm697_vm2, %v424_v25  ;;  %v449_v25 = vld [vmem:[%s13528_s1 + $0x330] sm:$0xff] }
 0x246   :  { %v9185_v8 = vpop.f32.mrf.mxu2 }
 0x247   :  { %v1849_v53 = vadd.f32 %v9185_v8, %v9122_v47  ;;  %v442_v8 = vld [vmem:[%s13528_s1 + $0x2f8] sm:$0xff] }
 0x248   :  { %v9188_v26 = vpop.f32.mrf.mxu1 }
 0x249   :  { %7875 = vmatmul.msk.f32.gmra.mxu3 %vm2382_vm3, %v1828_v27 }
 0x24b   :  { %1368 = vmatmul.f32.gmra.mxu1 %v433_v28  ;;  %7724 = vmatmul.msk.f32.gmra.mxu2 %vm697_vm2, %v426_v29  ;;  %v2323_v28 = vld [vmem:[%s13532_s5 + $0x80] sm:$0xff] }
 0x24e   :  { %v9198_v20 = vpop.f32.mrf.mxu2 }
 0x24f   :  { %v1852_v2 = vadd.f32 %v9198_v20, %v9135_v11  ;;  %v2324_v11 = vld [vmem:[%s13532_s5 + $0x88] sm:$0xff] }
 0x250   :  { %v1324_v31 = vpop.f32.mrf.mxu1  ;;  %2733 = vmatpush.msra.mxu3 %v2324_v11  ;;  %v467_v11 = vld [vmem:[%s13528_s1 + $0x3c0] sm:$0xff] }
 0x251   :  { %7876 = vmatmul.msk.f32.gmra.mxu3 %vm2382_vm3, %v1831_v30 }
 0x252   :  { %2734 = vmatpush.msra.mxu3 %v2323_v28  ;;  %v460_v28 = vld [vmem:[%s13528_s1 + $0x388] sm:$0xff] }
 0x253   :  { %1371 = vmatmul.f32.gmra.mxu1 %v435_v10  ;;  %7725 = vmatmul.msk.f32.gmra.mxu2 %vm697_vm2, %v428_v33  ;;  %v451_v33 = vld [vmem:[%s13528_s1 + $0x340] sm:$0xff] }
 0x256   :  { %v9221_v39 = vpop.f32.mrf.mxu2 }
 0x257   :  { %v1855_v20 = vadd.f32 %v9221_v39, %v9148_v15 }
 0x258   :  { %v1327_v41 = vpop.f32.mrf.mxu1 }
 0x259   :  { %7877 = vmatmul.msk.f32.gmra.mxu3 %vm2382_vm3, %v1834_v34 }
 0x25b   :  { %1374 = vmatmul.f32.gmra.mxu1 %v437_v38  ;;  %7726 = vmatmul.msk.f32.gmra.mxu2 %vm697_vm2, %v430_v43 }
 0x25c   :  { %v9239_v42 = vpop.f32.mrf.mxu3 }
 0x25e   :  { %v9241_v44 = vpop.f32.mrf.mxu2 }
 0x25f   :  { %v1858_v37 = vadd.f32 %v9241_v44, %v9161_v18 }
 0x260   :  { %v1330_v48 = vpop.f32.mrf.mxu1 }
 0x261   :  { %7878 = vmatmul.msk.f32.gmra.mxu3 %vm2382_vm3, %v1837_v45  ;;  %v455_v45 = vld [vmem:[%s13528_s1 + $0x360] sm:$0xff] }
 0x263   :  { %1377 = vmatmul.f32.gmra.mxu1 %v439_v49  ;;  %7727 = vmatmul.msk.f32.gmra.mxu2 %vm697_vm2, %v432_v51 }
 0x264   :  { %v9253_v54 = vpop.f32.mrf.mxu3 }
 0x266   :  { %v9255_v55 = vpop.f32.mrf.mxu2 }
 0x267   :  { %v1861_v43 = vadd.f32 %v9255_v55, %v9175_v23 }
 0x268   :  { %v1333_v56 = vpop.f32.mrf.mxu1 }
 0x269   :  { %7879 = vmatmul.msk.f32.gmra.mxu3 %vm2382_vm3, %v1840_v46 }
 0x26b   :  { %1380 = vmatmul.f32.gmra.mxu1 %v441_v58  ;;  %7728 = vmatmul.msk.f32.gmra.mxu2 %vm697_vm2, %v434_v61  ;;  %v450_v58 = vld [vmem:[%s13528_s1 + $0x338] sm:$0xff] }
 0x26c   :  { %v9267_v40 = vpop.f32.mrf.mxu3 }
 0x26e   :  { %v9269_v63 = vpop.f32.mrf.mxu2 }
 0x270   :  { %v1336_v0 = vpop.f32.mrf.mxu1 }
 0x271   :  { %7880 = vmatmul.msk.f32.gmra.mxu3 %vm2382_vm3, %v1843_v52  ;;  %v452_v52 = vld [vmem:[%s13528_s1 + $0x348] sm:$0xff] }
 0x273   :  { %1383 = vmatmul.f32.gmra.mxu1 %v443_v50  ;;  %7729 = vmatmul.msk.f32.gmra.mxu2 %vm697_vm2, %v436_v1 }
 0x274   :  { %v9281_v4 = vpop.f32.mrf.mxu3 }
 0x276   :  { %v1866_v5 = vpop.f32.mrf.mxu2 }
 0x277   :  { %v1867_v6 = vadd.f32 %v1866_v5, %v1324_v31  ;;  %v2322_v31 = vld [vmem:[%s13532_s5 + $0x78] sm:$0xff]  ;;  %v461_v5 = vld [vmem:[%s13528_s1 + $0x390] sm:$0xff] }
 0x278   :  { %v1339_v7 = vpop.f32.mrf.mxu1  ;;  %2735 = vmatpush.msra.mxu3 %v2322_v31  ;;  %v469_v31 = vld [vmem:[%s13528_s1 + $0x3d0] sm:$0xff] }
 0x279   :  { %7881 = vmatmul.msk.f32.vlgmr.msrb.gmra.mxu3 %vm2382_vm3, %v1846_v57  ;;  %7888 = vmatmul.msk.f32.vlgmr.msrb.gmra.mxu0 %vm2382_vm3, %v1867_v6  ;;  %v454_v57 = vld [vmem:[%s13528_s1 + $0x358] sm:$0xff] }
 0x27b   :  { %1386 = vmatmul.f32.gmra.mxu1 %v445_v9  ;;  %7730 = vmatmul.msk.f32.gmra.mxu2 %vm697_vm2, %v438_v12  ;;  %v463_v12 = vld [vmem:[%s13528_s1 + $0x3a0] sm:$0xff] }
 0x27c   :  { %v9294_v13 = vpop.f32.mrf.mxu3 }
 0x27e   :  { %v1869_v62 = vpop.f32.mrf.mxu2 }
 0x27f   :  { %v1870_v16 = vadd.f32 %v1869_v62, %v1327_v41  ;;  %v456_v62 = vld [vmem:[%s13528_s1 + $0x368] sm:$0xff] }
 0x280   :  { %v9298_v17 = vpop.f32.mrf.mxu1 }
 0x281   :  { %7882 = vmatmul.msk.f32.gmra.mxu3 %vm2382_vm3, %v1849_v53  ;;  %7889 = vmatmul.msk.f32.gmra.mxu0 %vm2382_vm3, %v1870_v16  ;;  %v2327_v53 = vld [vmem:[%s13532_s5 + $0xa0] sm:$0xff]  ;;  %v2326_v16 = vld [vmem:[%s13532_s5 + $0x98] sm:$0xff] }
 0x282   :  { %2799 = vmatpush.msra.mxu0 %v2327_v53  ;;  %v476_v53 = vld [vmem:[%s13528_s1 + $0x408] sm:$0xff] }
 0x283   :  { %1389 = vmatmul.f32.gmra.mxu1 %v447_v59  ;;  %7731 = vmatmul.msk.f32.gmra.mxu2 %vm697_vm2, %v440_v19  ;;  %v2325_v19 = vld [vmem:[%s13532_s5 + $0x90] sm:$0xff] }
 0x284   :  { %v9309_v21 = vpop.f32.mrf.mxu3  ;;  %2800 = vmatpush.msra.mxu0 %v2326_v16 }
 0x286   :  { %v1872_v47 = vpop.f32.mrf.mxu2  ;;  %2801 = vmatpush.msra.mxu0 %v2325_v19 }
 0x287   :  { %v1873_v22 = vadd.f32 %v1872_v47, %v1330_v48  ;;  %v448_v48 = vld [vmem:[%s13528_s1 + $0x328] sm:$0xff] }
 0x288   :  { %v1345_v24 = vpop.f32.mrf.mxu1 }
 0x289   :  { %7883 = vmatmul.msk.f32.gmra.mxu3 %vm2382_vm3, %v1852_v2  ;;  %7890 = vmatmul.msk.f32.gmra.mxu0 %vm2382_vm3, %v1873_v22  ;;  %v465_v2 = vld [vmem:[%s13528_s1 + $0x3b0] sm:$0xff]  ;;  %v458_v22 = vld [vmem:[%s13528_s1 + $0x378] sm:$0xff] }
 0x28b   :  { %1392 = vmatmul.f32.gmra.mxu1 %v449_v25  ;;  %7732 = vmatmul.msk.f32.gmra.mxu2 %vm697_vm2, %v442_v8 }
 0x28c   :  { %v9325_v27 = vpop.f32.mrf.mxu3 }
 0x28e   :  { %v1875_v29 = vpop.f32.mrf.mxu2 }
 0x28f   :  { %v1876_v30 = vadd.f32 %v1875_v29, %v1333_v56  ;;  %v457_v56 = vld [vmem:[%s13528_s1 + $0x370] sm:$0xff] }
 0x290   :  { %v1348_v10 = vpop.f32.mrf.mxu1 }
 0x291   :  { %7884 = vmatmul.msk.f32.gmra.mxu3 %vm2382_vm3, %v1855_v20  ;;  %7891 = vmatmul.msk.f32.gmra.mxu0 %vm2382_vm3, %v1876_v30 }
 0x293   :  { %1395 = vmatmul.f32.gmra.mxu1 %v451_v33  ;;  %7733 = vmatmul.msk.f32.gmra.mxu2 %vm697_vm2, %v444_v35 }
 0x294   :  { %v2483_v15 = vpop.f32.mrf.mxu3 }
 0x295   :  { %v9345_v3 = vadd.f32 %v2483_v15, %v9239_v42 }
 0x296   :  { %v1878_v36 = vpop.f32.mrf.mxu2 }
 0x297   :  { %v1879_v39 = vadd.f32 %v1878_v36, %v1336_v0  ;;  %v471_v36 = vld [vmem:[%s13528_s1 + $0x3e0] sm:$0xff] }
 0x298   :  { %v1351_v34 = vpop.f32.mrf.mxu1 }
 0x299   :  { %7885 = vmatmul.msk.f32.gmra.mxu3 %vm2382_vm3, %v1858_v37  ;;  %7892 = vmatmul.msk.f32.gmra.mxu0 %vm2382_vm3, %v1879_v39  ;;  %v464_v37 = vld [vmem:[%s13528_s1 + $0x3a8] sm:$0xff] }
 0x29b   :  { %1398 = vmatmul.f32.gmra.mxu1 %v453_v32  ;;  %7734 = vmatmul.msk.f32.gmra.mxu2 %vm697_vm2, %v446_v60  ;;  %v473_v60 = vld [vmem:[%s13528_s1 + $0x3f0] sm:$0xff] }
 0x29c   :  { %v2486_v41 = vpop.f32.mrf.mxu3 }
 0x29d   :  { %v9359_v18 = vadd.f32 %v2486_v41, %v9253_v54  ;;  %v1864_v54 = vadd.f32 %v9269_v63, %v9188_v26  ;;  %v459_v63 = vld [vmem:[%s13528_s1 + $0x380] sm:$0xff]  ;;  %v466_v41 = vld [vmem:[%s13528_s1 + $0x3b8] sm:$0xff] }
 0x29e   :  { %v1881_v38 = vpop.f32.mrf.mxu2 }
 0x29f   :  { %v1882_v42 = vadd.f32 %v1881_v38, %v1339_v7 }
 0x2a0   :  { %v1354_v44 = vpop.f32.mrf.mxu1 }
 0x2a1   :  { %7886 = vmatmul.msk.f32.gmra.mxu3 %vm2382_vm3, %v1861_v43  ;;  %7893 = vmatmul.msk.f32.gmra.mxu0 %vm2382_vm3, %v1882_v42 }
 0x2a3   :  { %1401 = vmatmul.f32.gmra.mxu1 %v455_v45  ;;  %7735 = vmatmul.msk.f32.gmra.mxu2 %vm697_vm2, %v448_v48  ;;  %v468_v45 = vld [vmem:[%s13528_s1 + $0x3c8] sm:$0xff] }
 0x2a4   :  { %v2489_v49 = vpop.f32.mrf.mxu3 }
 0x2a5   :  { %v9373_v23 = vadd.f32 %v2489_v49, %v9267_v40 }
 0x2a6   :  { %v1884_v51 = vpop.f32.mrf.mxu2 }
 0x2a7   :  { %v9378_v55 = vadd.f32 %v1884_v51, %v9298_v17 }
 0x2a8   :  { %v1357_v46 = vpop.f32.mrf.mxu1 }
 0x2a9   :  { %7887 = vmatmul.msk.f32.gmra.mxu3 %vm2382_vm3, %v1864_v54  ;;  %v477_v54 = vld [vmem:[%s13528_s1 + $0x410] sm:$0xff] }
 0x2ab   :  { %1404 = vmatmul.f32.gmra.mxu1 %v457_v56  ;;  %7736 = vmatmul.msk.f32.gmra.mxu2 %vm697_vm2, %v450_v58  ;;  %v2330_v56 = vld [vmem:[%s13532_s5 + $0xb8] sm:$0xff]  ;;  %v2329_v58 = vld [vmem:[%s13532_s5 + $0xb0] sm:$0xff] }
 0x2ac   :  { %2865 = vmatpush.msrb.mxu3 %v2330_v56  ;;  %v9510_v16 = vpop.f32.mrf.mxu3  ;;  %v488_v56 = vld [vmem:[%s13528_s1 + $0x468] sm:$0xff] }
 0x2ae   :  { %v1887_v61 = vpop.f32.mrf.mxu2  ;;  %2866 = vmatpush.msrb.mxu3 %v2329_v58 }
 0x2af   :  { %v1888_v40 = vadd.f32 %v1887_v61, %v1345_v24 }
 0x2b0   :  { %v1360_v26 = vpop.f32.mrf.mxu1 }
 0x2b1   :  { %7895 = vmatmul.msk.f32.vlgmr.msra.gmra.mxu3 %vm2382_vm3, %v1888_v40 }
 0x2b3   :  { %1407 = vmatmul.f32.gmra.mxu1 %v459_v63  ;;  %7737 = vmatmul.msk.f32.gmra.mxu2 %vm697_vm2, %v452_v52  ;;  %v479_v52 = vld [vmem:[%s13528_s1 + $0x420] sm:$0xff] }
 0x2b6   :  { %v1890_v0 = vpop.f32.mrf.mxu2 }
 0x2b7   :  { %v1891_v50 = vadd.f32 %v1890_v0, %v1348_v10  ;;  %v462_v10 = vld [vmem:[%s13528_s1 + $0x398] sm:$0xff]  ;;  %v472_v0 = vld [vmem:[%s13528_s1 + $0x3e8] sm:$0xff] }
 0x2b8   :  { %v1363_v1 = vpop.f32.mrf.mxu1 }
 0x2b9   :  { %7896 = vmatmul.msk.f32.gmra.mxu3 %vm2382_vm3, %v1891_v50 }
 0x2bb   :  { %1410 = vmatmul.f32.gmra.mxu1 %v461_v5  ;;  %7738 = vmatmul.msk.f32.gmra.mxu2 %vm697_vm2, %v454_v57  ;;  %v481_v57 = vld [vmem:[%s13528_s1 + $0x430] sm:$0xff] }
 0x2be   :  { %v1893_v6 = vpop.f32.mrf.mxu2 }
 0x2bf   :  { %v1894_v7 = vadd.f32 %v1893_v6, %v1351_v34  ;;  %v474_v6 = vld [vmem:[%s13528_s1 + $0x3f8] sm:$0xff] }
 0x2c0   :  { %v1366_v9 = vpop.f32.mrf.mxu1 }
 0x2c1   :  { %7897 = vmatmul.msk.f32.gmra.mxu3 %vm2382_vm3, %v1894_v7 }
 0x2c3   :  { %1413 = vmatmul.f32.gmra.mxu1 %v463_v12  ;;  %7739 = vmatmul.msk.f32.gmra.mxu2 %vm697_vm2, %v456_v62  ;;  %v483_v62 = vld [vmem:[%s13528_s1 + $0x440] sm:$0xff] }
 0x2c6   :  { %v1896_v17 = vpop.f32.mrf.mxu2 }
 0x2c7   :  { %v1897_v59 = vadd.f32 %v1896_v17, %v1354_v44  ;;  %v475_v44 = vld [vmem:[%s13528_s1 + $0x400] sm:$0xff] }
 0x2c8   :  { %v1369_v47 = vpop.f32.mrf.mxu1 }
 0x2c9   :  { %7898 = vmatmul.msk.f32.gmra.mxu3 %vm2382_vm3, %v1897_v59 }
 0x2cb   :  { %1416 = vmatmul.f32.gmra.mxu1 %v465_v2  ;;  %7740 = vmatmul.msk.f32.gmra.mxu2 %vm697_vm2, %v458_v22  ;;  %v478_v2 = vld [vmem:[%s13528_s1 + $0x418] sm:$0xff] }
 0x2ce   :  { %v1899_v24 = vpop.f32.mrf.mxu2 }
 0x2cf   :  { %v1900_v25 = vadd.f32 %v1899_v24, %v1357_v46  ;;  %v470_v46 = vld [vmem:[%s13528_s1 + $0x3d8] sm:$0xff]  ;;  %v9520_v24 = vpop.f32.mrf.mxu3 }
 0x2d0   :  { %v1372_v8 = vpop.f32.mrf.mxu1 }
 0x2d1   :  { %7899 = vmatmul.msk.f32.gmra.mxu3 %vm2382_vm3, %v1900_v25 }
 0x2d3   :  { %1419 = vmatmul.f32.gmra.mxu1 %v467_v11  ;;  %7741 = vmatmul.msk.f32.gmra.mxu2 %vm697_vm2, %v460_v28  ;;  %v487_v11 = vld [vmem:[%s13528_s1 + $0x460] sm:$0xff]  ;;  %v480_v28 = vld [vmem:[%s13528_s1 + $0x428] sm:$0xff] }
 0x2d6   :  { %v1902_v29 = vpop.f32.mrf.mxu2 }
 0x2d7   :  { %v1903_v20 = vadd.f32 %v1902_v29, %v1360_v26  ;;  %v2328_v26 = vld [vmem:[%s13532_s5 + $0xa8] sm:$0xff] }
 0x2d8   :  { %v1375_v30 = vpop.f32.mrf.mxu1  ;;  %2867 = vmatpush.msrb.mxu3 %v2328_v26 }
 0x2d9   :  { %7900 = vmatmul.msk.f32.gmra.mxu3 %vm2382_vm3, %v1903_v20 }
 0x2db   :  { %1422 = vmatmul.f32.gmra.mxu1 %v469_v31  ;;  %7742 = vmatmul.msk.f32.gmra.mxu2 %vm697_vm2, %v462_v10  ;;  %v489_v31 = vld [vmem:[%s13528_s1 + $0x470] sm:$0xff]  ;;  %v482_v10 = vld [vmem:[%s13528_s1 + $0x438] sm:$0xff] }
 0x2de   :  { %v1905_v33 = vpop.f32.mrf.mxu2 }
 0x2df   :  { %v1906_v35 = vadd.f32 %v1905_v33, %v1363_v1  ;;  %v9536_v33 = vpop.f32.mrf.mxu3 }
 0x2e0   :  { %v1378_v15 = vpop.f32.mrf.mxu1 }
 0x2e1   :  { %7901 = vmatmul.msk.f32.gmra.mxu3 %vm2382_vm3, %v1906_v35 }
 0x2e3   :  { %1425 = vmatmul.f32.gmra.mxu1 %v471_v36  ;;  %7743 = vmatmul.msk.f32.gmra.mxu2 %vm697_vm2, %v464_v37  ;;  %v491_v37 = vld [vmem:[%s13528_s1 + $0x480] sm:$0xff] }
 0x2e6   :  { %v1908_v39 = vpop.f32.mrf.mxu2 }
 0x2e7   :  { %v1909_v34 = vadd.f32 %v1908_v39, %v1366_v9  ;;  %v484_v39 = vld [vmem:[%s13528_s1 + $0x448] sm:$0xff] }
 0x2e8   :  { %v1381_v32 = vpop.f32.mrf.mxu1 }
 0x2e9   :  { %7902 = vmatmul.msk.f32.vlgmr.msra.gmra.mxu0 %vm2382_vm3, %v1909_v34  ;;  %v9547_v34 = vpop.f32.mrf.mxu3 }
 0x2eb   :  { %1428 = vmatmul.f32.gmra.mxu1 %v473_v60  ;;  %7744 = vmatmul.msk.f32.gmra.mxu2 %vm697_vm2, %v466_v41  ;;  %v2332_v60 = vld [vmem:[%s13532_s5 + $0xc8] sm:$0xff] }
 0x2ee   :  { %v1911_v38 = vpop.f32.mrf.mxu2 }
 0x2ef   :  { %v1912_v43 = vadd.f32 %v1911_v38, %v1369_v47  ;;  %v485_v47 = vld [vmem:[%s13528_s1 + $0x450] sm:$0xff] }
 0x2f0   :  { %v1384_v42 = vpop.f32.mrf.mxu1 }
 0x2f1   :  { %7903 = vmatmul.msk.f32.gmra.mxu0 %vm2382_vm3, %v1912_v43  ;;  %v2331_v43 = vld [vmem:[%s13532_s5 + $0xc0] sm:$0xff] }
 0x2f3   :  { %1431 = vmatmul.f32.gmra.mxu1 %v475_v44  ;;  %7745 = vmatmul.msk.f32.gmra.mxu2 %vm697_vm2, %v468_v45  ;;  %v493_v44 = vld [vmem:[%s13528_s1 + $0x490] sm:$0xff]  ;;  %v486_v45 = vld [vmem:[%s13528_s1 + $0x458] sm:$0xff] }
 0x2f6   :  { %v1914_v48 = vpop.f32.mrf.mxu2 }
 0x2f7   :  { %v1915_v49 = vadd.f32 %v1914_v48, %v1372_v8  ;;  %v9567_v48 = vpop.f32.mrf.mxu3 }
 0x2f8   :  { %v1387_v51 = vpop.f32.mrf.mxu1 }
 0x2f9   :  { %7904 = vmatmul.msk.f32.gmra.mxu0 %vm2382_vm3, %v1915_v49 }
 0x2fb   :  { %1434 = vmatmul.f32.gmra.mxu1 %v477_v54  ;;  %7746 = vmatmul.msk.f32.gmra.mxu2 %vm697_vm2, %v470_v46  ;;  %v495_v46 = vld [vmem:[%s13528_s1 + $0x4a0] sm:$0xff] }
 0x2fe   :  { %v1917_v61 = vpop.f32.mrf.mxu2 }
 0x2ff   :  { %v1918_v40 = vadd.f32 %v1917_v61, %v1375_v30  ;;  %v9577_v61 = vpop.f32.mrf.mxu3 }
 0x300   :  { %v1390_v63 = vpop.f32.mrf.mxu1 }
 0x301   :  { %7905 = vmatmul.msk.f32.gmra.mxu0 %vm2382_vm3, %v1918_v40 }
 0x303   :  { %1437 = vmatmul.f32.gmra.mxu1 %v479_v52  ;;  %7747 = vmatmul.msk.f32.gmra.mxu2 %vm697_vm2, %v472_v0  ;;  %v490_v52 = vld [vmem:[%s13528_s1 + $0x478] sm:$0xff] }
 0x306   :  { %v1920_v50 = vpop.f32.mrf.mxu2 }
 0x307   :  { %v1921_v1 = vadd.f32 %v1920_v50, %v1378_v15 }
 0x308   :  { %v1393_v5 = vpop.f32.mrf.mxu1 }
 0x309   :  { %7906 = vmatmul.msk.f32.gmra.mxu0 %vm2382_vm3, %v1921_v1 }
 0x30b   :  { %1440 = vmatmul.f32.gmra.mxu1 %v481_v57  ;;  %7748 = vmatmul.msk.f32.gmra.mxu2 %vm697_vm2, %v474_v6  ;;  %v492_v57 = vld [vmem:[%s13528_s1 + $0x488] sm:$0xff]  ;;  %v9593_v6 = vpop.f32.mrf.mxu3 }
 0x30e   :  { %v1923_v7 = vpop.f32.mrf.mxu2 }
 0x30f   :  { %v1924_v9 = vadd.f32 %v1923_v7, %v1381_v32  ;;  %v2333_v32 = vld [vmem:[%s13532_s5 + $0xd0] sm:$0xff] }
 0x310   :  { %v1396_v12 = vpop.f32.mrf.mxu1  ;;  %2931 = vmatpush.msrb.mxu0 %v2333_v32 }
 0x311   :  { %7907 = vmatmul.msk.f32.gmra.mxu0 %vm2382_vm3, %v1924_v9 }
 0x312   :  { %2932 = vmatpush.msrb.mxu0 %v2332_v60  ;;  %v509_v60 = vld [vmem:[%s13528_s1 + $0x510] sm:$0xff] }
 0x313   :  { %1443 = vmatmul.f32.gmra.mxu1 %v483_v62  ;;  %7749 = vmatmul.msk.f32.gmra.mxu2 %vm697_vm2, %v476_v53  ;;  %v501_v62 = vld [vmem:[%s13528_s1 + $0x4d0] sm:$0xff]  ;;  %v494_v53 = vld [vmem:[%s13528_s1 + $0x498] sm:$0xff] }
 0x314   :  { %2933 = vmatpush.msrb.mxu0 %v2331_v43 }
 0x316   :  { %v1926_v17 = vpop.f32.mrf.mxu2 }
 0x317   :  { %v1927_v59 = vadd.f32 %v1926_v17, %v1384_v42 }
 0x318   :  { %v1399_v19 = vpop.f32.mrf.mxu1 }
 0x319   :  { %7908 = vmatmul.msk.f32.gmra.mxu0 %vm2382_vm3, %v1927_v59 }
 0x31b   :  { %1446 = vmatmul.f32.gmra.mxu1 %v485_v47  ;;  %7750 = vmatmul.msk.f32.gmra.mxu2 %vm697_vm2, %v478_v2  ;;  %v503_v47 = vld [vmem:[%s13528_s1 + $0x4e0] sm:$0xff]  ;;  %v496_v2 = vld [vmem:[%s13528_s1 + $0x4a8] sm:$0xff] }
 0x31e   :  { %v1929_v22 = vpop.f32.mrf.mxu2 }
 0x31f   :  { %v1930_v25 = vadd.f32 %v1929_v22, %v1387_v51 }
 0x320   :  { %v1402_v8 = vpop.f32.mrf.mxu1 }
 0x321   :  { %7909 = vmatmul.msk.f32.vlgmr.msrb.gmra.mxu3 %vm2382_vm3, %v1930_v25 }
 0x323   :  { %1449 = vmatmul.f32.gmra.mxu1 %v487_v11  ;;  %7751 = vmatmul.msk.f32.gmra.mxu2 %vm697_vm2, %v480_v28  ;;  %v505_v11 = vld [vmem:[%s13528_s1 + $0x4f0] sm:$0xff]  ;;  %v498_v28 = vld [vmem:[%s13528_s1 + $0x4b8] sm:$0xff] }
 0x326   :  { %v1932_v29 = vpop.f32.mrf.mxu2 }
 0x327   :  { %v1933_v20 = vadd.f32 %v1932_v29, %v1390_v63  ;;  %v497_v63 = vld [vmem:[%s13528_s1 + $0x4b0] sm:$0xff]  ;;  %v2336_v29 = vld [vmem:[%s13532_s5 + $0xe8] sm:$0xff] }
 0x328   :  { %v1405_v30 = vpop.f32.mrf.mxu1  ;;  %2997 = vmatpush.msra.mxu3 %v2336_v29  ;;  %v521_v29 = vld [vmem:[%s13528_s1 + $0x570] sm:$0xff] }
 0x329   :  { %7910 = vmatmul.msk.f32.gmra.mxu3 %vm2382_vm3, %v1933_v20  ;;  %v2335_v20 = vld [vmem:[%s13532_s5 + $0xe0] sm:$0xff] }
 0x32a   :  { %2998 = vmatpush.msra.mxu3 %v2335_v20  ;;  %v514_v20 = vld [vmem:[%s13528_s1 + $0x538] sm:$0xff] }
 0x32b   :  { %1452 = vmatmul.f32.gmra.mxu1 %v489_v31  ;;  %7752 = vmatmul.msk.f32.gmra.mxu2 %vm697_vm2, %v482_v10  ;;  %v2334_v10 = vld [vmem:[%s13532_s5 + $0xd8] sm:$0xff] }
 0x32c   :  { %2999 = vmatpush.msra.mxu3 %v2334_v10 }
 0x32e   :  { %v1935_v35 = vpop.f32.mrf.mxu2 }
 0x32f   :  { %v1936_v15 = vadd.f32 %v1935_v35, %v1393_v5  ;;  %v499_v5 = vld [vmem:[%s13528_s1 + $0x4c0] sm:$0xff] }
 0x330   :  { %v1408_v36 = vpop.f32.mrf.mxu1 }
 0x331   :  { %7911 = vmatmul.msk.f32.gmra.mxu3 %vm2382_vm3, %v1936_v15  ;;  %v507_v15 = vld [vmem:[%s13528_s1 + $0x500] sm:$0xff] }
 0x333   :  { %1455 = vmatmul.f32.gmra.mxu1 %v491_v37  ;;  %7753 = vmatmul.msk.f32.gmra.mxu2 %vm697_vm2, %v484_v39 }
 0x336   :  { %v1938_v41 = vpop.f32.mrf.mxu2 }
 0x337   :  { %v1939_v38 = vadd.f32 %v1938_v41, %v1396_v12  ;;  %v502_v41 = vld [vmem:[%s13528_s1 + $0x4d8] sm:$0xff] }
 0x338   :  { %v1411_v42 = vpop.f32.mrf.mxu1 }
 0x339   :  { %7912 = vmatmul.msk.f32.gmra.mxu3 %vm2382_vm3, %v1939_v38 }
 0x33b   :  { %1458 = vmatmul.f32.gmra.mxu1 %v493_v44  ;;  %7754 = vmatmul.msk.f32.gmra.mxu2 %vm697_vm2, %v486_v45  ;;  %v511_v44 = vld [vmem:[%s13528_s1 + $0x520] sm:$0xff]  ;;  %v504_v45 = vld [vmem:[%s13528_s1 + $0x4e8] sm:$0xff] }
 0x33e   :  { %v1941_v49 = vpop.f32.mrf.mxu2 }
 0x33f   :  { %v1942_v51 = vadd.f32 %v1941_v49, %v1399_v19  ;;  %v9654_v49 = vpop.f32.mrf.mxu3 }
 0x340   :  { %v1414_v54 = vpop.f32.mrf.mxu1 }
 0x341   :  { %7913 = vmatmul.msk.f32.gmra.mxu3 %vm2382_vm3, %v1942_v51 }
 0x343   :  { %1461 = vmatmul.f32.gmra.mxu1 %v495_v46  ;;  %7755 = vmatmul.msk.f32.gmra.mxu2 %vm697_vm2, %v488_v56  ;;  %v513_v56 = vld [vmem:[%s13528_s1 + $0x530] sm:$0xff] }
 0x346   :  { %v1944_v58 = vpop.f32.mrf.mxu2 }
 0x347   :  { %v1945_v40 = vadd.f32 %v1944_v58, %v1402_v8  ;;  %v506_v58 = vld [vmem:[%s13528_s1 + $0x4f8] sm:$0xff] }
 0x348   :  { %v1417_v26 = vpop.f32.mrf.mxu1 }
 0x349   :  { %7914 = vmatmul.msk.f32.gmra.mxu3 %vm2382_vm3, %v1945_v40 }
 0x34b   :  { %1464 = vmatmul.f32.gmra.mxu1 %v497_v63  ;;  %7756 = vmatmul.msk.f32.gmra.mxu2 %vm697_vm2, %v490_v52 }
 0x34e   :  { %v1947_v0 = vpop.f32.mrf.mxu2 }
 0x34f   :  { %v1948_v50 = vadd.f32 %v1947_v0, %v1405_v30  ;;  %v515_v0 = vld [vmem:[%s13528_s1 + $0x540] sm:$0xff] }
 0x350   :  { %v1420_v1 = vpop.f32.mrf.mxu1 }
 0x351   :  { %7915 = vmatmul.msk.f32.gmra.mxu3 %vm2382_vm3, %v1948_v50  ;;  %v508_v50 = vld [vmem:[%s13528_s1 + $0x508] sm:$0xff] }
 0x353   :  { %1467 = vmatmul.f32.gmra.mxu1 %v499_v5  ;;  %7757 = vmatmul.msk.f32.gmra.mxu2 %vm697_vm2, %v492_v57 }
 0x356   :  { %v1950_v7 = vpop.f32.mrf.mxu2 }
 0x357   :  { %v1951_v9 = vadd.f32 %v1950_v7, %v1408_v36  ;;  %v500_v36 = vld [vmem:[%s13528_s1 + $0x4c8] sm:$0xff]  ;;  %v517_v7 = vld [vmem:[%s13528_s1 + $0x550] sm:$0xff] }
 0x358   :  { %v1423_v12 = vpop.f32.mrf.mxu1 }
 0x359   :  { %7916 = vmatmul.msk.f32.vlgmr.msrb.gmra.mxu0 %vm2382_vm3, %v1951_v9  ;;  %v510_v9 = vld [vmem:[%s13528_s1 + $0x518] sm:$0xff] }
 0x35b   :  { %1470 = vmatmul.f32.gmra.mxu1 %v501_v62  ;;  %7758 = vmatmul.msk.f32.gmra.mxu2 %vm697_vm2, %v494_v53 }
 0x35e   :  { %v1953_v17 = vpop.f32.mrf.mxu2 }
 0x35f   :  { %v1954_v59 = vadd.f32 %v1953_v17, %v1411_v42 }
 0x360   :  { %v1426_v19 = vpop.f32.mrf.mxu1 }
 0x361   :  { %7917 = vmatmul.msk.f32.gmra.mxu0 %vm2382_vm3, %v1954_v59  ;;  %v519_v59 = vld [vmem:[%s13528_s1 + $0x560] sm:$0xff] }
 0x363   :  { %1473 = vmatmul.f32.gmra.mxu1 %v503_v47  ;;  %7759 = vmatmul.msk.f32.gmra.mxu2 %vm697_vm2, %v496_v2  ;;  %v2339_v2 = vld [vmem:[%s13532_s5 + $0x100] sm:$0xff] }
 0x364   :  { %3063 = vmatpush.msra.mxu0 %v2339_v2 }
 0x366   :  { %v1956_v22 = vpop.f32.mrf.mxu2 }
 0x367   :  { %v1957_v25 = vadd.f32 %v1956_v22, %v1414_v54  ;;  %v2338_v22 = vld [vmem:[%s13532_s5 + $0xf8] sm:$0xff] }
 0x368   :  { %v1429_v8 = vpop.f32.mrf.mxu1  ;;  %3064 = vmatpush.msra.mxu0 %v2338_v22  ;;  %v2340_v22 = vld [vmem:[%s13532_s5 + $0x108] sm:$0xff] }
 0x369   :  { %7918 = vmatmul.msk.f32.gmra.mxu0 %vm2382_vm3, %v1957_v25 }
 0x36b   :  { %1476 = vmatmul.f32.gmra.mxu1 %v505_v11  ;;  %7760 = vmatmul.msk.f32.gmra.mxu2 %vm697_vm2, %v498_v28  ;;  %v2337_v11 = vld [vmem:[%s13532_s5 + $0xf0] sm:$0xff] }
 0x36c   :  { %3065 = vmatpush.msra.mxu0 %v2337_v11  ;;  %v528_v11 = vld [vmem:[%s13528_s1 + $0x5a8] sm:$0xff] }
 0x36e   :  { %v1959_v30 = vpop.f32.mrf.mxu2 }
 0x36f   :  { %v1960_v31 = vadd.f32 %v1959_v30, %v1417_v26  ;;  %v9664_v26 = vpop.f32.mrf.mxu3 }
 0x370   :  { %v1432_v35 = vpop.f32.mrf.mxu1 }
 0x371   :  { %7919 = vmatmul.msk.f32.gmra.mxu0 %vm2382_vm3, %v1960_v31 }
 0x373   :  { %1479 = vmatmul.f32.gmra.mxu1 %v507_v15  ;;  %7761 = vmatmul.msk.f32.gmra.mxu2 %vm697_vm2, %v500_v36  ;;  %v523_v15 = vld [vmem:[%s13528_s1 + $0x580] sm:$0xff]  ;;  %v516_v36 = vld [vmem:[%s13528_s1 + $0x548] sm:$0xff] }
 0x376   :  { %v1962_v37 = vpop.f32.mrf.mxu2 }
 0x377   :  { %v1963_v39 = vadd.f32 %v1962_v37, %v1420_v1 }
 0x378   :  { %v1435_v32 = vpop.f32.mrf.mxu1 }
 0x379   :  { %7920 = vmatmul.msk.f32.gmra.mxu0 %vm2382_vm3, %v1963_v39 }
 0x37b   :  { %1482 = vmatmul.f32.gmra.mxu1 %v509_v60  ;;  %7762 = vmatmul.msk.f32.gmra.mxu2 %vm697_vm2, %v502_v41  ;;  %v525_v41 = vld [vmem:[%s13528_s1 + $0x590] sm:$0xff] }
 0x37e   :  { %v1965_v38 = vpop.f32.mrf.mxu2 }
 0x37f   :  { %v1966_v43 = vadd.f32 %v1965_v38, %v1423_v12  ;;  %v9680_v12 = vpop.f32.mrf.mxu3  ;;  %v518_v38 = vld [vmem:[%s13528_s1 + $0x558] sm:$0xff] }
 0x380   :  { %v1438_v42 = vpop.f32.mrf.mxu1 }
 0x381   :  { %7921 = vmatmul.msk.f32.gmra.mxu0 %vm2382_vm3, %v1966_v43 }
 0x383   :  { %1485 = vmatmul.f32.gmra.mxu1 %v511_v44  ;;  %7763 = vmatmul.msk.f32.gmra.mxu2 %vm697_vm2, %v504_v45  ;;  %v527_v45 = vld [vmem:[%s13528_s1 + $0x5a0] sm:$0xff] }
 0x386   :  { %v1968_v51 = vpop.f32.mrf.mxu2 }
 0x387   :  { %v1969_v54 = vadd.f32 %v1968_v51, %v1426_v19  ;;  %v512_v19 = vld [vmem:[%s13528_s1 + $0x528] sm:$0xff]  ;;  %v9691_v47 = vpop.f32.mrf.mxu3 }
 0x388   :  { %v1441_v46 = vpop.f32.mrf.mxu1  ;;  %v520_v51 = vld [vmem:[%s13528_s1 + $0x568] sm:$0xff] }
 0x389   :  { %7922 = vmatmul.msk.f32.gmra.mxu0 %vm2382_vm3, %v1969_v54 }
 0x38b   :  { %1488 = vmatmul.f32.gmra.mxu1 %v513_v56  ;;  %7764 = vmatmul.msk.f32.gmra.mxu2 %vm697_vm2, %v506_v58 }
 0x38e   :  { %v1971_v40 = vpop.f32.mrf.mxu2 }
 0x38f   :  { %v1972_v63 = vadd.f32 %v1971_v40, %v1429_v8  ;;  %v9711_v30 = vpop.f32.mrf.mxu3  ;;  %v529_v40 = vld [vmem:[%s13528_s1 + $0x5b0] sm:$0xff] }
 0x390   :  { %v1444_v52 = vpop.f32.mrf.mxu1 }
 0x391   :  { %7923 = vmatmul.msk.f32.vlgmr.msra.gmra.mxu3 %vm2382_vm3, %v1972_v63  ;;  %v522_v63 = vld [vmem:[%s13528_s1 + $0x578] sm:$0xff] }
 0x393   :  { %1491 = vmatmul.f32.gmra.mxu1 %v515_v0  ;;  %7765 = vmatmul.msk.f32.gmra.mxu2 %vm697_vm2, %v508_v50 }
 0x396   :  { %v1974_v1 = vpop.f32.mrf.mxu2 }
 0x397   :  { %v1975_v5 = vadd.f32 %v1974_v1, %v1432_v35  ;;  %v9721_v39 = vpop.f32.mrf.mxu3  ;;  %v531_v1 = vld [vmem:[%s13528_s1 + $0x5c0] sm:$0xff] }
 0x398   :  { %v1447_v57 = vpop.f32.mrf.mxu1 }
 0x399   :  { %7924 = vmatmul.msk.f32.gmra.mxu3 %vm2382_vm3, %v1975_v5  ;;  %v524_v5 = vld [vmem:[%s13528_s1 + $0x588] sm:$0xff] }
 0x39b   :  { %1494 = vmatmul.f32.gmra.mxu1 %v517_v7  ;;  %7766 = vmatmul.msk.f32.gmra.mxu2 %vm697_vm2, %v510_v9 }
 0x39e   :  { %v1977_v62 = vpop.f32.mrf.mxu2 }
 0x39f   :  { %v1978_v53 = vadd.f32 %v1977_v62, %v1435_v32  ;;  %v9737_v54 = vpop.f32.mrf.mxu3  ;;  %v533_v62 = vld [vmem:[%s13528_s1 + $0x5d0] sm:$0xff] }
 0x3a0   :  { %v1450_v17 = vpop.f32.mrf.mxu1 }
 0x3a1   :  { %7925 = vmatmul.msk.f32.gmra.mxu3 %vm2382_vm3, %v1978_v53  ;;  %v526_v53 = vld [vmem:[%s13528_s1 + $0x598] sm:$0xff] }
 0x3a3   :  { %1497 = vmatmul.f32.gmra.mxu1 %v519_v59  ;;  %7767 = vmatmul.msk.f32.gmra.mxu2 %vm697_vm2, %v512_v19  ;;  %v2341_v59 = vld [vmem:[%s13532_s5 + $0x110] sm:$0xff] }
 0x3a6   :  { %v1980_v25 = vpop.f32.mrf.mxu2 }
 0x3a7   :  { %v1981_v8 = vadd.f32 %v1980_v25, %v1438_v42 }
 0x3a8   :  { %v1453_v28 = vpop.f32.mrf.mxu1 }
 0x3a9   :  { %7926 = vmatmul.msk.f32.gmra.mxu3 %vm2382_vm3, %v1981_v8  ;;  %v535_v8 = vld [vmem:[%s13528_s1 + $0x5e0] sm:$0xff] }
 0x3ab   :  { %1500 = vmatmul.f32.gmra.mxu1 %v521_v29  ;;  %7768 = vmatmul.msk.f32.gmra.mxu2 %vm697_vm2, %v514_v20 }
 0x3ae   :  { %v1983_v31 = vpop.f32.mrf.mxu2 }
 0x3af   :  { %v1984_v10 = vadd.f32 %v1983_v31, %v1441_v46 }
 0x3b0   :  { %v1456_v35 = vpop.f32.mrf.mxu1 }
 0x3b1   :  { %7927 = vmatmul.msk.f32.gmra.mxu3 %vm2382_vm3, %v1984_v10  ;;  %v537_v10 = vld [vmem:[%s13528_s1 + $0x5f0] sm:$0xff] }
 0x3b3   :  { %1503 = vmatmul.f32.gmra.mxu1 %v523_v15  ;;  %7769 = vmatmul.msk.f32.gmra.mxu2 %vm697_vm2, %v516_v36 }
 0x3b6   :  { %v1986_v37 = vpop.f32.mrf.mxu2 }
 0x3b7   :  { %v1987_v32 = vadd.f32 %v1986_v37, %v1444_v52 }
 0x3b8   :  { %v1459_v60 = vpop.f32.mrf.mxu1 }
 0x3b9   :  { %7928 = vmatmul.msk.f32.gmra.mxu3 %vm2382_vm3, %v1987_v32 }
 0x3bb   :  { %1506 = vmatmul.f32.gmra.mxu1 %v525_v41  ;;  %7770 = vmatmul.msk.f32.gmra.mxu2 %vm697_vm2, %v518_v38  ;;  %v532_v41 = vld [vmem:[%s13528_s1 + $0x5c8] sm:$0xff]  ;;  %v9802_v38 = vpop.f32.mrf.mxu3 }
 0x3be   :  { %v1989_v43 = vpop.f32.mrf.mxu2 }
 0x3bf   :  { %v1990_v42 = vadd.f32 %v1989_v43, %v1447_v57 }
 0x3c0   :  { %v1462_v44 = vpop.f32.mrf.mxu1 }
 0x3c1   :  { %7929 = vmatmul.msk.f32.gmra.mxu3 %vm2382_vm3, %v1990_v42 }
 0x3c3   :  { %1509 = vmatmul.f32.gmra.mxu1 %v527_v45  ;;  %7771 = vmatmul.msk.f32.gmra.mxu2 %vm697_vm2, %v520_v51  ;;  %v541_v45 = vld [vmem:[%s13528_s1 + $0x610] sm:$0xff]  ;;  %v534_v51 = vld [vmem:[%s13528_s1 + $0x5d8] sm:$0xff] }
 0x3c6   :  { %v1992_v46 = vpop.f32.mrf.mxu2 }
 0x3c7   :  { %v1993_v56 = vadd.f32 %v1992_v46, %v1450_v17  ;;  %v2342_v17 = vld [vmem:[%s13532_s5 + $0x118] sm:$0xff] }
 0x3c8   :  { %v1465_v58 = vpop.f32.mrf.mxu1  ;;  %3129 = vmatpush.msrb.mxu3 %v2342_v17 }
 0x3c9   :  { %7930 = vmatmul.msk.f32.vlgmr.msra.gmra.mxu0 %vm2382_vm3, %v1993_v56 }
 0x3ca   :  { %3130 = vmatpush.msrb.mxu3 %v2341_v59  ;;  %v547_v59 = vld [vmem:[%s13528_s1 + $0x640] sm:$0xff] }
 0x3cb   :  { %1512 = vmatmul.f32.gmra.mxu1 %v529_v40  ;;  %7772 = vmatmul.msk.f32.gmra.mxu2 %vm697_vm2, %v522_v63 }
 0x3cc   :  { %3131 = vmatpush.msrb.mxu3 %v2340_v22  ;;  %v2345_v22 = vld [vmem:[%s13532_s5 + $0x130] sm:$0xff] }
 0x3cd   :  { %3195 = vmatpush.msrb.mxu0 %v2345_v22 }
 0x3ce   :  { %v1995_v52 = vpop.f32.mrf.mxu2 }
 0x3cf   :  { %v1996_v0 = vadd.f32 %v1995_v52, %v1453_v28  ;;  %v9782_v28 = vpop.f32.mrf.mxu0  ;;  %v543_v52 = vld [vmem:[%s13528_s1 + $0x620] sm:$0xff] }
 0x3d0   :  { %v1468_v50 = vpop.f32.mrf.mxu1 }
 0x3d1   :  { %7931 = vmatmul.msk.f32.gmra.mxu0 %vm2382_vm3, %v1996_v0  ;;  %v536_v0 = vld [vmem:[%s13528_s1 + $0x5e8] sm:$0xff] }
 0x3d3   :  { %1515 = vmatmul.f32.gmra.mxu1 %v531_v1  ;;  %7773 = vmatmul.msk.f32.gmra.mxu2 %vm697_vm2, %v524_v5 }
 0x3d6   :  { %v1998_v57 = vpop.f32.mrf.mxu2 }
 0x3d7   :  { %v1999_v7 = vadd.f32 %v1998_v57, %v1456_v35  ;;  %v530_v35 = vld [vmem:[%s13528_s1 + $0x5b8] sm:$0xff]  ;;  %v9792_v36 = vpop.f32.mrf.mxu0  ;;  %v545_v57 = vld [vmem:[%s13528_s1 + $0x630] sm:$0xff] }
 0x3d8   :  { %v1471_v9 = vpop.f32.mrf.mxu1  ;;  %13555 = vst [vmem:[#allocation5_spill] sm:$0xff] %v9792_v36  ;;  %v628_v36 = vld [vmem:[%s13528_s1 + $0x8c8] sm:$0xff] }
 0x3d9   :  { %7932 = vmatmul.msk.f32.gmra.mxu0 %vm2382_vm3, %v1999_v7  ;;  %v538_v7 = vld [vmem:[%s13528_s1 + $0x5f8] sm:$0xff] }
 0x3db   :  { %1518 = vmatmul.f32.gmra.mxu1 %v533_v62  ;;  %7774 = vmatmul.msk.f32.gmra.mxu2 %vm697_vm2, %v526_v53 }
 0x3de   :  { %v2001_v19 = vpop.f32.mrf.mxu2 }
 0x3df   :  { %v2002_v2 = vadd.f32 %v2001_v19, %v1459_v60  ;;  %v539_v60 = vld [vmem:[%s13528_s1 + $0x600] sm:$0xff]  ;;  %v9810_v46 = vpop.f32.mrf.mxu0  ;;  %v540_v19 = vld [vmem:[%s13528_s1 + $0x608] sm:$0xff] }
 0x3e0   :  { %v1474_v25 = vpop.f32.mrf.mxu1  ;;  %13556 = vst [vmem:[#allocation6_spill] sm:$0xff] %v9810_v46  ;;  %v656_v46 = vld [vmem:[%s13528_s1 + $0x9a8] sm:$0xff] }
 0x3e1   :  { %7933 = vmatmul.msk.f32.gmra.mxu0 %vm2382_vm3, %v2002_v2 }
 0x3e3   :  { %1521 = vmatmul.f32.gmra.mxu1 %v535_v8  ;;  %7775 = vmatmul.msk.f32.gmra.mxu2 %vm697_vm2, %v528_v11 }
 0x3e6   :  { %v2004_v29 = vpop.f32.mrf.mxu2 }
 0x3e7   :  { %v2005_v20 = vadd.f32 %v2004_v29, %v1462_v44  ;;  %v2343_v29 = vld [vmem:[%s13532_s5 + $0x120] sm:$0xff] }
 0x3e8   :  { %v1477_v31 = vpop.f32.mrf.mxu1 }
 0x3e9   :  { %7934 = vmatmul.msk.f32.gmra.mxu0 %vm2382_vm3, %v2005_v20 }
 0x3eb   :  { %1524 = vmatmul.f32.gmra.mxu1 %v537_v10  ;;  %7776 = vmatmul.msk.f32.gmra.mxu2 %vm697_vm2, %v530_v35  ;;  %v542_v10 = vld [vmem:[%s13528_s1 + $0x618] sm:$0xff] }
 0x3ee   :  { %v2007_v15 = vpop.f32.mrf.mxu2 }
 0x3ef   :  { %v2008_v37 = vadd.f32 %v2007_v15, %v1465_v58  ;;  %v9814_v58 = vpop.f32.mrf.mxu3 }
 0x3f0   :  { %v1480_v32 = vpop.f32.mrf.mxu1 }
 0x3f1   :  { %7935 = vmatmul.msk.f32.gmra.mxu0 %vm2382_vm3, %v2008_v37 }
 0x3f3   :  { %1527 = vmatmul.f32.gmra.mxu1 %v539_v60  ;;  %7777 = vmatmul.msk.f32.gmra.mxu2 %vm697_vm2, %v532_v41  ;;  %v551_v60 = vld [vmem:[%s13528_s1 + $0x660] sm:$0xff]  ;;  %v544_v41 = vld [vmem:[%s13528_s1 + $0x628] sm:$0xff] }
 0x3f6   :  { %v2010_v43 = vpop.f32.mrf.mxu2 }
 0x3f7   :  { %v2011_v42 = vadd.f32 %v2010_v43, %v1468_v50 }
 0x3f8   :  { %v1483_v44 = vpop.f32.mrf.mxu1 }
 0x3f9   :  { %7936 = vmatmul.msk.f32.gmra.mxu0 %vm2382_vm3, %v2011_v42 }
 0x3fb   :  { %1530 = vmatmul.f32.gmra.mxu1 %v541_v45  ;;  %7778 = vmatmul.msk.f32.gmra.mxu2 %vm697_vm2, %v534_v51 }
 0x3fe   :  { %v2013_v56 = vpop.f32.mrf.mxu2 }
 0x3ff   :  { %v2014_v40 = vadd.f32 %v2013_v56, %v1471_v9  ;;  %v9830_v9 = vpop.f32.mrf.mxu3  ;;  %v546_v56 = vld [vmem:[%s13528_s1 + $0x638] sm:$0xff] }
 0x400   :  { %v1486_v63 = vpop.f32.mrf.mxu1 }
 0x401   :  { %7937 = vmatmul.msk.f32.vlgmr.msrb.gmra.mxu3 %vm2382_vm3, %v2014_v40 }
 0x403   :  { %1533 = vmatmul.f32.gmra.mxu1 %v543_v52  ;;  %7779 = vmatmul.msk.f32.gmra.mxu2 %vm697_vm2, %v536_v0  ;;  %v9881_v52 = vpop.f32.mrf.mxu0 }
 0x406   :  { %v2016_v50 = vpop.f32.mrf.mxu2 }
 0x407   :  { %v2017_v1 = vadd.f32 %v2016_v50, %v1474_v25  ;;  %v9841_v2 = vpop.f32.mrf.mxu3  ;;  %v2344_v25 = vld [vmem:[%s13532_s5 + $0x128] sm:$0xff] }
 0x408   :  { %v1489_v5 = vpop.f32.mrf.mxu1  ;;  %3196 = vmatpush.msrb.mxu0 %v2344_v25 }
 0x409   :  { %7938 = vmatmul.msk.f32.gmra.mxu3 %vm2382_vm3, %v2017_v1  ;;  %v548_v1 = vld [vmem:[%s13528_s1 + $0x648] sm:$0xff] }
 0x40a   :  { %3197 = vmatpush.msrb.mxu0 %v2343_v29 }
 0x40b   :  { %1536 = vmatmul.f32.gmra.mxu1 %v545_v57  ;;  %7780 = vmatmul.msk.f32.gmra.mxu2 %vm697_vm2, %v538_v7 }
 0x40e   :  { %v2019_v62 = vpop.f32.mrf.mxu2 }
 0x40f   :  { %v2020_v53 = vadd.f32 %v2019_v62, %v1477_v31  ;;  %v549_v31 = vld [vmem:[%s13528_s1 + $0x650] sm:$0xff]  ;;  %v9861_v35 = vpop.f32.mrf.mxu3 }
 0x410   :  { %v1492_v17 = vpop.f32.mrf.mxu1  ;;  %13557 = vst [vmem:[#allocation7_spill] sm:$0xff] %v9861_v35  ;;  %v600_v35 = vld [vmem:[%s13528_s1 + $0x7e8] sm:$0xff] }
 0x411   :  { %7939 = vmatmul.msk.f32.gmra.mxu3 %vm2382_vm3, %v2020_v53 }
 0x413   :  { %1539 = vmatmul.f32.gmra.mxu1 %v547_v59  ;;  %7781 = vmatmul.msk.f32.gmra.mxu2 %vm697_vm2, %v540_v19  ;;  %v550_v59 = vld [vmem:[%s13528_s1 + $0x658] sm:$0xff]  ;;  %v9899_v19 = vpop.f32.mrf.mxu0 }
 0x416   :  { %v2022_v8 = vpop.f32.mrf.mxu2 }
 0x417   :  { %v2023_v11 = vadd.f32 %v2022_v8, %v1480_v32  ;;  %v9871_v42 = vpop.f32.mrf.mxu3 }
 0x418   :  { %v1495_v20 = vpop.f32.mrf.mxu1  ;;  %13558 = vst [vmem:[#allocation8_spill] sm:$0xff] %v9871_v42  ;;  %v614_v42 = vld [vmem:[%s13528_s1 + $0x858] sm:$0xff] }
 0x419   :  { %7940 = vmatmul.msk.f32.gmra.mxu3 %vm2382_vm3, %v2023_v11  ;;  %v552_v11 = vld [vmem:[%s13528_s1 + $0x668] sm:$0xff] }
 0x41b   :  { %1542 = vmatmul.f32.gmra.mxu1 %v549_v31  ;;  %7782 = vmatmul.msk.f32.gmra.mxu2 %vm697_vm2, %v542_v10  ;;  %v9910_v29 = vpop.f32.mrf.mxu0 }
 0x41e   :  { %v2025_v15 = vpop.f32.mrf.mxu2 }
 0x41f   :  { %v2026_v37 = vadd.f32 %v2025_v15, %v1483_v44  ;;  %v553_v44 = vld [vmem:[%s13528_s1 + $0x670] sm:$0xff]  ;;  %v9889_v57 = vpop.f32.mrf.mxu3 }
 0x420   :  { %v1498_v32 = vpop.f32.mrf.mxu1  ;;  %13559 = vst [vmem:[#allocation9_spill] sm:$0xff] %v9889_v57  ;;  %v642_v57 = vld [vmem:[%s13528_s1 + $0x938] sm:$0xff] }
 0x421   :  { %7941 = vmatmul.msk.f32.gmra.mxu3 %vm2382_vm3, %v2026_v37  ;;  %v554_v37 = vld [vmem:[%s13528_s1 + $0x678] sm:$0xff] }
 0x423   :  { %1545 = vmatmul.f32.gmra.mxu1 %v551_v60  ;;  %7783 = vmatmul.msk.f32.gmra.mxu2 %vm697_vm2, %v544_v41  ;;  %v9920_v60 = vpop.f32.mrf.mxu0  ;;  %v2347_v41 = vld [vmem:[%s13532_s5 + $0x140] sm:$0xff] }
 0x426   :  { %v2028_v43 = vpop.f32.mrf.mxu2 }
 0x427   :  { %v2029_v45 = vadd.f32 %v2028_v43, %v1486_v63  ;;  %v555_v63 = vld [vmem:[%s13528_s1 + $0x680] sm:$0xff] }
 0x428   :  { %v1501_v51 = vpop.f32.mrf.mxu1 }
 0x429   :  { %7942 = vmatmul.msk.f32.gmra.mxu3 %vm2382_vm3, %v2029_v45 }
 0x42b   :  { %1548 = vmatmul.f32.gmra.mxu1 %v553_v44  ;;  %7784 = vmatmul.msk.f32.gmra.mxu2 %vm697_vm2, %v546_v56  ;;  %v2346_v44 = vld [vmem:[%s13532_s5 + $0x138] sm:$0xff] }
 0x42e   :  { %v2031_v40 = vpop.f32.mrf.mxu2 }
 0x42f   :  { %v2032_v0 = vadd.f32 %v2031_v40, %v1489_v5  ;;  %v557_v5 = vld [vmem:[%s13528_s1 + $0x690] sm:$0xff]  ;;  %v563_v40 = vld [vmem:[%s13528_s1 + $0x6c0] sm:$0xff] }
 0x430   :  { %v1504_v50 = vpop.f32.mrf.mxu1 }
 0x431   :  { %7943 = vmatmul.msk.f32.gmra.mxu3 %vm2382_vm3, %v2032_v0  ;;  %v556_v0 = vld [vmem:[%s13528_s1 + $0x688] sm:$0xff] }
 0x433   :  { %1551 = vmatmul.f32.gmra.mxu1 %v555_v63  ;;  %7785 = vmatmul.msk.f32.gmra.mxu2 %vm697_vm2, %v548_v1 }
 0x436   :  { %v2034_v7 = vpop.f32.mrf.mxu2 }
 0x437   :  { %v2035_v62 = vadd.f32 %v2034_v7, %v1492_v17  ;;  %v559_v17 = vld [vmem:[%s13528_s1 + $0x6a0] sm:$0xff] }
 0x438   :  { %v1507_v53 = vpop.f32.mrf.mxu1 }
 0x439   :  { %7944 = vmatmul.msk.f32.vlgmr.msrb.gmra.mxu0 %vm2382_vm3, %v2035_v62  ;;  %v565_v62 = vld [vmem:[%s13528_s1 + $0x6d0] sm:$0xff] }
 0x43b   :  { %1554 = vmatmul.f32.gmra.mxu1 %v557_v5  ;;  %7786 = vmatmul.msk.f32.gmra.mxu2 %vm697_vm2, %v550_v59  ;;  %v558_v5 = vld [vmem:[%s13528_s1 + $0x698] sm:$0xff] }
 0x43e   :  { %v2037_v22 = vpop.f32.mrf.mxu2 }
 0x43f   :  { %v2038_v25 = vadd.f32 %v2037_v22, %v1495_v20  ;;  %v561_v20 = vld [vmem:[%s13528_s1 + $0x6b0] sm:$0xff] }
 0x440   :  { %v1510_v8 = vpop.f32.mrf.mxu1 }
 0x441   :  { %7945 = vmatmul.msk.f32.gmra.mxu0 %vm2382_vm3, %v2038_v25 }
 0x443   :  { %1557 = vmatmul.f32.gmra.mxu1 %v559_v17  ;;  %7787 = vmatmul.msk.f32.gmra.mxu2 %vm697_vm2, %v552_v11  ;;  %v560_v11 = vld [vmem:[%s13528_s1 + $0x6a8] sm:$0xff] }
 0x446   :  { %v2040_v31 = vpop.f32.mrf.mxu2 }
 0x447   :  { %v2041_v10 = vadd.f32 %v2040_v31, %v1498_v32  ;;  %v2348_v32 = vld [vmem:[%s13532_s5 + $0x148] sm:$0xff] }
 0x448   :  { %v1513_v15 = vpop.f32.mrf.mxu1  ;;  %3261 = vmatpush.msra.mxu3 %v2348_v32  ;;  %v562_v32 = vld [vmem:[%s13528_s1 + $0x6b8] sm:$0xff] }
 0x449   :  { %7946 = vmatmul.msk.f32.gmra.mxu0 %vm2382_vm3, %v2041_v10  ;;  %v9960_v10 = vpop.f32.mrf.mxu3 }
 0x44a   :  { %3262 = vmatpush.msra.mxu3 %v2347_v41 }
 0x44b   :  { %1560 = vmatmul.f32.gmra.mxu1 %v561_v20  ;;  %7788 = vmatmul.msk.f32.gmra.mxu2 %vm697_vm2, %v554_v37 }
 0x44c   :  { %3263 = vmatpush.msra.mxu3 %v2346_v44 }
 0x44e   :  { %v2043_v43 = vpop.f32.mrf.mxu2 }
 0x44f   :  { %v2044_v45 = vadd.f32 %v2043_v43, %v1501_v51  ;;  %v9940_v51 = vpop.f32.mrf.mxu0 }
 0x450   :  { %v1516_v56 = vpop.f32.mrf.mxu1  ;;  %13560 = vst [vmem:[#allocation10_spill] sm:$0xff] %v9940_v51 }
 0x451   :  { %7947 = vmatmul.msk.f32.gmra.mxu0 %vm2382_vm3, %v2044_v45 }
 0x453   :  { %1563 = vmatmul.f32.gmra.mxu1 %v563_v40  ;;  %7789 = vmatmul.msk.f32.gmra.mxu2 %vm697_vm2, %v556_v0  ;;  %v564_v40 = vld [vmem:[%s13528_s1 + $0x6c8] sm:$0xff]  ;;  %v9978_v0 = vpop.f32.mrf.mxu3 }
 0x456   :  { %v2046_v63 = vpop.f32.mrf.mxu2 }
 0x457   :  { %v2047_v1 = vadd.f32 %v2046_v63, %v1504_v50  ;;  %v9950_v22 = vpop.f32.mrf.mxu0  ;;  %v567_v50 = vld [vmem:[%s13528_s1 + $0x6e0] sm:$0xff] }
 0x458   :  { %v1519_v7 = vpop.f32.mrf.mxu1  ;;  %13561 = vst [vmem:[#allocation11_spill] sm:$0xff] %v9950_v22  ;;  %v607_v22 = vld [vmem:[%s13528_s1 + $0x820] sm:$0xff] }
 0x459   :  { %7948 = vmatmul.msk.f32.gmra.mxu0 %vm2382_vm3, %v2047_v1 }
 0x45b   :  { %1566 = vmatmul.f32.gmra.mxu1 %v565_v62  ;;  %7790 = vmatmul.msk.f32.gmra.mxu2 %vm697_vm2, %v558_v5  ;;  %v566_v5 = vld [vmem:[%s13528_s1 + $0x6d8] sm:$0xff] }
 0x45e   :  { %v2049_v59 = vpop.f32.mrf.mxu2 }
 0x45f   :  { %v2050_v25 = vadd.f32 %v2049_v59, %v1507_v53  ;;  %v569_v53 = vld [vmem:[%s13528_s1 + $0x6f0] sm:$0xff]  ;;  %v9968_v41 = vpop.f32.mrf.mxu0  ;;  %v9989_v59 = vpop.f32.mrf.mxu3 }
 0x460   :  { %v1522_v17 = vpop.f32.mrf.mxu1  ;;  %13562 = vst [vmem:[#allocation12_spill] sm:$0xff] %v9968_v41  ;;  %v621_v41 = vld [vmem:[%s13528_s1 + $0x890] sm:$0xff] }
 0x461   :  { %7949 = vmatmul.msk.f32.gmra.mxu0 %vm2382_vm3, %v2050_v25 }
 0x463   :  { %1569 = vmatmul.f32.gmra.mxu1 %v567_v50  ;;  %7791 = vmatmul.msk.f32.gmra.mxu2 %vm697_vm2, %v560_v11 }
 0x466   :  { %v2052_v31 = vpop.f32.mrf.mxu2 }
 0x467   :  { %v2053_v20 = vadd.f32 %v2052_v31, %v1510_v8  ;;  %v571_v8 = vld [vmem:[%s13528_s1 + $0x700] sm:$0xff]  ;;  %v568_v31 = vld [vmem:[%s13528_s1 + $0x6e8] sm:$0xff] }
 0x468   :  { %v1525_v37 = vpop.f32.mrf.mxu1 }
 0x469   :  { %7950 = vmatmul.msk.f32.gmra.mxu0 %vm2382_vm3, %v2053_v20  ;;  %v9999_v20 = vpop.f32.mrf.mxu3 }
 0x46b   :  { %1572 = vmatmul.f32.gmra.mxu1 %v569_v53  ;;  %7792 = vmatmul.msk.f32.gmra.mxu2 %vm697_vm2, %v562_v32  ;;  %v2350_v53 = vld [vmem:[%s13532_s5 + $0x158] sm:$0xff] }
 0x46e   :  { %v2055_v43 = vpop.f32.mrf.mxu2 }
 0x46f   :  { %v2056_v45 = vadd.f32 %v2055_v43, %v1513_v15  ;;  %v573_v15 = vld [vmem:[%s13528_s1 + $0x710] sm:$0xff] }
 0x470   :  { %v1528_v44 = vpop.f32.mrf.mxu1 }
 0x471   :  { %7951 = vmatmul.msk.f32.vlgmr.msra.gmra.mxu3 %vm2382_vm3, %v2056_v45  ;;  %v2349_v45 = vld [vmem:[%s13532_s5 + $0x150] sm:$0xff] }
 0x473   :  { %1575 = vmatmul.f32.gmra.mxu1 %v571_v8  ;;  %7793 = vmatmul.msk.f32.gmra.mxu2 %vm697_vm2, %v564_v40  ;;  %v577_v40 = vld [vmem:[%s13528_s1 + $0x730] sm:$0xff] }
 0x476   :  { %v2058_v63 = vpop.f32.mrf.mxu2 }
 0x477   :  { %v2059_v1 = vadd.f32 %v2058_v63, %v1516_v56  ;;  %v575_v56 = vld [vmem:[%s13528_s1 + $0x720] sm:$0xff]  ;;  %v570_v63 = vld [vmem:[%s13528_s1 + $0x6f8] sm:$0xff] }
 0x478   :  { %v1531_v62 = vpop.f32.mrf.mxu1 }
 0x479   :  { %7952 = vmatmul.msk.f32.gmra.mxu3 %vm2382_vm3, %v2059_v1 }
 0x47b   :  { %1578 = vmatmul.f32.gmra.mxu1 %v573_v15  ;;  %7794 = vmatmul.msk.f32.gmra.mxu2 %vm697_vm2, %v566_v5 }
 0x47e   :  { %v2061_v25 = vpop.f32.mrf.mxu2 }
 0x47f   :  { %v2062_v50 = vadd.f32 %v2061_v25, %v1519_v7  ;;  %v2351_v7 = vld [vmem:[%s13532_s5 + $0x160] sm:$0xff] }
 0x480   :  { %v1534_v11 = vpop.f32.mrf.mxu1  ;;  %3327 = vmatpush.msra.mxu0 %v2351_v7  ;;  %v579_v25 = vld [vmem:[%s13528_s1 + $0x740] sm:$0xff] }
 0x481   :  { %7953 = vmatmul.msk.f32.gmra.mxu3 %vm2382_vm3, %v2062_v50  ;;  %v572_v50 = vld [vmem:[%s13528_s1 + $0x708] sm:$0xff] }
 0x482   :  { %3328 = vmatpush.msra.mxu0 %v2350_v53 }
 0x483   :  { %1581 = vmatmul.f32.gmra.mxu1 %v575_v56  ;;  %7795 = vmatmul.msk.f32.gmra.mxu2 %vm697_vm2, %v568_v31 }
 0x484   :  { %3329 = vmatpush.msra.mxu0 %v2349_v45  ;;  %v10039_v45 = vpop.f32.mrf.mxu0 }
 0x486   :  { %v2064_v32 = vpop.f32.mrf.mxu2 }
 0x487   :  { %v2065_v43 = vadd.f32 %v2064_v32, %v1522_v17  ;;  %v10019_v17 = vpop.f32.mrf.mxu3  ;;  %v574_v32 = vld [vmem:[%s13528_s1 + $0x718] sm:$0xff] }
 0x488   :  { %v1537_v8 = vpop.f32.mrf.mxu1  ;;  %13563 = vst [vmem:[#allocation13_spill] sm:$0xff] %v10019_v17  ;;  %v593_v17 = vld [vmem:[%s13528_s1 + $0x7b0] sm:$0xff] }
 0x489   :  { %7954 = vmatmul.msk.f32.gmra.mxu3 %vm2382_vm3, %v2065_v43 }
 0x48b   :  { %1584 = vmatmul.f32.gmra.mxu1 %v577_v40  ;;  %7796 = vmatmul.msk.f32.gmra.mxu2 %vm697_vm2, %v570_v63 }
 0x48e   :  { %v2067_v1 = vpop.f32.mrf.mxu2 }
 0x48f   :  { %v2068_v15 = vadd.f32 %v2067_v1, %v1525_v37  ;;  %v10029_v31 = vpop.f32.mrf.mxu3  ;;  %v581_v37 = vld [vmem:[%s13528_s1 + $0x750] sm:$0xff]  ;;  %v576_v1 = vld [vmem:[%s13528_s1 + $0x728] sm:$0xff] }
 0x490   :  { %v1540_v5 = vpop.f32.mrf.mxu1  ;;  %13564 = vst [vmem:[#allocation14_spill] sm:$0xff] %v10029_v31  ;;  %v586_v31 = vld [vmem:[%s13528_s1 + $0x778] sm:$0xff] }
 0x491   :  { %7955 = vmatmul.msk.f32.gmra.mxu3 %vm2382_vm3, %v2068_v15 }
 0x493   :  { %1587 = vmatmul.f32.gmra.mxu1 %v579_v25  ;;  %7797 = vmatmul.msk.f32.gmra.mxu2 %vm697_vm2, %v572_v50 }
 0x496   :  { %v2070_v56 = vpop.f32.mrf.mxu2 }
 0x497   :  { %v2071_v7 = vadd.f32 %v2070_v56, %v1528_v44  ;;  %v583_v44 = vld [vmem:[%s13528_s1 + $0x760] sm:$0xff]  ;;  %v10047_v15 = vpop.f32.mrf.mxu3 }
 0x498   :  { %v1543_v53 = vpop.f32.mrf.mxu1  ;;  %13565 = vst [vmem:[#allocation15_spill] sm:$0xff] %v10047_v15 }
 0x499   :  { %7956 = vmatmul.msk.f32.gmra.mxu3 %vm2382_vm3, %v2071_v7  ;;  %v578_v7 = vld [vmem:[%s13528_s1 + $0x738] sm:$0xff] }
 0x49b   :  { %1590 = vmatmul.f32.gmra.mxu1 %v581_v37  ;;  %7798 = vmatmul.msk.f32.gmra.mxu2 %vm697_vm2, %v574_v32  ;;  %v10057_v37 = vpop.f32.mrf.mxu0 }
 0x49e   :  { %v2073_v43 = vpop.f32.mrf.mxu2 }
 0x49f   :  { %v2074_v40 = vadd.f32 %v2073_v43, %v1531_v62  ;;  %v585_v62 = vld [vmem:[%s13528_s1 + $0x770] sm:$0xff] }
 0x4a0   :  { %v1546_v63 = vpop.f32.mrf.mxu1 }
 0x4a1   :  { %7957 = vmatmul.msk.f32.gmra.mxu3 %vm2382_vm3, %v2074_v40 }
 0x4a3   :  { %1593 = vmatmul.f32.gmra.mxu1 %v583_v44  ;;  %7799 = vmatmul.msk.f32.gmra.mxu2 %vm697_vm2, %v576_v1  ;;  %v580_v44 = vld [vmem:[%s13528_s1 + $0x748] sm:$0xff]  ;;  %v10068_v1 = vpop.f32.mrf.mxu0 }
 0x4a6   :  { %v2076_v25 = vpop.f32.mrf.mxu2 }
 0x4a7   :  { %v2077_v50 = vadd.f32 %v2076_v25, %v1534_v11  ;;  %v587_v11 = vld [vmem:[%s13528_s1 + $0x780] sm:$0xff] }
 0x4a8   :  { %v1549_v56 = vpop.f32.mrf.mxu1 }
 0x4a9   :  { %7958 = vmatmul.msk.f32.vlgmr.msra.gmra.mxu0 %vm2382_vm3, %v2077_v50 }
 0x4ab   :  { %1596 = vmatmul.f32.gmra.mxu1 %v585_v62  ;;  %7800 = vmatmul.msk.f32.gmra.mxu2 %vm697_vm2, %v578_v7  ;;  %v582_v7 = vld [vmem:[%s13528_s1 + $0x758] sm:$0xff] }
 0x4ae   :  { %v2079_v32 = vpop.f32.mrf.mxu2 }
 0x4af   :  { %v2080_v43 = vadd.f32 %v2079_v32, %v1537_v8  ;;  %v589_v8 = vld [vmem:[%s13528_s1 + $0x790] sm:$0xff]  ;;  %v10078_v32 = vpop.f32.mrf.mxu0 }
 0x4b0   :  { %v1552_v40 = vpop.f32.mrf.mxu1 }
 0x4b1   :  { %7959 = vmatmul.msk.f32.gmra.mxu0 %vm2382_vm3, %v2080_v43  ;;  %v2353_v43 = vld [vmem:[%s13532_s5 + $0x170] sm:$0xff] }
 0x4b3   :  { %1599 = vmatmul.f32.gmra.mxu1 %v587_v11  ;;  %7801 = vmatmul.msk.f32.gmra.mxu2 %vm697_vm2, %v580_v44 }
 0x4b6   :  { %v2082_v25 = vpop.f32.mrf.mxu2 }
 0x4b7   :  { %v2083_v50 = vadd.f32 %v2082_v25, %v1540_v5  ;;  %v2354_v5 = vld [vmem:[%s13532_s5 + $0x178] sm:$0xff]  ;;  %v2352_v25 = vld [vmem:[%s13532_s5 + $0x168] sm:$0xff] }
 0x4b8   :  { %v1555_v62 = vpop.f32.mrf.mxu1  ;;  %3393 = vmatpush.msrb.mxu3 %v2354_v5 }
 0x4b9   :  { %7960 = vmatmul.msk.f32.gmra.mxu0 %vm2382_vm3, %v2083_v50 }
 0x4ba   :  { %3394 = vmatpush.msrb.mxu3 %v2353_v43 }
 0x4bb   :  { %1602 = vmatmul.f32.gmra.mxu1 %v589_v8  ;;  %7802 = vmatmul.msk.f32.gmra.mxu2 %vm697_vm2, %v582_v7  ;;  %v591_v8 = vld [vmem:[%s13528_s1 + $0x7a0] sm:$0xff]  ;;  %v584_v7 = vld [vmem:[%s13528_s1 + $0x768] sm:$0xff] }
 0x4bc   :  { %3395 = vmatpush.msrb.mxu3 %v2352_v25 }
 0x4be   :  { %v2085_v11 = vpop.f32.mrf.mxu2 }
 0x4bf   :  { %v2086_v44 = vadd.f32 %v2085_v11, %v1543_v53  ;;  %v10098_v53 = vpop.f32.mrf.mxu0 }
 0x4c0   :  { %v1558_v50 = vpop.f32.mrf.mxu1  ;;  %13566 = vst [vmem:[#allocation16_spill] sm:$0xff] %v10098_v53 }
 0x4c1   :  { %7961 = vmatmul.msk.f32.gmra.mxu0 %vm2382_vm3, %v2086_v44 }
 0x4c3   :  { %1605 = vmatmul.f32.gmra.mxu1 %v591_v8  ;;  %7803 = vmatmul.msk.f32.gmra.mxu2 %vm697_vm2, %v584_v7 }
 0x4c6   :  { %v2088_v5 = vpop.f32.mrf.mxu2 }
 0x4c7   :  { %v2089_v43 = vadd.f32 %v2088_v5, %v1546_v63  ;;  %v10108_v25 = vpop.f32.mrf.mxu0  ;;  %v595_v63 = vld [vmem:[%s13528_s1 + $0x7c0] sm:$0xff]  ;;  %v588_v5 = vld [vmem:[%s13528_s1 + $0x788] sm:$0xff] }
 0x4c8   :  { %v1561_v11 = vpop.f32.mrf.mxu1  ;;  %13567 = vst [vmem:[#allocation17_spill] sm:$0xff] %v10108_v25 }
 0x4c9   :  { %7962 = vmatmul.msk.f32.gmra.mxu0 %vm2382_vm3, %v2089_v43 }
 0x4cb   :  { %1608 = vmatmul.f32.gmra.mxu1 %v593_v17  ;;  %7804 = vmatmul.msk.f32.gmra.mxu2 %vm697_vm2, %v586_v31  ;;  %v10118_v31 = vpop.f32.mrf.mxu3 }
 0x4cc   :  { %13568 = vst [vmem:[#allocation18_spill] sm:$0xff] %v10118_v31  ;;  %v635_v31 = vld [vmem:[%s13528_s1 + $0x900] sm:$0xff] }
 0x4ce   :  { %v2091_v44 = vpop.f32.mrf.mxu2 }
 0x4cf   :  { %v2092_v8 = vadd.f32 %v2091_v44, %v1549_v56  ;;  %v597_v56 = vld [vmem:[%s13528_s1 + $0x7d0] sm:$0xff]  ;;  %v590_v44 = vld [vmem:[%s13528_s1 + $0x798] sm:$0xff]  ;;  %v10126_v25 = vpop.f32.mrf.mxu0 }
 0x4d0   :  { %v1564_v7 = vpop.f32.mrf.mxu1  ;;  %13569 = vst [vmem:[#allocation19_spill] sm:$0xff] %v10126_v25 }
 0x4d1   :  { %7963 = vmatmul.msk.f32.gmra.mxu0 %vm2382_vm3, %v2092_v8 }
 0x4d3   :  { %1611 = vmatmul.f32.gmra.mxu1 %v595_v63  ;;  %7805 = vmatmul.msk.f32.gmra.mxu2 %vm697_vm2, %v588_v5  ;;  %v10136_v51 = vpop.f32.mrf.mxu3 }
 0x4d4   :  { %13570 = vst [vmem:[#allocation20_spill] sm:$0xff] %v10136_v51  ;;  %v649_v51 = vld [vmem:[%s13528_s1 + $0x970] sm:$0xff] }
 0x4d6   :  { %v2094_v17 = vpop.f32.mrf.mxu2 }
 0x4d7   :  { %v2095_v43 = vadd.f32 %v2094_v17, %v1552_v40  ;;  %v599_v40 = vld [vmem:[%s13528_s1 + $0x7e0] sm:$0xff]  ;;  %v592_v17 = vld [vmem:[%s13528_s1 + $0x7a8] sm:$0xff] }
 0x4d8   :  { %v1567_v53 = vpop.f32.mrf.mxu1 }
 0x4d9   :  { %7964 = vmatmul.msk.f32.gmra.mxu0 %vm2382_vm3, %v2095_v43 }
 0x4db   :  { %1614 = vmatmul.f32.gmra.mxu1 %v597_v56  ;;  %7806 = vmatmul.msk.f32.gmra.mxu2 %vm697_vm2, %v590_v44  ;;  %v10147_v25 = vpop.f32.mrf.mxu3 }
 0x4de   :  { %v2097_v8 = vpop.f32.mrf.mxu2 }
 0x4df   :  { %v2098_v63 = vadd.f32 %v2097_v8, %v1555_v62  ;;  %v601_v62 = vld [vmem:[%s13528_s1 + $0x7f0] sm:$0xff]  ;;  %v594_v8 = vld [vmem:[%s13528_s1 + $0x7b8] sm:$0xff] }
 0x4e0   :  { %v1570_v5 = vpop.f32.mrf.mxu1 }
 0x4e1   :  { %7965 = vmatmul.msk.f32.vlgmr.msrb.gmra.mxu3 %vm2382_vm3, %v2098_v63 }
 0x4e3   :  { %1617 = vmatmul.f32.gmra.mxu1 %v599_v40  ;;  %7807 = vmatmul.msk.f32.gmra.mxu2 %vm697_vm2, %v592_v17  ;;  %v10157_v15 = vpop.f32.mrf.mxu3 }
 0x4e6   :  { %v2100_v43 = vpop.f32.mrf.mxu2 }
 0x4e7   :  { %v2101_v56 = vadd.f32 %v2100_v43, %v1558_v50  ;;  %v603_v50 = vld [vmem:[%s13528_s1 + $0x800] sm:$0xff]  ;;  %v596_v43 = vld [vmem:[%s13528_s1 + $0x7c8] sm:$0xff] }
 0x4e8   :  { %v1573_v44 = vpop.f32.mrf.mxu1 }
 0x4e9   :  { %7966 = vmatmul.msk.f32.gmra.mxu3 %vm2382_vm3, %v2101_v56  ;;  %v2356_v56 = vld [vmem:[%s13532_s5 + $0x188] sm:$0xff] }
 0x4eb   :  { %1620 = vmatmul.f32.gmra.mxu1 %v601_v62  ;;  %7808 = vmatmul.msk.f32.gmra.mxu2 %vm697_vm2, %v594_v8 }
 0x4ee   :  { %v2103_v63 = vpop.f32.mrf.mxu2 }
 0x4ef   :  { %v2104_v40 = vadd.f32 %v2103_v63, %v1561_v11  ;;  %v2357_v11 = vld [vmem:[%s13532_s5 + $0x190] sm:$0xff]  ;;  %v2355_v63 = vld [vmem:[%s13532_s5 + $0x180] sm:$0xff] }
 0x4f0   :  { %v1576_v17 = vpop.f32.mrf.mxu1  ;;  %3459 = vmatpush.msrb.mxu0 %v2357_v11 }
 0x4f1   :  { %7967 = vmatmul.msk.f32.gmra.mxu3 %vm2382_vm3, %v2104_v40 }
 0x4f2   :  { %3460 = vmatpush.msrb.mxu0 %v2356_v56 }
 0x4f3   :  { %1623 = vmatmul.f32.gmra.mxu1 %v603_v50  ;;  %7809 = vmatmul.msk.f32.gmra.mxu2 %vm697_vm2, %v596_v43  ;;  %v605_v50 = vld [vmem:[%s13528_s1 + $0x810] sm:$0xff]  ;;  %v598_v43 = vld [vmem:[%s13528_s1 + $0x7d8] sm:$0xff] }
 0x4f4   :  { %3461 = vmatpush.msrb.mxu0 %v2355_v63 }
 0x4f6   :  { %v2106_v62 = vpop.f32.mrf.mxu2 }
 0x4f7   :  { %v2107_v8 = vadd.f32 %v2106_v62, %v1564_v7  ;;  %v10177_v7 = vpop.f32.mrf.mxu3 }
 0x4f8   :  { %v1579_v40 = vpop.f32.mrf.mxu1  ;;  %13571 = vst [vmem:[#allocation21_spill] sm:$0xff] %v10177_v7 }
 0x4f9   :  { %7968 = vmatmul.msk.f32.gmra.mxu3 %vm2382_vm3, %v2107_v8 }
 0x4fb   :  { %1626 = vmatmul.f32.gmra.mxu1 %v605_v50  ;;  %7810 = vmatmul.msk.f32.gmra.mxu2 %vm697_vm2, %v598_v43 }
 0x4fe   :  { %v2109_v11 = vpop.f32.mrf.mxu2 }
 0x4ff   :  { %v2110_v56 = vadd.f32 %v2109_v11, %v1567_v53  ;;  %v10187_v63 = vpop.f32.mrf.mxu3  ;;  %v609_v53 = vld [vmem:[%s13528_s1 + $0x830] sm:$0xff]  ;;  %v602_v11 = vld [vmem:[%s13528_s1 + $0x7f8] sm:$0xff] }
 0x500   :  { %v1582_v62 = vpop.f32.mrf.mxu1  ;;  %13572 = vst [vmem:[#allocation22_spill] sm:$0xff] %v10187_v63 }
 0x501   :  { %7969 = vmatmul.msk.f32.gmra.mxu3 %vm2382_vm3, %v2110_v56 }
 0x503   :  { %1629 = vmatmul.f32.gmra.mxu1 %v607_v22  ;;  %7811 = vmatmul.msk.f32.gmra.mxu2 %vm697_vm2, %v600_v35  ;;  %v10197_v35 = vpop.f32.mrf.mxu0 }
 0x504   :  { %13573 = vst [vmem:[#allocation23_spill] sm:$0xff] %v10197_v35 }
 0x506   :  { %v2112_v8 = vpop.f32.mrf.mxu2 }
 0x507   :  { %v2113_v50 = vadd.f32 %v2112_v8, %v1570_v5  ;;  %v611_v5 = vld [vmem:[%s13528_s1 + $0x840] sm:$0xff]  ;;  %v604_v8 = vld [vmem:[%s13528_s1 + $0x808] sm:$0xff]  ;;  %v10205_v63 = vpop.f32.mrf.mxu3 }
 0x508   :  { %v1585_v43 = vpop.f32.mrf.mxu1  ;;  %13574 = vst [vmem:[#allocation24_spill] sm:$0xff] %v10205_v63 }
 0x509   :  { %7970 = vmatmul.msk.f32.gmra.mxu3 %vm2382_vm3, %v2113_v50 }
 0x50b   :  { %1632 = vmatmul.f32.gmra.mxu1 %v609_v53  ;;  %7812 = vmatmul.msk.f32.gmra.mxu2 %vm697_vm2, %v602_v11  ;;  %v10215_v35 = vpop.f32.mrf.mxu0 }
 0x50c   :  { %13575 = vst [vmem:[#allocation25_spill] sm:$0xff] %v10215_v35 }
 0x50e   :  { %v2115_v22 = vpop.f32.mrf.mxu2 }
 0x50f   :  { %v2116_v56 = vadd.f32 %v2115_v22, %v1573_v44  ;;  %v613_v44 = vld [vmem:[%s13528_s1 + $0x850] sm:$0xff]  ;;  %v606_v22 = vld [vmem:[%s13528_s1 + $0x818] sm:$0xff] }
 0x510   :  { %v1588_v7 = vpop.f32.mrf.mxu1 }
 0x511   :  { %7971 = vmatmul.msk.f32.gmra.mxu3 %vm2382_vm3, %v2116_v56 }
 0x513   :  { %1635 = vmatmul.f32.gmra.mxu1 %v611_v5  ;;  %7813 = vmatmul.msk.f32.gmra.mxu2 %vm697_vm2, %v604_v8  ;;  %v10226_v63 = vpop.f32.mrf.mxu0 }
 0x516   :  { %v2118_v50 = vpop.f32.mrf.mxu2 }
 0x517   :  { %v2119_v53 = vadd.f32 %v2118_v50, %v1576_v17  ;;  %v615_v17 = vld [vmem:[%s13528_s1 + $0x860] sm:$0xff]  ;;  %v608_v50 = vld [vmem:[%s13528_s1 + $0x828] sm:$0xff] }
 0x518   :  { %v1591_v11 = vpop.f32.mrf.mxu1 }
 0x519   :  { %7972 = vmatmul.msk.f32.vlgmr.msrb.gmra.mxu0 %vm2382_vm3, %v2119_v53 }
 0x51b   :  { %1638 = vmatmul.f32.gmra.mxu1 %v613_v44  ;;  %7814 = vmatmul.msk.f32.gmra.mxu2 %vm697_vm2, %v606_v22  ;;  %v10236_v35 = vpop.f32.mrf.mxu0 }
 0x51e   :  { %v2121_v56 = vpop.f32.mrf.mxu2 }
 0x51f   :  { %v2122_v5 = vadd.f32 %v2121_v56, %v1579_v40  ;;  %v617_v40 = vld [vmem:[%s13528_s1 + $0x870] sm:$0xff]  ;;  %v610_v56 = vld [vmem:[%s13528_s1 + $0x838] sm:$0xff] }
 0x520   :  { %v1594_v8 = vpop.f32.mrf.mxu1 }
 0x521   :  { %7973 = vmatmul.msk.f32.gmra.mxu0 %vm2382_vm3, %v2122_v5  ;;  %v2359_v5 = vld [vmem:[%s13532_s5 + $0x1a0] sm:$0xff] }
 0x523   :  { %1641 = vmatmul.f32.gmra.mxu1 %v615_v17  ;;  %7815 = vmatmul.msk.f32.gmra.mxu2 %vm697_vm2, %v608_v50 }
 0x526   :  { %v2124_v53 = vpop.f32.mrf.mxu2 }
 0x527   :  { %v2125_v44 = vadd.f32 %v2124_v53, %v1582_v62  ;;  %v2360_v62 = vld [vmem:[%s13532_s5 + $0x1a8] sm:$0xff]  ;;  %v2358_v53 = vld [vmem:[%s13532_s5 + $0x198] sm:$0xff] }
 0x528   :  { %v1597_v22 = vpop.f32.mrf.mxu1  ;;  %3525 = vmatpush.msra.mxu3 %v2360_v62 }
 0x529   :  { %7974 = vmatmul.msk.f32.gmra.mxu0 %vm2382_vm3, %v2125_v44 }
 0x52a   :  { %3526 = vmatpush.msra.mxu3 %v2359_v5 }
 0x52b   :  { %1644 = vmatmul.f32.gmra.mxu1 %v617_v40  ;;  %7816 = vmatmul.msk.f32.gmra.mxu2 %vm697_vm2, %v610_v56  ;;  %v619_v40 = vld [vmem:[%s13528_s1 + $0x880] sm:$0xff]  ;;  %v612_v56 = vld [vmem:[%s13528_s1 + $0x848] sm:$0xff] }
 0x52c   :  { %3527 = vmatpush.msra.mxu3 %v2358_v53 }
 0x52e   :  { %v2127_v17 = vpop.f32.mrf.mxu2 }
 0x52f   :  { %v2128_v50 = vadd.f32 %v2127_v17, %v1585_v43  ;;  %v10256_v43 = vpop.f32.mrf.mxu0 }
 0x530   :  { %v1600_v44 = vpop.f32.mrf.mxu1  ;;  %13576 = vst [vmem:[#allocation26_spill] sm:$0xff] %v10256_v43 }
 0x531   :  { %7975 = vmatmul.msk.f32.gmra.mxu0 %vm2382_vm3, %v2128_v50 }
 0x533   :  { %1647 = vmatmul.f32.gmra.mxu1 %v619_v40  ;;  %7817 = vmatmul.msk.f32.gmra.mxu2 %vm697_vm2, %v612_v56 }
 0x536   :  { %v2130_v62 = vpop.f32.mrf.mxu2 }
 0x537   :  { %v2131_v5 = vadd.f32 %v2130_v62, %v1588_v7  ;;  %v10266_v53 = vpop.f32.mrf.mxu0  ;;  %v623_v7 = vld [vmem:[%s13528_s1 + $0x8a0] sm:$0xff]  ;;  %v616_v62 = vld [vmem:[%s13528_s1 + $0x868] sm:$0xff] }
 0x538   :  { %v1603_v17 = vpop.f32.mrf.mxu1  ;;  %13577 = vst [vmem:[#allocation27_spill] sm:$0xff] %v10266_v53 }
 0x539   :  { %7976 = vmatmul.msk.f32.gmra.mxu0 %vm2382_vm3, %v2131_v5 }
 0x53b   :  { %1650 = vmatmul.f32.gmra.mxu1 %v621_v41  ;;  %7818 = vmatmul.msk.f32.gmra.mxu2 %vm697_vm2, %v614_v42  ;;  %v10276_v42 = vpop.f32.mrf.mxu3 }
 0x53c   :  { %13578 = vst [vmem:[#allocation28_spill] sm:$0xff] %v10276_v42 }
 0x53e   :  { %v2133_v50 = vpop.f32.mrf.mxu2 }
 0x53f   :  { %v2134_v40 = vadd.f32 %v2133_v50, %v1591_v11  ;;  %v625_v11 = vld [vmem:[%s13528_s1 + $0x8b0] sm:$0xff]  ;;  %v618_v50 = vld [vmem:[%s13528_s1 + $0x878] sm:$0xff]  ;;  %v10284_v53 = vpop.f32.mrf.mxu0 }
 0x540   :  { %v1606_v56 = vpop.f32.mrf.mxu1  ;;  %13579 = vst [vmem:[#allocation29_spill] sm:$0xff] %v10284_v53 }
 0x541   :  { %7977 = vmatmul.msk.f32.gmra.mxu0 %vm2382_vm3, %v2134_v40 }
 0x543   :  { %1653 = vmatmul.f32.gmra.mxu1 %v623_v7  ;;  %7819 = vmatmul.msk.f32.gmra.mxu2 %vm697_vm2, %v616_v62  ;;  %v10294_v42 = vpop.f32.mrf.mxu3 }
 0x544   :  { %13580 = vst [vmem:[#allocation30_spill] sm:$0xff] %v10294_v42 }
 0x546   :  { %v2136_v41 = vpop.f32.mrf.mxu2 }
 0x547   :  { %v2137_v5 = vadd.f32 %v2136_v41, %v1594_v8  ;;  %v627_v8 = vld [vmem:[%s13528_s1 + $0x8c0] sm:$0xff]  ;;  %v620_v41 = vld [vmem:[%s13528_s1 + $0x888] sm:$0xff] }
 0x548   :  { %v1609_v43 = vpop.f32.mrf.mxu1 }
 0x549   :  { %7978 = vmatmul.msk.f32.gmra.mxu0 %vm2382_vm3, %v2137_v5 }
 0x54b   :  { %1656 = vmatmul.f32.gmra.mxu1 %v625_v11  ;;  %7820 = vmatmul.msk.f32.gmra.mxu2 %vm697_vm2, %v618_v50  ;;  %v10305_v53 = vpop.f32.mrf.mxu3 }
 0x54e   :  { %v2139_v40 = vpop.f32.mrf.mxu2 }
 0x54f   :  { %v2140_v7 = vadd.f32 %v2139_v40, %v1597_v22  ;;  %v629_v22 = vld [vmem:[%s13528_s1 + $0x8d0] sm:$0xff]  ;;  %v622_v40 = vld [vmem:[%s13528_s1 + $0x898] sm:$0xff] }
 0x550   :  { %v1612_v62 = vpop.f32.mrf.mxu1 }
 0x551   :  { %7979 = vmatmul.msk.f32.vlgmr.msra.gmra.mxu3 %vm2382_vm3, %v2140_v7 }
 0x553   :  { %1659 = vmatmul.f32.gmra.mxu1 %v627_v8  ;;  %7821 = vmatmul.msk.f32.gmra.mxu2 %vm697_vm2, %v620_v41  ;;  %v10315_v42 = vpop.f32.mrf.mxu3 }
 0x556   :  { %v2142_v5 = vpop.f32.mrf.mxu2 }
 0x557   :  { %v2143_v11 = vadd.f32 %v2142_v5, %v1600_v44  ;;  %v631_v44 = vld [vmem:[%s13528_s1 + $0x8e0] sm:$0xff]  ;;  %v624_v5 = vld [vmem:[%s13528_s1 + $0x8a8] sm:$0xff] }
 0x558   :  { %v1615_v50 = vpop.f32.mrf.mxu1 }
 0x559   :  { %7980 = vmatmul.msk.f32.gmra.mxu3 %vm2382_vm3, %v2143_v11  ;;  %v2362_v11 = vld [vmem:[%s13532_s5 + $0x1b8] sm:$0xff] }
 0x55b   :  { %1662 = vmatmul.f32.gmra.mxu1 %v629_v22  ;;  %7822 = vmatmul.msk.f32.gmra.mxu2 %vm697_vm2, %v622_v40 }
 0x55e   :  { %v2145_v7 = vpop.f32.mrf.mxu2 }
 0x55f   :  { %v2146_v8 = vadd.f32 %v2145_v7, %v1603_v17  ;;  %v2363_v17 = vld [vmem:[%s13532_s5 + $0x1c0] sm:$0xff]  ;;  %v2361_v7 = vld [vmem:[%s13532_s5 + $0x1b0] sm:$0xff] }
 0x560   :  { %v1618_v41 = vpop.f32.mrf.mxu1  ;;  %3591 = vmatpush.msra.mxu0 %v2363_v17 }
 0x561   :  { %7981 = vmatmul.msk.f32.gmra.mxu3 %vm2382_vm3, %v2146_v8 }
 0x562   :  { %3592 = vmatpush.msra.mxu0 %v2362_v11 }
 0x563   :  { %1665 = vmatmul.f32.gmra.mxu1 %v631_v44  ;;  %7823 = vmatmul.msk.f32.gmra.mxu2 %vm697_vm2, %v624_v5  ;;  %v633_v44 = vld [vmem:[%s13528_s1 + $0x8f0] sm:$0xff]  ;;  %v626_v5 = vld [vmem:[%s13528_s1 + $0x8b8] sm:$0xff] }
 0x564   :  { %3593 = vmatpush.msra.mxu0 %v2361_v7 }
 0x566   :  { %v2148_v22 = vpop.f32.mrf.mxu2 }
 0x567   :  { %v2149_v40 = vadd.f32 %v2148_v22, %v1606_v56  ;;  %v10335_v56 = vpop.f32.mrf.mxu3 }
 0x568   :  { %v1621_v8 = vpop.f32.mrf.mxu1  ;;  %13581 = vst [vmem:[#allocation31_spill] sm:$0xff] %v10335_v56 }
 0x569   :  { %7982 = vmatmul.msk.f32.gmra.mxu3 %vm2382_vm3, %v2149_v40 }
 0x56b   :  { %1668 = vmatmul.f32.gmra.mxu1 %v633_v44  ;;  %7824 = vmatmul.msk.f32.gmra.mxu2 %vm697_vm2, %v626_v5 }
 0x56e   :  { %v2151_v17 = vpop.f32.mrf.mxu2 }
 0x56f   :  { %v2152_v11 = vadd.f32 %v2151_v17, %v1609_v43  ;;  %v10345_v7 = vpop.f32.mrf.mxu3  ;;  %v637_v43 = vld [vmem:[%s13528_s1 + $0x910] sm:$0xff]  ;;  %v630_v17 = vld [vmem:[%s13528_s1 + $0x8d8] sm:$0xff] }
 0x570   :  { %v1624_v22 = vpop.f32.mrf.mxu1  ;;  %13582 = vst [vmem:[#allocation32_spill] sm:$0xff] %v10345_v7 }
 0x571   :  { %7983 = vmatmul.msk.f32.gmra.mxu3 %vm2382_vm3, %v2152_v11 }
 0x573   :  { %1671 = vmatmul.f32.gmra.mxu1 %v635_v31  ;;  %7825 = vmatmul.msk.f32.gmra.mxu2 %vm697_vm2, %v628_v36  ;;  %v10355_v36 = vpop.f32.mrf.mxu0 }
 0x574   :  { %13583 = vst [vmem:[#allocation33_spill] sm:$0xff] %v10355_v36 }
 0x576   :  { %v2154_v40 = vpop.f32.mrf.mxu2 }
 0x577   :  { %v2155_v44 = vadd.f32 %v2154_v40, %v1612_v62  ;;  %v639_v62 = vld [vmem:[%s13528_s1 + $0x920] sm:$0xff]  ;;  %v632_v40 = vld [vmem:[%s13528_s1 + $0x8e8] sm:$0xff]  ;;  %v10363_v7 = vpop.f32.mrf.mxu3 }
 0x578   :  { %v1627_v5 = vpop.f32.mrf.mxu1  ;;  %13584 = vst [vmem:[#allocation34_spill] sm:$0xff] %v10363_v7 }
 0x579   :  { %7984 = vmatmul.msk.f32.gmra.mxu3 %vm2382_vm3, %v2155_v44 }
 0x57b   :  { %1674 = vmatmul.f32.gmra.mxu1 %v637_v43  ;;  %7826 = vmatmul.msk.f32.gmra.mxu2 %vm697_vm2, %v630_v17  ;;  %v10373_v36 = vpop.f32.mrf.mxu0 }
 0x57c   :  { %13585 = vst [vmem:[#allocation35_spill] sm:$0xff] %v10373_v36 }
 0x57e   :  { %v2157_v31 = vpop.f32.mrf.mxu2 }
 0x57f   :  { %v2158_v11 = vadd.f32 %v2157_v31, %v1615_v50  ;;  %v641_v50 = vld [vmem:[%s13528_s1 + $0x930] sm:$0xff]  ;;  %v634_v31 = vld [vmem:[%s13528_s1 + $0x8f8] sm:$0xff] }
 0x580   :  { %v1630_v56 = vpop.f32.mrf.mxu1 }
 0x581   :  { %7985 = vmatmul.msk.f32.gmra.mxu3 %vm2382_vm3, %v2158_v11 }
 0x583   :  { %1677 = vmatmul.f32.gmra.mxu1 %v639_v62  ;;  %7827 = vmatmul.msk.f32.gmra.mxu2 %vm697_vm2, %v632_v40  ;;  %v10384_v7 = vpop.f32.mrf.mxu0 }
 0x586   :  { %v2160_v44 = vpop.f32.mrf.mxu2 }
 0x587   :  { %v2161_v43 = vadd.f32 %v2160_v44, %v1618_v41  ;;  %v643_v41 = vld [vmem:[%s13528_s1 + $0x940] sm:$0xff]  ;;  %v636_v44 = vld [vmem:[%s13528_s1 + $0x908] sm:$0xff] }
 0x588   :  { %v1633_v17 = vpop.f32.mrf.mxu1 }
 0x589   :  { %7986 = vmatmul.msk.f32.vlgmr.msra.gmra.mxu0 %vm2382_vm3, %v2161_v43 }
 0x58b   :  { %1680 = vmatmul.f32.gmra.mxu1 %v641_v50  ;;  %7828 = vmatmul.msk.f32.gmra.mxu2 %vm697_vm2, %v634_v31  ;;  %v10394_v36 = vpop.f32.mrf.mxu0 }
 0x58c   :  { %13586 = vst [vmem:[#allocation36_spill] sm:$0xff] %v10394_v36 }
 0x58e   :  { %v2163_v11 = vpop.f32.mrf.mxu2 }
 0x58f   :  { %v2164_v62 = vadd.f32 %v2163_v11, %v1621_v8  ;;  %v645_v8 = vld [vmem:[%s13528_s1 + $0x950] sm:$0xff]  ;;  %v638_v11 = vld [vmem:[%s13528_s1 + $0x918] sm:$0xff] }
 0x590   :  { %v1636_v40 = vpop.f32.mrf.mxu1 }
 0x591   :  { %7987 = vmatmul.msk.f32.gmra.mxu0 %vm2382_vm3, %v2164_v62  ;;  %v2365_v62 = vld [vmem:[%s13532_s5 + $0x1d0] sm:$0xff] }
 0x593   :  { %1683 = vmatmul.f32.gmra.mxu1 %v643_v41  ;;  %7829 = vmatmul.msk.f32.gmra.mxu2 %vm697_vm2, %v636_v44 }
 0x596   :  { %v2166_v43 = vpop.f32.mrf.mxu2 }
 0x597   :  { %v2167_v50 = vadd.f32 %v2166_v43, %v1624_v22  ;;  %v2366_v22 = vld [vmem:[%s13532_s5 + $0x1d8] sm:$0xff]  ;;  %v2364_v43 = vld [vmem:[%s13532_s5 + $0x1c8] sm:$0xff] }
 0x598   :  { %v1639_v31 = vpop.f32.mrf.mxu1  ;;  %3657 = vmatpush.msrb.mxu3 %v2366_v22 }
 0x599   :  { %7988 = vmatmul.msk.f32.gmra.mxu0 %vm2382_vm3, %v2167_v50 }
 0x59a   :  { %3658 = vmatpush.msrb.mxu3 %v2365_v62 }
 0x59b   :  { %1686 = vmatmul.f32.gmra.mxu1 %v645_v8  ;;  %7830 = vmatmul.msk.f32.gmra.mxu2 %vm697_vm2, %v638_v11  ;;  %v647_v8 = vld [vmem:[%s13528_s1 + $0x960] sm:$0xff]  ;;  %v640_v11 = vld [vmem:[%s13528_s1 + $0x928] sm:$0xff] }
 0x59c   :  { %3659 = vmatpush.msrb.mxu3 %v2364_v43 }
 0x59e   :  { %v2169_v41 = vpop.f32.mrf.mxu2 }
 0x59f   :  { %v2170_v44 = vadd.f32 %v2169_v41, %v1627_v5  ;;  %v10414_v5 = vpop.f32.mrf.mxu0 }
 0x5a0   :  { %v1642_v50 = vpop.f32.mrf.mxu1  ;;  %13587 = vst [vmem:[#allocation37_spill] sm:$0xff] %v10414_v5 }
 0x5a1   :  { %7989 = vmatmul.msk.f32.gmra.mxu0 %vm2382_vm3, %v2170_v44 }
 0x5a3   :  { %1689 = vmatmul.f32.gmra.mxu1 %v647_v8  ;;  %7831 = vmatmul.msk.f32.gmra.mxu2 %vm697_vm2, %v640_v11 }
 0x5a6   :  { %v2172_v22 = vpop.f32.mrf.mxu2 }
 0x5a7   :  { %v2173_v62 = vadd.f32 %v2172_v22, %v1630_v56  ;;  %v10424_v43 = vpop.f32.mrf.mxu0  ;;  %v651_v56 = vld [vmem:[%s13528_s1 + $0x980] sm:$0xff]  ;;  %v644_v22 = vld [vmem:[%s13528_s1 + $0x948] sm:$0xff] }
 0x5a8   :  { %v1645_v41 = vpop.f32.mrf.mxu1  ;;  %13588 = vst [vmem:[#allocation38_spill] sm:$0xff] %v10424_v43 }
 0x5a9   :  { %7990 = vmatmul.msk.f32.gmra.mxu0 %vm2382_vm3, %v2173_v62 }
 0x5ab   :  { %1692 = vmatmul.f32.gmra.mxu1 %v649_v51  ;;  %7832 = vmatmul.msk.f32.gmra.mxu2 %vm697_vm2, %v642_v57  ;;  %v10434_v57 = vpop.f32.mrf.mxu3 }
 0x5ac   :  { %13589 = vst [vmem:[#allocation39_spill] sm:$0xff] %v10434_v57 }
 0x5ae   :  { %v2175_v44 = vpop.f32.mrf.mxu2 }
 0x5af   :  { %v2176_v8 = vadd.f32 %v2175_v44, %v1633_v17  ;;  %v653_v17 = vld [vmem:[%s13528_s1 + $0x990] sm:$0xff]  ;;  %v646_v44 = vld [vmem:[%s13528_s1 + $0x958] sm:$0xff]  ;;  %v10442_v43 = vpop.f32.mrf.mxu0 }
 0x5b0   :  { %v1648_v11 = vpop.f32.mrf.mxu1  ;;  %13590 = vst [vmem:[#allocation40_spill] sm:$0xff] %v10442_v43 }
 0x5b1   :  { %7991 = vmatmul.msk.f32.gmra.mxu0 %vm2382_vm3, %v2176_v8 }
 0x5b3   :  { %1695 = vmatmul.f32.gmra.mxu1 %v651_v56  ;;  %7833 = vmatmul.msk.f32.gmra.mxu2 %vm697_vm2, %v644_v22  ;;  %v10452_v57 = vpop.f32.mrf.mxu3 }
 0x5b4   :  { %13591 = vst [vmem:[#allocation41_spill] sm:$0xff] %v10452_v57 }
 0x5b6   :  { %v2178_v51 = vpop.f32.mrf.mxu2 }
 0x5b7   :  { %v2179_v62 = vadd.f32 %v2178_v51, %v1636_v40  ;;  %v655_v40 = vld [vmem:[%s13528_s1 + $0x9a0] sm:$0xff]  ;;  %v648_v51 = vld [vmem:[%s13528_s1 + $0x968] sm:$0xff] }
 0x5b8   :  { %v1651_v5 = vpop.f32.mrf.mxu1 }
 0x5b9   :  { %7992 = vmatmul.msk.f32.gmra.mxu0 %vm2382_vm3, %v2179_v62 }
 0x5bb   :  { %1698 = vmatmul.f32.gmra.mxu1 %v653_v17  ;;  %7834 = vmatmul.msk.f32.gmra.mxu2 %vm697_vm2, %v646_v44  ;;  %v10463_v43 = vpop.f32.mrf.mxu3 }
 0x5be   :  { %v2181_v8 = vpop.f32.mrf.mxu2 }
 0x5bf   :  { %v2182_v56 = vadd.f32 %v2181_v8, %v1639_v31  ;;  %v657_v31 = vld [vmem:[%s13528_s1 + $0x9b0] sm:$0xff]  ;;  %v650_v8 = vld [vmem:[%s13528_s1 + $0x978] sm:$0xff] }
 0x5c0   :  { %v1654_v22 = vpop.f32.mrf.mxu1 }
 0x5c1   :  { %7993 = vmatmul.msk.f32.vlgmr.msrb.gmra.mxu3 %vm2382_vm3, %v2182_v56 }
 0x5c3   :  { %1701 = vmatmul.f32.gmra.mxu1 %v655_v40  ;;  %7835 = vmatmul.msk.f32.gmra.mxu2 %vm697_vm2, %v648_v51  ;;  %v10473_v57 = vpop.f32.mrf.mxu3 }
 0x5c4   :  { %13592 = vst [vmem:[#allocation42_spill] sm:$0xff] %v10473_v57  ;;  %v663_v57 = vld [vmem:[%s13528_s1 + $0x9e0] sm:$0xff] }
 0x5c6   :  { %v2184_v62 = vpop.f32.mrf.mxu2 }
 0x5c7   :  { %v2185_v17 = vadd.f32 %v2184_v62, %v1642_v50  ;;  %v659_v50 = vld [vmem:[%s13528_s1 + $0x9c0] sm:$0xff]  ;;  %v652_v62 = vld [vmem:[%s13528_s1 + $0x988] sm:$0xff] }
 0x5c8   :  { %v1657_v44 = vpop.f32.mrf.mxu1 }
 0x5c9   :  { %7994 = vmatmul.msk.f32.gmra.mxu3 %vm2382_vm3, %v2185_v17  ;;  %v2368_v17 = vld [vmem:[%s13532_s5 + $0x1e8] sm:$0xff] }
 0x5cb   :  { %1704 = vmatmul.f32.gmra.mxu1 %v657_v31  ;;  %7836 = vmatmul.msk.f32.gmra.mxu2 %vm697_vm2, %v650_v8 }
 0x5ce   :  { %v2187_v56 = vpop.f32.mrf.mxu2 }
 0x5cf   :  { %v2188_v40 = vadd.f32 %v2187_v56, %v1645_v41  ;;  %v2369_v41 = vld [vmem:[%s13532_s5 + $0x1f0] sm:$0xff]  ;;  %v2367_v56 = vld [vmem:[%s13532_s5 + $0x1e0] sm:$0xff] }
 0x5d0   :  { %v1660_v51 = vpop.f32.mrf.mxu1  ;;  %3723 = vmatpush.msrb.mxu0 %v2369_v41 }
 0x5d1   :  { %7995 = vmatmul.msk.f32.gmra.mxu3 %vm2382_vm3, %v2188_v40 }
 0x5d2   :  { %3724 = vmatpush.msrb.mxu0 %v2368_v17 }
 0x5d3   :  { %1707 = vmatmul.f32.gmra.mxu1 %v659_v50  ;;  %7837 = vmatmul.msk.f32.gmra.mxu2 %vm697_vm2, %v652_v62  ;;  %v661_v50 = vld [vmem:[%s13528_s1 + $0x9d0] sm:$0xff]  ;;  %v654_v62 = vld [vmem:[%s13528_s1 + $0x998] sm:$0xff] }
 0x5d4   :  { %3725 = vmatpush.msrb.mxu0 %v2367_v56 }
 0x5d6   :  { %v2190_v31 = vpop.f32.mrf.mxu2 }
 0x5d7   :  { %v2191_v8 = vadd.f32 %v2190_v31, %v1648_v11  ;;  %v10493_v11 = vpop.f32.mrf.mxu3 }
 0x5d8   :  { %v1663_v40 = vpop.f32.mrf.mxu1  ;;  %13593 = vst [vmem:[#allocation43_spill] sm:$0xff] %v10493_v11  ;;  %v658_v11 = vld [vmem:[%s13528_s1 + $0x9b8] sm:$0xff] }
 0x5d9   :  { %7996 = vmatmul.msk.f32.gmra.mxu3 %vm2382_vm3, %v2191_v8  ;;  %v10503_v8 = vpop.f32.mrf.mxu0 }
 0x5da   :  { %13594 = vst [vmem:[#allocation44_spill] sm:$0xff] %v10503_v8 }
 0x5db   :  { %1710 = vmatmul.f32.gmra.mxu1 %v661_v50  ;;  %7838 = vmatmul.msk.f32.gmra.mxu2 %vm697_vm2, %v654_v62 }
 0x5de   :  { %v2193_v41 = vpop.f32.mrf.mxu2 }
 0x5df   :  { %v2194_v17 = vadd.f32 %v2193_v41, %v1651_v5  ;;  %v10505_v50 = vpop.f32.mrf.mxu3  ;;  %v665_v41 = vld [vmem:[%s13528_s1 + $0x9f0] sm:$0xff] }
 0x5e0   :  { %v1666_v31 = vpop.f32.mrf.mxu1  ;;  %13595 = vst [vmem:[#allocation45_spill] sm:$0xff] %v10505_v50 }
 0x5e1   :  { %7997 = vmatmul.msk.f32.gmra.mxu3 %vm2382_vm3, %v2194_v17  ;;  %v10515_v17 = vpop.f32.mrf.mxu0 }
 0x5e2   :  { %13596 = vst [vmem:[#allocation46_spill] sm:$0xff] %v10515_v17 }
 0x5e3   :  { %1713 = vmatmul.f32.gmra.mxu1 %v663_v57  ;;  %7839 = vmatmul.msk.f32.gmra.mxu2 %vm697_vm2, %v656_v46 }
 0x5e6   :  { %v2196_v56 = vpop.f32.mrf.mxu2 }
 0x5e7   :  { %v2197_v5 = vadd.f32 %v2196_v56, %v1654_v22  ;;  %v667_v22 = vld [vmem:[%s13528_s1 + $0xa00] sm:$0xff]  ;;  %v660_v56 = vld [vmem:[%s13528_s1 + $0x9c8] sm:$0xff]  ;;  %v10523_v8 = vpop.f32.mrf.mxu3 }
 0x5e8   :  { %v1669_v62 = vpop.f32.mrf.mxu1  ;;  %13597 = vst [vmem:[#allocation47_spill] sm:$0xff] %v10523_v8 }
 0x5e9   :  { %7998 = vmatmul.msk.f32.gmra.mxu3 %vm2382_vm3, %v2197_v5  ;;  %v10534_v17 = vpop.f32.mrf.mxu0 }
 0x5ea   :  { %13598 = vst [vmem:[#allocation48_spill] sm:$0xff] %v10534_v17  ;;  %v670_v17 = vld [vmem:[%s13528_s1 + $0xa18] sm:$0xff] }
 0x5eb   :  { %1716 = vmatmul.f32.gmra.mxu1 %v665_v41  ;;  %7840 = vmatmul.msk.f32.gmra.mxu2 %vm697_vm2, %v658_v11  ;;  %v669_v41 = vld [vmem:[%s13528_s1 + $0xa10] sm:$0xff] }
 0x5ee   :  { %v2199_v46 = vpop.f32.mrf.mxu2 }
 0x5ef   :  { %v2200_v57 = vadd.f32 %v2199_v46, %v1657_v44  ;;  %v662_v46 = vld [vmem:[%s13528_s1 + $0x9d8] sm:$0xff]  ;;  %v10582_v36 = vpop.f32.mrf.mxu3 }
 0x5f0   :  { %v1672_v50 = vpop.f32.mrf.mxu1  ;;  %13602 = vst [vmem:[#allocation52_spill] sm:$0xff] %v10582_v36  ;;  %v676_v36 = vld [vmem:[%s13528_s1 + $0xa48] sm:$0xff] }
 0x5f1   :  { %7999 = vmatmul.msk.f32.gmra.mxu3 %vm2382_vm3, %v2200_v57  ;;  %v10544_v8 = vpop.f32.mrf.mxu0 }
 0x5f2   :  { %13599 = vst [vmem:[#allocation49_spill] sm:$0xff] %v10544_v8  ;;  %v677_v8 = vld [vmem:[%s13528_s1 + $0xa50] sm:$0xff] }
 0x5f3   :  { %1719 = vmatmul.f32.gmra.mxu1 %v667_v22  ;;  %7841 = vmatmul.msk.f32.gmra.mxu2 %vm697_vm2, %v660_v56 }
 0x5f6   :  { %v2202_v11 = vpop.f32.mrf.mxu2 }
 0x5f7   :  { %v2203_v44 = vadd.f32 %v2202_v11, %v1660_v51  ;;  %v671_v51 = vld [vmem:[%s13528_s1 + $0xa20] sm:$0xff]  ;;  %v664_v11 = vld [vmem:[%s13528_s1 + $0x9e8] sm:$0xff] }
 0x5f8   :  { %v1675_v5 = vpop.f32.mrf.mxu1 }
 0x5f9   :  { %8000 = vmatmul.msk.f32.vlgmr.msrb.gmra.mxu0 %vm2382_vm3, %v2203_v44 }
 0x5fb   :  { %1722 = vmatmul.f32.gmra.mxu1 %v669_v41  ;;  %7842 = vmatmul.msk.f32.gmra.mxu2 %vm697_vm2, %v662_v46 }
 0x5fe   :  { %v2205_v57 = vpop.f32.mrf.mxu2 }
 0x5ff   :  { %v2206_v22 = vadd.f32 %v2205_v57, %v1663_v40  ;;  %v673_v40 = vld [vmem:[%s13528_s1 + $0xa30] sm:$0xff]  ;;  %v666_v57 = vld [vmem:[%s13528_s1 + $0x9f8] sm:$0xff] }
 0x600   :  { %v1678_v56 = vpop.f32.mrf.mxu1 }
 0x601   :  { %8001 = vmatmul.msk.f32.gmra.mxu0 %vm2382_vm3, %v2206_v22  ;;  %v2372_v22 = vld [vmem:[%s13532_s5 + $0x208] sm:$0xff] }
 0x602   :  { %3789 = vmatpush.msra.mxu3 %v2372_v22  ;;  %v668_v22 = vld [vmem:[%s13528_s1 + $0xa08] sm:$0xff] }
 0x603   :  { %1725 = vmatmul.f32.gmra.mxu1 %v671_v51  ;;  %7843 = vmatmul.msk.f32.gmra.mxu2 %vm697_vm2, %v664_v11  ;;  %v10558_v51 = vpop.f32.mrf.mxu0 }
 0x604   :  { %13600 = vst [vmem:[#allocation50_spill] sm:$0xff] %v10558_v51 }
 0x606   :  { %v2208_v44 = vpop.f32.mrf.mxu2 }
 0x607   :  { %v2209_v41 = vadd.f32 %v2208_v44, %v1666_v31  ;;  %v2371_v31 = vld [vmem:[%s13532_s5 + $0x200] sm:$0xff] }
 0x608   :  { %v1681_v46 = vpop.f32.mrf.mxu1  ;;  %3790 = vmatpush.msra.mxu3 %v2371_v31 }
 0x609   :  { %8002 = vmatmul.msk.f32.gmra.mxu0 %vm2382_vm3, %v2209_v41  ;;  %v2370_v41 = vld [vmem:[%s13532_s5 + $0x1f8] sm:$0xff] }
 0x60a   :  { %3791 = vmatpush.msra.mxu3 %v2370_v41 }
 0x60b   :  { %1728 = vmatmul.f32.gmra.mxu1 %v673_v40  ;;  %7844 = vmatmul.msk.f32.gmra.mxu2 %vm697_vm2, %v666_v57  ;;  %v675_v57 = vld [vmem:[%s13528_s1 + $0xa40] sm:$0xff] }
 0x60e   :  { %v2211_v11 = vpop.f32.mrf.mxu2 }
 0x60f   :  { %v2212_v44 = vadd.f32 %v2211_v11, %v1669_v62  ;;  %v10574_v62 = vpop.f32.mrf.mxu0 }
 0x610   :  { %v1684_v40 = vpop.f32.mrf.mxu1  ;;  %13601 = vst [vmem:[#allocation51_spill] sm:$0xff] %v10574_v62  ;;  %v681_v62 = vld [vmem:[%s13528_s1 + $0xa70] sm:$0xff] }
 0x611   :  { %8003 = vmatmul.msk.f32.gmra.mxu0 %vm2382_vm3, %v2212_v44 }
 0x613   :  { %1731 = vmatmul.f32.gmra.mxu1 %v675_v57  ;;  %7845 = vmatmul.msk.f32.gmra.mxu2 %vm697_vm2, %v668_v22  ;;  %v679_v22 = vld [vmem:[%s13528_s1 + $0xa60] sm:$0xff] }
 0x616   :  { %v2214_v31 = vpop.f32.mrf.mxu2 }
 0x617   :  { %v2215_v11 = vadd.f32 %v2214_v31, %v1672_v50  ;;  %v10586_v57 = vpop.f32.mrf.mxu0  ;;  %v672_v31 = vld [vmem:[%s13528_s1 + $0xa28] sm:$0xff] }
 0x618   :  { %v1687_v51 = vpop.f32.mrf.mxu1  ;;  %13603 = vst [vmem:[#allocation53_spill] sm:$0xff] %v10586_v57  ;;  %v674_v57 = vld [vmem:[%s13528_s1 + $0xa38] sm:$0xff] }
 0x619   :  { %8004 = vmatmul.msk.f32.gmra.mxu0 %vm2382_vm3, %v2215_v11  ;;  %v5336_v11 = vld [vmem:[%s13534_s7 + $0x118] sm:$0xff] }
 0x61a   :  { %6122 = vmatpush.msra.mxu2 %v5336_v11 }
 0x61b   :  { %1734 = vmatmul.f32.gmra.mxu1 %v677_v8  ;;  %7846 = vmatmul.msk.f32.gmra.mxu2 %vm697_vm2, %v670_v17  ;;  %v10598_v8 = vpop.f32.mrf.mxu3 }
 0x61c   :  { %13604 = vst [vmem:[#allocation54_spill] sm:$0xff] %v10598_v8  ;;  %v678_v8 = vld [vmem:[%s13528_s1 + $0xa58] sm:$0xff] }
 0x61e   :  { %v2217_v44 = vpop.f32.mrf.mxu2 }
 0x61f   :  { %v2218_v41 = vadd.f32 %v2217_v44, %v1675_v5 }
 0x620   :  { %v1690_v50 = vpop.f32.mrf.mxu1 }
 0x621   :  { %8005 = vmatmul.msk.f32.gmra.mxu0 %vm2382_vm3, %v2218_v41  ;;  %v10608_v41 = vpop.f32.mrf.mxu0 }
 0x622   :  { %13605 = vst [vmem:[#allocation55_spill] sm:$0xff] %v10608_v41  ;;  %v685_v41 = vld [vmem:[%s13528_s1 + $0xa90] sm:$0xff] }
 0x623   :  { %1737 = vmatmul.f32.gmra.mxu1 %v679_v22  ;;  %7847 = vmatmul.msk.f32.gmra.mxu2 %vm697_vm2, %v672_v31  ;;  %v10611_v22 = vpop.f32.mrf.mxu3 }
 0x626   :  { %v2220_v17 = vpop.f32.mrf.mxu2 }
 0x627   :  { %v2221_v5 = vadd.f32 %v2220_v17, %v1678_v56  ;;  %v683_v17 = vld [vmem:[%s13528_s1 + $0xa80] sm:$0xff] }
 0x628   :  { %v1693_v44 = vpop.f32.mrf.mxu1 }
 0x629   :  { %8006 = vmatmul.msk.f32.gmra.mxu0 %vm2382_vm3, %v2221_v5 }
 0x62b   :  { %1740 = vmatmul.f32.gmra.mxu1 %v681_v62  ;;  %7848 = vmatmul.msk.f32.gmra.mxu2 %vm697_vm2, %v674_v57  ;;  %v10621_v62 = vpop.f32.mrf.mxu0  ;;  %v10623_v57 = vpop.f32.mrf.mxu3 }
 0x62c   :  { %13606 = vst [vmem:[#allocation56_spill] sm:$0xff] %v10621_v62  ;;  %v687_v62 = vld [vmem:[%s13528_s1 + $0xaa0] sm:$0xff] }
 0x62d   :  { %13607 = vst [vmem:[#allocation57_spill] sm:$0xff] %v10623_v57  ;;  %v680_v57 = vld [vmem:[%s13528_s1 + $0xa68] sm:$0xff] }
 0x62e   :  { %v2223_v31 = vpop.f32.mrf.mxu2 }
 0x62f   :  { %v2224_v56 = vadd.f32 %v2223_v31, %v1681_v46 }
 0x630   :  { %v1696_v11 = vpop.f32.mrf.mxu1 }
 0x631   :  { %8007 = vmatmul.msk.f32.vlgmr.msra.gmra.mxu3 %vm2382_vm3, %v2224_v56 }
 0x633   :  { %1743 = vmatmul.f32.gmra.mxu1 %v683_v17  ;;  %7849 = vmatmul.msk.f32.gmra.mxu2 %vm697_vm2, %v676_v36  ;;  %v10633_v36 = vpop.f32.mrf.mxu0  ;;  %v10635_v17 = vpop.f32.mrf.mxu3 }
 0x634   :  { %13608 = vst [vmem:[#allocation58_spill] sm:$0xff] %v10633_v36  ;;  %v684_v36 = vld [vmem:[%s13528_s1 + $0xa88] sm:$0xff] }
 0x635   :  { %13609 = vst [vmem:[#allocation59_spill] sm:$0xff] %v10635_v17 }
 0x636   :  { %v2226_v5 = vpop.f32.mrf.mxu2 }
 0x637   :  { %v2227_v46 = vadd.f32 %v2226_v5, %v1684_v40 }
 0x638   :  { %v1699_v31 = vpop.f32.mrf.mxu1 }
 0x639   :  { %8008 = vmatmul.msk.f32.gmra.mxu3 %vm2382_vm3, %v2227_v46 }
 0x63b   :  { %1746 = vmatmul.f32.gmra.mxu1 %v685_v41  ;;  %7850 = vmatmul.msk.f32.gmra.mxu2 %vm697_vm2, %v678_v8  ;;  %v2375_v8 = vld [vmem:[%s13532_s5 + $0x220] sm:$0xff]  ;;  %v10651_v41 = vpop.f32.mrf.mxu0  ;;  %v10662_v17 = vpop.f32.mrf.mxu3 }
 0x63c   :  { %3855 = vmatpush.msra.mxu0 %v2375_v8  ;;  %13610 = vst [vmem:[#allocation60_spill] sm:$0xff] %v10651_v41  ;;  %v682_v8 = vld [vmem:[%s13528_s1 + $0xa78] sm:$0xff]  ;;  %v691_v41 = vld [vmem:[%s13528_s1 + $0xac0] sm:$0xff] }
 0x63d   :  { %13611 = vst [vmem:[#allocation61_spill] sm:$0xff] %v10662_v17 }
 0x63e   :  { %v2229_v56 = vpop.f32.mrf.mxu2 }
 0x63f   :  { %v2230_v40 = vadd.f32 %v2229_v56, %v1687_v51  ;;  %v2374_v51 = vld [vmem:[%s13532_s5 + $0x218] sm:$0xff] }
 0x640   :  { %v1702_v5 = vpop.f32.mrf.mxu1  ;;  %3856 = vmatpush.msra.mxu0 %v2374_v51 }
 0x641   :  { %8009 = vmatmul.msk.f32.gmra.mxu3 %vm2382_vm3, %v2230_v40 }
 0x643   :  { %1749 = vmatmul.f32.gmra.mxu1 %v687_v62  ;;  %7851 = vmatmul.msk.f32.gmra.mxu2 %vm697_vm2, %v680_v57  ;;  %v2373_v62 = vld [vmem:[%s13532_s5 + $0x210] sm:$0xff]  ;;  %v10675_v17 = vpop.f32.mrf.mxu3 }
 0x644   :  { %v689_v57 = vld [vmem:[%s13528_s1 + $0xab0] sm:$0xff]  ;;  %3857 = vmatpush.msra.mxu0 %v2373_v62  ;;  %13613 = vst [vmem:[#allocation63_spill] sm:$0xff] %v10675_v17  ;;  %v2376_v17 = vld [vmem:[%s13532_s5 + $0x228] sm:$0xff] }
 0x646   :  { %v2232_v46 = vpop.f32.mrf.mxu2 }
 0x647   :  { %v2233_v56 = vadd.f32 %v2232_v46, %v1690_v50  ;;  %v10666_v46 = vpop.f32.mrf.mxu0 }
 0x648   :  { %v1705_v40 = vpop.f32.mrf.mxu1  ;;  %13612 = vst [vmem:[#allocation62_spill] sm:$0xff] %v10666_v46  ;;  %v688_v46 = vld [vmem:[%s13528_s1 + $0xaa8] sm:$0xff] }
 0x649   :  { %8010 = vmatmul.msk.f32.gmra.mxu3 %vm2382_vm3, %v2233_v56 }
 0x64b   :  { %1752 = vmatmul.f32.gmra.mxu1 %v689_v57  ;;  %7852 = vmatmul.msk.f32.gmra.mxu2 %vm697_vm2, %v682_v8  ;;  %v693_v57 = vld [vmem:[%s13528_s1 + $0xad0] sm:$0xff]  ;;  %v686_v8 = vld [vmem:[%s13528_s1 + $0xa98] sm:$0xff] }
 0x64e   :  { %v2235_v50 = vpop.f32.mrf.mxu2 }
 0x64f   :  { %v2236_v51 = vadd.f32 %v2235_v50, %v1693_v44  ;;  %v10685_v50 = vpop.f32.mrf.mxu0 }
 0x650   :  { %v1708_v62 = vpop.f32.mrf.mxu1  ;;  %13614 = vst [vmem:[#allocation64_spill] sm:$0xff] %v10685_v50 }
 0x651   :  { %8011 = vmatmul.msk.f32.gmra.mxu3 %vm2382_vm3, %v2236_v51  ;;  %v10688_v51 = vpop.f32.mrf.mxu3 }
 0x652   :  { %13615 = vst [vmem:[#allocation65_spill] sm:$0xff] %v10688_v51 }
 0x653   :  { %1755 = vmatmul.f32.gmra.mxu1 %v691_v41  ;;  %7853 = vmatmul.msk.f32.gmra.mxu2 %vm697_vm2, %v684_v36 }
 0x656   :  { %v2238_v56 = vpop.f32.mrf.mxu2 }
 0x657   :  { %v2239_v44 = vadd.f32 %v2238_v56, %v1696_v11  ;;  %v695_v56 = vld [vmem:[%s13528_s1 + $0xae0] sm:$0xff] }
 0x658   :  { %v1711_v41 = vpop.f32.mrf.mxu1 }
 0x659   :  { %8012 = vmatmul.msk.f32.gmra.mxu3 %vm2382_vm3, %v2239_v44  ;;  %v10698_v44 = vpop.f32.mrf.mxu0  ;;  %v10700_v50 = vpop.f32.mrf.mxu3 }
 0x65a   :  { %13616 = vst [vmem:[#allocation66_spill] sm:$0xff] %v10698_v44 }
 0x65b   :  { %1758 = vmatmul.f32.gmra.mxu1 %v693_v57  ;;  %7854 = vmatmul.msk.f32.gmra.mxu2 %vm697_vm2, %v686_v8  ;;  %13617 = vst [vmem:[#allocation67_spill] sm:$0xff] %v10700_v50 }
 0x65e   :  { %v2241_v36 = vpop.f32.mrf.mxu2 }
 0x65f   :  { %v2242_v11 = vadd.f32 %v2241_v36, %v1699_v31  ;;  %v690_v36 = vld [vmem:[%s13528_s1 + $0xab8] sm:$0xff] }
 0x660   :  { %v1714_v57 = vpop.f32.mrf.mxu1 }
 0x661   :  { %8013 = vmatmul.msk.f32.gmra.mxu3 %vm2382_vm3, %v2242_v11  ;;  %v10709_v11 = vpop.f32.mrf.mxu0 }
 0x662   :  { %13618 = vst [vmem:[#allocation68_spill] sm:$0xff] %v10709_v11 }
 0x663   :  { %1761 = vmatmul.f32.gmra.mxu1 %v695_v56  ;;  %7855 = vmatmul.msk.f32.gmra.mxu2 %vm697_vm2, %v688_v46 }
 0x666   :  { %v2244_v8 = vpop.f32.mrf.mxu2 }
 0x667   :  { %v2245_v31 = vadd.f32 %v2244_v8, %v1702_v5  ;;  %v692_v5 = vld [vmem:[%s13528_s1 + $0xac8] sm:$0xff]  ;;  %v10714_v8 = vpop.f32.mrf.mxu3 }
 0x668   :  { %v1717_v44 = vpop.f32.mrf.mxu1 }
 0x669   :  { %8014 = vmatmul.msk.f32.vlgmr.msra.gmra.mxu0 %vm2382_vm3, %v2245_v31 }
 0x66b   :  { %7856 = vmatmul.msk.f32.gmra.mxu2 %vm697_vm2, %v690_v36  ;;  %7860 = vmatmul.msk.f32.vlgmr.msra.gmra.mxu1 %vm2382_vm3, %v9002_v14  ;;  %v10720_v36 = vpop.f32.mrf.mxu0 }
 0x66c   :  { %13619 = vst [vmem:[#allocation69_spill] sm:$0xff] %v10720_v36 }
 0x66e   :  { %v2247_v46 = vpop.f32.mrf.mxu2 }
 0x66f   :  { %v2248_v56 = vadd.f32 %v2247_v46, %v1705_v40  ;;  %v694_v40 = vld [vmem:[%s13528_s1 + $0xad8] sm:$0xff]  ;;  %v10725_v46 = vpop.f32.mrf.mxu3 }
 0x670   :  { %13620 = vst [vmem:[#allocation70_spill] sm:$0xff] %v10725_v46 }
 0x671   :  { %8015 = vmatmul.msk.f32.gmra.mxu0 %vm2382_vm3, %v2248_v56  ;;  %v2378_v56 = vld [vmem:[%s13532_s5 + $0x238] sm:$0xff] }
 0x672   :  { %3921 = vmatpush.msrb.mxu3 %v2378_v56 }
 0x673   :  { %7857 = vmatmul.msk.f32.gmra.mxu2 %vm697_vm2, %v692_v5  ;;  %7894 = vmatmul.msk.f32.vlgmr.msrb.gmra.mxu1 %vm2382_vm3, %v9378_v55  ;;  %v1720_v5 = vpop.f32.mrf.mxu1  ;;  %v2377_v55 = vld [vmem:[%s13532_s5 + $0x230] sm:$0xff]  ;;  %v10742_v56 = vpop.f32.mrf.mxu0 }
 0x674   :  { %3922 = vmatpush.msrb.mxu3 %v2377_v55  ;;  %13621 = vst [vmem:[#allocation71_spill] sm:$0xff] %v10742_v56 }
 0x676   :  { %v2250_v31 = vpop.f32.mrf.mxu2  ;;  %3923 = vmatpush.msrb.mxu3 %v2376_v17 }
 0x677   :  { %v2251_v14 = vadd.f32 %v2250_v31, %v1708_v62 }
 0x679   :  { %8016 = vmatmul.msk.f32.gmra.mxu0 %vm2382_vm3, %v2251_v14  ;;  %v696_v14 = vld [vmem:[%s13528_s1 + $0xae8] sm:$0xff]  ;;  %s7650_s1 = sshll.u32 %s13538_s11, 4  ;;  %s7651_s1 = int_to_ptr.hbm [resolvable:$true] %s7650_s1 }
 0x67b   :  { %7858 = vmatmul.msk.f32.gmra.mxu2 %vm697_vm2, %v694_v40  ;;  %v10744_v40 = vpop.f32.mrf.mxu3  ;;  %v1723_v46 = vpop.f32.mrf.mxu1 }
 0x67c   :  { %13622 = vst [vmem:[#allocation72_spill] sm:$0xff] %v10744_v40 }
 0x67e   :  { %v2253_v62 = vpop.f32.mrf.mxu2 }
 0x67f   :  { %v2254_v31 = vadd.f32 %v2253_v62, %v1711_v41  ;;  %v10748_v62 = vpop.f32.mrf.mxu0 }
 0x680   :  { %13623 = vst [vmem:[#allocation73_spill] sm:$0xff] %v10748_v62 }
 0x681   :  { %8017 = vmatmul.msk.f32.gmra.mxu0 %vm2382_vm3, %v2254_v31 }
 0x683   :  { %7859 = vmatmul.msk.f32.gmra.mxu2 %vm697_vm2, %v696_v14  ;;  %v10750_v11 = vpop.f32.mrf.mxu3  ;;  %v1726_v36 = vpop.f32.mrf.mxu1 }
 0x684   :  { %13624 = vst [vmem:[#allocation74_spill] sm:$0xff] %v10750_v11 }
 0x686   :  { %v2256_v55 = vpop.f32.mrf.mxu2 }
 0x687   :  { %v2257_v41 = vadd.f32 %v2256_v55, %v1714_v57  ;;  %v10753_v31 = vpop.f32.mrf.mxu0 }
 0x688   :  { %13625 = vst [vmem:[#allocation75_spill] sm:$0xff] %v10753_v31 }
 0x689   :  { %8018 = vmatmul.msk.f32.gmra.mxu0 %vm2382_vm3, %v2257_v41 }
 0x68b   :  { %v10755_v40 = vpop.f32.mrf.mxu3  ;;  %v1729_v50 = vpop.f32.mrf.mxu1 }
 0x68c   :  { %13626 = vst [vmem:[#allocation76_spill] sm:$0xff] %v10755_v40 }
 0x68e   :  { %v2259_v51 = vpop.f32.mrf.mxu2 }
 0x68f   :  { %v2260_v17 = vadd.f32 %v2259_v51, %v1717_v44  ;;  %v10758_v57 = vpop.f32.mrf.mxu0 }
 0x690   :  { %13627 = vst [vmem:[#allocation77_spill] sm:$0xff] %v10758_v57 }
 0x691   :  { %8019 = vmatmul.msk.f32.gmra.mxu0 %vm2382_vm3, %v2260_v17 }
 0x693   :  { %v10760_v62 = vpop.f32.mrf.mxu3  ;;  %v1732_v51 = vpop.f32.mrf.mxu1 }
 0x694   :  { %13628 = vst [vmem:[#allocation78_spill] sm:$0xff] %v10760_v62 }
 0x696   :  { %v2262_v56 = vpop.f32.mrf.mxu2 }
 0x697   :  { %v2263_v14 = vadd.f32 %v2262_v56, %v1720_v5  ;;  %v10763_v11 = vpop.f32.mrf.mxu0 }
 0x698   :  { %13629 = vst [vmem:[#allocation79_spill] sm:$0xff] %v10763_v11 }
 0x699   :  { %8020 = vmatmul.msk.f32.gmra.mxu0 %vm2382_vm3, %v2263_v14 }
 0x69b   :  { %v10766_v31 = vpop.f32.mrf.mxu3  ;;  %v1735_v5 = vpop.f32.mrf.mxu1 }
 0x69e   :  { %v2265_v55 = vpop.f32.mrf.mxu2 }
 0x69f   :  { %v2266_v41 = vadd.f32 %v2265_v55, %v1723_v46  ;;  %v10769_v57 = vpop.f32.mrf.mxu0  ;;  %v2381_v46 = vld [vmem:[%s13532_s5 + $0x250] sm:$0xff] }
 0x6a0   :  { %13630 = vst [vmem:[#allocation80_spill] sm:$0xff] %v10769_v57  ;;  %3987 = vmatpush.msrb.mxu0 %v2381_v46 }
 0x6a1   :  { %8021 = vmatmul.msk.f32.vlgmr.msrb.gmra.mxu3 %vm2382_vm3, %v2266_v41 }
 0x6a3   :  { %v10774_v55 = vpop.f32.mrf.mxu3  ;;  %v1738_v41 = vpop.f32.mrf.mxu1 }
 0x6a4   :  { %13631 = vst [vmem:[#allocation81_spill] sm:$0xff] %v10774_v55 }
 0x6a6   :  { %v2268_v44 = vpop.f32.mrf.mxu2 }
 0x6a7   :  { %v2269_v17 = vadd.f32 %v2268_v44, %v1726_v36  ;;  %v2380_v36 = vld [vmem:[%s13532_s5 + $0x248] sm:$0xff] }
 0x6a8   :  { %3988 = vmatpush.msrb.mxu0 %v2380_v36 }
 0x6a9   :  { %8022 = vmatmul.msk.f32.gmra.mxu3 %vm2382_vm3, %v2269_v17 }
 0x6ab   :  { %v1741_v40 = vpop.f32.mrf.mxu1 }
 0x6ae   :  { %v2271_v56 = vpop.f32.mrf.mxu2 }
 0x6af   :  { %v2272_v14 = vadd.f32 %v2271_v56, %v1729_v50  ;;  %v2379_v50 = vld [vmem:[%s13532_s5 + $0x240] sm:$0xff]  ;;  %v10783_v56 = vpop.f32.mrf.mxu0  ;;  %s8560_s5 = smov 24  }
 0x6b0   :  { %3989 = vmatpush.msrb.mxu0 %v2379_v50  ;;  %13632 = vst [vmem:[#allocation82_spill] sm:$0xff] %v10783_v56 }
 0x6b1   :  { %8023 = vmatmul.msk.f32.gmra.mxu3 %vm2382_vm3, %v2272_v14  ;;  %v10785_v14 = vpop.f32.mrf.mxu3 }
 0x6b2   :  { %13633 = vst [vmem:[#allocation83_spill] sm:$0xff] %v10785_v14 }
 0x6b3   :  { %v1744_v50 = vpop.f32.mrf.mxu1 }
 0x6b6   :  { %v2274_v44 = vpop.f32.mrf.mxu2 }
 0x6b7   :  { %v2275_v17 = vadd.f32 %v2274_v44, %v1732_v51  ;;  %v10788_v57 = vpop.f32.mrf.mxu0 }
 0x6b9   :  { %8024 = vmatmul.msk.f32.gmra.mxu3 %vm2382_vm3, %v2275_v17  ;;  %v10790_v44 = vpop.f32.mrf.mxu3 }
 0x6ba   :  { %13634 = vst [vmem:[#allocation84_spill] sm:$0xff] %v10790_v44 }
 0x6be   :  { %v2277_v46 = vpop.f32.mrf.mxu2 }
 0x6bf   :  { %v2278_v11 = vadd.f32 %v2277_v46, %v1735_v5  ;;  %v10793_v62 = vpop.f32.mrf.mxu0  ;;  %v1747_v5 = vpop.f32.mrf.mxu1 }
 0x6c0   :  { %13635 = vst [vmem:[#allocation85_spill] sm:$0xff] %v10793_v62 }
 0x6c1   :  { %8025 = vmatmul.msk.f32.gmra.mxu3 %vm2382_vm3, %v2278_v11  ;;  %v10796_v14 = vpop.f32.mrf.mxu3 }
 0x6c2   :  { %13636 = vst [vmem:[#allocation86_spill] sm:$0xff] %v10796_v14 }
 0x6c6   :  { %v2280_v36 = vpop.f32.mrf.mxu2 }
 0x6c7   :  { %v2281_v51 = vadd.f32 %v2280_v36, %v1738_v41  ;;  %v10798_v55 = vpop.f32.mrf.mxu0  ;;  %v1750_v36 = vpop.f32.mrf.mxu1 }
 0x6c8   :  { %13637 = vst [vmem:[#allocation87_spill] sm:$0xff] %v10798_v55 }
 0x6c9   :  { %8026 = vmatmul.msk.f32.gmra.mxu3 %vm2382_vm3, %v2281_v51  ;;  %v10801_v41 = vpop.f32.mrf.mxu3 }
 0x6ca   :  { %13638 = vst [vmem:[#allocation88_spill] sm:$0xff] %v10801_v41 }
 0x6ce   :  { %v2283_v17 = vpop.f32.mrf.mxu2 }
 0x6cf   :  { %v2284_v56 = vadd.f32 %v2283_v17, %v1741_v40  ;;  %v10804_v62 = vpop.f32.mrf.mxu0  ;;  %v1753_v14 = vpop.f32.mrf.mxu1 }
 0x6d0   :  { %13639 = vst [vmem:[#allocation89_spill] sm:$0xff] %v10804_v62 }
 0x6d1   :  { %8027 = vmatmul.msk.f32.gmra.mxu3 %vm2382_vm3, %v2284_v56  ;;  %v10806_v40 = vpop.f32.mrf.mxu3 }
 0x6d2   :  { %13640 = vst [vmem:[#allocation90_spill] sm:$0xff] %v10806_v40 }
 0x6d6   :  { %v2286_v46 = vpop.f32.mrf.mxu2 }
 0x6d7   :  { %v2287_v11 = vadd.f32 %v2286_v46, %v1744_v50  ;;  %v10809_v50 = vpop.f32.mrf.mxu0 }
 0x6d8   :  { %13641 = vst [vmem:[#allocation91_spill] sm:$0xff] %v10809_v50 }
 0x6d9   :  { %8028 = vmatmul.msk.f32.vlgmr.msrb.gmra.mxu0 %vm2382_vm3, %v2287_v11  ;;  %v10811_v55 = vpop.f32.mrf.mxu3 }
 0x6de   :  { %v2289_v51 = vpop.f32.mrf.mxu2 }
 0x6df   :  { %v2290_v44 = vadd.f32 %v2289_v51, %v1747_v5  ;;  %v1756_v5 = vpop.f32.mrf.mxu1  ;;  %v10814_v51 = vpop.f32.mrf.mxu0 }
 0x6e0   :  { %13642 = vst [vmem:[#allocation92_spill] sm:$0xff] %v10814_v51 }
 0x6e1   :  { %8029 = vmatmul.msk.f32.gmra.mxu0 %vm2382_vm3, %v2290_v44  ;;  %v10817_v41 = vpop.f32.mrf.mxu3 }
 0x6e2   :  { %13643 = vst [vmem:[#allocation93_spill] sm:$0xff] %v10817_v41 }
 0x6e6   :  { %v2292_v56 = vpop.f32.mrf.mxu2 }
 0x6e7   :  { %v2293_v17 = vadd.f32 %v2292_v56, %v1750_v36  ;;  %v1759_v36 = vpop.f32.mrf.mxu1  ;;  %v10819_v40 = vpop.f32.mrf.mxu0 }
 0x6e9   :  { %8030 = vmatmul.msk.f32.gmra.mxu0 %vm2382_vm3, %v2293_v17 }
 0x6ee   :  { %v2295_v46 = vpop.f32.mrf.mxu2 }
 0x6ef   :  { %v2296_v11 = vadd.f32 %v2295_v46, %v1753_v14  ;;  %v10822_v14 = vpop.f32.mrf.mxu3  ;;  %v1762_v46 = vpop.f32.mrf.mxu1 }
 0x6f0   :  { %13644 = vst [vmem:[#allocation94_spill] sm:$0xff] %v10822_v14  ;;  %v10825_v51 = vpop.f32.mrf.mxu0 }
 0x6f1   :  { %8031 = vmatmul.msk.f32.gmra.mxu0 %vm2382_vm3, %v2296_v11  ;;  %13645 = vst [vmem:[#allocation95_spill] sm:$0xff] %v10825_v51 }
 0x6f6   :  { %v2298_v44 = vpop.f32.mrf.mxu2 }
 0x6f7   :  { %v2299_v62 = vadd.f32 %v2298_v44, %v1756_v5  ;;  %v10827_v5 = vpop.f32.mrf.mxu3  ;;  %v2421_v41 = vpop.f32.mrf.mxu1 }
 0x6f8   :  { %13646 = vst [vmem:[#allocation96_spill] sm:$0xff] %v10827_v5 }
 0x6f9   :  { %8032 = vmatmul.msk.f32.gmra.mxu0 %vm2382_vm3, %v2299_v62  ;;  %v10829_v62 = vpop.f32.mrf.mxu0 }
 0x6fa   :  { %13647 = vst [vmem:[#allocation97_spill] sm:$0xff] %v10829_v62  ;;  %v2499_v62 = vadd.f32 %v9536_v33, %v9309_v21 }
 0x6fe   :  { %v2301_v56 = vpop.f32.mrf.mxu2 }
 0x6ff   :  { %v2302_v17 = vadd.f32 %v2301_v56, %v1759_v36  ;;  %v10831_v44 = vpop.f32.mrf.mxu3  ;;  %v2689_v51 = vpop.f32.mrf.mxu1 }
 0x700   :  { %13648 = vst [vmem:[#allocation98_spill] sm:$0xff] %v10831_v44  ;;  %v2566_v44 = vadd.f32 %v9680_v12, %v2499_v62 }
 0x701   :  { %8033 = vmatmul.msk.f32.gmra.mxu0 %vm2382_vm3, %v2302_v17  ;;  %v10833_v36 = vpop.f32.mrf.mxu0 }
 0x702   :  { %13649 = vst [vmem:[#allocation99_spill] sm:$0xff] %v10833_v36 }
 0x706   :  { %v2304_v11 = vpop.f32.mrf.mxu2 }
 0x707   :  { %v2305_v50 = vadd.f32 %v2304_v11, %v1762_v46  ;;  %v10835_v56 = vpop.f32.mrf.mxu3  ;;  %v2481_v46 = vadd.f32 %v9325_v27, %v2421_v41 }
 0x708   :  { %13650 = vst [vmem:[#allocation100_spill] sm:$0xff] %v10835_v56  ;;  %v2632_v56 = vadd.f32 %v9830_v9, %v2566_v44 }
 0x709   :  { %8034 = vmatmul.msk.f32.gmra.mxu0 %vm2382_vm3, %v2305_v50  ;;  %v10837_v17 = vpop.f32.mrf.mxu0  ;;  %v2560_v5 = vadd.f32 %v9547_v34, %v2481_v46  ;;  %v13659_v46 = vld [vmem:[#allocation5_spill] sm:$0xff] }
 0x70a   :  { %13651 = vst [vmem:[#allocation101_spill] sm:$0xff] %v10837_v17  ;;  %v2698_v41 = vadd.f32 %v2689_v51, %v2632_v56  ;;  %v13658_v56 = vld [vmem:[#allocation48_spill] sm:$0xff] }
 0x70b   :  { %v2626_v36 = vadd.f32 %v9691_v47, %v2560_v5 }
 0x70c   :  { %v2764_v34 = vadd.f32 %v9989_v59, %v2698_v41 }
 0x70d   :  { %v2692_v27 = vadd.f32 %v9782_v28, %v2626_v36  ;;  %v13657_v36 = vld [vmem:[#allocation20_spill] sm:$0xff] }
 0x70e   :  { %v2830_v12 = vadd.f32 %v10068_v1, %v2764_v34 }
 0x70f   :  { %v10839_v14 = vpop.f32.mrf.mxu3 }
 0x710   :  { %13652 = vst [vmem:[#allocation102_spill] sm:$0xff] %v10839_v14  ;;  %v2758_v14 = vadd.f32 %v9841_v2, %v2692_v27  ;;  %v2896_v9 = vadd.f32 %v10147_v25, %v2830_v12  ;;  %v2496_v2 = vadd.f32 %v9520_v24, %v9294_v13  ;;  %v2563_v13 = vadd.f32 %v9593_v6, %v9373_v23  ;;  %v13660_v27 = vld [vmem:[#allocation18_spill] sm:$0xff]  ;;  %v13663_v12 = vld [vmem:[#allocation25_spill] sm:$0xff] }
 0x711   :  { %v10842_v50 = vpop.f32.mrf.mxu0  ;;  %v2562_v24 = vadd.f32 %v9577_v61, %v9359_v18 }
 0x712   :  { %13653 = vst [vmem:[#allocation103_spill] sm:$0xff] %v10842_v50  ;;  %v2824_v21 = vadd.f32 %v9920_v60, %v2758_v14  ;;  %v2962_v51 = vadd.f32 %v10226_v63, %v2896_v9  ;;  %v2493_v60 = vadd.f32 %v9510_v16, %v9281_v4  ;;  %v13664_v9 = vld [vmem:[#allocation7_spill] sm:$0xff] }
 0x713   :  { %v2628_v23 = vadd.f32 %v9721_v39, %v2562_v24 }
 0x714   :  { %v2890_v5 = vadd.f32 %v9999_v20, %v2824_v21  ;;  %v2565_v20 = vadd.f32 %v9664_v26, %v2496_v2  ;;  %v3028_v25 = vadd.f32 %v10305_v53, %v2962_v51  ;;  %v2629_v26 = vadd.f32 %v9737_v54, %v2563_v13  ;;  %v13662_v21 = vld [vmem:[#allocation12_spill] sm:$0xff]  ;;  %v13665_v51 = vld [vmem:[#allocation23_spill] sm:$0xff] }
 0x716   :  { %v2956_v28 = vadd.f32 %v10078_v32, %v2890_v5  ;;  %v2564_v32 = vadd.f32 %v9654_v49, %v2493_v60  ;;  %v2631_v63 = vadd.f32 %v9814_v58, %v2565_v20  ;;  %v3094_v4 = vadd.f32 %v10384_v7, %v3028_v25  ;;  %v13656_v7 = vld [vmem:[#allocation9_spill] sm:$0xff]  ;;  %v13666_v60 = vld [vmem:[#allocation42_spill] sm:$0xff]  ;;  %v13667_v20 = vld [vmem:[#allocation11_spill] sm:$0xff] }
 0x717   :  { %v10844_v11 = vpop.f32.mrf.mxu3  ;;  %v2561_v58 = vadd.f32 %v9567_v48, %v9345_v3  ;;  %v2695_v54 = vadd.f32 %v9881_v52, %v2629_v26  ;;  %v13661_v52 = vld [vmem:[#allocation8_spill] sm:$0xff] }
 0x718   :  { %v3022_v59 = vadd.f32 %v10157_v15, %v2956_v28  ;;  %v2630_v14 = vadd.f32 %v9802_v38, %v2564_v32  ;;  %v2697_v49 = vadd.f32 %v9910_v29, %v2631_v63  ;;  %v13668_v32 = vld [vmem:[#allocation15_spill] sm:$0xff]  ;;  %v13671_v26 = vld [vmem:[#allocation28_spill] sm:$0xff] }
 0x719   :  { %v10851_v17 = vpop.f32.mrf.mxu0  ;;  %v2627_v53 = vadd.f32 %v9711_v30, %v2561_v58  ;;  %v13672_v58 = vld [vmem:[#allocation14_spill] sm:$0xff] }
 0x71a   :  { %v3088_v44 = vadd.f32 %v10236_v35, %v3022_v59  ;;  %v2696_v38 = vadd.f32 %v9899_v19, %v2630_v14  ;;  %v2763_v6 = vadd.f32 %v9978_v0, %v2697_v49  ;;  %v3160_v35 = vadd.f32 %v10463_v43, %v3094_v4  ;;  %v13654_v19 = vld [vmem:[#allocation36_spill] sm:$0xff]  ;;  %v13669_v14 = vld [vmem:[#allocation30_spill] sm:$0xff] }
 0x71b   :  { %v2761_v0 = vadd.f32 %v13656_v7, %v2695_v54  ;;  %v13670_v4 = vld [vmem:[#allocation10_spill] sm:$0xff]  ;;  %v13676_v54 = vld [vmem:[#allocation33_spill] sm:$0xff] }
 0x71c   :  { %v3154_v15 = vadd.f32 %v10315_v42, %v3088_v44  ;;  %v2762_v18 = vadd.f32 %v9960_v10, %v2696_v38  ;;  %v2829_v3 = vadd.f32 %v10057_v37, %v2763_v6  ;;  %v13655_v42 = vld [vmem:[#allocation6_spill] sm:$0xff]  ;;  %v3226_v30 = vadd.f32 %v13658_v56, %v3160_v35  ;;  %v13674_v6 = vld [vmem:[#allocation35_spill] sm:$0xff] }
 0x71d   :  { %v2694_v39 = vadd.f32 %v13655_v42, %v2628_v23  ;;  %v2693_v10 = vadd.f32 %v13659_v46, %v2627_v53  ;;  %v13675_v53 = vld [vmem:[#allocation13_spill] sm:$0xff] }
 0x71e   :  { %v2828_v48 = vadd.f32 %v10039_v45, %v2762_v18  ;;  %v3220_v29 = vadd.f32 %v13654_v19, %v3154_v15  ;;  %v2895_v43 = vadd.f32 %v13657_v36, %v2829_v3  ;;  %v2827_v45 = vadd.f32 %v13662_v21, %v2761_v0  ;;  %v13673_v15 = vld [vmem:[#allocation19_spill] sm:$0xff]  ;;  %v13678_v42 = vld [vmem:[#allocation17_spill] sm:$0xff] }
 0x71f   :  { %v10855_v50 = vpop.f32.mrf.mxu3  ;;  %v2760_v37 = vadd.f32 %v13661_v52, %v2694_v39  ;;  %v2759_v28 = vadd.f32 %v13664_v9, %v2693_v10  ;;  %v3292_v13 = vadd.f32 %v10611_v22, %v3226_v30  ;;  %v13679_v39 = vld [vmem:[#allocation24_spill] sm:$0xff]  ;;  %v13680_v0 = vld [vmem:[#allocation41_spill] sm:$0xff]  ;;  %v13683_v10 = vld [vmem:[#allocation39_spill] sm:$0xff] }
 0x720   :  { %v2894_v41 = vadd.f32 %v13660_v27, %v2828_v48  ;;  %v2961_v5 = vadd.f32 %v13663_v12, %v2895_v43  ;;  %v3286_v59 = vadd.f32 %v13666_v60, %v3220_v29  ;;  %v2893_v63 = vadd.f32 %v13668_v32, %v2827_v45  ;;  %v13677_v48 = vld [vmem:[#allocation49_spill] sm:$0xff]  ;;  %v13681_v43 = vld [vmem:[#allocation58_spill] sm:$0xff]  ;;  %v13682_v30 = vld [vmem:[#allocation16_spill] sm:$0xff] }
 0x721   :  { %v10860_v33 = vpop.f32.mrf.mxu0  ;;  %v2826_v25 = vadd.f32 %v13667_v20, %v2760_v37  ;;  %v2825_v24 = vadd.f32 %v13670_v4, %v2759_v28  ;;  %v3358_v56 = vadd.f32 %v13681_v43, %v3292_v13  ;;  %v13684_v52 = vld [vmem:[#allocation22_spill] sm:$0xff]  ;;  %v13685_v21 = vld [vmem:[#allocation29_spill] sm:$0xff]  ;;  %v13690_v20 = vld [vmem:[#allocation27_spill] sm:$0xff] }
 0x722   :  { %v2960_v2 = vadd.f32 %v13665_v51, %v2894_v41  ;;  %v3027_v44 = vadd.f32 %v13669_v14, %v2961_v5  ;;  %v2959_v23 = vadd.f32 %v13673_v15, %v2893_v63  ;;  %v3352_v19 = vadd.f32 %v13677_v48, %v3286_v59  ;;  %v13686_v12 = vld [vmem:[#allocation46_spill] sm:$0xff]  ;;  %v13687_v9 = vld [vmem:[#allocation21_spill] sm:$0xff]  ;;  %v13688_v51 = vld [vmem:[#allocation44_spill] sm:$0xff] }
 0x723   :  { %v2892_v38 = vadd.f32 %v13672_v58, %v2826_v25  ;;  %v2891_v18 = vadd.f32 %v13675_v53, %v2825_v24  ;;  %v13689_v60 = vld [vmem:[#allocation57_spill] sm:$0xff]  ;;  %v13691_v32 = vld [vmem:[#allocation34_spill] sm:$0xff]  ;;  %v3424_v13 = vadd.f32 %v10714_v8, %v3358_v56  ;;  %v13695_v58 = vld [vmem:[#allocation32_spill] sm:$0xff] }
 0x724   :  { %v3026_v49 = vadd.f32 %v13671_v26, %v2960_v2  ;;  %v3093_v35 = vadd.f32 %v13674_v6, %v3027_v44  ;;  %v3025_v7 = vadd.f32 %v13679_v39, %v2959_v23  ;;  %v3418_v59 = vadd.f32 %v13689_v60, %v3352_v19  ;;  %v13692_v14 = vld [vmem:[#allocation54_spill] sm:$0xff]  ;;  %v13694_v26 = vld [vmem:[#allocation52_spill] sm:$0xff]  ;;  %v13698_v53 = vld [vmem:[#allocation31_spill] sm:$0xff] }
 0x725   :  { %v2958_v22 = vadd.f32 %v13678_v42, %v2892_v38  ;;  %v2957_v46 = vadd.f32 %v13682_v30, %v2891_v18  ;;  %v13693_v4 = vld [vmem:[#allocation26_spill] sm:$0xff]  ;;  %v13696_v15 = vld [vmem:[#allocation40_spill] sm:$0xff]  ;;  %v13702_v39 = vld [vmem:[#allocation47_spill] sm:$0xff] }
 0x726   :  { %v3092_v3 = vadd.f32 %v13676_v54, %v3026_v49  ;;  %v3159_v36 = vadd.f32 %v13680_v0, %v3093_v35  ;;  %v3091_v45 = vadd.f32 %v13685_v21, %v3025_v7  ;;  %v13697_v6 = vld [vmem:[#allocation56_spill] sm:$0xff]  ;;  %v13699_v54 = vld [vmem:[#allocation55_spill] sm:$0xff]  ;;  %v13701_v42 = vld [vmem:[#allocation38_spill] sm:$0xff] }
 0x727   :  { %v10863_v47 = vpop.f32.mrf.mxu3  ;;  %v3024_v37 = vadd.f32 %v13684_v52, %v2958_v22  ;;  %v3023_v28 = vadd.f32 %v13687_v9, %v2957_v46  ;;  %v13700_v48 = vld [vmem:[#allocation60_spill] sm:$0xff]  ;;  %v13703_v7 = vld [vmem:[#allocation67_spill] sm:$0xff]  ;;  %v13705_v56 = vld [vmem:[#allocation37_spill] sm:$0xff] }
 0x728   :  { %v3158_v27 = vadd.f32 %v13683_v10, %v3092_v3  ;;  %v3225_v5 = vadd.f32 %v13686_v12, %v3159_v36  ;;  %v3157_v63 = vadd.f32 %v13691_v32, %v3091_v45  ;;  %v3484_v19 = vadd.f32 %v13700_v48, %v3418_v59  ;;  %v13704_v36 = vld [vmem:[#allocation71_spill] sm:$0xff]  ;;  %v13706_v46 = vld [vmem:[#allocation65_spill] sm:$0xff]  ;;  %v13712_v59 = vld [vmem:[#allocation70_spill] sm:$0xff] }
 0x729   :  { %v10869_v62 = vpop.f32.mrf.mxu0  ;;  %v3090_v25 = vadd.f32 %v13690_v20, %v3024_v37  ;;  %v3089_v24 = vadd.f32 %v13693_v4, %v3023_v28  ;;  %v3490_v43 = vadd.f32 %v13704_v36, %v3424_v13  ;;  %v13707_v37 = vld [vmem:[#allocation45_spill] sm:$0xff]  ;;  %v13710_v28 = vld [vmem:[#allocation43_spill] sm:$0xff]  ;;  %v13726_v36 = vld [vmem:[#allocation62_spill] sm:$0xff] }
 0x72a   :  { %v3224_v2 = vadd.f32 %v13688_v51, %v3158_v27  ;;  %v3291_v44 = vadd.f32 %v13692_v14, %v3225_v5  ;;  %v3223_v23 = vadd.f32 %v13696_v15, %v3157_v63  ;;  %v13708_v45 = vld [vmem:[#allocation53_spill] sm:$0xff]  ;;  %v3550_v20 = vadd.f32 %v13712_v59, %v3484_v19  ;;  %v13714_v63 = vld [vmem:[#allocation63_spill] sm:$0xff] }
 0x72b   :  { %v3156_v38 = vadd.f32 %v13695_v58, %v3090_v25  ;;  %v3155_v18 = vadd.f32 %v13698_v53, %v3089_v24  ;;  %v13709_v5 = vld [vmem:[#allocation69_spill] sm:$0xff]  ;;  %v13713_v25 = vld [vmem:[#allocation51_spill] sm:$0xff]  ;;  %v13716_v24 = vld [vmem:[#allocation50_spill] sm:$0xff] }
 0x72c   :  { %v3290_v49 = vadd.f32 %v13694_v26, %v3224_v2  ;;  %v3357_v35 = vadd.f32 %v13697_v6, %v3291_v44  ;;  %v3289_v8 = vadd.f32 %v13702_v39, %v3223_v23  ;;  %v13711_v2 = vld [vmem:[#allocation68_spill] sm:$0xff]  ;;  %v13715_v13 = vld [vmem:[#allocation81_spill] sm:$0xff]  ;;  %v13719_v23 = vld [vmem:[#allocation66_spill] sm:$0xff] }
 0x72d   :  { %v3222_v22 = vadd.f32 %v13701_v42, %v3156_v38  ;;  %v3221_v30 = vadd.f32 %v13705_v56, %v3155_v18  ;;  %v3556_v4 = vadd.f32 %v13715_v13, %v3490_v43  ;;  %v13718_v38 = vld [vmem:[#allocation61_spill] sm:$0xff]  ;;  %v13721_v18 = vld [vmem:[#allocation59_spill] sm:$0xff]  ;;  %v13725_v39 = vld [vmem:[#allocation76_spill] sm:$0xff] }
 0x72e   :  { %v3356_v3 = vadd.f32 %v13699_v54, %v3290_v49  ;;  %v3423_v0 = vadd.f32 %v13703_v7, %v3357_v35  ;;  %v3355_v12 = vadd.f32 %v13708_v45, %v3289_v8  ;;  %v13717_v49 = vld [vmem:[#allocation78_spill] sm:$0xff]  ;;  %v13723_v19 = vld [vmem:[#allocation73_spill] sm:$0xff] }
 0x72f   :  { %v10876_v1 = vpop.f32.mrf.mxu3  ;;  %v3288_v21 = vadd.f32 %v13707_v37, %v3222_v22  ;;  %v3287_v51 = vadd.f32 %v13710_v28, %v3221_v30  ;;  %v13720_v35 = vld [vmem:[#allocation82_spill] sm:$0xff]  ;;  %v3616_v42 = vadd.f32 %v13723_v19, %v3550_v20  ;;  %v13724_v22 = vld [vmem:[#allocation64_spill] sm:$0xff]  ;;  %v13733_v59 = vld [vmem:[#allocation77_spill] sm:$0xff] }
 0x730   :  { %v3422_v10 = vadd.f32 %v13706_v46, %v3356_v3  ;;  %v3489_v9 = vadd.f32 %v13709_v5, %v3423_v0  ;;  %v3421_v14 = vadd.f32 %v13714_v63, %v3355_v12  ;;  %v13722_v3 = vld [vmem:[#allocation80_spill] sm:$0xff]  ;;  %v3622_v0 = vadd.f32 %v10788_v57, %v3556_v4  ;;  %v13727_v56 = vld [vmem:[#allocation90_spill] sm:$0xff]  ;;  %v13735_v63 = vld [vmem:[#allocation93_spill] sm:$0xff] }
 0x731   :  { %v3354_v32 = vadd.f32 %v13713_v25, %v3288_v21  ;;  %v3353_v26 = vadd.f32 %v13716_v24, %v3287_v51  ;;  %v13729_v21 = vld [vmem:[#allocation79_spill] sm:$0xff]  ;;  %v13730_v5 = vld [vmem:[#allocation72_spill] sm:$0xff]  ;;  %v13737_v4 = vld [vmem:[#allocation102_spill] sm:$0xff] }
 0x732   :  { %v3488_v60 = vadd.f32 %v13711_v2, %v3422_v10  ;;  %v3555_v44 = vadd.f32 %v10766_v31, %v3489_v9  ;;  %v3487_v6 = vadd.f32 %v13719_v23, %v3421_v14  ;;  %v13728_v10 = vld [vmem:[#allocation74_spill] sm:$0xff]  ;;  %v13731_v28 = vld [vmem:[#allocation92_spill] sm:$0xff]  ;;  %v13732_v2 = vld [vmem:[#allocation83_spill] sm:$0xff]  ;;  %v3688_v14 = vadd.f32 %v13735_v63, %v3622_v0 }
 0x733   :  { %v3420_v15 = vadd.f32 %v13718_v38, %v3354_v32  ;;  %v3419_v54 = vadd.f32 %v13721_v18, %v3353_v26  ;;  %v13734_v20 = vld [vmem:[#allocation88_spill] sm:$0xff]  ;;  %v13742_v18 = vld [vmem:[#allocation89_spill] sm:$0xff] }
 0x734   :  { %v3554_v58 = vadd.f32 %v13717_v49, %v3488_v60  ;;  %v3621_v53 = vadd.f32 %v13720_v35, %v3555_v44  ;;  %v3553_v8 = vadd.f32 %v13725_v39, %v3487_v6  ;;  %v3682_v60 = vadd.f32 %v13732_v2, %v3616_v42  ;;  %v13736_v44 = vld [vmem:[#allocation75_spill] sm:$0xff]  ;;  %v13741_v35 = vld [vmem:[#allocation85_spill] sm:$0xff] }
 0x735   :  { %v3486_v31 = vadd.f32 %v13724_v22, %v3420_v15  ;;  %v3485_v43 = vadd.f32 %v13726_v36, %v3419_v54  ;;  %v13739_v49 = vld [vmem:[#allocation91_spill] sm:$0xff]  ;;  %v13740_v15 = vld [vmem:[#allocation84_spill] sm:$0xff] }
 0x736   :  { %v3620_v48 = vadd.f32 %v13722_v3, %v3554_v58  ;;  %v3687_v7 = vadd.f32 %v10811_v55, %v3621_v53  ;;  %v3619_v45 = vadd.f32 %v13729_v21, %v3553_v8  ;;  %v3748_v53 = vadd.f32 %v13741_v35, %v3682_v60  ;;  %v13743_v54 = vld [vmem:[#allocation100_spill] sm:$0xff]  ;;  %v13745_v22 = vld [vmem:[#allocation87_spill] sm:$0xff]  ;;  %v13750_v21 = vld [vmem:[#allocation101_spill] sm:$0xff] }
 0x737   :  { %v10902_v61 = vpop.f32.mrf.mxu3  ;;  %v3552_v37 = vadd.f32 %v13728_v10, %v3486_v31  ;;  %v3551_v9 = vadd.f32 %v13730_v5, %v3485_v43 }
 0x738   :  { %v3686_v30 = vadd.f32 %v13727_v56, %v3620_v48  ;;  %v3753_v12 = vadd.f32 %v10819_v40, %v3687_v7  ;;  %v3685_v25 = vadd.f32 %v13734_v20, %v3619_v45  ;;  %v13738_v40 = vld [vmem:[#allocation86_spill] sm:$0xff]  ;;  %v13744_v48 = vld [vmem:[#allocation95_spill] sm:$0xff]  ;;  %v13748_v56 = vld [vmem:[#allocation96_spill] sm:$0xff] }
 0x739   :  { %v3618_v57 = vadd.f32 %v13733_v59, %v3552_v37  ;;  %v3617_v13 = vadd.f32 %v13736_v44, %v3551_v9  ;;  %v3754_v19 = vadd.f32 %v13744_v48, %v3688_v14  ;;  %v13746_v7 = vld [vmem:[#allocation98_spill] sm:$0xff]  ;;  %v13751_v9 = vld [vmem:[#allocation99_spill] sm:$0xff]  ;;  %v13752_v59 = vld [vmem:[#allocation97_spill] sm:$0xff] }
 0x73a   :  { %v3752_v51 = vadd.f32 %v13731_v28, %v3686_v30  ;;  %v3819_v32 = vadd.f32 %v10844_v11, %v3753_v12  ;;  %v3751_v58 = vadd.f32 %v13739_v49, %v3685_v25  ;;  %v13749_v30 = vld [vmem:[#allocation94_spill] sm:$0xff] }
 0x73b   :  { %v3684_v26 = vadd.f32 %v13738_v40, %v3618_v57  ;;  %v3683_v23 = vadd.f32 %v13740_v15, %v3617_v13  ;;  %v3814_v10 = vadd.f32 %v13749_v30, %v3748_v53  ;;  %v3820_v12 = vadd.f32 %v10855_v50, %v3754_v19  ;;  %v4096_v30 = vld [vmem:[%s13529_s2 + $0x130] sm:$0xff] }
 0x73c   :  { %v3818_v24 = vadd.f32 %v13737_v4, %v3752_v51  ;;  %v3885_v38 = vadd.f32 %v10860_v33, %v3819_v32  ;;  %v3817_v3 = vadd.f32 %v13743_v54, %v3751_v58  ;;  %v13747_v33 = vld [vmem:[#allocation103_spill] sm:$0xff] }
 0x73d   :  { %v3750_v11 = vadd.f32 %v13742_v18, %v3684_v26  ;;  %v3749_v31 = vadd.f32 %v13745_v22, %v3683_v23  ;;  %v3886_v2 = vadd.f32 %v10869_v62, %v3820_v12  ;;  %v3880_v57 = vadd.f32 %v13752_v59, %v3814_v10  ;;  %v4061_v10 = vld [vmem:[%s13529_s2 + $0x18] sm:$0xff]  ;;  %v4063_v12 = vld [vmem:[%s13529_s2 + $0x28] sm:$0xff]  ;;  %v5335_v59 = vld [vmem:[%s13534_s7 + $0x110] sm:$0xff] }
 0x73e   :  { %v3884_v6 = vadd.f32 %v10851_v17, %v3818_v24  ;;  %v3883_v36 = vadd.f32 %v13747_v33, %v3817_v3  ;;  %v4058_v33 = vld [vmem:[%s13529_s2] sm:$0xff]  ;;  %6123 = vmatpush.msra.mxu2 %v5335_v59 }
 0x73f   :  { %v10934_v29 = vpop.f32.mrf.mxu3  ;;  %v3816_v0 = vadd.f32 %v13746_v7, %v3750_v11  ;;  %v3815_v17 = vadd.f32 %v13748_v56, %v3749_v31  ;;  %v3946_v32 = vadd.f32 %v10863_v47, %v3880_v57  ;;  %v4095_v56 = vld [vmem:[%s13529_s2 + $0x128] sm:$0xff]  ;;  %v4068_v57 = vld [vmem:[%s13529_s2 + $0x50] sm:$0xff]  ;;  %v4122_v59 = vld [vmem:[%s13529_s2 + $0x200] sm:$0xff] }
 0x740   :  { %v3949_v5 = vadd.f32 %v10934_v29, %v3883_v36  ;;  %v4094_v36 = vld [vmem:[%s13529_s2 + $0x120] sm:$0xff] }
 0x741   :  { %v3882_v45 = vadd.f32 %v13750_v21, %v3816_v0  ;;  %v3881_v28 = vadd.f32 %v13751_v9, %v3815_v17  ;;  %v4060_v17 = vld [vmem:[%s13529_s2 + $0x10] sm:$0xff]  ;;  %v4062_v21 = vld [vmem:[%s13529_s2 + $0x20] sm:$0xff] }
 0x742   :  { %v4100_v9 = vld [vmem:[%s13529_s2 + $0x150] sm:$0xff] }
 0x743   :  { %v3948_v60 = vadd.f32 %v10902_v61, %v3882_v45  ;;  %v3947_v50 = vadd.f32 %v10876_v1, %v3881_v28  ;;  %v4098_v45 = vld [vmem:[%s13529_s2 + $0x140] sm:$0xff]  ;;  %v4065_v28 = vld [vmem:[%s13529_s2 + $0x38] sm:$0xff] }
 0x747   :  { %v3937_v27 = vpop.f32.mrf.mxu3 }
 0x748   :  { %v3950_v39 = vadd.f32 %v3937_v27, %v3884_v6  ;;  %v8453_v27 = vld [vmem:[%s13533_s6] ss:$0 sm:$0xff]  ;;  %s8562_s6 = smov 116  }
 0x74f   :  { %v3940_v55 = vpop.f32.mrf.mxu3 }
 0x750   :  { %v3951_v42 = vadd.f32 %v3940_v55, %v3885_v38 }
 0x756   :  { %v10887_v16 = vpop.f32.mrf.mxu0 }
 0x757   :  { %v3943_v51 = vpop.f32.mrf.mxu3 }
 0x758   :  { %v3952_v29 = vadd.f32 %v3943_v51, %v3886_v2  ;;  %v4101_v51 = vld [vmem:[%s13529_s2 + $0x158] sm:$0xff]  ;;  %v4066_v2 = vld [vmem:[%s13529_s2 + $0x40] sm:$0xff] }
 0x75e   :  { %v10914_v34 = vpop.f32.mrf.mxu0 }
 0x75f   :  { %v4013_v14 = vadd.f32 %v10914_v34, %v3947_v50  ;;  %v4069_v50 = vld [vmem:[%s13529_s2 + $0x58] sm:$0xff] }
 0x761   :  { %v4024_v40 = vadd.f32 %v8453_v27, %v4013_v14  ;;  %v4107_v14 = vld [vmem:[%s13529_s2 + $0x188] sm:$0xff] }
 0x763   :  { %v4031_v47 = vmul.f32 0.5, %v4024_v40 }
 0x766   :  { %v10942_v41 = vpop.f32.mrf.mxu0 }
 0x767   :  { %v4014_v25 = vadd.f32 %v10942_v41, %v3948_v60  ;;  %v4102_v60 = vld [vmem:[%s13529_s2 + $0x160] sm:$0xff] }
 0x769   :  { %v4025_v4 = vadd.f32 %v8453_v27, %v4014_v25  ;;  %v4070_v25 = vld [vmem:[%s13529_s2 + $0x60] sm:$0xff] }
 0x76b   :  { %v4032_v41 = vmul.f32 0.5, %v4025_v4  ;;  %v4074_v4 = vld [vmem:[%s13529_s2 + $0x80] sm:$0xff] }
 0x76e   :  { %v10968_v52 = vpop.f32.mrf.mxu0 }
 0x76f   :  { %v4015_v55 = vadd.f32 %v10968_v52, %v3949_v5  ;;  %v4012_v52 = vadd.f32 %v10887_v16, %v3946_v32  ;;  %v4099_v5 = vld [vmem:[%s13529_s2 + $0x148] sm:$0xff]  ;;  %v4106_v32 = vld [vmem:[%s13529_s2 + $0x180] sm:$0xff] }
 0x771   :  { %v4026_v44 = vadd.f32 %v8453_v27, %v4015_v55  ;;  %v4023_v49 = vadd.f32 %v8453_v27, %v4012_v52  ;;  %v4067_v55 = vld [vmem:[%s13529_s2 + $0x48] sm:$0xff] }
 0x773   :  { %v4033_v26 = vmul.f32 0.5, %v4026_v44  ;;  %v4030_v34 = vmul.f32 0.5, %v4023_v49  ;;  %v4072_v44 = vld [vmem:[%s13529_s2 + $0x70] sm:$0xff]  ;;  %v4111_v49 = vld [vmem:[%s13529_s2 + $0x1a8] sm:$0xff] }
 0x776   :  { %v4003_v46 = vpop.f32.mrf.mxu0 }
 0x777   :  { %v4016_v37 = vadd.f32 %v4003_v46, %v3950_v39 }
 0x779   :  { %v4027_v20 = vadd.f32 %v8453_v27, %v4016_v37  ;;  %v4097_v37 = vld [vmem:[%s13529_s2 + $0x138] sm:$0xff] }
 0x77b   :  { %v4034_v61 = vmul.f32 0.5, %v4027_v20  ;;  %v4104_v20 = vld [vmem:[%s13529_s2 + $0x170] sm:$0xff] }
 0x77e   :  { %v4006_v8 = vpop.f32.mrf.mxu0 }
 0x77f   :  { %v4017_v43 = vadd.f32 %v4006_v8, %v3951_v42 }
 0x781   :  { %v4028_v46 = vadd.f32 %v8453_v27, %v4017_v43  ;;  %v4059_v43 = vld [vmem:[%s13529_s2 + $0x8] sm:$0xff] }
 0x783   :  { %v4035_v62 = vmul.f32 0.5, %v4028_v46  ;;  %v4103_v46 = vld [vmem:[%s13529_s2 + $0x168] sm:$0xff] }
 0x785   :  { %8505 = vtanh.f32 %v4035_v62  ;;  %v4108_v62 = vld [vmem:[%s13529_s2 + $0x190] sm:$0xff] }
 0x786   :  { %v4009_v63 = vpop.f32.mrf.mxu0  ;;  %8507 = vtanh.f32 %v4034_v61  ;;  %v4109_v61 = vld [vmem:[%s13529_s2 + $0x198] sm:$0xff] }
 0x787   :  { %v4018_v13 = vadd.f32 %v4009_v63, %v3952_v29  ;;  %v4105_v29 = vld [vmem:[%s13529_s2 + $0x178] sm:$0xff]  ;;  %v4071_v63 = vld [vmem:[%s13529_s2 + $0x68] sm:$0xff] }
 0x789   :  { %v4029_v24 = vadd.f32 %v8453_v27, %v4018_v13  ;;  %v4064_v27 = vld [vmem:[%s13529_s2 + $0x30] sm:$0xff]  ;;  %v4073_v13 = vld [vmem:[%s13529_s2 + $0x78] sm:$0xff] }
 0x78b   :  { %v4036_v1 = vmul.f32 0.5, %v4029_v24  ;;  %v8506_v58 = vpop.eup %8505  ;;  %v4110_v24 = vld [vmem:[%s13529_s2 + $0x1a0] sm:$0xff] }
 0x78c   :  { %v8508_v38 = vpop.eup %8507  ;;  %v4049_v16 = vadd.f32 1.0, %v8506_v58  ;;  %v4076_v58 = vld [vmem:[%s13529_s2 + $0x90] sm:$0xff] }
 0x78d   :  { %8509 = vtanh.f32 %v4036_v1  ;;  %v4048_v53 = vadd.f32 1.0, %v8508_v38  ;;  %v4075_v1 = vld [vmem:[%s13529_s2 + $0x88] sm:$0xff] }
 0x78e   :  { %8511 = vtanh.f32 %v4033_v26  ;;  %v4056_v11 = vmul.f32 0.5, %v4049_v16  ;;  %v4113_v16 = vld [vmem:[%s13529_s2 + $0x1b8] sm:$0xff] }
 0x78f   :  { %8513 = vtanh.f32 %v4032_v41  ;;  %v4055_v48 = vmul.f32 0.5, %v4048_v53  ;;  %v4078_v53 = vld [vmem:[%s13529_s2 + $0xa0] sm:$0xff] }
 0x790   :  { %8515 = vtanh.f32 %v4031_v47 }
 0x791   :  { %8517 = vtanh.f32 %v4030_v34  ;;  %v4112_v34 = vld [vmem:[%s13529_s2 + $0x1b0] sm:$0xff] }
 0x793   :  { %v8510_v15 = vpop.eup %8509 }
 0x794   :  { %v4050_v23 = vadd.f32 1.0, %v8510_v15  ;;  %v8512_v6 = vpop.eup %8511 }
 0x795   :  { %v8514_v18 = vpop.eup %8513  ;;  %v4047_v54 = vadd.f32 1.0, %v8512_v6 }
 0x796   :  { %v4057_v35 = vmul.f32 0.5, %v4050_v23  ;;  %v8516_v3 = vpop.eup %8515  ;;  %v4046_v19 = vadd.f32 1.0, %v8514_v18  ;;  %v4077_v23 = vld [vmem:[%s13529_s2 + $0x98] sm:$0xff]  ;;  %v4114_v18 = vld [vmem:[%s13529_s2 + $0x1c0] sm:$0xff] }
 0x797   :  { %v8518_v42 = vpop.eup %8517  ;;  %v4054_v22 = vmul.f32 0.5, %v4047_v54  ;;  %v4045_v31 = vadd.f32 1.0, %v8516_v3  ;;  %v4079_v3 = vld [vmem:[%s13529_s2 + $0xa8] sm:$0xff] }
 0x798   :  { %4768 = vmatpush.msra.mxu0 %v4057_v35  ;;  %8437 = vmatpush.msra.mxu3 %v4057_v35  ;;  %v4053_v39 = vmul.f32 0.5, %v4046_v19  ;;  %v4044_v8 = vadd.f32 1.0, %v8518_v42  ;;  %v5306_v19 = vld [vmem:[%s13534_s7 + $0x28] sm:$0xff] }
 0x799   :  { %v4052_v7 = vmul.f32 0.5, %v4045_v31  ;;  %v4080_v31 = vld [vmem:[%s13529_s2 + $0xb0] sm:$0xff] }
 0x79a   :  { %4769 = vmatpush.msra.mxu0 %v4056_v11  ;;  %8438 = vmatpush.msra.mxu3 %v4056_v11  ;;  %v4051_v0 = vmul.f32 0.5, %v4044_v8 }
 0x79c   :  { %4770 = vmatpush.msra.mxu0 %v4055_v48  ;;  %8439 = vmatpush.msra.mxu3 %v4055_v48  ;;  %v4115_v48 = vld [vmem:[%s13529_s2 + $0x1c8] sm:$0xff] }
 0x79e   :  { %4771 = vmatpush.msra.mxu0 %v4054_v22  ;;  %8440 = vmatpush.msra.mxu3 %v4054_v22 }
 0x7a0   :  { %4772 = vmatpush.msra.mxu0 %v4053_v39  ;;  %8441 = vmatpush.msra.mxu3 %v4053_v39  ;;  %v4116_v39 = vld [vmem:[%s13529_s2 + $0x1d0] sm:$0xff] }
 0x7a2   :  { %4773 = vmatpush.msra.mxu0 %v4052_v7  ;;  %8442 = vmatpush.msra.mxu3 %v4052_v7 }
 0x7a4   :  { %4774 = vmatpush.msra.mxu0 %v4051_v0  ;;  %8443 = vmatpush.msra.mxu3 %v4051_v0  ;;  %v4081_v0 = vld [vmem:[%s13529_s2 + $0xb8] sm:$0xff] }
 0x7a5   :  { %8035 = vmatmul.msk.f32.vlgmr.msra.gmra.mxu0 %vm4233_vm4, %v4058_v33  ;;  %8071 = vmatmul.msk.f32.vlgmr.msra.gmra.mxu3 %vm4233_vm4, %v4094_v36  ;;  %v4117_v33 = vld [vmem:[%s13529_s2 + $0x1d8] sm:$0xff] }
 0x7a6   :  { %5410 = vmatpush.msrb.mxu0 %v5306_v19  ;;  %v4092_v19 = vld [vmem:[%s13529_s2 + $0x110] sm:$0xff] }
 0x7ad   :  { %8036 = vmatmul.msk.f32.gmra.mxu0 %vm4233_vm4, %v4059_v43  ;;  %8072 = vmatmul.msk.f32.gmra.mxu3 %vm4233_vm4, %v4095_v56  ;;  %v4082_v56 = vld [vmem:[%s13529_s2 + $0xc0] sm:$0xff] }
 0x7b5   :  { %8037 = vmatmul.msk.f32.gmra.mxu0 %vm4233_vm4, %v4060_v17  ;;  %8073 = vmatmul.msk.f32.gmra.mxu3 %vm4233_vm4, %v4096_v30  ;;  %v4118_v17 = vld [vmem:[%s13529_s2 + $0x1e0] sm:$0xff] }
 0x7bd   :  { %8038 = vmatmul.msk.f32.gmra.mxu0 %vm4233_vm4, %v4061_v10  ;;  %8074 = vmatmul.msk.f32.gmra.mxu3 %vm4233_vm4, %v4097_v37  ;;  %v4083_v37 = vld [vmem:[%s13529_s2 + $0xc8] sm:$0xff] }
 0x7c5   :  { %8039 = vmatmul.msk.f32.gmra.mxu0 %vm4233_vm4, %v4062_v21  ;;  %8075 = vmatmul.msk.f32.gmra.mxu3 %vm4233_vm4, %v4098_v45  ;;  %v4119_v21 = vld [vmem:[%s13529_s2 + $0x1e8] sm:$0xff] }
 0x7cd   :  { %8040 = vmatmul.msk.f32.gmra.mxu0 %vm4233_vm4, %v4063_v12  ;;  %8076 = vmatmul.msk.f32.gmra.mxu3 %vm4233_vm4, %v4099_v5  ;;  %v4084_v5 = vld [vmem:[%s13529_s2 + $0xd0] sm:$0xff] }
 0x7d5   :  { %8041 = vmatmul.msk.f32.gmra.mxu0 %vm4233_vm4, %v4064_v27  ;;  %8077 = vmatmul.msk.f32.gmra.mxu3 %vm4233_vm4, %v4100_v9  ;;  %v4120_v27 = vld [vmem:[%s13529_s2 + $0x1f0] sm:$0xff] }
 0x7dd   :  { %8042 = vmatmul.msk.f32.gmra.mxu0 %vm4233_vm4, %v4065_v28  ;;  %8078 = vmatmul.msk.f32.gmra.mxu3 %vm4233_vm4, %v4101_v51  ;;  %v4085_v51 = vld [vmem:[%s13529_s2 + $0xd8] sm:$0xff] }
 0x7e5   :  { %8043 = vmatmul.msk.f32.gmra.mxu0 %vm4233_vm4, %v4066_v2  ;;  %8079 = vmatmul.msk.f32.gmra.mxu3 %vm4233_vm4, %v4102_v60  ;;  %v4121_v2 = vld [vmem:[%s13529_s2 + $0x1f8] sm:$0xff] }
 0x7ed   :  { %8044 = vmatmul.msk.f32.gmra.mxu0 %vm4233_vm4, %v4067_v55  ;;  %8080 = vmatmul.msk.f32.gmra.mxu3 %vm4233_vm4, %v4103_v46  ;;  %v4086_v46 = vld [vmem:[%s13529_s2 + $0xe0] sm:$0xff] }
 0x7f5   :  { %8045 = vmatmul.msk.f32.gmra.mxu0 %vm4233_vm4, %v4068_v57  ;;  %8081 = vmatmul.msk.f32.gmra.mxu3 %vm4233_vm4, %v4104_v20 }
 0x7fd   :  { %8046 = vmatmul.msk.f32.gmra.mxu0 %vm4233_vm4, %v4069_v50  ;;  %8082 = vmatmul.msk.f32.gmra.mxu3 %vm4233_vm4, %v4105_v29  ;;  %v4087_v50 = vld [vmem:[%s13529_s2 + $0xe8] sm:$0xff] }
 0x7fe   :  { %v4123_v29 = vld [vmem:[%s13529_s2 + $0x208] sm:$0xff] }
 0x805   :  { %8047 = vmatmul.msk.f32.gmra.mxu0 %vm4233_vm4, %v4070_v25  ;;  %8083 = vmatmul.msk.f32.gmra.mxu3 %vm4233_vm4, %v4106_v32 }
 0x80d   :  { %8048 = vmatmul.msk.f32.gmra.mxu0 %vm4233_vm4, %v4071_v63  ;;  %8084 = vmatmul.msk.f32.gmra.mxu3 %vm4233_vm4, %v4107_v14  ;;  %v4088_v63 = vld [vmem:[%s13529_s2 + $0xf0] sm:$0xff] }
 0x80e   :  { %v4124_v14 = vld [vmem:[%s13529_s2 + $0x210] sm:$0xff] }
 0x815   :  { %8049 = vmatmul.msk.f32.gmra.mxu0 %vm4233_vm4, %v4072_v44  ;;  %8085 = vmatmul.msk.f32.gmra.mxu3 %vm4233_vm4, %v4108_v62 }
 0x81d   :  { %8050 = vmatmul.msk.f32.gmra.mxu0 %vm4233_vm4, %v4073_v13  ;;  %8086 = vmatmul.msk.f32.gmra.mxu3 %vm4233_vm4, %v4109_v61  ;;  %v4089_v13 = vld [vmem:[%s13529_s2 + $0xf8] sm:$0xff] }
 0x81e   :  { %v4125_v61 = vld [vmem:[%s13529_s2 + $0x218] sm:$0xff] }
 0x822   :  { %v11167_v52 = vpop.f32.mrf.mxu0 }
 0x825   :  { %8051 = vmatmul.msk.f32.gmra.mxu0 %vm4233_vm4, %v4074_v4  ;;  %8087 = vmatmul.msk.f32.gmra.mxu3 %vm4233_vm4, %v4110_v24  ;;  %v5305_v24 = vld [vmem:[%s13534_s7 + $0x20] sm:$0xff] }
 0x826   :  { %5411 = vmatpush.msrb.mxu0 %v5305_v24 }
 0x828   :  { %v11177_v40 = vpop.f32.mrf.mxu3 }
 0x82a   :  { %v11179_v26 = vpop.f32.mrf.mxu0 }
 0x82d   :  { %8052 = vmatmul.msk.f32.gmra.mxu0 %vm4233_vm4, %v4075_v1  ;;  %8088 = vmatmul.msk.f32.gmra.mxu3 %vm4233_vm4, %v4111_v49  ;;  %v4090_v49 = vld [vmem:[%s13529_s2 + $0x100] sm:$0xff] }
 0x830   :  { %v11189_v41 = vpop.f32.mrf.mxu3 }
 0x832   :  { %v11191_v47 = vpop.f32.mrf.mxu0 }
 0x835   :  { %8053 = vmatmul.msk.f32.gmra.mxu0 %vm4233_vm4, %v4076_v58  ;;  %8089 = vmatmul.msk.f32.gmra.mxu3 %vm4233_vm4, %v4112_v34  ;;  %v4126_v58 = vld [vmem:[%s13529_s2 + $0x220] sm:$0xff]  ;;  %v5304_v34 = vld [vmem:[%s13534_s7 + $0x18] sm:$0xff] }
 0x836   :  { %5412 = vmatpush.msrb.mxu0 %v5304_v34 }
 0x838   :  { %v11201_v38 = vpop.f32.mrf.mxu3 }
 0x83a   :  { %v11203_v15 = vpop.f32.mrf.mxu0 }
 0x83d   :  { %8054 = vmatmul.msk.f32.gmra.mxu0 %vm4233_vm4, %v4077_v23  ;;  %8090 = vmatmul.msk.f32.gmra.mxu3 %vm4233_vm4, %v4113_v16 }
 0x840   :  { %v11213_v6 = vpop.f32.mrf.mxu3 }
 0x842   :  { %v11215_v35 = vpop.f32.mrf.mxu0 }
 0x845   :  { %8055 = vmatmul.msk.f32.gmra.mxu0 %vm4233_vm4, %v4078_v53  ;;  %8091 = vmatmul.msk.f32.gmra.mxu3 %vm4233_vm4, %v4114_v18  ;;  %v4091_v53 = vld [vmem:[%s13529_s2 + $0x108] sm:$0xff] }
 0x846   :  { %v4127_v18 = vld [vmem:[%s13529_s2 + $0x228] sm:$0xff] }
 0x848   :  { %v11225_v11 = vpop.f32.mrf.mxu3 }
 0x84a   :  { %v11227_v54 = vpop.f32.mrf.mxu0 }
 0x84d   :  { %8056 = vmatmul.msk.f32.gmra.mxu0 %vm4233_vm4, %v4079_v3  ;;  %8092 = vmatmul.msk.f32.gmra.mxu3 %vm4233_vm4, %v4115_v48 }
 0x850   :  { %v11240_v42 = vpop.f32.mrf.mxu3 }
 0x852   :  { %v11242_v22 = vpop.f32.mrf.mxu0 }
 0x855   :  { %8057 = vmatmul.msk.f32.gmra.mxu0 %vm4233_vm4, %v4080_v31  ;;  %8093 = vmatmul.msk.f32.gmra.mxu3 %vm4233_vm4, %v4116_v39  ;;  %v4128_v31 = vld [vmem:[%s13529_s2 + $0x230] sm:$0xff] }
 0x858   :  { %v11252_v8 = vpop.f32.mrf.mxu3 }
 0x85a   :  { %v11254_v7 = vpop.f32.mrf.mxu0 }
 0x85d   :  { %8058 = vmatmul.msk.f32.gmra.mxu0 %vm4233_vm4, %v4081_v0  ;;  %8094 = vmatmul.msk.f32.gmra.mxu3 %vm4233_vm4, %v4117_v33  ;;  %v4093_v33 = vld [vmem:[%s13529_s2 + $0x118] sm:$0xff] }
 0x860   :  { %v11264_v36 = vpop.f32.mrf.mxu3 }
 0x862   :  { %v11266_v43 = vpop.f32.mrf.mxu0 }
 0x865   :  { %8059 = vmatmul.msk.f32.gmra.mxu0 %vm4233_vm4, %v4082_v56  ;;  %8095 = vmatmul.msk.f32.gmra.mxu3 %vm4233_vm4, %v4118_v17  ;;  %v4129_v56 = vld [vmem:[%s13529_s2 + $0x238] sm:$0xff] }
 0x868   :  { %v11276_v30 = vpop.f32.mrf.mxu3 }
 0x86a   :  { %v11278_v10 = vpop.f32.mrf.mxu0 }
 0x86d   :  { %8060 = vmatmul.msk.f32.gmra.mxu0 %vm4233_vm4, %v4083_v37  ;;  %8096 = vmatmul.msk.f32.gmra.mxu3 %vm4233_vm4, %v4119_v21  ;;  %v4130_v21 = vld [vmem:[%s13529_s2 + $0x240] sm:$0xff] }
 0x870   :  { %v11288_v45 = vpop.f32.mrf.mxu3 }
 0x872   :  { %v11290_v12 = vpop.f32.mrf.mxu0 }
 0x875   :  { %8061 = vmatmul.msk.f32.gmra.mxu0 %vm4233_vm4, %v4084_v5  ;;  %8097 = vmatmul.msk.f32.gmra.mxu3 %vm4233_vm4, %v4120_v27 }
 0x878   :  { %v11300_v9 = vpop.f32.mrf.mxu3 }
 0x87a   :  { %v11302_v28 = vpop.f32.mrf.mxu0 }
 0x87d   :  { %8062 = vmatmul.msk.f32.gmra.mxu0 %vm4233_vm4, %v4085_v51  ;;  %8098 = vmatmul.msk.f32.gmra.mxu3 %vm4233_vm4, %v4121_v2  ;;  %v4131_v51 = vld [vmem:[%s13529_s2 + $0x248] sm:$0xff] }
 0x880   :  { %v11312_v60 = vpop.f32.mrf.mxu3 }
 0x882   :  { %v11314_v55 = vpop.f32.mrf.mxu0 }
 0x885   :  { %8063 = vmatmul.msk.f32.gmra.mxu0 %vm4233_vm4, %v4086_v46  ;;  %8099 = vmatmul.msk.f32.gmra.mxu3 %vm4233_vm4, %v4122_v59  ;;  %v5303_v59 = vld [vmem:[%s13534_s7 + $0x10] sm:$0xff] }
 0x886   :  { %5469 = vmatpush.msra.mxu0 %v5303_v59  ;;  %v4140_v59 = vld [vmem:[%s13529_s2 + $0x290] sm:$0xff] }
 0x888   :  { %v11324_v57 = vpop.f32.mrf.mxu3 }
 0x88a   :  { %v11326_v20 = vpop.f32.mrf.mxu0 }
 0x88d   :  { %8064 = vmatmul.msk.f32.gmra.mxu0 %vm4233_vm4, %v4087_v50  ;;  %8100 = vmatmul.msk.f32.gmra.mxu3 %vm4233_vm4, %v4123_v29 }
 0x890   :  { %v11336_v25 = vpop.f32.mrf.mxu3 }
 0x892   :  { %v11338_v32 = vpop.f32.mrf.mxu0 }
 0x895   :  { %8065 = vmatmul.msk.f32.gmra.mxu0 %vm4233_vm4, %v4088_v63  ;;  %8101 = vmatmul.msk.f32.gmra.mxu3 %vm4233_vm4, %v4124_v14  ;;  %v4133_v63 = vld [vmem:[%s13529_s2 + $0x258] sm:$0xff] }
 0x898   :  { %v11348_v44 = vpop.f32.mrf.mxu3 }
 0x89a   :  { %v11350_v62 = vpop.f32.mrf.mxu0 }
 0x89d   :  { %8066 = vmatmul.msk.f32.gmra.mxu0 %vm4233_vm4, %v4089_v13  ;;  %8102 = vmatmul.msk.f32.gmra.mxu3 %vm4233_vm4, %v4125_v61  ;;  %v4134_v61 = vld [vmem:[%s13529_s2 + $0x260] sm:$0xff] }
 0x8a0   :  { %v11360_v4 = vpop.f32.mrf.mxu3 }
 0x8a2   :  { %v11365_v1 = vpop.f32.mrf.mxu0 }
 0x8a5   :  { %8067 = vmatmul.msk.f32.gmra.mxu0 %vm4233_vm4, %v4090_v49  ;;  %8103 = vmatmul.msk.f32.gmra.mxu3 %vm4233_vm4, %v4126_v58 }
 0x8a8   :  { %v11378_v23 = vpop.f32.mrf.mxu3 }
 0x8aa   :  { %v11380_v16 = vpop.f32.mrf.mxu0 }
 0x8ad   :  { %8068 = vmatmul.msk.f32.gmra.mxu0 %vm4233_vm4, %v4091_v53  ;;  %8104 = vmatmul.msk.f32.gmra.mxu3 %vm4233_vm4, %v4127_v18 }
 0x8b0   :  { %v11390_v3 = vpop.f32.mrf.mxu3 }
 0x8b2   :  { %v11392_v48 = vpop.f32.mrf.mxu0 }
 0x8b5   :  { %8069 = vmatmul.msk.f32.gmra.mxu0 %vm4233_vm4, %v4092_v19  ;;  %8105 = vmatmul.msk.f32.gmra.mxu3 %vm4233_vm4, %v4128_v31 }
 0x8b8   :  { %v11402_v39 = vpop.f32.mrf.mxu3 }
 0x8ba   :  { %v11404_v0 = vpop.f32.mrf.mxu0 }
 0x8bd   :  { %8070 = vmatmul.msk.f32.gmra.mxu0 %vm4233_vm4, %v4093_v33  ;;  %8106 = vmatmul.msk.f32.gmra.mxu3 %vm4233_vm4, %v4129_v56 }
 0x8c0   :  { %v11414_v17 = vpop.f32.mrf.mxu3 }
 0x8c2   :  { %v11416_v37 = vpop.f32.mrf.mxu0 }
 0x8c5   :  { %8107 = vmatmul.msk.f32.gmra.mxu3 %vm4233_vm4, %v4130_v21  ;;  %8210 = vmatmul.msk.f32.vlgmr.msrb.gmra.mxu0 %vm2382_vm3, %v11254_v7  ;;  %v4132_v7 = vld [vmem:[%s13529_s2 + $0x250] sm:$0xff]  ;;  %v5309_v21 = vld [vmem:[%s13534_s7 + $0x40] sm:$0xff] }
 0x8c8   :  { %v11424_v5 = vpop.f32.mrf.mxu3 }
 0x8ca   :  { %v11426_v27 = vpop.f32.mrf.mxu0 }
 0x8cd   :  { %8108 = vmatmul.msk.f32.gmra.mxu3 %vm4233_vm4, %v4131_v51  ;;  %8211 = vmatmul.msk.f32.gmra.mxu0 %vm2382_vm3, %v11266_v43  ;;  %v5302_v43 = vld [vmem:[%s13534_s7 + $0x8] sm:$0xff] }
 0x8ce   :  { %5470 = vmatpush.msra.mxu0 %v5302_v43 }
 0x8d0   :  { %v11434_v2 = vpop.f32.mrf.mxu3 }
 0x8d2   :  { %v11436_v46 = vpop.f32.mrf.mxu0 }
 0x8d5   :  { %8109 = vmatmul.msk.f32.gmra.mxu3 %vm4233_vm4, %v4132_v7  ;;  %8212 = vmatmul.msk.f32.gmra.mxu0 %vm2382_vm3, %v11278_v10  ;;  %v5301_v10 = vld [vmem:[%s13534_s7] sm:$0xff] }
 0x8d6   :  { %5471 = vmatpush.msra.mxu0 %v5301_v10  ;;  %v4141_v10 = vld [vmem:[%s13529_s2 + $0x298] sm:$0xff] }
 0x8d8   :  { %v11447_v50 = vpop.f32.mrf.mxu3  ;;  %5528 = vmatpush.msrb.mxu0 %v5309_v21 }
 0x8da   :  { %v11452_v29 = vpop.f32.mrf.mxu0 }
 0x8dd   :  { %8110 = vmatmul.msk.f32.gmra.mxu3 %vm4233_vm4, %v4133_v63  ;;  %8213 = vmatmul.msk.f32.gmra.mxu0 %vm2382_vm3, %v11290_v12  ;;  %v4135_v12 = vld [vmem:[%s13529_s2 + $0x268] sm:$0xff] }
 0x8e0   :  { %v11463_v14 = vpop.f32.mrf.mxu3 }
 0x8e2   :  { %v11465_v13 = vpop.f32.mrf.mxu0 }
 0x8e5   :  { %8111 = vmatmul.msk.f32.gmra.mxu3 %vm4233_vm4, %v4134_v61  ;;  %8214 = vmatmul.msk.f32.gmra.mxu0 %vm2382_vm3, %v11302_v28  ;;  %v4136_v28 = vld [vmem:[%s13529_s2 + $0x270] sm:$0xff] }
 0x8e8   :  { %v11473_v24 = vpop.f32.mrf.mxu3 }
 0x8ea   :  { %v11475_v49 = vpop.f32.mrf.mxu0 }
 0x8ed   :  { %8112 = vmatmul.msk.f32.gmra.mxu3 %vm4233_vm4, %v4135_v12  ;;  %8215 = vmatmul.msk.f32.gmra.mxu0 %vm2382_vm3, %v11314_v55  ;;  %v4137_v55 = vld [vmem:[%s13529_s2 + $0x278] sm:$0xff] }
 0x8f0   :  { %v11483_v58 = vpop.f32.mrf.mxu3 }
 0x8f2   :  { %v11485_v34 = vpop.f32.mrf.mxu0 }
 0x8f5   :  { %8113 = vmatmul.msk.f32.gmra.mxu3 %vm4233_vm4, %v4136_v28  ;;  %8216 = vmatmul.msk.f32.gmra.mxu0 %vm2382_vm3, %v11326_v20  ;;  %v4138_v20 = vld [vmem:[%s13529_s2 + $0x280] sm:$0xff] }
 0x8f8   :  { %v11493_v53 = vpop.f32.mrf.mxu3 }
 0x8fa   :  { %v11495_v18 = vpop.f32.mrf.mxu0 }
 0x8fd   :  { %8114 = vmatmul.msk.f32.gmra.mxu3 %vm4233_vm4, %v4137_v55  ;;  %8217 = vmatmul.msk.f32.vlgmr.msra.gmra.mxu0 %vm2382_vm3, %v11167_v52  ;;  %v4139_v52 = vld [vmem:[%s13529_s2 + $0x288] sm:$0xff] }
 0x900   :  { %v11503_v19 = vpop.f32.mrf.mxu3 }
 0x902   :  { %v11505_v31 = vpop.f32.mrf.mxu0 }
 0x905   :  { %8115 = vmatmul.msk.f32.gmra.mxu3 %vm4233_vm4, %v4138_v20  ;;  %8218 = vmatmul.msk.f32.gmra.mxu0 %vm2382_vm3, %v11179_v26  ;;  %v5308_v26 = vld [vmem:[%s13534_s7 + $0x38] sm:$0xff] }
 0x906   :  { %5529 = vmatpush.msrb.mxu0 %v5308_v26 }
 0x908   :  { %v11513_v33 = vpop.f32.mrf.mxu3 }
 0x90a   :  { %v11515_v56 = vpop.f32.mrf.mxu0 }
 0x90d   :  { %8116 = vmatmul.msk.f32.gmra.mxu3 %vm4233_vm4, %v4139_v52  ;;  %8219 = vmatmul.msk.f32.gmra.mxu0 %vm2382_vm3, %v11191_v47  ;;  %v5307_v47 = vld [vmem:[%s13534_s7 + $0x30] sm:$0xff] }
 0x90e   :  { %5530 = vmatpush.msrb.mxu0 %v5307_v47 }
 0x910   :  { %v11526_v51 = vpop.f32.mrf.mxu3 }
 0x912   :  { %v11531_v7 = vpop.f32.mrf.mxu0 }
 0x915   :  { %8117 = vmatmul.msk.f32.gmra.mxu3 %vm4233_vm4, %v4140_v59  ;;  %8220 = vmatmul.msk.f32.gmra.mxu0 %vm2382_vm3, %v11203_v15  ;;  %v4142_v15 = vld [vmem:[%s13529_s2 + $0x2a0] sm:$0xff] }
 0x918   :  { %v11542_v43 = vpop.f32.mrf.mxu3 }
 0x91a   :  { %v11544_v63 = vpop.f32.mrf.mxu0 }
 0x91d   :  { %8118 = vmatmul.msk.f32.gmra.mxu3 %vm4233_vm4, %v4141_v10  ;;  %8221 = vmatmul.msk.f32.gmra.mxu0 %vm2382_vm3, %v11215_v35  ;;  %v4143_v35 = vld [vmem:[%s13529_s2 + $0x2a8] sm:$0xff]  ;;  %v5312_v10 = vld [vmem:[%s13534_s7 + $0x58] sm:$0xff] }
 0x91e   :  { %5594 = vmatpush.msra.mxu0 %v5312_v10 }
 0x920   :  { %v11552_v61 = vpop.f32.mrf.mxu3 }
 0x922   :  { %v11554_v12 = vpop.f32.mrf.mxu0 }
 0x925   :  { %8119 = vmatmul.msk.f32.gmra.mxu3 %vm4233_vm4, %v4142_v15  ;;  %8222 = vmatmul.msk.f32.gmra.mxu0 %vm2382_vm3, %v11227_v54  ;;  %v4144_v54 = vld [vmem:[%s13529_s2 + $0x2b0] sm:$0xff] }
 0x928   :  { %v11562_v28 = vpop.f32.mrf.mxu3 }
 0x92a   :  { %v11564_v55 = vpop.f32.mrf.mxu0 }
 0x92d   :  { %8120 = vmatmul.msk.f32.gmra.mxu3 %vm4233_vm4, %v4143_v35  ;;  %8223 = vmatmul.msk.f32.gmra.mxu0 %vm2382_vm3, %v11242_v22  ;;  %v4145_v22 = vld [vmem:[%s13529_s2 + $0x2b8] sm:$0xff] }
 0x930   :  { %v11572_v20 = vpop.f32.mrf.mxu3 }
 0x932   :  { %v11574_v52 = vpop.f32.mrf.mxu0 }
 0x935   :  { %8121 = vmatmul.msk.f32.gmra.mxu3 %vm4233_vm4, %v4144_v54  ;;  %8224 = vmatmul.msk.f32.vlgmr.msrb.gmra.mxu0 %vm2382_vm3, %v11338_v32  ;;  %v4146_v32 = vld [vmem:[%s13529_s2 + $0x2c0] sm:$0xff]  ;;  %v4147_v54 = vld [vmem:[%s13529_s2 + $0x2c8] sm:$0xff] }
 0x938   :  { %v11582_v21 = vpop.f32.mrf.mxu3 }
 0x93a   :  { %v11584_v26 = vpop.f32.mrf.mxu0 }
 0x93d   :  { %8122 = vmatmul.msk.f32.gmra.mxu3 %vm4233_vm4, %v4145_v22  ;;  %8225 = vmatmul.msk.f32.gmra.mxu0 %vm2382_vm3, %v11350_v62  ;;  %v5311_v62 = vld [vmem:[%s13534_s7 + $0x50] sm:$0xff]  ;;  %v5334_v22 = vld [vmem:[%s13534_s7 + $0x108] sm:$0xff] }
 0x93e   :  { %5595 = vmatpush.msra.mxu0 %v5311_v62  ;;  %6124 = vmatpush.msra.mxu2 %v5334_v22  ;;  %v4148_v62 = vld [vmem:[%s13529_s2 + $0x2d0] sm:$0xff] }
 0x940   :  { %v11592_v59 = vpop.f32.mrf.mxu3 }
 0x942   :  { %v11594_v47 = vpop.f32.mrf.mxu0 }
 0x943   :  { %13753 = vst [vmem:[#allocation36_spill] sm:$0xff] %v11594_v47 }
 0x945   :  { %8123 = vmatmul.msk.f32.gmra.mxu3 %vm4233_vm4, %v4146_v32  ;;  %8226 = vmatmul.msk.f32.gmra.mxu0 %vm2382_vm3, %v11365_v1  ;;  %v5310_v1 = vld [vmem:[%s13534_s7 + $0x48] sm:$0xff] }
 0x946   :  { %5596 = vmatpush.msra.mxu0 %v5310_v1  ;;  %v4149_v1 = vld [vmem:[%s13529_s2 + $0x2d8] sm:$0xff] }
 0x948   :  { %v11605_v15 = vpop.f32.mrf.mxu3 }
 0x94a   :  { %v11610_v35 = vpop.f32.mrf.mxu0 }
 0x94b   :  { %13754 = vst [vmem:[#allocation6_spill] sm:$0xff] %v11610_v35 }
 0x94d   :  { %8124 = vmatmul.msk.f32.gmra.mxu3 %vm4233_vm4, %v4147_v54  ;;  %8227 = vmatmul.msk.f32.gmra.mxu0 %vm2382_vm3, %v11380_v16 }
 0x950   :  { %v11624_v32 = vpop.f32.mrf.mxu3 }
 0x952   :  { %v11626_v10 = vpop.f32.mrf.mxu0 }
 0x953   :  { %13755 = vst [vmem:[#allocation9_spill] sm:$0xff] %v11626_v10 }
 0x955   :  { %8125 = vmatmul.msk.f32.gmra.mxu3 %vm4233_vm4, %v4148_v62  ;;  %8228 = vmatmul.msk.f32.gmra.mxu0 %vm2382_vm3, %v11392_v48  ;;  %v4150_v48 = vld [vmem:[%s13529_s2 + $0x2e0] sm:$0xff] }
 0x958   :  { %v11634_v54 = vpop.f32.mrf.mxu3 }
 0x95a   :  { %v11636_v16 = vpop.f32.mrf.mxu0 }
 0x95d   :  { %8126 = vmatmul.msk.f32.gmra.mxu3 %vm4233_vm4, %v4149_v1  ;;  %8229 = vmatmul.msk.f32.gmra.mxu0 %vm2382_vm3, %v11404_v0  ;;  %v4151_v0 = vld [vmem:[%s13529_s2 + $0x2e8] sm:$0xff] }
 0x960   :  { %v11644_v22 = vpop.f32.mrf.mxu3 }
 0x962   :  { %v11646_v10 = vpop.f32.mrf.mxu0 }
 0x965   :  { %8127 = vmatmul.msk.f32.gmra.mxu3 %vm4233_vm4, %v4150_v48  ;;  %8230 = vmatmul.msk.f32.gmra.mxu0 %vm2382_vm3, %v11416_v37  ;;  %v4152_v37 = vld [vmem:[%s13529_s2 + $0x2f0] sm:$0xff] }
 0x968   :  { %v11654_v62 = vpop.f32.mrf.mxu3 }
 0x96a   :  { %v11656_v35 = vpop.f32.mrf.mxu0 }
 0x96d   :  { %8128 = vmatmul.msk.f32.gmra.mxu3 %vm4233_vm4, %v4151_v0  ;;  %8231 = vmatmul.msk.f32.vlgmr.msra.gmra.mxu0 %vm2382_vm3, %v11426_v27  ;;  %v4153_v27 = vld [vmem:[%s13529_s2 + $0x2f8] sm:$0xff] }
 0x970   :  { %v5007_v1 = vpop.f32.mrf.mxu3 }
 0x971   :  { %8287 = vmatmul.msk.f32.vlgmr.msra.gmra.mxu2 %vm2382_vm3, %v5007_v1  ;;  %v5315_v1 = vld [vmem:[%s13534_s7 + $0x70] sm:$0xff] }
 0x972   :  { %v11665_v48 = vpop.f32.mrf.mxu0  ;;  %5660 = vmatpush.msrb.mxu0 %v5315_v1  ;;  %v5339_v1 = vld [vmem:[%s13534_s7 + $0x130] sm:$0xff] }
 0x973   :  { %6188 = vmatpush.msra.mxu1 %v5339_v1 }
 0x975   :  { %8129 = vmatmul.msk.f32.gmra.mxu3 %vm4233_vm4, %v4152_v37  ;;  %8232 = vmatmul.msk.f32.gmra.mxu0 %vm2382_vm3, %v11436_v46  ;;  %v5314_v46 = vld [vmem:[%s13534_s7 + $0x68] sm:$0xff] }
 0x976   :  { %5661 = vmatpush.msrb.mxu0 %v5314_v46  ;;  %v5337_v46 = vld [vmem:[%s13534_s7 + $0x120] sm:$0xff] }
 0x978   :  { %v5010_v47 = vpop.f32.mrf.mxu3 }
 0x979   :  { %8288 = vmatmul.msk.f32.gmra.mxu2 %vm2382_vm3, %v5010_v47 }
 0x97a   :  { %v11674_v0 = vpop.f32.mrf.mxu0 }
 0x97d   :  { %8130 = vmatmul.msk.f32.gmra.mxu3 %vm4233_vm4, %v4153_v27  ;;  %8233 = vmatmul.msk.f32.gmra.mxu0 %vm2382_vm3, %v11452_v29  ;;  %v4154_v27 = vld [vmem:[%s13529_s2 + $0x300] sm:$0xff] }
 0x97e   :  { %v5313_v29 = vld [vmem:[%s13534_s7 + $0x60] sm:$0xff] }
 0x97f   :  { %5662 = vmatpush.msrb.mxu0 %v5313_v29 }
 0x980   :  { %v5013_v37 = vpop.f32.mrf.mxu3 }
 0x981   :  { %8289 = vmatmul.msk.f32.gmra.mxu2 %vm2382_vm3, %v5013_v37  ;;  %v5338_v37 = vld [vmem:[%s13534_s7 + $0x128] sm:$0xff] }
 0x982   :  { %v11689_v47 = vpop.f32.mrf.mxu0  ;;  %6189 = vmatpush.msra.mxu1 %v5338_v37 }
 0x983   :  { %13756 = vst [vmem:[#allocation20_spill] sm:$0xff] %v11689_v47 }
 0x984   :  { %6190 = vmatpush.msra.mxu1 %v5337_v46 }
 0x985   :  { %8131 = vmatmul.msk.f32.gmra.mxu3 %vm4233_vm4, %v4154_v27  ;;  %8234 = vmatmul.msk.f32.gmra.mxu0 %vm2382_vm3, %v11465_v13  ;;  %v4155_v27 = vld [vmem:[%s13529_s2 + $0x308] sm:$0xff] }
 0x988   :  { %v5016_v47 = vpop.f32.mrf.mxu3 }
 0x989   :  { %8290 = vmatmul.msk.f32.gmra.mxu2 %vm2382_vm3, %v5016_v47  ;;  %v4156_v47 = vld [vmem:[%s13529_s2 + $0x310] sm:$0xff] }
 0x98a   :  { %v11710_v29 = vpop.f32.mrf.mxu0 }
 0x98b   :  { %13757 = vst [vmem:[#allocation48_spill] sm:$0xff] %v11710_v29  ;;  %v5345_v29 = vld [vmem:[%s13534_s7 + $0x160] sm:$0xff] }
 0x98c   :  { %6320 = vmatpush.msrb.mxu2 %v5345_v29  ;;  %v4169_v29 = vld [vmem:[%s13529_s2 + $0x378] sm:$0xff] }
 0x98d   :  { %8132 = vmatmul.msk.f32.gmra.mxu3 %vm4233_vm4, %v4155_v27  ;;  %8235 = vmatmul.msk.f32.gmra.mxu0 %vm2382_vm3, %v11475_v49  ;;  %v4157_v49 = vld [vmem:[%s13529_s2 + $0x318] sm:$0xff] }
 0x990   :  { %v5019_v13 = vpop.f32.mrf.mxu3 }
 0x991   :  { %8291 = vmatmul.msk.f32.gmra.mxu2 %vm2382_vm3, %v5019_v13 }
 0x992   :  { %v11719_v1 = vpop.f32.mrf.mxu0 }
 0x995   :  { %8133 = vmatmul.msk.f32.gmra.mxu3 %vm4233_vm4, %v4156_v47  ;;  %8236 = vmatmul.msk.f32.gmra.mxu0 %vm2382_vm3, %v11485_v34  ;;  %v4158_v34 = vld [vmem:[%s13529_s2 + $0x320] sm:$0xff] }
 0x998   :  { %v5022_v37 = vpop.f32.mrf.mxu3 }
 0x999   :  { %8292 = vmatmul.msk.f32.gmra.mxu2 %vm2382_vm3, %v5022_v37 }
 0x99a   :  { %v11728_v46 = vpop.f32.mrf.mxu0 }
 0x99d   :  { %8134 = vmatmul.msk.f32.gmra.mxu3 %vm4233_vm4, %v4157_v49  ;;  %8237 = vmatmul.msk.f32.gmra.mxu0 %vm2382_vm3, %v11495_v18  ;;  %v4159_v18 = vld [vmem:[%s13529_s2 + $0x328] sm:$0xff] }
 0x9a0   :  { %v5025_v27 = vpop.f32.mrf.mxu3 }
 0x9a1   :  { %8293 = vmatmul.msk.f32.gmra.mxu2 %vm2382_vm3, %v5025_v27 }
 0x9a2   :  { %v11737_v13 = vpop.f32.mrf.mxu0 }
 0x9a5   :  { %8135 = vmatmul.msk.f32.gmra.mxu3 %vm4233_vm4, %v4158_v34  ;;  %8238 = vmatmul.msk.f32.vlgmr.msrb.gmra.mxu0 %vm2382_vm3, %v11505_v31  ;;  %v4160_v31 = vld [vmem:[%s13529_s2 + $0x330] sm:$0xff]  ;;  %v5318_v34 = vld [vmem:[%s13534_s7 + $0x88] sm:$0xff] }
 0x9a6   :  { %5726 = vmatpush.msra.mxu0 %v5318_v34 }
 0x9a8   :  { %v5028_v47 = vpop.f32.mrf.mxu3 }
 0x9a9   :  { %8294 = vmatmul.msk.f32.vlgmr.msra.gmra.mxu1 %vm2382_vm3, %v5028_v47 }
 0x9aa   :  { %v11746_v37 = vpop.f32.mrf.mxu0 }
 0x9ad   :  { %8136 = vmatmul.msk.f32.gmra.mxu3 %vm4233_vm4, %v4159_v18  ;;  %8239 = vmatmul.msk.f32.gmra.mxu0 %vm2382_vm3, %v11515_v56  ;;  %v5317_v56 = vld [vmem:[%s13534_s7 + $0x80] sm:$0xff] }
 0x9ae   :  { %5727 = vmatpush.msra.mxu0 %v5317_v56 }
 0x9b0   :  { %v5031_v49 = vpop.f32.mrf.mxu3 }
 0x9b1   :  { %8295 = vmatmul.msk.f32.gmra.mxu1 %vm2382_vm3, %v5031_v49  ;;  %v4161_v49 = vld [vmem:[%s13529_s2 + $0x338] sm:$0xff] }
 0x9b2   :  { %v11755_v27 = vpop.f32.mrf.mxu0 }
 0x9b5   :  { %8137 = vmatmul.msk.f32.gmra.mxu3 %vm4233_vm4, %v4160_v31  ;;  %8240 = vmatmul.msk.f32.gmra.mxu0 %vm2382_vm3, %v11531_v7  ;;  %v5316_v7 = vld [vmem:[%s13534_s7 + $0x78] sm:$0xff] }
 0x9b6   :  { %5728 = vmatpush.msra.mxu0 %v5316_v7 }
 0x9b8   :  { %v5034_v47 = vpop.f32.mrf.mxu3 }
 0x9b9   :  { %8296 = vmatmul.msk.f32.gmra.mxu1 %vm2382_vm3, %v5034_v47  ;;  %v4162_v47 = vld [vmem:[%s13529_s2 + $0x340] sm:$0xff] }
 0x9ba   :  { %v11770_v18 = vpop.f32.mrf.mxu0 }
 0x9bb   :  { %13758 = vst [vmem:[#allocation5_spill] sm:$0xff] %v11770_v18 }
 0x9bd   :  { %8138 = vmatmul.msk.f32.gmra.mxu3 %vm4233_vm4, %v4161_v49  ;;  %8241 = vmatmul.msk.f32.gmra.mxu0 %vm2382_vm3, %v11544_v63  ;;  %v4163_v63 = vld [vmem:[%s13529_s2 + $0x348] sm:$0xff] }
 0x9c0   :  { %v5037_v31 = vpop.f32.mrf.mxu3 }
 0x9c1   :  { %8297 = vmatmul.msk.f32.gmra.mxu1 %vm2382_vm3, %v5037_v31 }
 0x9c2   :  { %v11782_v34 = vpop.f32.mrf.mxu0 }
 0x9c3   :  { %13759 = vst [vmem:[#allocation18_spill] sm:$0xff] %v11782_v34 }
 0x9c5   :  { %8139 = vmatmul.msk.f32.gmra.mxu3 %vm4233_vm4, %v4162_v47  ;;  %8242 = vmatmul.msk.f32.gmra.mxu0 %vm2382_vm3, %v11554_v12  ;;  %v4164_v12 = vld [vmem:[%s13529_s2 + $0x350] sm:$0xff] }
 0x9c8   :  { %v5040_v56 = vpop.f32.mrf.mxu3 }
 0x9c9   :  { %8298 = vmatmul.msk.f32.gmra.mxu1 %vm2382_vm3, %v5040_v56 }
 0x9ca   :  { %v11791_v49 = vpop.f32.mrf.mxu0 }
 0x9cd   :  { %8140 = vmatmul.msk.f32.gmra.mxu3 %vm4233_vm4, %v4163_v63  ;;  %8243 = vmatmul.msk.f32.gmra.mxu0 %vm2382_vm3, %v11564_v55  ;;  %v4165_v55 = vld [vmem:[%s13529_s2 + $0x358] sm:$0xff] }
 0x9d0   :  { %v5043_v7 = vpop.f32.mrf.mxu3 }
 0x9d1   :  { %8299 = vmatmul.msk.f32.gmra.mxu1 %vm2382_vm3, %v5043_v7 }
 0x9d2   :  { %v11800_v31 = vpop.f32.mrf.mxu0 }
 0x9d5   :  { %8141 = vmatmul.msk.f32.gmra.mxu3 %vm4233_vm4, %v4164_v12  ;;  %8244 = vmatmul.msk.f32.gmra.mxu0 %vm2382_vm3, %v11574_v52  ;;  %v4166_v52 = vld [vmem:[%s13529_s2 + $0x360] sm:$0xff] }
 0x9d8   :  { %v5046_v47 = vpop.f32.mrf.mxu3 }
 0x9d9   :  { %8300 = vmatmul.msk.f32.gmra.mxu1 %vm2382_vm3, %v5046_v47 }
 0x9da   :  { %v11809_v56 = vpop.f32.mrf.mxu0 }
 0x9dd   :  { %8142 = vmatmul.msk.f32.gmra.mxu3 %vm4233_vm4, %v4165_v55  ;;  %8245 = vmatmul.msk.f32.vlgmr.msra.gmra.mxu0 %vm2382_vm3, %v11584_v26  ;;  %v4167_v26 = vld [vmem:[%s13529_s2 + $0x368] sm:$0xff]  ;;  %v5321_v55 = vld [vmem:[%s13534_s7 + $0xa0] sm:$0xff] }
 0x9de   :  { %5792 = vmatpush.msrb.mxu0 %v5321_v55  ;;  %v5344_v55 = vld [vmem:[%s13534_s7 + $0x158] sm:$0xff] }
 0x9df   :  { %6321 = vmatpush.msrb.mxu2 %v5344_v55 }
 0x9e0   :  { %v11817_v63 = vpop.f32.mrf.mxu3 }
 0x9e2   :  { %v11819_v7 = vpop.f32.mrf.mxu0 }
 0x9e5   :  { %8143 = vmatmul.msk.f32.gmra.mxu3 %vm4233_vm4, %v4166_v52  ;;  %8246 = vmatmul.msk.f32.gmra.mxu0 %vm2382_vm3, %v11177_v40  ;;  %v5320_v40 = vld [vmem:[%s13534_s7 + $0x98] sm:$0xff] }
 0x9e6   :  { %5793 = vmatpush.msrb.mxu0 %v5320_v40  ;;  %v5343_v40 = vld [vmem:[%s13534_s7 + $0x150] sm:$0xff] }
 0x9e7   :  { %6322 = vmatpush.msrb.mxu2 %v5343_v40 }
 0x9e8   :  { %v11827_v12 = vpop.f32.mrf.mxu3 }
 0x9ea   :  { %v11829_v47 = vpop.f32.mrf.mxu0 }
 0x9eb   :  { %13760 = vst [vmem:[#allocation8_spill] sm:$0xff] %v11829_v47 }
 0x9ed   :  { %8144 = vmatmul.msk.f32.gmra.mxu3 %vm4233_vm4, %v4167_v26  ;;  %8247 = vmatmul.msk.f32.gmra.mxu0 %vm2382_vm3, %v11189_v41  ;;  %v4168_v26 = vld [vmem:[%s13529_s2 + $0x370] sm:$0xff] }
 0x9ee   :  { %v5319_v41 = vld [vmem:[%s13534_s7 + $0x90] sm:$0xff] }
 0x9ef   :  { %5794 = vmatpush.msrb.mxu0 %v5319_v41  ;;  %v4170_v41 = vld [vmem:[%s13529_s2 + $0x380] sm:$0xff] }
 0x9f0   :  { %v11840_v52 = vpop.f32.mrf.mxu3 }
 0x9f2   :  { %v11845_v34 = vpop.f32.mrf.mxu0 }
 0x9f3   :  { %13761 = vst [vmem:[#allocation12_spill] sm:$0xff] %v11845_v34 }
 0x9f5   :  { %8145 = vmatmul.msk.f32.gmra.mxu3 %vm4233_vm4, %v4168_v26  ;;  %8248 = vmatmul.msk.f32.gmra.mxu0 %vm2382_vm3, %v11201_v38 }
 0x9f8   :  { %v11865_v34 = vpop.f32.mrf.mxu3 }
 0x9fa   :  { %v11867_v18 = vpop.f32.mrf.mxu0 }
 0x9fb   :  { %13762 = vst [vmem:[#allocation25_spill] sm:$0xff] %v11867_v18 }
 0x9fd   :  { %8146 = vmatmul.msk.f32.gmra.mxu3 %vm4233_vm4, %v4169_v29  ;;  %8249 = vmatmul.msk.f32.gmra.mxu0 %vm2382_vm3, %v11213_v6  ;;  %v4171_v6 = vld [vmem:[%s13529_s2 + $0x388] sm:$0xff] }
 0xa00   :  { %v11875_v38 = vpop.f32.mrf.mxu3 }
 0xa02   :  { %v11877_v26 = vpop.f32.mrf.mxu0 }
 0xa05   :  { %8147 = vmatmul.msk.f32.gmra.mxu3 %vm4233_vm4, %v4170_v41  ;;  %8250 = vmatmul.msk.f32.gmra.mxu0 %vm2382_vm3, %v11225_v11  ;;  %v4172_v11 = vld [vmem:[%s13529_s2 + $0x390] sm:$0xff] }
 0xa08   :  { %v11885_v55 = vpop.f32.mrf.mxu3 }
 0xa0a   :  { %v11887_v40 = vpop.f32.mrf.mxu0 }
 0xa0d   :  { %8148 = vmatmul.msk.f32.gmra.mxu3 %vm4233_vm4, %v4171_v6  ;;  %8251 = vmatmul.msk.f32.gmra.mxu0 %vm2382_vm3, %v11240_v42  ;;  %v4173_v42 = vld [vmem:[%s13529_s2 + $0x398] sm:$0xff] }
 0xa10   :  { %v11895_v29 = vpop.f32.mrf.mxu3 }
 0xa12   :  { %v11897_v18 = vpop.f32.mrf.mxu0 }
 0xa15   :  { %8149 = vmatmul.msk.f32.gmra.mxu3 %vm4233_vm4, %v4172_v11  ;;  %8252 = vmatmul.msk.f32.vlgmr.msrb.gmra.mxu0 %vm2382_vm3, %v11252_v8  ;;  %v4174_v8 = vld [vmem:[%s13529_s2 + $0x3a0] sm:$0xff] }
 0xa18   :  { %v5070_v41 = vpop.f32.mrf.mxu3 }
 0xa19   :  { %8308 = vmatmul.msk.f32.vlgmr.msrb.gmra.mxu2 %vm2382_vm3, %v5070_v41  ;;  %v5324_v41 = vld [vmem:[%s13534_s7 + $0xb8] sm:$0xff] }
 0xa1a   :  { %v11906_v6 = vpop.f32.mrf.mxu0  ;;  %5858 = vmatpush.msra.mxu0 %v5324_v41  ;;  %v5348_v41 = vld [vmem:[%s13534_s7 + $0x178] sm:$0xff] }
 0xa1b   :  { %6386 = vmatpush.msrb.mxu1 %v5348_v41 }
 0xa1d   :  { %8150 = vmatmul.msk.f32.gmra.mxu3 %vm4233_vm4, %v4173_v42  ;;  %8253 = vmatmul.msk.f32.gmra.mxu0 %vm2382_vm3, %v11264_v36  ;;  %v5323_v36 = vld [vmem:[%s13534_s7 + $0xb0] sm:$0xff] }
 0xa1e   :  { %5859 = vmatpush.msra.mxu0 %v5323_v36  ;;  %v5346_v36 = vld [vmem:[%s13534_s7 + $0x168] sm:$0xff] }
 0xa20   :  { %v5073_v47 = vpop.f32.mrf.mxu3 }
 0xa21   :  { %8309 = vmatmul.msk.f32.gmra.mxu2 %vm2382_vm3, %v5073_v47 }
 0xa22   :  { %v11915_v11 = vpop.f32.mrf.mxu0 }
 0xa25   :  { %8151 = vmatmul.msk.f32.gmra.mxu3 %vm4233_vm4, %v4174_v8  ;;  %8254 = vmatmul.msk.f32.gmra.mxu0 %vm2382_vm3, %v11276_v30  ;;  %v4175_v8 = vld [vmem:[%s13529_s2 + $0x3a8] sm:$0xff] }
 0xa26   :  { %v5322_v30 = vld [vmem:[%s13534_s7 + $0xa8] sm:$0xff] }
 0xa27   :  { %5860 = vmatpush.msra.mxu0 %v5322_v30 }
 0xa28   :  { %v5076_v42 = vpop.f32.mrf.mxu3 }
 0xa29   :  { %8310 = vmatmul.msk.f32.gmra.mxu2 %vm2382_vm3, %v5076_v42  ;;  %v5347_v42 = vld [vmem:[%s13534_s7 + $0x170] sm:$0xff] }
 0xa2a   :  { %v11930_v47 = vpop.f32.mrf.mxu0  ;;  %6387 = vmatpush.msrb.mxu1 %v5347_v42 }
 0xa2b   :  { %13763 = vst [vmem:[#allocation7_spill] sm:$0xff] %v11930_v47 }
 0xa2c   :  { %6388 = vmatpush.msrb.mxu1 %v5346_v36 }
 0xa2d   :  { %8152 = vmatmul.msk.f32.gmra.mxu3 %vm4233_vm4, %v4175_v8  ;;  %8255 = vmatmul.msk.f32.gmra.mxu0 %vm2382_vm3, %v11288_v45  ;;  %v4176_v8 = vld [vmem:[%s13529_s2 + $0x3b0] sm:$0xff] }
 0xa30   :  { %v5079_v47 = vpop.f32.mrf.mxu3 }
 0xa31   :  { %8311 = vmatmul.msk.f32.gmra.mxu2 %vm2382_vm3, %v5079_v47  ;;  %v4177_v47 = vld [vmem:[%s13529_s2 + $0x3b8] sm:$0xff] }
 0xa32   :  { %v11951_v30 = vpop.f32.mrf.mxu0 }
 0xa33   :  { %13764 = vst [vmem:[#allocation23_spill] sm:$0xff] %v11951_v30  ;;  %v5354_v30 = vld [vmem:[%s13534_s7 + $0x1a8] sm:$0xff] }
 0xa34   :  { %6518 = vmatpush.msra.mxu2 %v5354_v30  ;;  %v4190_v30 = vld [vmem:[%s13529_s2 + $0x420] sm:$0xff] }
 0xa35   :  { %8153 = vmatmul.msk.f32.gmra.mxu3 %vm4233_vm4, %v4176_v8  ;;  %8256 = vmatmul.msk.f32.gmra.mxu0 %vm2382_vm3, %v11300_v9  ;;  %v4178_v9 = vld [vmem:[%s13529_s2 + $0x3c0] sm:$0xff] }
 0xa38   :  { %v5082_v45 = vpop.f32.mrf.mxu3 }
 0xa39   :  { %8312 = vmatmul.msk.f32.gmra.mxu2 %vm2382_vm3, %v5082_v45 }
 0xa3a   :  { %v11960_v41 = vpop.f32.mrf.mxu0 }
 0xa3d   :  { %8154 = vmatmul.msk.f32.gmra.mxu3 %vm4233_vm4, %v4177_v47  ;;  %8257 = vmatmul.msk.f32.gmra.mxu0 %vm2382_vm3, %v11312_v60  ;;  %v4179_v60 = vld [vmem:[%s13529_s2 + $0x3c8] sm:$0xff] }
 0xa40   :  { %v5085_v42 = vpop.f32.mrf.mxu3 }
 0xa41   :  { %8313 = vmatmul.msk.f32.gmra.mxu2 %vm2382_vm3, %v5085_v42 }
 0xa42   :  { %v11969_v36 = vpop.f32.mrf.mxu0 }
 0xa45   :  { %8155 = vmatmul.msk.f32.gmra.mxu3 %vm4233_vm4, %v4178_v9  ;;  %8258 = vmatmul.msk.f32.gmra.mxu0 %vm2382_vm3, %v11324_v57  ;;  %v4180_v57 = vld [vmem:[%s13529_s2 + $0x3d0] sm:$0xff] }
 0xa48   :  { %v5088_v8 = vpop.f32.mrf.mxu3 }
 0xa49   :  { %8314 = vmatmul.msk.f32.gmra.mxu2 %vm2382_vm3, %v5088_v8 }
 0xa4a   :  { %v11978_v45 = vpop.f32.mrf.mxu0 }
 0xa4d   :  { %8156 = vmatmul.msk.f32.gmra.mxu3 %vm4233_vm4, %v4179_v60  ;;  %8259 = vmatmul.msk.f32.vlgmr.msra.gmra.mxu0 %vm2382_vm3, %v11336_v25  ;;  %v4181_v25 = vld [vmem:[%s13529_s2 + $0x3d8] sm:$0xff]  ;;  %v5327_v60 = vld [vmem:[%s13534_s7 + $0xd0] sm:$0xff] }
 0xa4e   :  { %5924 = vmatpush.msrb.mxu0 %v5327_v60 }
 0xa50   :  { %v5091_v47 = vpop.f32.mrf.mxu3 }
 0xa51   :  { %8315 = vmatmul.msk.f32.vlgmr.msrb.gmra.mxu1 %vm2382_vm3, %v5091_v47 }
 0xa52   :  { %v11987_v42 = vpop.f32.mrf.mxu0 }
 0xa55   :  { %8157 = vmatmul.msk.f32.gmra.mxu3 %vm4233_vm4, %v4180_v57  ;;  %8260 = vmatmul.msk.f32.gmra.mxu0 %vm2382_vm3, %v11348_v44  ;;  %v5326_v44 = vld [vmem:[%s13534_s7 + $0xc8] sm:$0xff] }
 0xa56   :  { %5925 = vmatpush.msrb.mxu0 %v5326_v44 }
 0xa58   :  { %v5094_v9 = vpop.f32.mrf.mxu3 }
 0xa59   :  { %8316 = vmatmul.msk.f32.gmra.mxu1 %vm2382_vm3, %v5094_v9  ;;  %v4182_v9 = vld [vmem:[%s13529_s2 + $0x3e0] sm:$0xff] }
 0xa5a   :  { %v11996_v8 = vpop.f32.mrf.mxu0 }
 0xa5d   :  { %8158 = vmatmul.msk.f32.gmra.mxu3 %vm4233_vm4, %v4181_v25  ;;  %8261 = vmatmul.msk.f32.gmra.mxu0 %vm2382_vm3, %v11360_v4  ;;  %v5325_v4 = vld [vmem:[%s13534_s7 + $0xc0] sm:$0xff] }
 0xa5e   :  { %5926 = vmatpush.msrb.mxu0 %v5325_v4 }
 0xa60   :  { %v5097_v47 = vpop.f32.mrf.mxu3 }
 0xa61   :  { %8317 = vmatmul.msk.f32.gmra.mxu1 %vm2382_vm3, %v5097_v47  ;;  %v4183_v47 = vld [vmem:[%s13529_s2 + $0x3e8] sm:$0xff] }
 0xa62   :  { %v12011_v57 = vpop.f32.mrf.mxu0 }
 0xa63   :  { %13765 = vst [vmem:[#allocation42_spill] sm:$0xff] %v12011_v57 }
 0xa65   :  { %8159 = vmatmul.msk.f32.gmra.mxu3 %vm4233_vm4, %v4182_v9  ;;  %8262 = vmatmul.msk.f32.gmra.mxu0 %vm2382_vm3, %v11378_v23  ;;  %v4184_v23 = vld [vmem:[%s13529_s2 + $0x3f0] sm:$0xff] }
 0xa68   :  { %v5100_v25 = vpop.f32.mrf.mxu3 }
 0xa69   :  { %8318 = vmatmul.msk.f32.gmra.mxu1 %vm2382_vm3, %v5100_v25 }
 0xa6a   :  { %v12023_v60 = vpop.f32.mrf.mxu0 }
 0xa6b   :  { %13766 = vst [vmem:[#allocation11_spill] sm:$0xff] %v12023_v60 }
 0xa6d   :  { %8160 = vmatmul.msk.f32.gmra.mxu3 %vm4233_vm4, %v4183_v47  ;;  %8263 = vmatmul.msk.f32.gmra.mxu0 %vm2382_vm3, %v11390_v3  ;;  %v4185_v3 = vld [vmem:[%s13529_s2 + $0x3f8] sm:$0xff] }
 0xa70   :  { %v5103_v44 = vpop.f32.mrf.mxu3 }
 0xa71   :  { %8319 = vmatmul.msk.f32.gmra.mxu1 %vm2382_vm3, %v5103_v44 }
 0xa72   :  { %v12032_v9 = vpop.f32.mrf.mxu0 }
 0xa75   :  { %8161 = vmatmul.msk.f32.gmra.mxu3 %vm4233_vm4, %v4184_v23  ;;  %8264 = vmatmul.msk.f32.gmra.mxu0 %vm2382_vm3, %v11402_v39  ;;  %v4186_v39 = vld [vmem:[%s13529_s2 + $0x400] sm:$0xff] }
 0xa78   :  { %v5106_v4 = vpop.f32.mrf.mxu3 }
 0xa79   :  { %8320 = vmatmul.msk.f32.gmra.mxu1 %vm2382_vm3, %v5106_v4 }
 0xa7a   :  { %v12041_v25 = vpop.f32.mrf.mxu0 }
 0xa7d   :  { %8162 = vmatmul.msk.f32.gmra.mxu3 %vm4233_vm4, %v4185_v3  ;;  %8265 = vmatmul.msk.f32.gmra.mxu0 %vm2382_vm3, %v11414_v17  ;;  %v4187_v17 = vld [vmem:[%s13529_s2 + $0x408] sm:$0xff] }
 0xa80   :  { %v5109_v47 = vpop.f32.mrf.mxu3 }
 0xa81   :  { %8321 = vmatmul.msk.f32.gmra.mxu1 %vm2382_vm3, %v5109_v47 }
 0xa82   :  { %v12050_v44 = vpop.f32.mrf.mxu0 }
 0xa85   :  { %8163 = vmatmul.msk.f32.gmra.mxu3 %vm4233_vm4, %v4186_v39  ;;  %8266 = vmatmul.msk.f32.vlgmr.msrb.gmra.mxu0 %vm2382_vm3, %v11424_v5  ;;  %v4188_v5 = vld [vmem:[%s13529_s2 + $0x410] sm:$0xff]  ;;  %v5330_v39 = vld [vmem:[%s13534_s7 + $0xe8] sm:$0xff] }
 0xa86   :  { %5990 = vmatpush.msra.mxu0 %v5330_v39  ;;  %v5353_v39 = vld [vmem:[%s13534_s7 + $0x1a0] sm:$0xff] }
 0xa87   :  { %6519 = vmatpush.msra.mxu2 %v5353_v39 }
 0xa88   :  { %v12058_v23 = vpop.f32.mrf.mxu3 }
 0xa8a   :  { %v12060_v4 = vpop.f32.mrf.mxu0 }
 0xa8d   :  { %8164 = vmatmul.msk.f32.gmra.mxu3 %vm4233_vm4, %v4187_v17  ;;  %8267 = vmatmul.msk.f32.gmra.mxu0 %vm2382_vm3, %v11434_v2  ;;  %v5329_v2 = vld [vmem:[%s13534_s7 + $0xe0] sm:$0xff] }
 0xa8e   :  { %5991 = vmatpush.msra.mxu0 %v5329_v2  ;;  %v5352_v2 = vld [vmem:[%s13534_s7 + $0x198] sm:$0xff] }
 0xa8f   :  { %6520 = vmatpush.msra.mxu2 %v5352_v2 }
 0xa90   :  { %v12068_v3 = vpop.f32.mrf.mxu3 }
 0xa92   :  { %v12070_v47 = vpop.f32.mrf.mxu0 }
 0xa93   :  { %13767 = vst [vmem:[#allocation15_spill] sm:$0xff] %v12070_v47 }
 0xa95   :  { %8165 = vmatmul.msk.f32.gmra.mxu3 %vm4233_vm4, %v4188_v5  ;;  %8268 = vmatmul.msk.f32.gmra.mxu0 %vm2382_vm3, %v11447_v50  ;;  %v4189_v5 = vld [vmem:[%s13529_s2 + $0x418] sm:$0xff] }
 0xa96   :  { %v5328_v50 = vld [vmem:[%s13534_s7 + $0xd8] sm:$0xff] }
 0xa97   :  { %5992 = vmatpush.msra.mxu0 %v5328_v50  ;;  %v4191_v50 = vld [vmem:[%s13529_s2 + $0x428] sm:$0xff] }
 0xa98   :  { %v12081_v17 = vpop.f32.mrf.mxu3 }
 0xa9a   :  { %v12086_v60 = vpop.f32.mrf.mxu0 }
 0xa9b   :  { %13768 = vst [vmem:[#allocation30_spill] sm:$0xff] %v12086_v60 }
 0xa9d   :  { %8166 = vmatmul.msk.f32.gmra.mxu3 %vm4233_vm4, %v4189_v5  ;;  %8269 = vmatmul.msk.f32.gmra.mxu0 %vm2382_vm3, %v11463_v14 }
 0xaa0   :  { %v12106_v60 = vpop.f32.mrf.mxu3 }
 0xaa2   :  { %v12108_v57 = vpop.f32.mrf.mxu0 }
 0xaa3   :  { %13769 = vst [vmem:[#allocation10_spill] sm:$0xff] %v12108_v57 }
 0xaa5   :  { %8167 = vmatmul.msk.f32.gmra.mxu3 %vm4233_vm4, %v4190_v30  ;;  %8270 = vmatmul.msk.f32.gmra.mxu0 %vm2382_vm3, %v11473_v24  ;;  %v4192_v24 = vld [vmem:[%s13529_s2 + $0x430] sm:$0xff] }
 0xaa8   :  { %v12116_v14 = vpop.f32.mrf.mxu3 }
 0xaaa   :  { %v12118_v5 = vpop.f32.mrf.mxu0 }
 0xaad   :  { %8168 = vmatmul.msk.f32.gmra.mxu3 %vm4233_vm4, %v4191_v50  ;;  %8271 = vmatmul.msk.f32.gmra.mxu0 %vm2382_vm3, %v11483_v58  ;;  %v4193_v58 = vld [vmem:[%s13529_s2 + $0x438] sm:$0xff] }
 0xab0   :  { %v12126_v39 = vpop.f32.mrf.mxu3 }
 0xab2   :  { %v12128_v2 = vpop.f32.mrf.mxu0 }
 0xab5   :  { %8169 = vmatmul.msk.f32.gmra.mxu3 %vm4233_vm4, %v4192_v24  ;;  %8272 = vmatmul.msk.f32.gmra.mxu0 %vm2382_vm3, %v11493_v53  ;;  %v4194_v53 = vld [vmem:[%s13529_s2 + $0x440] sm:$0xff] }
 0xab8   :  { %v12136_v30 = vpop.f32.mrf.mxu3 }
 0xaba   :  { %v12138_v57 = vpop.f32.mrf.mxu0 }
 0xabd   :  { %8170 = vmatmul.msk.f32.gmra.mxu3 %vm4233_vm4, %v4193_v58  ;;  %8273 = vmatmul.msk.f32.vlgmr.msra.gmra.mxu0 %vm2382_vm3, %v11503_v19  ;;  %v4195_v19 = vld [vmem:[%s13529_s2 + $0x448] sm:$0xff] }
 0xac0   :  { %v5133_v50 = vpop.f32.mrf.mxu3 }
 0xac1   :  { %8329 = vmatmul.msk.f32.vlgmr.msra.gmra.mxu2 %vm2382_vm3, %v5133_v50  ;;  %v5333_v50 = vld [vmem:[%s13534_s7 + $0x100] sm:$0xff] }
 0xac2   :  { %v12147_v24 = vpop.f32.mrf.mxu0  ;;  %6056 = vmatpush.msrb.mxu0 %v5333_v50  ;;  %v5357_v50 = vld [vmem:[%s13534_s7 + $0x1c0] sm:$0xff] }
 0xac3   :  { %6584 = vmatpush.msra.mxu1 %v5357_v50 }
 0xac5   :  { %8171 = vmatmul.msk.f32.gmra.mxu3 %vm4233_vm4, %v4194_v53  ;;  %8274 = vmatmul.msk.f32.gmra.mxu0 %vm2382_vm3, %v11513_v33  ;;  %v5332_v33 = vld [vmem:[%s13534_s7 + $0xf8] sm:$0xff] }
 0xac6   :  { %6057 = vmatpush.msrb.mxu0 %v5332_v33  ;;  %v5355_v33 = vld [vmem:[%s13534_s7 + $0x1b0] sm:$0xff] }
 0xac8   :  { %v5136_v47 = vpop.f32.mrf.mxu3 }
 0xac9   :  { %8330 = vmatmul.msk.f32.gmra.mxu2 %vm2382_vm3, %v5136_v47 }
 0xaca   :  { %v12156_v58 = vpop.f32.mrf.mxu0 }
 0xacd   :  { %8172 = vmatmul.msk.f32.gmra.mxu3 %vm4233_vm4, %v4195_v19  ;;  %8275 = vmatmul.msk.f32.gmra.mxu0 %vm2382_vm3, %v11526_v51  ;;  %v4196_v19 = vld [vmem:[%s13529_s2 + $0x450] sm:$0xff] }
 0xace   :  { %v5331_v51 = vld [vmem:[%s13534_s7 + $0xf0] sm:$0xff] }
 0xacf   :  { %6058 = vmatpush.msrb.mxu0 %v5331_v51 }
 0xad0   :  { %v5139_v53 = vpop.f32.mrf.mxu3 }
 0xad1   :  { %8331 = vmatmul.msk.f32.gmra.mxu2 %vm2382_vm3, %v5139_v53  ;;  %v5356_v53 = vld [vmem:[%s13534_s7 + $0x1b8] sm:$0xff] }
 0xad2   :  { %v12171_v47 = vpop.f32.mrf.mxu0  ;;  %6585 = vmatpush.msra.mxu1 %v5356_v53 }
 0xad3   :  { %13770 = vst [vmem:[#allocation28_spill] sm:$0xff] %v12171_v47 }
 0xad4   :  { %6586 = vmatpush.msra.mxu1 %v5355_v33 }
 0xad5   :  { %8173 = vmatmul.msk.f32.gmra.mxu3 %vm4233_vm4, %v4196_v19  ;;  %8276 = vmatmul.msk.f32.gmra.mxu0 %vm2382_vm3, %v11542_v43  ;;  %v4197_v19 = vld [vmem:[%s13529_s2 + $0x458] sm:$0xff] }
 0xad8   :  { %v5142_v47 = vpop.f32.mrf.mxu3 }
 0xad9   :  { %8332 = vmatmul.msk.f32.gmra.mxu2 %vm2382_vm3, %v5142_v47  ;;  %v4198_v47 = vld [vmem:[%s13529_s2 + $0x460] sm:$0xff] }
 0xada   :  { %v12192_v51 = vpop.f32.mrf.mxu0 }
 0xadb   :  { %13771 = vst [vmem:[#allocation14_spill] sm:$0xff] %v12192_v51  ;;  %v5363_v51 = vld [vmem:[%s13534_s7 + $0x1f0] sm:$0xff] }
 0xadc   :  { %6716 = vmatpush.msrb.mxu2 %v5363_v51  ;;  %v4211_v51 = vld [vmem:[%s13529_s2 + $0x4c8] sm:$0xff] }
 0xadd   :  { %8174 = vmatmul.msk.f32.gmra.mxu3 %vm4233_vm4, %v4197_v19  ;;  %8277 = vmatmul.msk.f32.gmra.mxu0 %vm2382_vm3, %v11552_v61  ;;  %v4199_v61 = vld [vmem:[%s13529_s2 + $0x468] sm:$0xff] }
 0xae0   :  { %v5145_v43 = vpop.f32.mrf.mxu3 }
 0xae1   :  { %8333 = vmatmul.msk.f32.gmra.mxu2 %vm2382_vm3, %v5145_v43 }
 0xae2   :  { %v12201_v50 = vpop.f32.mrf.mxu0 }
 0xae5   :  { %8175 = vmatmul.msk.f32.gmra.mxu3 %vm4233_vm4, %v4198_v47  ;;  %8278 = vmatmul.msk.f32.gmra.mxu0 %vm2382_vm3, %v11562_v28  ;;  %v4200_v28 = vld [vmem:[%s13529_s2 + $0x470] sm:$0xff] }
 0xae8   :  { %v5148_v53 = vpop.f32.mrf.mxu3 }
 0xae9   :  { %8334 = vmatmul.msk.f32.gmra.mxu2 %vm2382_vm3, %v5148_v53 }
 0xaea   :  { %v12210_v33 = vpop.f32.mrf.mxu0 }
 0xaed   :  { %8176 = vmatmul.msk.f32.gmra.mxu3 %vm4233_vm4, %v4199_v61  ;;  %8279 = vmatmul.msk.f32.gmra.mxu0 %vm2382_vm3, %v11572_v20  ;;  %v4201_v20 = vld [vmem:[%s13529_s2 + $0x478] sm:$0xff] }
 0xaf0   :  { %v5151_v19 = vpop.f32.mrf.mxu3 }
 0xaf1   :  { %8335 = vmatmul.msk.f32.gmra.mxu2 %vm2382_vm3, %v5151_v19 }
 0xaf2   :  { %v12219_v43 = vpop.f32.mrf.mxu0 }
 0xaf5   :  { %8177 = vmatmul.msk.f32.gmra.mxu3 %vm4233_vm4, %v4200_v28  ;;  %8280 = vmatmul.msk.f32.vlgmr.msrb.gmra.mxu0 %vm2382_vm3, %v11582_v21  ;;  %v4202_v21 = vld [vmem:[%s13529_s2 + $0x480] sm:$0xff]  ;;  %v5342_v28 = vld [vmem:[%s13534_s7 + $0x148] sm:$0xff] }
 0xaf6   :  { %6254 = vmatpush.msra.mxu0 %v5342_v28 }
 0xaf8   :  { %v5154_v47 = vpop.f32.mrf.mxu3 }
 0xaf9   :  { %8336 = vmatmul.msk.f32.vlgmr.msra.gmra.mxu1 %vm2382_vm3, %v5154_v47 }
 0xafa   :  { %v12228_v53 = vpop.f32.mrf.mxu0 }
 0xafd   :  { %8178 = vmatmul.msk.f32.gmra.mxu3 %vm4233_vm4, %v4201_v20  ;;  %8281 = vmatmul.msk.f32.gmra.mxu0 %vm2382_vm3, %v11592_v59  ;;  %v5341_v59 = vld [vmem:[%s13534_s7 + $0x140] sm:$0xff] }
 0xafe   :  { %6255 = vmatpush.msra.mxu0 %v5341_v59 }
 0xb00   :  { %v5157_v61 = vpop.f32.mrf.mxu3 }
 0xb01   :  { %8337 = vmatmul.msk.f32.gmra.mxu1 %vm2382_vm3, %v5157_v61  ;;  %v4203_v61 = vld [vmem:[%s13529_s2 + $0x488] sm:$0xff] }
 0xb02   :  { %v12237_v19 = vpop.f32.mrf.mxu0 }
 0xb03   :  { %13772 = vst [vmem:[#allocation19_spill] sm:$0xff] %v12237_v19  ;;  %v5358_v19 = vld [vmem:[%s13534_s7 + $0x1c8] sm:$0xff] }
 0xb05   :  { %8179 = vmatmul.msk.f32.gmra.mxu3 %vm4233_vm4, %v4202_v21  ;;  %8282 = vmatmul.msk.f32.gmra.mxu0 %vm2382_vm3, %v11605_v15  ;;  %v5340_v15 = vld [vmem:[%s13534_s7 + $0x138] sm:$0xff] }
 0xb06   :  { %6256 = vmatpush.msra.mxu0 %v5340_v15 }
 0xb08   :  { %v5160_v47 = vpop.f32.mrf.mxu3 }
 0xb09   :  { %8338 = vmatmul.msk.f32.gmra.mxu1 %vm2382_vm3, %v5160_v47  ;;  %v4204_v47 = vld [vmem:[%s13529_s2 + $0x490] sm:$0xff] }
 0xb0a   :  { %v12252_v20 = vpop.f32.mrf.mxu0 }
 0xb0b   :  { %13773 = vst [vmem:[#allocation35_spill] sm:$0xff] %v12252_v20 }
 0xb0d   :  { %8180 = vmatmul.msk.f32.gmra.mxu3 %vm4233_vm4, %v4203_v61  ;;  %8283 = vmatmul.msk.f32.gmra.mxu0 %vm2382_vm3, %v11624_v32  ;;  %v4205_v32 = vld [vmem:[%s13529_s2 + $0x498] sm:$0xff] }
 0xb10   :  { %v5163_v21 = vpop.f32.mrf.mxu3 }
 0xb11   :  { %8339 = vmatmul.msk.f32.gmra.mxu1 %vm2382_vm3, %v5163_v21 }
 0xb12   :  { %v12264_v28 = vpop.f32.mrf.mxu0 }
 0xb13   :  { %13774 = vst [vmem:[#allocation13_spill] sm:$0xff] %v12264_v28 }
 0xb15   :  { %8181 = vmatmul.msk.f32.gmra.mxu3 %vm4233_vm4, %v4204_v47  ;;  %8284 = vmatmul.msk.f32.gmra.mxu0 %vm2382_vm3, %v11634_v54  ;;  %v4206_v54 = vld [vmem:[%s13529_s2 + $0x4a0] sm:$0xff] }
 0xb18   :  { %v5166_v59 = vpop.f32.mrf.mxu3 }
 0xb19   :  { %8340 = vmatmul.msk.f32.gmra.mxu1 %vm2382_vm3, %v5166_v59 }
 0xb1a   :  { %v12273_v61 = vpop.f32.mrf.mxu0 }
 0xb1d   :  { %8182 = vmatmul.msk.f32.gmra.mxu3 %vm4233_vm4, %v4205_v32  ;;  %8285 = vmatmul.msk.f32.gmra.mxu0 %vm2382_vm3, %v11644_v22  ;;  %v4207_v22 = vld [vmem:[%s13529_s2 + $0x4a8] sm:$0xff] }
 0xb20   :  { %v5169_v15 = vpop.f32.mrf.mxu3 }
 0xb21   :  { %8341 = vmatmul.msk.f32.gmra.mxu1 %vm2382_vm3, %v5169_v15 }
 0xb22   :  { %v12282_v21 = vpop.f32.mrf.mxu0 }
 0xb25   :  { %8183 = vmatmul.msk.f32.gmra.mxu3 %vm4233_vm4, %v4206_v54  ;;  %8286 = vmatmul.msk.f32.gmra.mxu0 %vm2382_vm3, %v11654_v62  ;;  %v4208_v62 = vld [vmem:[%s13529_s2 + $0x4b0] sm:$0xff] }
 0xb28   :  { %v5172_v47 = vpop.f32.mrf.mxu3 }
 0xb29   :  { %8342 = vmatmul.msk.f32.gmra.mxu1 %vm2382_vm3, %v5172_v47 }
 0xb2a   :  { %v12291_v59 = vpop.f32.mrf.mxu0 }
 0xb2d   :  { %8184 = vmatmul.msk.f32.gmra.mxu3 %vm4233_vm4, %v4207_v22  ;;  %8301 = vmatmul.msk.f32.vlgmr.msra.gmra.mxu0 %vm2382_vm3, %v11817_v63  ;;  %v4209_v63 = vld [vmem:[%s13529_s2 + $0x4b8] sm:$0xff]  ;;  %v5351_v22 = vld [vmem:[%s13534_s7 + $0x190] sm:$0xff] }
 0xb2e   :  { %6452 = vmatpush.msrb.mxu0 %v5351_v22  ;;  %v5362_v22 = vld [vmem:[%s13534_s7 + $0x1e8] sm:$0xff] }
 0xb2f   :  { %6717 = vmatpush.msrb.mxu2 %v5362_v22 }
 0xb30   :  { %v12299_v32 = vpop.f32.mrf.mxu3 }
 0xb32   :  { %v12301_v15 = vpop.f32.mrf.mxu0 }
 0xb33   :  { %13775 = vst [vmem:[#allocation33_spill] sm:$0xff] %v12301_v15  ;;  %v4215_v15 = vld [vmem:[%s13529_s2 + $0x4e8] sm:$0xff] }
 0xb35   :  { %8185 = vmatmul.msk.f32.gmra.mxu3 %vm4233_vm4, %v4208_v62  ;;  %8302 = vmatmul.msk.f32.gmra.mxu0 %vm2382_vm3, %v11827_v12  ;;  %v5350_v12 = vld [vmem:[%s13534_s7 + $0x188] sm:$0xff] }
 0xb36   :  { %6453 = vmatpush.msrb.mxu0 %v5350_v12  ;;  %v5361_v12 = vld [vmem:[%s13534_s7 + $0x1e0] sm:$0xff] }
 0xb37   :  { %6718 = vmatpush.msrb.mxu2 %v5361_v12  ;;  %v4212_v12 = vld [vmem:[%s13529_s2 + $0x4d0] sm:$0xff] }
 0xb38   :  { %v12309_v54 = vpop.f32.mrf.mxu3 }
 0xb3a   :  { %v12311_v47 = vpop.f32.mrf.mxu0 }
 0xb3b   :  { %13776 = vst [vmem:[#allocation49_spill] sm:$0xff] %v12311_v47 }
 0xb3d   :  { %8186 = vmatmul.msk.f32.gmra.mxu3 %vm4233_vm4, %v4209_v63  ;;  %8303 = vmatmul.msk.f32.gmra.mxu0 %vm2382_vm3, %v11840_v52  ;;  %v4210_v63 = vld [vmem:[%s13529_s2 + $0x4c0] sm:$0xff] }
 0xb3e   :  { %v5349_v52 = vld [vmem:[%s13534_s7 + $0x180] sm:$0xff] }
 0xb3f   :  { %6454 = vmatpush.msrb.mxu0 %v5349_v52  ;;  %v12361_v52 = vpop.f32.mrf.mxu1 }
 0xb40   :  { %v12322_v62 = vpop.f32.mrf.mxu3  ;;  %13780 = vst [vmem:[#allocation58_spill] sm:$0xff] %v12361_v52  ;;  %v4213_v52 = vld [vmem:[%s13529_s2 + $0x4d8] sm:$0xff] }
 0xb42   :  { %v12327_v28 = vpop.f32.mrf.mxu0 }
 0xb43   :  { %13777 = vst [vmem:[#allocation17_spill] sm:$0xff] %v12327_v28 }
 0xb45   :  { %8187 = vmatmul.msk.f32.gmra.mxu3 %vm4233_vm4, %v4210_v63  ;;  %8304 = vmatmul.msk.f32.gmra.mxu0 %vm2382_vm3, %v11865_v34  ;;  %v12357_v34 = vpop.f32.mrf.mxu2 }
 0xb46   :  { %13779 = vst [vmem:[#allocation41_spill] sm:$0xff] %v12357_v34 }
 0xb47   :  { %v12380_v34 = vpop.f32.mrf.mxu1 }
 0xb48   :  { %v12347_v28 = vpop.f32.mrf.mxu3  ;;  %13782 = vst [vmem:[#allocation39_spill] sm:$0xff] %v12380_v34 }
 0xb4a   :  { %v12349_v20 = vpop.f32.mrf.mxu0 }
 0xb4b   :  { %13778 = vst [vmem:[#allocation24_spill] sm:$0xff] %v12349_v20 }
 0xb4d   :  { %8188 = vmatmul.msk.f32.gmra.mxu3 %vm4233_vm4, %v4211_v51  ;;  %8305 = vmatmul.msk.f32.gmra.mxu0 %vm2382_vm3, %v11875_v38  ;;  %v12373_v38 = vpop.f32.mrf.mxu2 }
 0xb4e   :  { %13781 = vst [vmem:[#allocation16_spill] sm:$0xff] %v12373_v38  ;;  %v4214_v38 = vld [vmem:[%s13529_s2 + $0x4e0] sm:$0xff] }
 0xb4f   :  { %v12397_v34 = vpop.f32.mrf.mxu1 }
 0xb50   :  { %v12359_v63 = vpop.f32.mrf.mxu3  ;;  %13784 = vst [vmem:[#allocation29_spill] sm:$0xff] %v12397_v34 }
 0xb52   :  { %v12363_v22 = vpop.f32.mrf.mxu0 }
 0xb55   :  { %8189 = vmatmul.msk.f32.gmra.mxu3 %vm4233_vm4, %v4212_v12  ;;  %8306 = vmatmul.msk.f32.gmra.mxu0 %vm2382_vm3, %v11885_v55  ;;  %v12392_v47 = vpop.f32.mrf.mxu2 }
 0xb56   :  { %13783 = vst [vmem:[#allocation22_spill] sm:$0xff] %v12392_v47 }
 0xb57   :  { %v12410_v47 = vpop.f32.mrf.mxu1 }
 0xb58   :  { %v12371_v51 = vpop.f32.mrf.mxu3 }
 0xb5a   :  { %v12375_v20 = vpop.f32.mrf.mxu0 }
 0xb5d   :  { %8190 = vmatmul.msk.f32.gmra.mxu3 %vm4233_vm4, %v4213_v52  ;;  %8307 = vmatmul.msk.f32.gmra.mxu0 %vm2382_vm3, %v11895_v29 }
 0xb60   :  { %v12385_v12 = vpop.f32.mrf.mxu3 }
 0xb62   :  { %v12387_v55 = vpop.f32.mrf.mxu0 }
 0xb65   :  { %8191 = vmatmul.msk.f32.gmra.mxu3 %vm4233_vm4, %v4214_v38  ;;  %8322 = vmatmul.msk.f32.vlgmr.msrb.gmra.mxu0 %vm2382_vm3, %v12058_v23  ;;  %v12408_v38 = vpop.f32.mrf.mxu2 }
 0xb68   :  { %v5196_v52 = vpop.f32.mrf.mxu3 }
 0xb69   :  { %8350 = vmatmul.msk.f32.vlgmr.msrb.gmra.mxu2 %vm2382_vm3, %v5196_v52  ;;  %v4216_v52 = vld [vmem:[%s13529_s2 + $0x4f0] sm:$0xff] }
 0xb6a   :  { %v12400_v29 = vpop.f32.mrf.mxu0 }
 0xb6b   :  { %13785 = vst [vmem:[#allocation46_spill] sm:$0xff] %v12400_v29 }
 0xb6d   :  { %8192 = vmatmul.msk.f32.gmra.mxu3 %vm4233_vm4, %v4215_v15  ;;  %8323 = vmatmul.msk.f32.gmra.mxu0 %vm2382_vm3, %v12068_v3  ;;  %v5360_v3 = vld [vmem:[%s13534_s7 + $0x1d8] sm:$0xff]  ;;  %v12424_v15 = vpop.f32.mrf.mxu2 }
 0xb6e   :  { %6650 = vmatpush.msra.mxu0 %v5360_v3  ;;  %v5366_v3 = vld [vmem:[%s13534_s7 + $0x208] sm:$0xff] }
 0xb6f   :  { %6782 = vmatpush.msrb.mxu1 %v5366_v3 }
 0xb70   :  { %v5199_v23 = vpop.f32.mrf.mxu3 }
 0xb71   :  { %8351 = vmatmul.msk.f32.gmra.mxu2 %vm2382_vm3, %v5199_v23  ;;  %v5359_v23 = vld [vmem:[%s13534_s7 + $0x1d0] sm:$0xff] }
 0xb72   :  { %v12413_v34 = vpop.f32.mrf.mxu0  ;;  %6651 = vmatpush.msra.mxu0 %v5359_v23  ;;  %v5364_v23 = vld [vmem:[%s13534_s7 + $0x1f8] sm:$0xff] }
 0xb73   :  { %13786 = vst [vmem:[#allocation21_spill] sm:$0xff] %v12413_v34  ;;  %v12430_v34 = vpop.f32.mrf.mxu1 }
 0xb74   :  { %6652 = vmatpush.msra.mxu0 %v5358_v19 }
 0xb75   :  { %8193 = vmatmul.msk.f32.gmra.mxu3 %vm4233_vm4, %v4216_v52  ;;  %8324 = vmatmul.msk.f32.gmra.mxu0 %vm2382_vm3, %v12081_v17  ;;  %v4217_v17 = vld [vmem:[%s13529_s2 + $0x4f8] sm:$0xff]  ;;  %v12453_v19 = vpop.f32.mrf.mxu2 }
 0xb76   :  { %13788 = vst [vmem:[#allocation57_spill] sm:$0xff] %v12453_v19 }
 0xb78   :  { %v5202_v29 = vpop.f32.mrf.mxu3 }
 0xb79   :  { %8352 = vmatmul.msk.f32.gmra.mxu2 %vm2382_vm3, %v5202_v29  ;;  %v5365_v29 = vld [vmem:[%s13534_s7 + $0x200] sm:$0xff] }
 0xb7a   :  { %v12432_v52 = vpop.f32.mrf.mxu0  ;;  %6783 = vmatpush.msrb.mxu1 %v5365_v29 }
 0xb7b   :  { %13787 = vst [vmem:[#allocation44_spill] sm:$0xff] %v12432_v52 }
 0xb7c   :  { %6784 = vmatpush.msrb.mxu1 %v5364_v23 }
 0xb7d   :  { %8194 = vmatmul.msk.f32.gmra.mxu3 %vm4233_vm4, %v4217_v17  ;;  %8325 = vmatmul.msk.f32.gmra.mxu0 %vm2382_vm3, %v12106_v60  ;;  %v4218_v60 = vld [vmem:[%s13529_s2 + $0x500] sm:$0xff]  ;;  %v12460_v17 = vpop.f32.mrf.mxu1 }
 0xb7e   :  { %13790 = vst [vmem:[#allocation34_spill] sm:$0xff] %v12460_v17 }
 0xb80   :  { %v5205_v52 = vpop.f32.mrf.mxu3 }
 0xb81   :  { %8353 = vmatmul.msk.f32.gmra.mxu2 %vm2382_vm3, %v5205_v52  ;;  %v4219_v52 = vld [vmem:[%s13529_s2 + $0x508] sm:$0xff] }
 0xb82   :  { %v12455_v3 = vpop.f32.mrf.mxu0 }
 0xb83   :  { %13789 = vst [vmem:[#allocation27_spill] sm:$0xff] %v12455_v3  ;;  %v12471_v3 = vpop.f32.mrf.mxu2 }
 0xb84   :  { %13791 = vst [vmem:[#allocation54_spill] sm:$0xff] %v12471_v3 }
 0xb85   :  { %8195 = vmatmul.msk.f32.gmra.mxu3 %vm4233_vm4, %v4218_v60  ;;  %8326 = vmatmul.msk.f32.gmra.mxu0 %vm2382_vm3, %v12116_v14  ;;  %v12476_v60 = vpop.f32.mrf.mxu1 }
 0xb86   :  { %13792 = vst [vmem:[#allocation26_spill] sm:$0xff] %v12476_v60 }
 0xb88   :  { %v5208_v29 = vpop.f32.mrf.mxu3 }
 0xb89   :  { %8354 = vmatmul.msk.f32.gmra.mxu2 %vm2382_vm3, %v5208_v29  ;;  %v4220_v29 = vld [vmem:[%s13529_s2 + $0x510] sm:$0xff] }
 0xb8a   :  { %v12466_v23 = vpop.f32.mrf.mxu0 }
 0xb8b   :  { %v12484_v19 = vpop.f32.mrf.mxu2 }
 0xb8c   :  { %13793 = vst [vmem:[#allocation52_spill] sm:$0xff] %v12484_v19 }
 0xb8d   :  { %8196 = vmatmul.msk.f32.gmra.mxu3 %vm4233_vm4, %v4219_v52  ;;  %8327 = vmatmul.msk.f32.gmra.mxu0 %vm2382_vm3, %v12126_v39  ;;  %v12489_v52 = vpop.f32.mrf.mxu1 }
 0xb8e   :  { %13794 = vst [vmem:[#allocation32_spill] sm:$0xff] %v12489_v52 }
 0xb90   :  { %v5211_v17 = vpop.f32.mrf.mxu3 }
 0xb91   :  { %8355 = vmatmul.msk.f32.gmra.mxu2 %vm2382_vm3, %v5211_v17  ;;  %v4221_v17 = vld [vmem:[%s13529_s2 + $0x518] sm:$0xff] }
 0xb92   :  { %v12479_v14 = vpop.f32.mrf.mxu0 }
 0xb95   :  { %8197 = vmatmul.msk.f32.gmra.mxu3 %vm4233_vm4, %v4220_v29  ;;  %8328 = vmatmul.msk.f32.gmra.mxu0 %vm2382_vm3, %v12136_v30  ;;  %v12500_v29 = vpop.f32.mrf.mxu2  ;;  %v12502_v19 = vpop.f32.mrf.mxu1 }
 0xb96   :  { %13795 = vst [vmem:[#allocation40_spill] sm:$0xff] %v12500_v29 }
 0xb97   :  { %13796 = vst [vmem:[#allocation56_spill] sm:$0xff] %v12502_v19 }
 0xb98   :  { %v5214_v39 = vpop.f32.mrf.mxu3 }
 0xb99   :  { %8356 = vmatmul.msk.f32.gmra.mxu2 %vm2382_vm3, %v5214_v39  ;;  %v4222_v39 = vld [vmem:[%s13529_s2 + $0x520] sm:$0xff] }
 0xb9a   :  { %v12492_v60 = vpop.f32.mrf.mxu0 }
 0xb9d   :  { %8198 = vmatmul.msk.f32.gmra.mxu3 %vm4233_vm4, %v4221_v17  ;;  %8343 = vmatmul.msk.f32.vlgmr.msra.gmra.mxu0 %vm2382_vm3, %v12299_v32  ;;  %v12513_v17 = vpop.f32.mrf.mxu2  ;;  %v12516_v19 = vpop.f32.mrf.mxu1 }
 0xb9e   :  { %13798 = vst [vmem:[#allocation55_spill] sm:$0xff] %v12513_v17 }
 0xb9f   :  { %13799 = vst [vmem:[#allocation60_spill] sm:$0xff] %v12516_v19  ;;  %v5369_v19 = vld [vmem:[%s13534_s7 + $0x220] sm:$0xff] }
 0xba0   :  { %v5217_v30 = vpop.f32.mrf.mxu3  ;;  %6848 = vmatpush.msrb.mxu0 %v5369_v19  ;;  %v4225_v19 = vld [vmem:[%s13529_s2 + $0x538] sm:$0xff] }
 0xba1   :  { %8357 = vmatmul.msk.f32.vlgmr.msrb.gmra.mxu1 %vm2382_vm3, %v5217_v30  ;;  %v4223_v30 = vld [vmem:[%s13529_s2 + $0x528] sm:$0xff] }
 0xba2   :  { %v12505_v52 = vpop.f32.mrf.mxu0 }
 0xba3   :  { %13797 = vst [vmem:[#allocation31_spill] sm:$0xff] %v12505_v52  ;;  %v4229_v52 = vld [vmem:[%s13529_s2 + $0x558] sm:$0xff] }
 0xba5   :  { %8199 = vmatmul.msk.f32.gmra.mxu3 %vm4233_vm4, %v4222_v39  ;;  %8344 = vmatmul.msk.f32.gmra.mxu0 %vm2382_vm3, %v12309_v54  ;;  %v12527_v54 = vpop.f32.mrf.mxu2 }
 0xba8   :  { %v5220_v32 = vpop.f32.mrf.mxu3 }
 0xba9   :  { %8358 = vmatmul.msk.f32.gmra.mxu1 %vm2382_vm3, %v5220_v32  ;;  %v4224_v32 = vld [vmem:[%s13529_s2 + $0x530] sm:$0xff] }
 0xbaa   :  { %v12518_v29 = vpop.f32.mrf.mxu0 }
 0xbab   :  { %13800 = vst [vmem:[#allocation38_spill] sm:$0xff] %v12518_v29  ;;  %v12537_v29 = vpop.f32.mrf.mxu1 }
 0xbad   :  { %8200 = vmatmul.msk.f32.gmra.mxu3 %vm4233_vm4, %v4223_v30  ;;  %8345 = vmatmul.msk.f32.gmra.mxu0 %vm2382_vm3, %v12322_v62  ;;  %v5368_v62 = vld [vmem:[%s13534_s7 + $0x218] sm:$0xff]  ;;  %v5367_v30 = vld [vmem:[%s13534_s7 + $0x210] sm:$0xff] }
 0xbae   :  { %6849 = vmatpush.msrb.mxu0 %v5368_v62 }
 0xbb0   :  { %v5223_v39 = vpop.f32.mrf.mxu3  ;;  %6850 = vmatpush.msrb.mxu0 %v5367_v30 }
 0xbb1   :  { %8359 = vmatmul.msk.f32.gmra.mxu1 %vm2382_vm3, %v5223_v39 }
 0xbb2   :  { %v12529_v17 = vpop.f32.mrf.mxu0 }
 0xbb3   :  { %13801 = vst [vmem:[#allocation47_spill] sm:$0xff] %v12529_v17 }
 0xbb5   :  { %8201 = vmatmul.msk.f32.gmra.mxu3 %vm4233_vm4, %v4224_v32  ;;  %8346 = vmatmul.msk.f32.gmra.mxu0 %vm2382_vm3, %v12347_v28  ;;  %v12554_v28 = vpop.f32.mrf.mxu2  ;;  %v12559_v32 = vpop.f32.mrf.mxu1 }
 0xbb6   :  { %13803 = vst [vmem:[#allocation71_spill] sm:$0xff] %v12559_v32  ;;  %v5483_v32 = vadd.f32 %v11719_v1, %v11636_v16  ;;  %v5486_v1 = vadd.f32 %v11728_v46, %v11646_v10  ;;  %v4230_v10 = vld [vmem:[%s13529_s2 + $0x560] sm:$0xff] }
 0xbb8   :  { %v5226_v39 = vpop.f32.mrf.mxu3 }
 0xbb9   :  { %8360 = vmatmul.msk.f32.gmra.mxu1 %vm2382_vm3, %v5226_v39  ;;  %v4226_v39 = vld [vmem:[%s13529_s2 + $0x540] sm:$0xff] }
 0xbba   :  { %v12549_v17 = vpop.f32.mrf.mxu0 }
 0xbbb   :  { %13802 = vst [vmem:[#allocation67_spill] sm:$0xff] %v12549_v17 }
 0xbbd   :  { %8202 = vmatmul.msk.f32.gmra.mxu3 %vm4233_vm4, %v4225_v19  ;;  %8347 = vmatmul.msk.f32.gmra.mxu0 %vm2382_vm3, %v12359_v63  ;;  %v12570_v19 = vpop.f32.mrf.mxu2  ;;  %v12572_v17 = vpop.f32.mrf.mxu1 }
 0xbbe   :  { %13804 = vst [vmem:[#allocation37_spill] sm:$0xff] %v12570_v19 }
 0xbbf   :  { %13805 = vst [vmem:[#allocation65_spill] sm:$0xff] %v12572_v17 }
 0xbc0   :  { %v5229_v62 = vpop.f32.mrf.mxu3 }
 0xbc1   :  { %8361 = vmatmul.msk.f32.gmra.mxu1 %vm2382_vm3, %v5229_v62  ;;  %v4227_v62 = vld [vmem:[%s13529_s2 + $0x548] sm:$0xff] }
 0xbc2   :  { %v12562_v30 = vpop.f32.mrf.mxu0 }
 0xbc5   :  { %8203 = vmatmul.msk.f32.gmra.mxu3 %vm4233_vm4, %v4226_v39  ;;  %8348 = vmatmul.msk.f32.gmra.mxu0 %vm2382_vm3, %v12371_v51  ;;  %v12583_v39 = vpop.f32.mrf.mxu2  ;;  %v12586_v17 = vpop.f32.mrf.mxu1 }
 0xbc6   :  { %13806 = vst [vmem:[#allocation45_spill] sm:$0xff] %v12583_v39 }
 0xbc7   :  { %13807 = vst [vmem:[#allocation53_spill] sm:$0xff] %v12586_v17 }
 0xbc8   :  { %v5232_v63 = vpop.f32.mrf.mxu3 }
 0xbc9   :  { %8362 = vmatmul.msk.f32.gmra.mxu1 %vm2382_vm3, %v5232_v63  ;;  %v4228_v63 = vld [vmem:[%s13529_s2 + $0x550] sm:$0xff] }
 0xbca   :  { %v12575_v3 = vpop.f32.mrf.mxu0 }
 0xbcd   :  { %8204 = vmatmul.msk.f32.gmra.mxu3 %vm4233_vm4, %v4227_v62  ;;  %8349 = vmatmul.msk.f32.gmra.mxu0 %vm2382_vm3, %v12385_v12  ;;  %v5556_v12 = vadd.f32 %v11791_v49, %v5483_v32  ;;  %v12597_v62 = vpop.f32.mrf.mxu2  ;;  %v12601_v17 = vpop.f32.mrf.mxu1 }
 0xbce   :  { %13809 = vst [vmem:[#allocation43_spill] sm:$0xff] %v12601_v17 }
 0xbd0   :  { %v5235_v51 = vpop.f32.mrf.mxu3 }
 0xbd1   :  { %8363 = vmatmul.msk.f32.gmra.mxu1 %vm2382_vm3, %v5235_v51  ;;  %v5622_v51 = vadd.f32 %v11877_v26, %v5556_v12  ;;  %v5557_v26 = vadd.f32 %v11800_v31, %v5486_v1 }
 0xbd2   :  { %v12588_v19 = vpop.f32.mrf.mxu0 }
 0xbd3   :  { %13808 = vst [vmem:[#allocation69_spill] sm:$0xff] %v12588_v19  ;;  %v5688_v16 = vadd.f32 %v11960_v41, %v5622_v51 }
 0xbd5   :  { %8205 = vmatmul.msk.f32.gmra.mxu3 %vm4233_vm4, %v4228_v63  ;;  %v5754_v49 = vadd.f32 %v12032_v9, %v5688_v16  ;;  %v5623_v63 = vadd.f32 %v11887_v40, %v5557_v26  ;;  %v12618_v17 = vpop.f32.mrf.mxu2  ;;  %v12627_v9 = vpop.f32.mrf.mxu1  ;;  %v5489_v40 = vadd.f32 %v11737_v13, %v11656_v35  ;;  %v4231_v13 = vld [vmem:[%s13529_s2 + $0x568] sm:$0xff] }
 0xbd7   :  { %v5820_v32 = vadd.f32 %v12118_v5, %v5754_v49  ;;  %v5689_v46 = vadd.f32 %v11969_v36, %v5623_v63 }
 0xbd8   :  { %v5238_v39 = vpop.f32.mrf.mxu3 }
 0xbd9   :  { %8364 = vmatmul.msk.f32.vlgmr.msrb.gmra.mxu0 %vm2382_vm3, %v5238_v39  ;;  %v5886_v12 = vadd.f32 %v12201_v50, %v5820_v32  ;;  %v5755_v5 = vadd.f32 %v12041_v25, %v5689_v46  ;;  %v13810_v25 = vld [vmem:[#allocation36_spill] sm:$0xff] }
 0xbda   :  { %v12603_v19 = vpop.f32.mrf.mxu0 }
 0xbdb   :  { %v5952_v31 = vadd.f32 %v12273_v61, %v5886_v12  ;;  %v5821_v51 = vadd.f32 %v12128_v2, %v5755_v5 }
 0xbdd   :  { %8206 = vmatmul.msk.f32.gmra.mxu3 %vm4233_vm4, %v4229_v52  ;;  %v6018_v50 = vadd.f32 %v12363_v22, %v5952_v31  ;;  %v5558_v52 = vadd.f32 %v11809_v56, %v5489_v40  ;;  %v5887_v1 = vadd.f32 %v12210_v33, %v5821_v51  ;;  %v5474_v56 = vadd.f32 %v11674_v0, %v13810_v25  ;;  %v12655_v49 = vpop.f32.mrf.mxu2  ;;  %v12665_v32 = vpop.f32.mrf.mxu1  ;;  %v13812_v40 = vld [vmem:[#allocation15_spill] sm:$0xff]  ;;  %v13816_v25 = vld [vmem:[#allocation57_spill] sm:$0xff] }
 0xbde   :  { %v5492_v33 = vadd.f32 %v11746_v37, %v11665_v48  ;;  %v13811_v48 = vld [vmem:[#allocation8_spill] sm:$0xff] }
 0xbdf   :  { %v6084_v16 = vadd.f32 %v12466_v23, %v6018_v50  ;;  %v5624_v61 = vadd.f32 %v11897_v18, %v5558_v52  ;;  %v5953_v22 = vadd.f32 %v12282_v21, %v5887_v1  ;;  %v5372_v18 = vld [vmem:[%s13534_s7 + $0x238] sm:$0xff]  ;;  %v5553_v26 = vadd.f32 %v11755_v27, %v5474_v56  ;;  %v5371_v21 = vld [vmem:[%s13534_s7 + $0x230] sm:$0xff] }
 0xbe0   :  { %v5241_v39 = vpop.f32.mrf.mxu3  ;;  %6914 = vmatpush.msra.mxu2 %v5372_v18  ;;  %v13814_v1 = vld [vmem:[#allocation33_spill] sm:$0xff] }
 0xbe1   :  { %8365 = vmatmul.msk.f32.gmra.mxu0 %vm2382_vm3, %v5241_v39  ;;  %v5690_v2 = vadd.f32 %v11978_v45, %v5624_v61  ;;  %v6150_v23 = vadd.f32 %v12408_v38, %v6084_v16  ;;  %v6019_v45 = vadd.f32 %v12375_v20, %v5953_v22  ;;  %v5559_v38 = vadd.f32 %v11819_v7, %v5492_v33  ;;  %v5370_v20 = vld [vmem:[%s13534_s7 + $0x228] sm:$0xff] }
 0xbe2   :  { %v12620_v41 = vpop.f32.mrf.mxu0  ;;  %6915 = vmatpush.msra.mxu2 %v5371_v21  ;;  %v5619_v37 = vadd.f32 %v13811_v48, %v5553_v26  ;;  %v13820_v26 = vld [vmem:[#allocation34_spill] sm:$0xff]  ;;  %v13821_v21 = vld [vmem:[#allocation41_spill] sm:$0xff] }
 0xbe3   :  { %v5756_v0 = vadd.f32 %v12050_v44, %v5690_v2  ;;  %v6085_v27 = vadd.f32 %v12479_v14, %v6019_v45  ;;  %v6216_v44 = vadd.f32 %v12410_v47, %v6150_v23  ;;  %v5625_v12 = vadd.f32 %v11906_v6, %v5559_v38  ;;  %v4232_v47 = vld [vmem:[%s13529_s2 + $0x570] sm:$0xff] }
 0xbe4   :  { %6916 = vmatpush.msra.mxu2 %v5370_v20  ;;  %v5685_v7 = vadd.f32 %v11915_v11, %v5619_v37  ;;  %v13817_v2 = vld [vmem:[#allocation46_spill] sm:$0xff]  ;;  %v13822_v48 = vld [vmem:[#allocation69_spill] sm:$0xff] }
 0xbe5   :  { %8207 = vmatmul.msk.f32.gmra.mxu3 %vm4233_vm4, %v4230_v10  ;;  %v5822_v39 = vadd.f32 %v12138_v57, %v5756_v0  ;;  %v6282_v46 = vadd.f32 %v12562_v30, %v6216_v44  ;;  %v5691_v14 = vadd.f32 %v11987_v42, %v5625_v12  ;;  %v6151_v11 = vadd.f32 %v12424_v15, %v6085_v27  ;;  %v12693_v52 = vpop.f32.mrf.mxu2  ;;  %v12699_v51 = vpop.f32.mrf.mxu1 }
 0xbe6   :  { %v5751_v31 = vadd.f32 %v11996_v8, %v5685_v7  ;;  %v13825_v7 = vld [vmem:[#allocation58_spill] sm:$0xff] }
 0xbe7   :  { %v5888_v10 = vadd.f32 %v12219_v43, %v5822_v39  ;;  %v5757_v43 = vadd.f32 %v12060_v4, %v5691_v14  ;;  %v6348_v50 = vadd.f32 %v12527_v54, %v6282_v46  ;;  %v6217_v15 = vadd.f32 %v12430_v34, %v6151_v11  ;;  %v13823_v39 = vld [vmem:[#allocation71_spill] sm:$0xff]  ;;  %v13826_v46 = vld [vmem:[#allocation37_spill] sm:$0xff]  ;;  %v13827_v14 = vld [vmem:[#allocation38_spill] sm:$0xff] }
 0xbe8   :  { %v5244_v36 = vpop.f32.mrf.mxu3  ;;  %v5817_v30 = vadd.f32 %v13812_v40, %v5751_v31 }
 0xbe9   :  { %8366 = vmatmul.msk.f32.gmra.mxu0 %vm2382_vm3, %v5244_v36  ;;  %v5954_v6 = vadd.f32 %v12291_v59, %v5888_v10  ;;  %v5823_v42 = vadd.f32 %v12147_v24, %v5757_v43  ;;  %v6283_v54 = vadd.f32 %v12575_v3, %v6217_v15  ;;  %v6414_v61 = vadd.f32 %v12537_v29, %v6348_v50  ;;  %v13819_v3 = vld [vmem:[#allocation31_spill] sm:$0xff] }
 0xbea   :  { %v12640_v35 = vpop.f32.mrf.mxu0  ;;  %v5883_v8 = vadd.f32 %v12156_v58, %v5817_v30  ;;  %v13829_v30 = vld [vmem:[#allocation65_spill] sm:$0xff] }
 0xbeb   :  { %v6020_v5 = vadd.f32 %v12387_v55, %v5954_v6  ;;  %v5889_v16 = vadd.f32 %v12228_v53, %v5823_v42  ;;  %v13813_v55 = vld [vmem:[#allocation19_spill] sm:$0xff]  ;;  %v13818_v53 = vld [vmem:[#allocation21_spill] sm:$0xff]  ;;  %v6349_v18 = vadd.f32 %v12554_v28, %v6283_v54  ;;  %v13828_v6 = vld [vmem:[#allocation26_spill] sm:$0xff] }
 0xbec   :  { %v5949_v36 = vadd.f32 %v13813_v55, %v5883_v8  ;;  %v13830_v8 = vld [vmem:[#allocation52_spill] sm:$0xff] }
 0xbed   :  { %8208 = vmatmul.msk.f32.gmra.mxu3 %vm4233_vm4, %v4231_v13  ;;  %v6086_v59 = vadd.f32 %v12492_v60, %v6020_v5  ;;  %v5955_v58 = vadd.f32 %v13814_v1, %v5889_v16  ;;  %v13815_v13 = vld [vmem:[#allocation49_spill] sm:$0xff]  ;;  %v12716_v29 = vpop.f32.mrf.mxu2  ;;  %v6415_v27 = vadd.f32 %v13823_v39, %v6349_v18  ;;  %v12722_v44 = vpop.f32.mrf.mxu1 }
 0xbee   :  { %v6015_v60 = vadd.f32 %v13815_v13, %v5949_v36  ;;  %v13831_v16 = vld [vmem:[#allocation45_spill] sm:$0xff]  ;;  %v13832_v36 = vld [vmem:[#allocation32_spill] sm:$0xff] }
 0xbef   :  { %v6152_v34 = vadd.f32 %v13816_v25, %v6086_v59  ;;  %v6021_v22 = vadd.f32 %v13817_v2, %v5955_v58 }
 0xbf0   :  { %v5247_v63 = vpop.f32.mrf.mxu3  ;;  %v6081_v23 = vadd.f32 %v13818_v53, %v6015_v60 }
 0xbf1   :  { %8367 = vmatmul.msk.f32.gmra.mxu0 %vm2382_vm3, %v5247_v63  ;;  %v6087_v33 = vadd.f32 %v13819_v3, %v6021_v22  ;;  %v6218_v0 = vadd.f32 %v13820_v26, %v6152_v34  ;;  %v13824_v63 = vld [vmem:[#allocation54_spill] sm:$0xff] }
 0xbf2   :  { %v12679_v57 = vpop.f32.mrf.mxu0  ;;  %v6147_v38 = vadd.f32 %v13821_v21, %v6081_v23  ;;  %v13834_v23 = vld [vmem:[#allocation43_spill] sm:$0xff] }
 0xbf3   :  { %v6284_v37 = vadd.f32 %v13822_v48, %v6218_v0  ;;  %v6153_v28 = vadd.f32 %v13824_v63, %v6087_v33  ;;  %v5373_v48 = vld [vmem:[%s13534_s7 + $0x240] sm:$0xff] }
 0xbf4   :  { %v6213_v10 = vadd.f32 %v13825_v7, %v6147_v38  ;;  %v5374_v38 = vld [vmem:[%s13534_s7 + $0x248] sm:$0xff] }
 0xbf5   :  { %8209 = vmatmul.msk.f32.gmra.mxu3 %vm4233_vm4, %v4232_v47  ;;  %v6350_v47 = vadd.f32 %v13826_v46, %v6284_v37  ;;  %v6219_v11 = vadd.f32 %v13828_v6, %v6153_v28  ;;  %v12734_v50 = vpop.f32.mrf.mxu2 }
 0xbf6   :  { %v6279_v31 = vadd.f32 %v13827_v14, %v6213_v10 }
 0xbf7   :  { %v6285_v40 = vadd.f32 %v12603_v19, %v6219_v11  ;;  %v6416_v5 = vadd.f32 %v13829_v30, %v6350_v47 }
 0xbf8   :  { %v5250_v4 = vpop.f32.mrf.mxu3  ;;  %v6345_v59 = vadd.f32 %v13830_v8, %v6279_v31  ;;  %v13836_v8 = vld [vmem:[#allocation20_spill] sm:$0xff] }
 0xbf9   :  { %8368 = vmatmul.msk.f32.gmra.mxu0 %vm2382_vm3, %v5250_v4  ;;  %v12739_v4 = vpop.f32.mrf.mxu1  ;;  %v6351_v55 = vadd.f32 %v13831_v16, %v6285_v40  ;;  %v13837_v16 = vld [vmem:[#allocation5_spill] sm:$0xff] }
 0xbfa   :  { %v6465_v24 = vpop.f32.mrf.mxu0  ;;  %v6411_v54 = vadd.f32 %v13832_v36, %v6345_v59  ;;  %v13838_v36 = vld [vmem:[#allocation12_spill] sm:$0xff] }
 0xbfb   :  { %v12709_v56 = vadd.f32 %v6465_v24, %v6414_v61  ;;  %v13833_v24 = vld [vmem:[#allocation53_spill] sm:$0xff] }
 0xbfc   :  { %v6477_v19 = vadd.f32 %v12620_v41, %v6411_v54  ;;  %v6417_v1 = vadd.f32 %v13833_v24, %v6351_v55 }
 0xbfd   :  { %v6540_v60 = vpop.f32.mrf.mxu2 }
 0xbfe   :  { %v6543_v25 = vadd.f32 %v12597_v62, %v6477_v19  ;;  %v5375_v62 = vld [vmem:[%s13534_s7 + $0x250] sm:$0xff]  ;;  %v13839_v19 = vld [vmem:[#allocation7_spill] sm:$0xff] }
 0xbff   :  { %6980 = vmatpush.msra.mxu1 %v5375_v62 }
 0xc00   :  { %v5253_v45 = vpop.f32.mrf.mxu3  ;;  %v6609_v18 = vadd.f32 %v13834_v23, %v6543_v25  ;;  %v13842_v25 = vld [vmem:[#allocation42_spill] sm:$0xff] }
 0xc01   :  { %8369 = vmatmul.msk.f32.gmra.mxu0 %vm2382_vm3, %v5253_v45  ;;  %v6606_v2 = vpop.f32.mrf.mxu1  ;;  %6981 = vmatpush.msra.mxu1 %v5374_v38  ;;  %v13848_v38 = vld [vmem:[#allocation35_spill] sm:$0xff] }
 0xc02   :  { %v6468_v20 = vpop.f32.mrf.mxu0 }
 0xc03   :  { %v12725_v12 = vadd.f32 %v6468_v20, %v6415_v27  ;;  %6982 = vmatpush.msra.mxu1 %v5373_v48 }
 0xc05   :  { %v6720_v33 = vpop.f32.mrf.mxu2 }
 0xc08   :  { %v5256_v43 = vpop.f32.mrf.mxu3 }
 0xc09   :  { %8370 = vmatmul.msk.f32.gmra.mxu0 %vm2382_vm3, %v5256_v43 }
 0xc0a   :  { %v6471_v42 = vpop.f32.mrf.mxu0 }
 0xc0b   :  { %v12737_v15 = vadd.f32 %v6471_v42, %v6416_v5  ;;  %v13835_v42 = vld [vmem:[#allocation6_spill] sm:$0xff] }
 0xc0c   :  { %v5477_v59 = vadd.f32 %v13836_v8, %v13835_v42  ;;  %v13853_v42 = vld [vmem:[#allocation14_spill] sm:$0xff] }
 0xc0d   :  { %v6723_v6 = vpop.f32.mrf.mxu2 }
 0xc0e   :  { %v5554_v55 = vadd.f32 %v13837_v16, %v5477_v59  ;;  %v13854_v59 = vld [vmem:[#allocation13_spill] sm:$0xff] }
 0xc10   :  { %v5259_v61 = vpop.f32.mrf.mxu3  ;;  %v5620_v54 = vadd.f32 %v13838_v36, %v5554_v55  ;;  %v13855_v55 = vld [vmem:[#allocation16_spill] sm:$0xff] }
 0xc11   :  { %8371 = vmatmul.msk.f32.vlgmr.msra.gmra.mxu2 %vm2382_vm3, %v5259_v61 }
 0xc12   :  { %v6474_v58 = vpop.f32.mrf.mxu0  ;;  %v5686_v24 = vadd.f32 %v13839_v19, %v5620_v54  ;;  %v13856_v54 = vld [vmem:[#allocation24_spill] sm:$0xff] }
 0xc13   :  { %v6483_v13 = vadd.f32 %v6474_v58, %v6417_v1  ;;  %v13840_v58 = vld [vmem:[#allocation9_spill] sm:$0xff] }
 0xc15   :  { %v6549_v34 = vadd.f32 %v6540_v60, %v6483_v13  ;;  %v12774_v43 = vpop.f32.mrf.mxu2  ;;  %v13841_v13 = vld [vmem:[#allocation48_spill] sm:$0xff] }
 0xc16   :  { %v5480_v60 = vadd.f32 %v13841_v13, %v13840_v58  ;;  %v13857_v58 = vld [vmem:[#allocation27_spill] sm:$0xff] }
 0xc17   :  { %v12747_v22 = vadd.f32 %v6606_v2, %v6549_v34  ;;  %v5752_v34 = vadd.f32 %v13842_v25, %v5686_v24 }
 0xc18   :  { %v5262_v53 = vpop.f32.mrf.mxu3 }
 0xc19   :  { %8372 = vmatmul.msk.f32.gmra.mxu2 %vm2382_vm3, %v5262_v53  ;;  %v13843_v53 = vld [vmem:[#allocation18_spill] sm:$0xff] }
 0xc1a   :  { %v6654_v3 = vpop.f32.mrf.mxu0  ;;  %v5555_v23 = vadd.f32 %v13843_v53, %v5480_v60  ;;  %v13858_v60 = vld [vmem:[#allocation39_spill] sm:$0xff] }
 0xc1b   :  { %v6675_v41 = vadd.f32 %v6654_v3, %v6609_v18  ;;  %v13844_v18 = vld [vmem:[#allocation30_spill] sm:$0xff]  ;;  %v13859_v53 = vld [vmem:[#allocation47_spill] sm:$0xff] }
 0xc1c   :  { %v5818_v3 = vadd.f32 %v13844_v18, %v5752_v34 }
 0xc1d   :  { %v6741_v26 = vadd.f32 %v6720_v33, %v6675_v41  ;;  %v12778_v5 = vpop.f32.mrf.mxu2  ;;  %v13845_v41 = vld [vmem:[#allocation25_spill] sm:$0xff] }
 0xc1e   :  { %v6786_v0 = vpop.f32.mrf.mxu1  ;;  %v5621_v33 = vadd.f32 %v13845_v41, %v5555_v23 }
 0xc1f   :  { %v12751_v45 = vadd.f32 %v6786_v0, %v6741_v26  ;;  %v13846_v26 = vld [vmem:[#allocation28_spill] sm:$0xff] }
 0xc20   :  { %v5265_v21 = vpop.f32.mrf.mxu3  ;;  %v5884_v0 = vadd.f32 %v13846_v26, %v5818_v3  ;;  %v13860_v3 = vld [vmem:[#allocation22_spill] sm:$0xff] }
 0xc21   :  { %8373 = vmatmul.msk.f32.gmra.mxu2 %vm2382_vm3, %v5265_v21  ;;  %v13847_v21 = vld [vmem:[#allocation23_spill] sm:$0xff] }
 0xc22   :  { %v6657_v31 = vpop.f32.mrf.mxu0  ;;  %v5687_v62 = vadd.f32 %v13847_v21, %v5621_v33  ;;  %v5950_v48 = vadd.f32 %v13848_v38, %v5884_v0  ;;  %v13861_v33 = vld [vmem:[#allocation40_spill] sm:$0xff]  ;;  %v13862_v0 = vld [vmem:[#allocation29_spill] sm:$0xff] }
 0xc25   :  { %v12792_v2 = vpop.f32.mrf.mxu2 }
 0xc26   :  { %v6789_v40 = vpop.f32.mrf.mxu1 }
 0xc28   :  { %v5268_v37 = vpop.f32.mrf.mxu3 }
 0xc29   :  { %8374 = vmatmul.msk.f32.gmra.mxu2 %vm2382_vm3, %v5268_v37 }
 0xc2a   :  { %v6660_v11 = vpop.f32.mrf.mxu0 }
 0xc2e   :  { %v12784_v61 = vpop.f32.mrf.mxu1 }
 0xc30   :  { %v5271_v39 = vpop.f32.mrf.mxu3 }
 0xc31   :  { %8375 = vmatmul.msk.f32.gmra.mxu2 %vm2382_vm3, %v5271_v39  ;;  %v13849_v39 = vld [vmem:[#allocation11_spill] sm:$0xff] }
 0xc32   :  { %v12776_v30 = vpop.f32.mrf.mxu0 }
 0xc36   :  { %v12800_v37 = vpop.f32.mrf.mxu1 }
 0xc38   :  { %v5274_v27 = vpop.f32.mrf.mxu3 }
 0xc39   :  { %8376 = vmatmul.msk.f32.gmra.mxu2 %vm2382_vm3, %v5274_v27  ;;  %v5753_v27 = vadd.f32 %v13849_v39, %v5687_v62 }
 0xc3a   :  { %v12787_v1 = vpop.f32.mrf.mxu0 }
 0xc3e   :  { %v12814_v24 = vpop.f32.mrf.mxu1 }
 0xc40   :  { %v5277_v20 = vpop.f32.mrf.mxu3 }
 0xc41   :  { %8377 = vmatmul.msk.f32.gmra.mxu2 %vm2382_vm3, %v5277_v20  ;;  %v13850_v20 = vld [vmem:[#allocation17_spill] sm:$0xff] }
 0xc46   :  { %v12826_v62 = vpop.f32.mrf.mxu1 }
 0xc48   :  { %v5280_v63 = vpop.f32.mrf.mxu3 }
 0xc49   :  { %8378 = vmatmul.msk.f32.vlgmr.msra.gmra.mxu1 %vm2382_vm3, %v5280_v63  ;;  %v6016_v63 = vadd.f32 %v13850_v20, %v5950_v48  ;;  %v13863_v48 = vld [vmem:[#allocation67_spill] sm:$0xff] }
 0xc50   :  { %v5283_v28 = vpop.f32.mrf.mxu3 }
 0xc51   :  { %8379 = vmatmul.msk.f32.gmra.mxu1 %vm2382_vm3, %v5283_v28  ;;  %v12804_v28 = vpop.f32.mrf.mxu0 }
 0xc58   :  { %v5286_v7 = vpop.f32.mrf.mxu3 }
 0xc59   :  { %8380 = vmatmul.msk.f32.gmra.mxu1 %vm2382_vm3, %v5286_v7  ;;  %v13851_v7 = vld [vmem:[#allocation10_spill] sm:$0xff]  ;;  %v12818_v34 = vpop.f32.mrf.mxu0 }
 0xc60   :  { %v5289_v10 = vpop.f32.mrf.mxu3 }
 0xc61   :  { %8381 = vmatmul.msk.f32.gmra.mxu1 %vm2382_vm3, %v5289_v10  ;;  %v5819_v10 = vadd.f32 %v13851_v7, %v5753_v27  ;;  %v6852_v38 = vpop.f32.mrf.mxu0  ;;  %v13864_v27 = vld [vmem:[#allocation56_spill] sm:$0xff] }
 0xc63   :  { %v5885_v8 = vadd.f32 %v13853_v42, %v5819_v10  ;;  %v13865_v10 = vld [vmem:[#allocation55_spill] sm:$0xff]  ;;  %v13866_v42 = vld [vmem:[#allocation60_spill] sm:$0xff] }
 0xc65   :  { %v5951_v16 = vadd.f32 %v13854_v59, %v5885_v8  ;;  %v12834_v59 = vpop.f32.mrf.mxu1 }
 0xc67   :  { %v6017_v19 = vadd.f32 %v13856_v54, %v5951_v16 }
 0xc68   :  { %v5292_v46 = vpop.f32.mrf.mxu3 }
 0xc69   :  { %8382 = vmatmul.msk.f32.gmra.mxu1 %vm2382_vm3, %v5292_v46  ;;  %v13852_v46 = vld [vmem:[#allocation44_spill] sm:$0xff]  ;;  %v6083_v13 = vadd.f32 %v13857_v58, %v6017_v19  ;;  %v6855_v16 = vpop.f32.mrf.mxu0 }
 0xc6b   :  { %v6149_v41 = vadd.f32 %v13860_v3, %v6083_v13  ;;  %v6546_v3 = vadd.f32 %v12693_v52, %v12709_v56 }
 0xc6d   :  { %v6215_v21 = vadd.f32 %v13862_v0, %v6149_v41 }
 0xc6f   :  { %v6281_v39 = vadd.f32 %v13863_v48, %v6215_v21 }
 0xc70   :  { %v5295_v47 = vpop.f32.mrf.mxu3 }
 0xc71   :  { %8383 = vmatmul.msk.f32.gmra.mxu1 %vm2382_vm3, %v5295_v47  ;;  %v6082_v47 = vadd.f32 %v13852_v46, %v6016_v63  ;;  %v6347_v46 = vadd.f32 %v13865_v10, %v6281_v39 }
 0xc73   :  { %v6148_v36 = vadd.f32 %v13855_v55, %v6082_v47  ;;  %v6413_v8 = vadd.f32 %v13866_v42, %v6347_v46 }
 0xc75   :  { %v6214_v25 = vadd.f32 %v13858_v60, %v6148_v36  ;;  %v6479_v55 = vadd.f32 %v12679_v57, %v6413_v8 }
 0xc77   :  { %v6280_v23 = vadd.f32 %v13859_v53, %v6214_v25  ;;  %v6545_v58 = vadd.f32 %v12655_v49, %v6479_v55  ;;  %v6858_v25 = vpop.f32.mrf.mxu0  ;;  %v12847_v49 = vld [vmem:[%s13535_s8] ss:$0 sm:$0xff]  ;;  %s8559_s8 = smov 12  }
 0xc78   :  { %v5298_v14 = vpop.f32.mrf.mxu3 }
 0xc79   :  { %8384 = vmatmul.msk.f32.gmra.mxu1 %vm2382_vm3, %v5298_v14  ;;  %v12808_v14 = vpop.f32.mrf.mxu2  ;;  %v6346_v26 = vadd.f32 %v13861_v33, %v6280_v23 }
 0xc7b   :  { %v6412_v20 = vadd.f32 %v13864_v27, %v6346_v26 }
 0xc7d   :  { %v6478_v7 = vadd.f32 %v12640_v35, %v6412_v20  ;;  %v6611_v35 = vadd.f32 %v12665_v32, %v6545_v58 }
 0xc7f   :  { %v6544_v47 = vadd.f32 %v12618_v17, %v6478_v7  ;;  %v6677_v17 = vadd.f32 %v6660_v11, %v6611_v35  ;;  %v6861_v56 = vpop.f32.mrf.mxu0 }
 0xc81   :  { %v12821_v18 = vpop.f32.mrf.mxu2  ;;  %v6610_v36 = vadd.f32 %v12627_v9, %v6544_v47  ;;  %v6743_v57 = vadd.f32 %v12774_v43, %v6677_v17  ;;  %v6547_v43 = vadd.f32 %v12716_v29, %v12725_v12 }
 0xc83   :  { %v6676_v19 = vadd.f32 %v6657_v31, %v6610_v36  ;;  %v6612_v31 = vadd.f32 %v12699_v51, %v6546_v3  ;;  %v6681_v3 = vadd.f32 %v12818_v34, %v12747_v22 }
 0xc85   :  { %v6742_v13 = vadd.f32 %v6723_v6, %v6676_v19  ;;  %v6809_v6 = vadd.f32 %v12784_v61, %v6743_v57  ;;  %v6678_v11 = vadd.f32 %v12776_v30, %v6612_v31  ;;  %v6613_v30 = vadd.f32 %v12722_v44, %v6547_v43 }
 0xc87   :  { %v6808_v53 = vadd.f32 %v6789_v40, %v6742_v13  ;;  %v6873_v40 = vadd.f32 %v6852_v38, %v12751_v45  ;;  %v6875_v26 = vadd.f32 %v6858_v25, %v6809_v6  ;;  %v6744_v48 = vadd.f32 %v12778_v5, %v6678_v11  ;;  %v6864_v46 = vpop.f32.mrf.mxu0 }
 0xc88   :  { %v6679_v38 = vadd.f32 %v12787_v1, %v6613_v30 }
 0xc89   :  { %v6874_v41 = vadd.f32 %v6855_v16, %v6808_v53  ;;  %v6810_v45 = vadd.f32 %v12800_v37, %v6744_v48 }
 0xc8a   :  { %v6745_v42 = vadd.f32 %v12792_v2, %v6679_v38  ;;  %v12926_v38 = vld [vmem:[%s13536_s9 + $0x258] sm:$0xff] }
 0xc8b   :  { %v6876_v5 = vadd.f32 %v6861_v56, %v6810_v45  ;;  %v12914_v45 = vld [vmem:[%s13536_s9 + $0x240] sm:$0xff] }
 0xc94   :  { %v6918_v63 = vpop.f32.mrf.mxu2 }
 0xc95   :  { %v6939_v51 = vadd.f32 %v6918_v63, %v6873_v40  ;;  %v6548_v63 = vadd.f32 %v12734_v50, %v12737_v15  ;;  %v6811_v50 = vadd.f32 %v12814_v24, %v6745_v42 }
 0xc97   :  { %v6614_v55 = vadd.f32 %v12739_v4, %v6548_v63  ;;  %v6877_v19 = vadd.f32 %v6864_v46, %v6811_v50  ;;  %v6867_v4 = vpop.f32.mrf.mxu0  ;;  %v12949_v46 = vld [vmem:[%s13536_s9 + $0x1c0] sm:$0xff]  ;;  %v13000_v50 = vld [vmem:[%s13536_s9 + $0x158] sm:$0xff] }
 0xc99   :  { %v6680_v15 = vadd.f32 %v12804_v28, %v6614_v55  ;;  %v12987_v55 = vld [vmem:[%s13536_s9 + $0x140] sm:$0xff] }
 0xc9c   :  { %v6921_v54 = vpop.f32.mrf.mxu2 }
 0xc9d   :  { %v6940_v33 = vadd.f32 %v6921_v54, %v6874_v41 }
 0xc9f   :  { %v6870_v56 = vpop.f32.mrf.mxu0 }
 0xca4   :  { %v6924_v23 = vpop.f32.mrf.mxu2 }
 0xca5   :  { %v6941_v39 = vadd.f32 %v6924_v23, %v6875_v26 }
 0xcac   :  { %v6927_v21 = vpop.f32.mrf.mxu2 }
 0xcad   :  { %v6942_v44 = vadd.f32 %v6927_v21, %v6876_v5  ;;  %v12943_v5 = vld [vmem:[%s13536_s9 + $0x218] sm:$0xff] }
 0xcb4   :  { %v6930_v37 = vpop.f32.mrf.mxu2 }
 0xcb5   :  { %v6943_v35 = vadd.f32 %v6930_v37, %v6877_v19  ;;  %v12974_v37 = vld [vmem:[%s13536_s9 + $0x190] sm:$0xff] }
 0xcbc   :  { %v6933_v24 = vpop.f32.mrf.mxu2 }
 0xcc6   :  { %v6984_v60 = vpop.f32.mrf.mxu1 }
 0xcc7   :  { %v7005_v27 = vadd.f32 %v6984_v60, %v6939_v51  ;;  %v6746_v60 = vadd.f32 %v12808_v14, %v6680_v15  ;;  %v13005_v15 = vld [vmem:[%s13536_s9 + $0x100] sm:$0xff] }
 0xcc9   :  { %v7016_v7 = vadd.f32 %v12847_v49, %v7005_v27  ;;  %v6812_v28 = vadd.f32 %v12826_v62, %v6746_v60 }
 0xccb   :  { %v7023_v8 = vmul.f32 0.5, %v7016_v7  ;;  %v12931_v7 = vld [vmem:[%s13536_s9 + $0x200] sm:$0xff] }
 0xcce   :  { %v6987_v9 = vpop.f32.mrf.mxu1 }
 0xccf   :  { %v7006_v32 = vadd.f32 %v6987_v9, %v6940_v33  ;;  %v6878_v33 = vadd.f32 %v6867_v4, %v6812_v28  ;;  %v13036_v4 = vld [vmem:[%s13536_s9 + $0xd8] sm:$0xff] }
 0xcd0   :  { %v13076_v28 = vld [vmem:[%s13536_s9 + $0x58] sm:$0xff] }
 0xcd1   :  { %v7017_v52 = vadd.f32 %v12847_v49, %v7006_v32  ;;  %v6747_v32 = vadd.f32 %v12821_v18, %v6681_v3  ;;  %v6944_v6 = vadd.f32 %v6933_v24, %v6878_v33  ;;  %v6936_v18 = vpop.f32.mrf.mxu2  ;;  %v13071_v24 = vld [vmem:[%s13536_s9 + $0x50] sm:$0xff]  ;;  %v13082_v3 = vld [vmem:[%s13536_s9] sm:$0xff]  ;;  %v13105_v33 = vld [vmem:[%s13536_s9 + $0x2a8] sm:$0xf] }
 0xcd2   :  { %13867 = vst [vmem:[#allocation68_spill] sm:$0xff] %v13071_v24 }
 0xcd3   :  { %v7024_v0 = vmul.f32 0.5, %v7017_v52  ;;  %v6813_v22 = vadd.f32 %v12834_v59, %v6747_v32  ;;  %v12894_v59 = vld [vmem:[%s13536_s9 + $0x280] sm:$0xf]  ;;  %13869 = vst [vmem:[#allocation51_spill] sm:$0xff] %v13105_v33  ;;  %v13129_v32 = vld [vmem:[%s13536_s9 + $0x268] sm:$0xff] }
 0xcd4   :  { %8385 = vmatpush.msk.msra.mxu0 %vm7178_vm5, %v12894_v59  ;;  %13870 = vst [vmem:[#allocation63_spill] sm:$0xff] %v13129_v32 }
 0xcd5   :  { %8519 = vtanh.f32 %v7024_v0  ;;  %v6879_v26 = vadd.f32 %v6870_v56, %v6813_v22  ;;  %v13157_v56 = vld [vmem:[%s13536_s9 + $0x1c8] sm:$0xff] }
 0xcd6   :  { %v6990_v61 = vpop.f32.mrf.mxu1  ;;  %7209 = vmatpush.msra.mxu0 %v12914_v45  ;;  %v13163_v22 = vld [vmem:[%s13536_s9 + $0x1e8] sm:$0xff] }
 0xcd7   :  { %v7007_v20 = vadd.f32 %v6990_v61, %v6941_v39  ;;  %v6945_v21 = vadd.f32 %v6936_v18, %v6879_v26  ;;  %v12899_v61 = vld [vmem:[%s13536_s9 + $0x290] sm:$0xf]  ;;  %13872 = vst [vmem:[#allocation50_spill] sm:$0xff] %v13163_v22  ;;  %v13175_v18 = vld [vmem:[%s13536_s9 + $0x188] sm:$0xff] }
 0xcd8   :  { %8389 = vmatpush.msk.msrb.mxu2 %vm7178_vm5, %v12899_v61  ;;  %7210 = vmatpush.msra.mxu0 %v12931_v7  ;;  %v13186_v26 = vld [vmem:[%s13536_s9 + $0x1b0] sm:$0xff] }
 0xcd9   :  { %v7018_v29 = vadd.f32 %v12847_v49, %v7007_v20  ;;  %v12909_v20 = vld [vmem:[%s13536_s9 + $0x298] sm:$0xf] }
 0xcda   :  { %8391 = vmatpush.msk.msrb.mxu1 %vm7178_vm5, %v12909_v20  ;;  %7211 = vmatpush.msra.mxu0 %v12949_v46 }
 0xcdb   :  { %v8520_v12 = vpop.eup %8519  ;;  %v7025_v10 = vmul.f32 0.5, %v7018_v29  ;;  %v12936_v29 = vld [vmem:[%s13536_s9 + $0x210] sm:$0xff] }
 0xcdc   :  { %v7038_v47 = vadd.f32 1.0, %v8520_v12  ;;  %7269 = vmatpush.msrb.mxu1 %v12926_v38 }
 0xcdd   :  { %8521 = vtanh.f32 %v7025_v10 }
 0xcde   :  { %v6993_v16 = vpop.f32.mrf.mxu1  ;;  %v12864_v1 = vmul.f32 0.5, %v7038_v47  ;;  %8523 = vtanh.f32 %v7023_v8  ;;  %v12954_v47 = vld [vmem:[%s13536_s9 + $0x1d0] sm:$0xff]  ;;  %7270 = vmatpush.msrb.mxu1 %v12943_v5  ;;  %v12967_v8 = vld [vmem:[%s13536_s9 + $0x180] sm:$0xff] }
 0xcdf   :  { %v7008_v36 = vadd.f32 %v6993_v16, %v6942_v44  ;;  %v12962_v44 = vld [vmem:[%s13536_s9 + $0x1d8] sm:$0xff]  ;;  %7212 = vmatpush.msra.mxu0 %v12967_v8 }
 0xce0   :  { %7141 = vrot.lane.b32.xlu0 %v12864_v1, %s8559_s8  ;;  %v12982_v16 = vld [vmem:[%s13536_s9 + $0x198] sm:$0xff]  ;;  %7271 = vmatpush.msrb.mxu1 %v12962_v44 }
 0xce1   :  { %v7019_v2 = vadd.f32 %v12847_v49, %v7008_v36  ;;  %v12994_v36 = vld [vmem:[%s13536_s9 + $0x150] sm:$0xff]  ;;  %7213 = vmatpush.msra.mxu0 %v12987_v55 }
 0xce2   :  { %7272 = vmatpush.msrb.mxu1 %v12982_v16 }
 0xce3   :  { %v8522_v54 = vpop.eup %8521  ;;  %v7026_v58 = vmul.f32 0.5, %v7019_v2  ;;  %7214 = vmatpush.msra.mxu0 %v13005_v15 }
 0xce4   :  { %v7039_v13 = vadd.f32 1.0, %v8522_v54  ;;  %v8524_v17 = vpop.eup %8523  ;;  %v13012_v54 = vld [vmem:[%s13536_s9 + $0x110] sm:$0xff]  ;;  %7273 = vmatpush.msrb.mxu1 %v13000_v50 }
 0xce5   :  { %8525 = vtanh.f32 %v7026_v58  ;;  %v7037_v41 = vadd.f32 1.0, %v8524_v17  ;;  %v13018_v58 = vld [vmem:[%s13536_s9 + $0x118] sm:$0xff] }
 0xce6   :  { %v6996_v25 = vpop.f32.mrf.mxu1  ;;  %v12873_v53 = vmul.f32 0.5, %v7039_v13  ;;  %v13023_v13 = vld [vmem:[%s13536_s9 + $0xc0] sm:$0xff]  ;;  %7274 = vmatpush.msrb.mxu1 %v13018_v58  ;;  %v13059_v17 = vld [vmem:[%s13536_s9 + $0x98] sm:$0xff] }
 0xce7   :  { %v7009_v23 = vadd.f32 %v6996_v25, %v6943_v35  ;;  %v12884_v52 = vmul.f32 0.5, %v7037_v41  ;;  %v13031_v35 = vld [vmem:[%s13536_s9 + $0xd0] sm:$0xff]  ;;  %7215 = vmatpush.msra.mxu0 %v13023_v13  ;;  %v13049_v25 = vld [vmem:[%s13536_s9 + $0x80] sm:$0xff]  ;;  %v13094_v41 = vld [vmem:[%s13536_s9 + $0x18] sm:$0xff] }
 0xce8   :  { %7145 = vrot.lane.b32.xlu0 %v12873_v53, %s8560_s5  ;;  %7275 = vmatpush.msrb.mxu1 %v13036_v4 }
 0xce9   :  { %v7020_v14 = vadd.f32 %v12847_v49, %v7009_v23  ;;  %7216 = vmatpush.msra.mxu0 %v13049_v25  ;;  %v13066_v23 = vld [vmem:[%s13536_s9 + $0x40] sm:$0xff] }
 0xcea   :  { %7276 = vmatpush.msrb.mxu1 %v13059_v17 }
 0xceb   :  { %v8526_v57 = vpop.eup %8525  ;;  %v7027_v9 = vmul.f32 0.5, %v7020_v14  ;;  %v13087_v14 = vld [vmem:[%s13536_s9 + $0x10] sm:$0xff]  ;;  %7217 = vmatpush.msra.mxu0 %v13066_v23 }
 0xcec   :  { %v7040_v31 = vadd.f32 1.0, %v8526_v57  ;;  %13868 = vst [vmem:[#allocation70_spill] sm:$0xff] %v13087_v14  ;;  %v13099_v57 = vld [vmem:[%s13536_s9 + $0x288] sm:$0xf]  ;;  %7277 = vmatpush.msrb.mxu1 %v13076_v28 }
 0xced   :  { %8527 = vtanh.f32 %v7027_v9  ;;  %v13110_v9 = vld [vmem:[%s13536_s9 + $0x2b0] sm:$0xf]  ;;  %7218 = vmatpush.msra.mxu0 %v13082_v3 }
 0xcee   :  { %v6999_v11 = vpop.f32.mrf.mxu1  ;;  %v12882_v40 = vmul.f32 0.5, %v7040_v31  ;;  %7278 = vmatpush.msrb.mxu1 %v13094_v41  ;;  %v13124_v31 = vld [vmem:[%s13536_s9 + $0x248] sm:$0xff] }
 0xcef   :  { %v7010_v62 = vadd.f32 %v6999_v11, %v6944_v6  ;;  %8387 = vmatpush.msk.msrb.mxu0 %vm7178_vm5, %v13099_v57  ;;  %v13134_v6 = vld [vmem:[%s13536_s9 + $0x270] sm:$0xff]  ;;  %v13140_v11 = vld [vmem:[%s13536_s9 + $0x208] sm:$0xff] }
 0xcf0   :  { %7149 = vrot.lane.b32.xlu1 %v12882_v40, %s8561_s16  ;;  %7407 = vrot.lane.b32.xlu0 %v12884_v52, %s8562_s6 }
 0xcf1   :  { %v7021_v34 = vadd.f32 %v12847_v49, %v7010_v62  ;;  %8397 = vmatpush.msk.msra.mxu1 %vm7178_vm5, %v13110_v9  ;;  %7229 = vmatpush.msrb.mxu0 %v13124_v31  ;;  %v13150_v62 = vld [vmem:[%s13536_s9 + $0x230] sm:$0xff] }
 0xcf3   :  { %v8528_v43 = vpop.eup %8527  ;;  %v7028_v51 = vmul.f32 0.5, %v7021_v34  ;;  %7329 = vmatpush.msra.mxu1 %v13134_v6  ;;  %7230 = vmatpush.msrb.mxu0 %v13140_v11  ;;  %v13168_v34 = vld [vmem:[%s13536_s9 + $0x1f0] sm:$0xff] }
 0xcf4   :  { %v7041_v0 = vadd.f32 1.0, %v8528_v43  ;;  %v13181_v43 = vld [vmem:[%s13536_s9 + $0x1a8] sm:$0xff] }
 0xcf5   :  { %8529 = vtanh.f32 %v7028_v51  ;;  %7330 = vmatpush.msra.mxu1 %v13150_v62  ;;  %7231 = vmatpush.msrb.mxu0 %v13157_v56  ;;  %13873 = vst [vmem:[#allocation78_spill] sm:$0xff] %v13181_v43  ;;  %v13196_v51 = vld [vmem:[%s13536_s9 + $0x148] sm:$0xff] }
 0xcf6   :  { %v7002_v48 = vpop.f32.mrf.mxu1  ;;  %v7048_v39 = vmul.f32 0.5, %v7041_v0  ;;  %v13201_v0 = vld [vmem:[%s13536_s9 + $0x168] sm:$0xff] }
 0xcf7   :  { %v7011_v27 = vadd.f32 %v7002_v48, %v6945_v21  ;;  %7331 = vmatpush.msra.mxu1 %v13168_v34  ;;  %7232 = vmatpush.msrb.mxu0 %v13175_v18  ;;  %13874 = vst [vmem:[#allocation61_spill] sm:$0xff] %v13201_v0  ;;  %v13206_v21 = vld [vmem:[%s13536_s9 + $0x170] sm:$0xff]  ;;  %v13213_v48 = vld [vmem:[%s13536_s9 + $0x108] sm:$0xff] }
 0xcf8   :  { %7153 = vrot.lane.b32.xlu1 %v7048_v39, %s8563_s17  ;;  %7416 = vrot.lane.b32.xlu0 %v7048_v39, %s8561_s16  ;;  %s8565_s16 = smov 72   ;;  %v13218_v39 = vld [vmem:[%s13536_s9 + $0x128] sm:$0xff] }
 0xcf9   :  { %v7022_v30 = vadd.f32 %v12847_v49, %v7011_v27  ;;  %v12919_v49 = vld [vmem:[%s13536_s9 + $0x250] sm:$0xff]  ;;  %7332 = vmatpush.msra.mxu1 %v13186_v26  ;;  %7233 = vmatpush.msrb.mxu0 %v13196_v51  ;;  %13875 = vst [vmem:[#allocation66_spill] sm:$0xff] %v13218_v39 }
 0xcfa   :  { %7249 = vmatpush.msrb.mxu2 %v12919_v49  ;;  %v13223_v27 = vld [vmem:[%s13536_s9 + $0x130] sm:$0xff] }
 0xcfb   :  { %v8530_v12 = vpop.eup %8529  ;;  %v7029_v63 = vmul.f32 0.5, %v7022_v30  ;;  %7333 = vmatpush.msra.mxu1 %v13206_v21  ;;  %v13229_v30 = vld [vmem:[%s13536_s9 + $0xc8] sm:$0xff]  ;;  %7234 = vmatpush.msrb.mxu0 %v13213_v48 }
 0xcfc   :  { %v7042_v10 = vadd.f32 1.0, %v8530_v12  ;;  %7250 = vmatpush.msrb.mxu2 %v12936_v29  ;;  %v13234_v12 = vld [vmem:[%s13536_s9 + $0xe8] sm:$0xff] }
 0xcfd   :  { %8531 = vtanh.f32 %v7029_v63  ;;  %13876 = vst [vmem:[#allocation82_spill] sm:$0xff] %v13234_v12  ;;  %v13241_v63 = vld [vmem:[%s13536_s9 + $0xf0] sm:$0xff]  ;;  %7334 = vmatpush.msra.mxu1 %v13223_v27  ;;  %7235 = vmatpush.msrb.mxu0 %v13229_v30 }
 0xcfe   :  { %v7049_v42 = vmul.f32 0.5, %v7042_v10  ;;  %7251 = vmatpush.msrb.mxu2 %v12954_v47  ;;  %v13247_v10 = vld [vmem:[%s13536_s9 + $0x88] sm:$0xff] }
 0xcff   :  { %7335 = vmatpush.msra.mxu1 %v13241_v63  ;;  %7236 = vmatpush.msrb.mxu0 %v13247_v10 }
 0xd00   :  { %7157 = vrot.lane.b32.xlu2 %v7049_v42, %s8564_s21  ;;  %7410 = vrot.lane.b32.xlu1 %v12873_v53, %s8559_s8  ;;  %v13054_v53 = vld [vmem:[%s13536_s9 + $0x90] sm:$0xff] }
 0xd01   :  { %7252 = vmatpush.msrb.mxu2 %v12974_v37 }
 0xd03   :  { %v8532_v2 = vpop.eup %8531  ;;  %7253 = vmatpush.msrb.mxu2 %v12994_v36 }
 0xd04   :  { %v7043_v19 = vadd.f32 1.0, %v8532_v2  ;;  %v13259_v2 = vld [vmem:[%s13536_s9 + $0xb0] sm:$0xff] }
 0xd05   :  { %7254 = vmatpush.msrb.mxu2 %v13012_v54  ;;  %13878 = vst [vmem:[#allocation80_spill] sm:$0xff] %v13259_v2  ;;  %7336 = vmatpush.msra.mxu1 %v13259_v2  ;;  %v13310_v2 = vld [vmem:[%s13536_s9 + $0x2a0] sm:$0xf] }
 0xd06   :  { %v7050_v60 = vmul.f32 0.5, %v7043_v19  ;;  %v13268_v19 = vld [vmem:[%s13536_s9 + $0x48] sm:$0xff] }
 0xd07   :  { %7255 = vmatpush.msrb.mxu2 %v13031_v35  ;;  %7237 = vmatpush.msrb.mxu0 %v13268_v19 }
 0xd08   :  { %7161 = vrot.lane.b32.xlu2 %v7050_v60, %s8565_s16  ;;  %7419 = vrot.lane.b32.xlu1 %v7049_v42, %s8563_s17  ;;  %v13252_v42 = vld [vmem:[%s13536_s9 + $0xa8] sm:$0xff] }
 0xd09   :  { %7256 = vmatpush.msrb.mxu2 %v13054_v53  ;;  %13877 = vst [vmem:[#allocation59_spill] sm:$0xff] %v13252_v42 }
 0xd0b   :  { %7257 = vmatpush.msrb.mxu2 %v13071_v24 }
 0xd0d   :  { %7258 = vmatpush.msrb.mxu2 %v13087_v14 }
 0xd0f   :  { %8395 = vmatpush.msk.msra.mxu2 %vm7178_vm5, %v13105_v33 }
 0xd10   :  { %7413 = vrot.lane.b32.xlu2 %v12882_v40, %s8560_s5  ;;  %v13145_v40 = vld [vmem:[%s13536_s9 + $0x228] sm:$0xff] }
 0xd11   :  { %13871 = vst [vmem:[#allocation81_spill] sm:$0xff] %v13145_v40  ;;  %7309 = vmatpush.msra.mxu2 %v13129_v32 }
 0xd13   :  { %7310 = vmatpush.msra.mxu2 %v13145_v40 }
 0xd15   :  { %7311 = vmatpush.msra.mxu2 %v13163_v22 }
 0xd17   :  { %7312 = vmatpush.msra.mxu2 %v13181_v43 }
 0xd18   :  { %7422 = vrot.lane.b32.xlu2 %v7050_v60, %s8564_s21  ;;  %v13273_v60 = vld [vmem:[%s13536_s9 + $0x68] sm:$0xff] }
 0xd19   :  { %7313 = vmatpush.msra.mxu2 %v13201_v0  ;;  %13879 = vst [vmem:[#allocation73_spill] sm:$0xff] %v13273_v60  ;;  %v13296_v0 = vld [vmem:[%s13536_s9 + $0x30] sm:$0xff] }
 0xd1a   :  { %13882 = vst [vmem:[#allocation62_spill] sm:$0xff] %v13296_v0 }
 0xd1b   :  { %7314 = vmatpush.msra.mxu2 %v13218_v39  ;;  %v13291_v39 = vld [vmem:[%s13536_s9 + $0x28] sm:$0xff] }
 0xd1c   :  { %13881 = vst [vmem:[#allocation76_spill] sm:$0xff] %v13291_v39 }
 0xd1d   :  { %7315 = vmatpush.msra.mxu2 %v13234_v12  ;;  %v13278_v12 = vld [vmem:[%s13536_s9 + $0x70] sm:$0xff] }
 0xd1e   :  { %13880 = vst [vmem:[#allocation64_spill] sm:$0xff] %v13278_v12  ;;  %7337 = vmatpush.msra.mxu1 %v13278_v12 }
 0xd1f   :  { %7316 = vmatpush.msra.mxu2 %v13252_v42  ;;  %v13286_v42 = vld [vmem:[%s13536_s9 + $0x8] sm:$0xff] }
 0xd20   :  { %7238 = vmatpush.msrb.mxu0 %v13286_v42  ;;  %7338 = vmatpush.msra.mxu1 %v13296_v0 }
 0xd21   :  { %7317 = vmatpush.msra.mxu2 %v13273_v60 }
 0xd23   :  { %7318 = vmatpush.msra.mxu2 %v13291_v39 }
 0xd52   :  { %v7142_v60 = vpop.permute.xlu0 %7141 }
 0xd53   :  { %v7165_v32 = vsel %vm7164_vm6, %v12884_v52, %v7142_v60 }
 0xd5a   :  { %v7158_v43 = vpop.permute.xlu2 %7157  ;;  %v7146_v40 = vpop.permute.xlu0 %7145 }
 0xd5b   :  { %v7166_v33 = vsel %vm2382_vm3, %v7165_v32, %v7146_v40 }
 0xd62   :  { %v7150_v22 = vpop.permute.xlu1 %7149  ;;  %v7162_v0 = vpop.permute.xlu2 %7161 }
 0xd63   :  { %v7168_v14 = vsel %vm7167_vm7, %v7166_v33, %v7150_v22  ;;  %v13343_v33 = vld [vmem:[%s13536_s9 + $0x1e0] sm:$0xff] }
 0xd6a   :  { %v7154_v12 = vpop.permute.xlu1 %7153  ;;  %v7414_v32 = vpop.permute.xlu2 %7413 }
 0xd6b   :  { %v7170_v39 = vsel %vm7169_vm8, %v7168_v14, %v7154_v12  ;;  %v13322_v14 = vld [vmem:[%s13536_s9 + $0x260] sm:$0xff] }
 0xd6c   :  { %v7172_v24 = vsel %vm7171_vm9, %v7170_v39, %v7158_v43 }
 0xd6d   :  { %v13313_v52 = vsel %vm697_vm2, %v7172_v24, %v7162_v0  ;;  %v13335_v24 = vld [vmem:[%s13536_s9 + $0x220] sm:$0xff]  ;;  %v7114_v0 = vld [vmem:[%s13536_s9 + $0x1f8] sm:$0xff] }
 0xd6e   :  { %8386 = vmatmul.msk.f32.vlgmr.msra.gmra.mxu0 %vm7174_vm10, %v13313_v52  ;;  %8390 = vmatmul.msk.f32.vlgmr.msrb.gmra.mxu2 %vm7174_vm10, %v13313_v52 }
 0xd6f   :  { %8392 = vmatmul.msk.f32.vlgmr.msrb.gmra.mxu1 %vm7174_vm10, %v13313_v52  ;;  %8393 = vmatpush.msk.msra.mxu0 %vm7178_vm5, %v13310_v2 }
 0xd70   :  { %8401 = vmatpush.msk.msrb.mxu2 %vm7178_vm5, %v12894_v59  ;;  %8403 = vmatpush.msk.msrb.mxu1 %vm7178_vm5, %v13099_v57  ;;  %v7408_v57 = vpop.permute.xlu0 %7407 }
 0xd71   :  { %7289 = vmatpush.msra.mxu0 %v13322_v14 }
 0xd72   :  { %7440 = vmatpush.msrb.mxu2 %v12914_v45  ;;  %7460 = vmatpush.msrb.mxu1 %v13124_v31  ;;  %v7411_v59 = vpop.permute.xlu1 %7410  ;;  %v13352_v45 = vld [vmem:[%s13536_s9 + $0x1a0] sm:$0xff]  ;;  %v7425_v31 = vsel %vm7164_vm6, %v7408_v57, %v12864_v1  ;;  %v7423_v43 = vpop.permute.xlu2 %7422 }
 0xd73   :  { %7290 = vmatpush.msra.mxu0 %v13335_v24  ;;  %v7071_v1 = vld [vmem:[%s13536_s9 + $0xa0] sm:$0xff] }
 0xd74   :  { %7441 = vmatpush.msrb.mxu2 %v12931_v7  ;;  %7461 = vmatpush.msrb.mxu1 %v13140_v11  ;;  %v13363_v7 = vld [vmem:[%s13536_s9 + $0x160] sm:$0xff]  ;;  %v7426_v11 = vsel %vm2382_vm3, %v7425_v31, %v7411_v59 }
 0xd75   :  { %7291 = vmatpush.msra.mxu0 %v13343_v33  ;;  %v7427_v40 = vsel %vm7167_vm7, %v7426_v11, %v7414_v32 }
 0xd76   :  { %7442 = vmatpush.msrb.mxu2 %v12949_v46  ;;  %7462 = vmatpush.msrb.mxu1 %v13157_v56  ;;  %v13373_v46 = vld [vmem:[%s13536_s9 + $0x120] sm:$0xff] }
 0xd77   :  { %8388 = vmatmul.msk.f32.vlgmr.msrb.gmra.mxu0 %vm7174_vm10, %v13313_v52  ;;  %8396 = vmatmul.msk.f32.vlgmr.msra.gmra.mxu2 %vm7174_vm10, %v13313_v52  ;;  %v7063_v56 = vld [vmem:[%s13536_s9 + $0x60] sm:$0xff] }
 0xd78   :  { %7292 = vmatpush.msra.mxu0 %v13352_v45  ;;  %8398 = vmatmul.msk.f32.vlgmr.msra.gmra.mxu1 %vm7174_vm10, %v13313_v52  ;;  %v7417_v22 = vpop.permute.xlu0 %7416 }
 0xd79   :  { %7443 = vmatpush.msrb.mxu2 %v12967_v8  ;;  %7463 = vmatpush.msrb.mxu1 %v13175_v18  ;;  %v7079_v8 = vld [vmem:[%s13536_s9 + $0xe0] sm:$0xff] }
 0xd7a   :  { %7293 = vmatpush.msra.mxu0 %v13363_v7  ;;  %v7055_v18 = vld [vmem:[%s13536_s9 + $0x20] sm:$0xff] }
 0xd7b   :  { %7444 = vmatpush.msrb.mxu2 %v12987_v55  ;;  %7464 = vmatpush.msrb.mxu1 %v13196_v51  ;;  %v7420_v55 = vpop.permute.xlu1 %7419  ;;  %v7138_v51 = vld [vmem:[%s13536_s9 + $0x2b8] sm:$0xf] }
 0xd7c   :  { %7294 = vmatpush.msra.mxu0 %v13373_v46 }
 0xd7d   :  { %7445 = vmatpush.msrb.mxu2 %v13005_v15  ;;  %7465 = vmatpush.msrb.mxu1 %v13213_v48  ;;  %v7428_v15 = vsel %vm7169_vm8, %v7427_v40, %v7417_v22 }
 0xd7e   :  { %7295 = vmatpush.msra.mxu0 %v7079_v8 }
 0xd7f   :  { %7446 = vmatpush.msrb.mxu2 %v13023_v13  ;;  %7466 = vmatpush.msrb.mxu1 %v13229_v30  ;;  %v7429_v13 = vsel %vm7171_vm9, %v7428_v15, %v7420_v55 }
 0xd80   :  { %7296 = vmatpush.msra.mxu0 %v7071_v1 }
 0xd81   :  { %7447 = vmatpush.msrb.mxu2 %v13049_v25  ;;  %7467 = vmatpush.msrb.mxu1 %v13247_v10  ;;  %v13409_v25 = vsel %vm697_vm2, %v7429_v13, %v7423_v43 }
 0xd82   :  { %7297 = vmatpush.msra.mxu0 %v7063_v56 }
 0xd83   :  { %7448 = vmatpush.msrb.mxu2 %v13066_v23  ;;  %7468 = vmatpush.msrb.mxu1 %v13268_v19  ;;  %v7130_v23 = vld [vmem:[%s13536_s9 + $0x278] sm:$0xff] }
 0xd84   :  { %7298 = vmatpush.msra.mxu0 %v7055_v18 }
 0xd85   :  { %7449 = vmatpush.msrb.mxu2 %v13082_v3  ;;  %7469 = vmatpush.msrb.mxu1 %v13286_v42  ;;  %v7122_v3 = vld [vmem:[%s13536_s9 + $0x238] sm:$0xff] }
 0xd86   :  { %8394 = vmatmul.msk.f32.vlgmr.msra.gmra.mxu0 %vm7174_vm10, %v13313_v52  ;;  %8402 = vmatmul.msk.f32.vlgmr.msrb.gmra.mxu2 %vm7174_vm10, %v13409_v25 }
 0xd87   :  { %8399 = vmatpush.msk.msrb.mxu0 %vm7178_vm5, %v7138_v51  ;;  %8404 = vmatmul.msk.f32.vlgmr.msrb.gmra.mxu1 %vm7174_vm10, %v13409_v25 }
 0xd88   :  { %8407 = vmatpush.msk.msra.mxu2 %vm7178_vm5, %v12909_v20  ;;  %8409 = vmatpush.msk.msra.mxu1 %vm7178_vm5, %v13310_v2  ;;  %v7106_v20 = vld [vmem:[%s13536_s9 + $0x1b8] sm:$0xff] }
 0xd89   :  { %7349 = vmatpush.msrb.mxu0 %v7130_v23 }
 0xd8a   :  { %7500 = vmatpush.msra.mxu2 %v12926_v38  ;;  %7520 = vmatpush.msra.mxu1 %v13322_v14  ;;  %v7098_v38 = vld [vmem:[%s13536_s9 + $0x178] sm:$0xff] }
 0xd8b   :  { %7350 = vmatpush.msrb.mxu0 %v7122_v3 }
 0xd8c   :  { %7501 = vmatpush.msra.mxu2 %v12943_v5  ;;  %7521 = vmatpush.msra.mxu1 %v13335_v24  ;;  %v7090_v5 = vld [vmem:[%s13536_s9 + $0x138] sm:$0xff] }
 0xd8d   :  { %7351 = vmatpush.msrb.mxu0 %v7114_v0 }
 0xd8e   :  { %7502 = vmatpush.msra.mxu2 %v12962_v44  ;;  %7522 = vmatpush.msra.mxu1 %v13343_v33  ;;  %v7082_v44 = vld [vmem:[%s13536_s9 + $0xf8] sm:$0xff] }
 0xd8f   :  { %7352 = vmatpush.msrb.mxu0 %v7106_v20 }
 0xd90   :  { %7503 = vmatpush.msra.mxu2 %v12982_v16  ;;  %7523 = vmatpush.msra.mxu1 %v13352_v45  ;;  %v7074_v16 = vld [vmem:[%s13536_s9 + $0xb8] sm:$0xff] }
 0xd91   :  { %7353 = vmatpush.msrb.mxu0 %v7098_v38 }
 0xd92   :  { %7504 = vmatpush.msra.mxu2 %v13000_v50  ;;  %7524 = vmatpush.msra.mxu1 %v13363_v7  ;;  %v7066_v50 = vld [vmem:[%s13536_s9 + $0x78] sm:$0xff] }
 0xd93   :  { %7354 = vmatpush.msrb.mxu0 %v7090_v5 }
 0xd94   :  { %7505 = vmatpush.msra.mxu2 %v13018_v58  ;;  %7525 = vmatpush.msra.mxu1 %v13373_v46  ;;  %v7058_v58 = vld [vmem:[%s13536_s9 + $0x38] sm:$0xff] }
 0xd95   :  { %7355 = vmatpush.msrb.mxu0 %v7082_v44 }
 0xd96   :  { %7506 = vmatpush.msra.mxu2 %v13036_v4  ;;  %7526 = vmatpush.msra.mxu1 %v7079_v8  ;;  %v13891_v4 = vld [vmem:[#allocation50_spill] sm:$0xff] }
 0xd97   :  { %7356 = vmatpush.msrb.mxu0 %v7074_v16 }
 0xd98   :  { %7507 = vmatpush.msra.mxu2 %v13059_v17  ;;  %7527 = vmatpush.msra.mxu1 %v7071_v1  ;;  %v13893_v17 = vld [vmem:[#allocation61_spill] sm:$0xff] }
 0xd99   :  { %7357 = vmatpush.msrb.mxu0 %v7066_v50 }
 0xd9a   :  { %7508 = vmatpush.msra.mxu2 %v13076_v28  ;;  %7528 = vmatpush.msra.mxu1 %v7063_v56  ;;  %v13894_v28 = vld [vmem:[#allocation66_spill] sm:$0xff] }
 0xd9b   :  { %7358 = vmatpush.msrb.mxu0 %v7058_v58 }
 0xd9c   :  { %7509 = vmatpush.msra.mxu2 %v13094_v41  ;;  %7529 = vmatpush.msra.mxu1 %v7055_v18  ;;  %v13895_v41 = vld [vmem:[#allocation82_spill] sm:$0xff] }
 0xd9d   :  { %8400 = vmatmul.msk.f32.vlgmr.msrb.gmra.mxu0 %vm7174_vm10, %v13313_v52  ;;  %8408 = vmatmul.msk.f32.vlgmr.msra.gmra.mxu2 %vm7174_vm10, %v13409_v25 }
 0xd9e   :  { %8405 = vmatpush.msk.msra.mxu0 %vm7178_vm5, %v12899_v61  ;;  %8410 = vmatmul.msk.f32.vlgmr.msra.gmra.mxu1 %vm7174_vm10, %v13409_v25  ;;  %v13883_v61 = vld [vmem:[#allocation80_spill] sm:$0xff] }
 0xd9f   :  { %8413 = vmatpush.msk.msrb.mxu2 %vm7178_vm5, %v13110_v9  ;;  %8415 = vmatpush.msk.msrb.mxu1 %vm7178_vm5, %v7138_v51  ;;  %v13896_v9 = vld [vmem:[#allocation59_spill] sm:$0xff] }
 0xda0   :  { %7480 = vmatpush.msra.mxu0 %v12919_v49  ;;  %v13884_v49 = vld [vmem:[#allocation68_spill] sm:$0xff] }
 0xda1   :  { %7560 = vmatpush.msrb.mxu2 %v13134_v6  ;;  %7580 = vmatpush.msrb.mxu1 %v7130_v23  ;;  %v13897_v6 = vld [vmem:[#allocation73_spill] sm:$0xff] }
 0xda2   :  { %7481 = vmatpush.msra.mxu0 %v12936_v29  ;;  %v13885_v29 = vld [vmem:[#allocation64_spill] sm:$0xff] }
 0xda3   :  { %7561 = vmatpush.msrb.mxu2 %v13150_v62  ;;  %7581 = vmatpush.msrb.mxu1 %v7122_v3  ;;  %v13898_v62 = vld [vmem:[#allocation76_spill] sm:$0xff] }
 0xda4   :  { %7482 = vmatpush.msra.mxu0 %v12954_v47  ;;  %v13886_v47 = vld [vmem:[#allocation70_spill] sm:$0xff] }
 0xda5   :  { %7562 = vmatpush.msrb.mxu2 %v13168_v34  ;;  %7582 = vmatpush.msrb.mxu1 %v7114_v0 }
 0xda6   :  { %7483 = vmatpush.msra.mxu0 %v12974_v37  ;;  %v13887_v37 = vld [vmem:[#allocation62_spill] sm:$0xff] }
 0xda7   :  { %7563 = vmatpush.msrb.mxu2 %v13186_v26  ;;  %7583 = vmatpush.msrb.mxu1 %v7106_v20 }
 0xda8   :  { %7484 = vmatpush.msra.mxu0 %v12994_v36  ;;  %v13888_v36 = vld [vmem:[#allocation51_spill] sm:$0xff] }
 0xda9   :  { %7564 = vmatpush.msrb.mxu2 %v13206_v21  ;;  %7584 = vmatpush.msrb.mxu1 %v7098_v38 }
 0xdaa   :  { %7485 = vmatpush.msra.mxu0 %v13012_v54  ;;  %v13889_v54 = vld [vmem:[#allocation63_spill] sm:$0xff] }
 0xdab   :  { %7565 = vmatpush.msrb.mxu2 %v13223_v27  ;;  %7585 = vmatpush.msrb.mxu1 %v7090_v5 }
 0xdac   :  { %7486 = vmatpush.msra.mxu0 %v13031_v35  ;;  %v13890_v35 = vld [vmem:[#allocation81_spill] sm:$0xff] }
 0xdad   :  { %7566 = vmatpush.msrb.mxu2 %v13241_v63  ;;  %7586 = vmatpush.msrb.mxu1 %v7082_v44  ;;  %v7139_v63 = vld [vmem:[%s13537_s10] sm:$0x1]  ;;  %s8566_s10 = smov [#allocation2]  }
 0xdae   :  { %7487 = vmatpush.msra.mxu0 %v13054_v53  ;;  %v13892_v53 = vld [vmem:[#allocation78_spill] sm:$0xff]  ;;  %s7648_s29 = sshll.u32 %s8566_s10, 4  ;;  %s7649_s29 = int_to_ptr.vmem [resolvable:$true] %s7648_s29 }
 0xdaf   :  { %7567 = vmatpush.msrb.mxu2 %v13883_v61  ;;  %7587 = vmatpush.msrb.mxu1 %v7074_v16 }
 0xdb0   :  { %7488 = vmatpush.msra.mxu0 %v13884_v49 }
 0xdb1   :  { %7568 = vmatpush.msrb.mxu2 %v13885_v29  ;;  %7588 = vmatpush.msrb.mxu1 %v7066_v50 }
 0xdb2   :  { %7489 = vmatpush.msra.mxu0 %v13886_v47 }
 0xdb3   :  { %7569 = vmatpush.msrb.mxu2 %v13887_v37  ;;  %7589 = vmatpush.msrb.mxu1 %v7058_v58 }
 0xdb4   :  { %8406 = vmatmul.msk.f32.vlgmr.msra.gmra.mxu0 %vm7174_vm10, %v13409_v25  ;;  %8414 = vmatmul.msk.f32.vlgmr.msrb.gmra.mxu2 %vm7174_vm10, %v13409_v25 }
 0xdb5   :  { %8411 = vmatpush.msk.msrb.mxu0 %vm7178_vm5, %v13888_v36  ;;  %8416 = vmatmul.msk.f32.vlgmr.msrb.gmra.mxu1 %vm7174_vm10, %v13409_v25 }
 0xdb7   :  { %7540 = vmatpush.msrb.mxu0 %v13889_v54 }
 0xdb9   :  { %7541 = vmatpush.msrb.mxu0 %v13890_v35 }
 0xdbb   :  { %7542 = vmatpush.msrb.mxu0 %v13891_v4 }
 0xdbd   :  { %7543 = vmatpush.msrb.mxu0 %v13892_v53 }
 0xdbf   :  { %7544 = vmatpush.msrb.mxu0 %v13893_v17 }
 0xdc1   :  { %7545 = vmatpush.msrb.mxu0 %v13894_v28 }
 0xdc3   :  { %7546 = vmatpush.msrb.mxu0 %v13895_v41 }
 0xdc5   :  { %7547 = vmatpush.msrb.mxu0 %v13896_v9 }
 0xdc7   :  { %7548 = vmatpush.msrb.mxu0 %v13897_v6 }
 0xdc9   :  { %7549 = vmatpush.msrb.mxu0 %v13898_v62 }
 0xdca   :  { %8412 = vmatmul.msk.f32.vlgmr.msrb.gmra.mxu0 %vm7174_vm10, %v13409_v25 }
 0xdeb   :  { %v7220_v34 = vpop.f32.mrf.mxu0 }
 0xdec   :  { %v7280_v39 = vpop.f32.mrf.mxu1  ;;  %v7363_v10 = vadd.f32 %v7220_v34, %v7139_v63 }
 0xdf1   :  { %v7260_v21 = vpop.f32.mrf.mxu2 }
 0xdf4   :  { %v7240_v26 = vpop.f32.mrf.mxu0 }
 0xdf5   :  { %7365 = vst [vmem:[#allocation1] sm:$0xff] %v7240_v26  ;;  %v7340_v24 = vpop.f32.mrf.mxu1 }
 0xdfa   :  { %v7320_v42 = vpop.f32.mrf.mxu2 }
 0xdfc   :  { %v7367_v48 = vld [vmem:[#allocation1 + $0x1] ss:$9 sm:$0xff] }
 0xdfd   :  { %7371 = vst [vmem:[#allocation1] sm:$0xff] %v7260_v21  ;;  %v7369_v19 = vadd.f32 %v7367_v48, %v7363_v10 }
 0xe03   :  { %v7300_v12 = vpop.f32.mrf.mxu0 }
 0xe04   :  { %v7373_v27 = vld [vmem:[#allocation1 + $0x2] ss:$9 sm:$0xff]  ;;  %v7471_v46 = vpop.f32.mrf.mxu1 }
 0xe05   :  { %7377 = vst [vmem:[#allocation1] sm:$0xff] %v7280_v39  ;;  %v7375_v60 = vadd.f32 %v7373_v27, %v7369_v19 }
 0xe09   :  { %v7451_v32 = vpop.f32.mrf.mxu2 }
 0xe0a   :  { %v7594_v43 = vadd.f32 %v7451_v32, %v7139_v63 }
 0xe0c   :  { %v7379_v30 = vld [vmem:[#allocation1 + $0x3] ss:$9 sm:$0xff] }
 0xe0d   :  { %7383 = vst [vmem:[#allocation1] sm:$0xff] %v7300_v12  ;;  %v7381_v52 = vadd.f32 %v7379_v30, %v7375_v60 }
 0xe14   :  { %v7385_v2 = vld [vmem:[#allocation1 + $0x4] ss:$9 sm:$0xff] }
 0xe15   :  { %7389 = vst [vmem:[#allocation1] sm:$0xff] %v7320_v42  ;;  %v7387_v14 = vadd.f32 %v7385_v2, %v7381_v52 }
 0xe1a   :  { %v7360_v45 = vpop.f32.mrf.mxu0 }
 0xe1b   :  { %v7531_v55 = vpop.f32.mrf.mxu1 }
 0xe1c   :  { %v7391_v33 = vld [vmem:[#allocation1 + $0x5] ss:$9 sm:$0xff] }
 0xe1d   :  { %7395 = vst [vmem:[#allocation1] sm:$0xff] %v7340_v24  ;;  %v7393_v59 = vadd.f32 %v7391_v33, %v7387_v14 }
 0xe20   :  { %v7511_v1 = vpop.f32.mrf.mxu2 }
 0xe24   :  { %v7397_v57 = vld [vmem:[#allocation1 + $0x6] ss:$9 sm:$0xff] }
 0xe25   :  { %7401 = vst [vmem:[#allocation1] sm:$0xff] %v7360_v45  ;;  %v7399_v7 = vadd.f32 %v7397_v57, %v7393_v59 }
 0xe2c   :  { %v7403_v31 = vld [vmem:[#allocation1 + $0x7] ss:$9 sm:$0xff] }
 0xe2d   :  { %7596 = vst [vmem:[#allocation1] sm:$0xff] %v7471_v46  ;;  %v7405_v50 = vadd.f32 %v7403_v31, %v7399_v7 }
 0xe31   :  { %v7491_v11 = vpop.f32.mrf.mxu0 }
 0xe32   :  { %v7591_v23 = vpop.f32.mrf.mxu1 }
 0xe34   :  { %v7598_v8 = vld [vmem:[#allocation1 + $0x1] ss:$9 sm:$0xff] }
 0xe35   :  { %7602 = vst [vmem:[#allocation1] sm:$0xff] %v7491_v11  ;;  %v7600_v51 = vadd.f32 %v7598_v8, %v7594_v43 }
 0xe37   :  { %v7571_v18 = vpop.f32.mrf.mxu2 }
 0xe3c   :  { %v7604_v40 = vld [vmem:[#allocation1 + $0x2] ss:$9 sm:$0xff] }
 0xe3d   :  { %7608 = vst [vmem:[#allocation1] sm:$0xff] %v7511_v1  ;;  %v7606_v25 = vadd.f32 %v7604_v40, %v7600_v51 }
 0xe44   :  { %v7610_v56 = vld [vmem:[#allocation1 + $0x3] ss:$9 sm:$0xff] }
 0xe45   :  { %7614 = vst [vmem:[#allocation1] sm:$0xff] %v7531_v55  ;;  %v7612_v0 = vadd.f32 %v7610_v56, %v7606_v25 }
 0xe47   :  { %v7551_v22 = vpop.f32.mrf.mxu0 }
 0xe4c   :  { %v7616_v15 = vld [vmem:[#allocation1 + $0x4] ss:$9 sm:$0xff] }
 0xe4d   :  { %7620 = vst [vmem:[#allocation1] sm:$0xff] %v7551_v22  ;;  %v7618_v20 = vadd.f32 %v7616_v15, %v7612_v0 }
 0xe54   :  { %v7622_v13 = vld [vmem:[#allocation1 + $0x5] ss:$9 sm:$0xff] }
 0xe55   :  { %7626 = vst [vmem:[#allocation1] sm:$0xff] %v7571_v18  ;;  %v7624_v38 = vadd.f32 %v7622_v13, %v7618_v20 }
 0xe5c   :  { %v7628_v3 = vld [vmem:[#allocation1 + $0x6] ss:$9 sm:$0xff] }
 0xe5d   :  { %7632 = vst [vmem:[#allocation1] sm:$0xff] %v7591_v23  ;;  %v7630_v5 = vadd.f32 %v7628_v3, %v7624_v38 }
 0xe64   :  { %v7634_v44 = vld [vmem:[#allocation1 + $0x7] ss:$9 sm:$0xff] }
 0xe65   :  { %v7636_v16 = vadd.f32 %v7634_v44, %v7630_v5 }
 0xe67   :  { %v7638_v58 = vperm.slane %v7636_v16, 0 }
 0xe69   :  { %v7641_v61 = vsel %vm7640_vm11, %v7405_v50, %v7638_v58 }
 0xe6a   :  { %7642 = vst [vmem:[#allocation2] sm:$0x3] %v7641_v61 }
 0xe6b   :  { %7653 = dma.vmem_to_hbm [thread:$0]  %s7649_s29, 32, %s7651_s1, [#allocation3]  }
 0xe6c   :  { %8557 = dma.done.wait [#allocation3], 32  }
 0xe6d   :  { %8558 = vsyncadd [#allocation3], 4294967264 }
 0xe6e   :  { %7658 = vsyncpa [#allocation3], 1 }

</bundles_post_ra>
